<compile_context>
chip_gen: v5e
topology: v5e:2x2
jax: 0.10.0
libtpu: 0.0.40
codegen_flags: <defaults>
</compile_context>

<pallas_src>
import functools
import math

import jax
import jax.numpy as jnp
from jax.experimental import pallas as pl
from jax.experimental.pallas import tpu as pltpu

EPS_LN = 1e-6
EPS_RMS = 1e-6


def _vmem_budget():
    """Generation-dependent VMEM budget (~3/4 of physical).

    v5e/v6e (128 MiB) -> ~96 MiB; v7x (64 MiB per TC) -> 48 MiB.
    Falls back to a v7x-safe 48 MiB if the query fails."""
    try:
        cap = int(pltpu.get_tpu_info().vmem_capacity_bytes)
        if cap > 0:
            return min((cap * 3) // 4, 100 * 1024 * 1024)
    except Exception:
        pass
    try:
        kind = jax.devices()[0].device_kind.lower()
        if "v5" in kind or "v6" in kind:
            return 96 * 1024 * 1024
    except Exception:
        pass
    return 48 * 1024 * 1024


VMEM_LIMIT = _vmem_budget()
_BIG_VMEM = VMEM_LIMIT >= 80 * 1024 * 1024

# Tile targets (every _pick_tile call falls back to the full extent at the
# tiny demo shapes below; these matter at production shapes).
L_TILE = 256                                # token tile (sublane axis)
LQ_TILE = 512                               # flash-attention query tile
LK_TILE = 1024 if _BIG_VMEM else 512        # flash-attention key/value tile
N_TILE_GEMM = 1024 if _BIG_VMEM else 512    # out-feature tile for gated GEMMs
N_TILE_FC1 = 2048                           # out-feature tile for MLP fc1
QKV_GROUP_LANES = 1024                      # lane width of one qkv head-group
ATTN_GROUP_LANES = 512                      # lane width of one attn head-group


def _pick_tile(full, target, mult):
    """Largest tile <= target that divides `full` and is a multiple of `mult`;
    falls back to the full extent (block == full array dim is always legal)."""
    if full <= target:
        return full
    t = (target // mult) * mult
    while t >= mult:
        if full % t == 0:
            return t
        t -= mult
    return full


def _heads_per_block(heads, head_dim, target_lanes):
    """Heads per head-group so the group lane width is ~target and legal."""
    for cand in range(heads, 0, -1):
        if heads % cand:
            continue
        lanes = cand * head_dim
        if lanes <= max(target_lanes, head_dim) and (lanes % 128 == 0 or cand == heads):
            return cand
    return heads


def _gelu_tanh(x):
    c = 0.7978845608028654  # sqrt(2/pi)
    return 0.5 * x * (1.0 + jnp.tanh(c * (x + 0.044715 * x * x * x)))


def _ln_modulate(x, shift, scale, eps):
    # x: (L, H) f32, shift/scale: (1, H) f32 (statistics kept in f32)
    mean = jnp.mean(x, axis=-1, keepdims=True)
    var = jnp.mean(jnp.square(x - mean), axis=-1, keepdims=True)
    xn = (x - mean) * jax.lax.rsqrt(var + eps)
    return xn * (1.0 + scale) + shift


# --------------------------------------------------------------------------
# Fused ModulateDiT (img + txt): linear(silu(vec)) over concatenated weights
# --------------------------------------------------------------------------
def _silu_linear_kernel(x_ref, w_ref, b_ref, o_ref):
    x = x_ref[...].astype(jnp.float32)
    xs = x * jax.nn.sigmoid(x)
    y = jnp.dot(xs.astype(jnp.bfloat16), w_ref[...].astype(jnp.bfloat16),
                preferred_element_type=jnp.float32) + b_ref[...]
    o_ref[...] = y.astype(o_ref.dtype)


def silu_linear(x, w, b):
    # x: (B, Din); w: (Din, Dout) bf16; b: (Dout,) f32
    Bv, Din = x.shape
    Dout = w.shape[1]
    nt = _pick_tile(Dout, 2 * N_TILE_GEMM, 128)
    return pl.pallas_call(
        _silu_linear_kernel,
        out_shape=jax.ShapeDtypeStruct((Bv, Dout), jnp.float32),
        grid=(Dout // nt,),
        in_specs=[
            pl.BlockSpec((Bv, Din), lambda n: (0, 0)),
            pl.BlockSpec((Din, nt), lambda n: (0, n)),
            pl.BlockSpec((1, nt), lambda n: (0, n)),
        ],
        out_specs=pl.BlockSpec((Bv, nt), lambda n: (0, n)),
        compiler_params=pltpu.CompilerParams(
            dimension_semantics=("parallel",),
            vmem_limit_bytes=VMEM_LIMIT),
    )(x, w, b.reshape(1, Dout))


# --------------------------------------------------------------------------
# Fused LayerNorm -> modulate -> qkv projection -> per-head RMSNorm(q, k)
# Output: one (3, B, L, H*D) bf16 array (plane 0 = q, 1 = k, 2 = v).
# --------------------------------------------------------------------------
def _ln_mod_qkv_kernel(x_ref, shift_ref, scale_ref, w_ref, b_ref, qw_ref, kw_ref,
                       o_ref, *, head_dim, heads_per_block):
    s_idx = pl.program_id(1)                       # 0 = q, 1 = k, 2 = v
    x = x_ref[0].astype(jnp.float32)               # (LT, Hd) stats in f32
    xm = _ln_modulate(x, shift_ref[0], scale_ref[0], EPS_LN).astype(jnp.bfloat16)
    y = jnp.dot(xm, w_ref[0].astype(jnp.bfloat16),
                preferred_element_type=jnp.float32) + b_ref[0]
    D = head_dim

    @pl.when(s_idx == 2)                           # v plane: no RMSNorm work
    def _v_plane():
        o_ref[0, 0] = y.astype(o_ref.dtype)

    @pl.when(s_idx != 2)                           # q / k planes: RMSNorm
    def _qk_plane():
        gamma = jnp.where(s_idx == 0, qw_ref[...], kw_ref[...])   # (1, D)
        for h in range(heads_per_block):
            sl = slice(h * D, (h + 1) * D)
            yh = y[:, sl]
            ms = jnp.mean(yh * yh, axis=-1, keepdims=True)        # f32 stats
            o_ref[0, 0, :, sl] = (yh * jax.lax.rsqrt(ms + EPS_RMS)
                                  * gamma).astype(o_ref.dtype)


def ln_mod_qkv(x, shift, scale, w, b, q_norm_w, k_norm_w, *, heads):
    """x: (B, L, Hd); w: (3, Hd, Hd) bf16, input-major; b: (3, 1, Hd) f32."""
    B, L, Hd = x.shape
    D = Hd // heads
    hg = _heads_per_block(heads, D, QKV_GROUP_LANES)
    NG = hg * D
    G = heads // hg
    LT = _pick_tile(L, L_TILE, 8)
    grid = (B, 3, G, L // LT)          # L innermost: weight tile stays resident
    kernel = functools.partial(_ln_mod_qkv_kernel, head_dim=D,
                               heads_per_block=hg)
    return pl.pallas_call(
        kernel,
        out_shape=jax.ShapeDtypeStruct((3, B, L, Hd), jnp.bfloat16),
        grid=grid,
        in_specs=[
            pl.BlockSpec((1, LT, Hd), lambda b, s, g, l: (b, l, 0)),
            pl.BlockSpec((1, 1, Hd), lambda b, s, g, l: (b, 0, 0)),
            pl.BlockSpec((1, 1, Hd), lambda b, s, g, l: (b, 0, 0)),
            pl.BlockSpec((1, Hd, NG), lambda b, s, g, l: (s, 0, g)),
            pl.BlockSpec((1, 1, NG), lambda b, s, g, l: (s, 0, g)),
            pl.BlockSpec((1, D), lambda b, s, g, l: (0, 0)),
            pl.BlockSpec((1, D), lambda b, s, g, l: (0, 0)),
        ],
        out_specs=pl.BlockSpec((1, 1, LT, NG), lambda b, s, g, l: (s, b, l, g)),
        compiler_params=pltpu.CompilerParams(
            dimension_semantics=("parallel",) * 4,
            vmem_limit_bytes=VMEM_LIMIT),
    )(x.astype(jnp.bfloat16),                  # bf16 activations: half HBM bytes
      shift.reshape(B, 1, Hd), scale.reshape(B, 1, Hd), w, b,
      q_norm_w.reshape(1, D), k_norm_w.reshape(1, D))


# --------------------------------------------------------------------------
# LayerNorm -> modulate -> Linear (MLP fc1), tiled over (B, N, L)
# --------------------------------------------------------------------------
def _ln_mod_linear_kernel(x_ref, shift_ref, scale_ref, w_ref, b_ref, o_ref):
    x = x_ref[0].astype(jnp.float32)
    xm = _ln_modulate(x, shift_ref[0], scale_ref[0], EPS_LN).astype(jnp.bfloat16)
    y = jnp.dot(xm, w_ref[...].astype(jnp.bfloat16),
                preferred_element_type=jnp.float32) + b_ref[...]
    o_ref[0] = y.astype(o_ref.dtype)


def ln_mod_linear(x, shift, scale, w, b):
    B, L, Hd = x.shape
    Dout = w.shape[1]
    LT = _pick_tile(L, L_TILE, 8)
    NT = _pick_tile(Dout, N_TILE_FC1, 128)
    grid = (B, Dout // NT, L // LT)        # L innermost: weight tile resident
    return pl.pallas_call(
        _ln_mod_linear_kernel,
        out_shape=jax.ShapeDtypeStruct((B, L, Dout), jnp.bfloat16),
        grid=grid,
        in_specs=[
            pl.BlockSpec((1, LT, Hd), lambda b, n, l: (b, l, 0)),
            pl.BlockSpec((1, 1, Hd), lambda b, n, l: (b, 0, 0)),
            pl.BlockSpec((1, 1, Hd), lambda b, n, l: (b, 0, 0)),
            pl.BlockSpec((Hd, NT), lambda b, n, l: (0, n)),
            pl.BlockSpec((1, NT), lambda b, n, l: (0, n)),
        ],
        out_specs=pl.BlockSpec((1, LT, NT), lambda b, n, l: (b, l, n)),
        compiler_params=pltpu.CompilerParams(
            dimension_semantics=("parallel",) * 3,
            vmem_limit_bytes=VMEM_LIMIT),
    )(x.astype(jnp.bfloat16), shift.reshape(B, 1, Hd), scale.reshape(B, 1, Hd),
      w, b.reshape(1, Dout))


# --------------------------------------------------------------------------
# residual + gate * Linear(act(x)): full-K per step, grid (B, N, L) with L
# innermost so the (Din, NT) weight tile stays resident across token tiles;
# the residual buffer is aliased and updated in place.
# --------------------------------------------------------------------------
def _gated_linear_res_kernel(x_ref, w_ref, b_ref, gate_ref, res_ref, o_ref,
                             *, apply_gelu):
    x = x_ref[0].astype(jnp.float32)
    if apply_gelu:
        x = _gelu_tanh(x)
    y = jnp.dot(x.astype(jnp.bfloat16), w_ref[...].astype(jnp.bfloat16),
                preferred_element_type=jnp.float32) + b_ref[...]
    o_ref[0] = (res_ref[0] + gate_ref[0] * y).astype(o_ref.dtype)


def gated_linear_residual(x, w, b, gate, residual, *, apply_gelu=False):
    B, L, Din = x.shape
    Dout = w.shape[1]
    LT = _pick_tile(L, L_TILE, 8)
    NT = _pick_tile(Dout, N_TILE_GEMM, 128)
    grid = (B, Dout // NT, L // LT)        # L innermost: weight tile resident
    return pl.pallas_call(
        functools.partial(_gated_linear_res_kernel, apply_gelu=apply_gelu),
        out_shape=jax.ShapeDtypeStruct((B, L, Dout), residual.dtype),
        grid=grid,
        in_specs=[
            pl.BlockSpec((1, LT, Din), lambda b, n, l: (b, l, 0)),
            pl.BlockSpec((Din, NT), lambda b, n, l: (0, n)),
            pl.BlockSpec((1, NT), lambda b, n, l: (0, n)),
            pl.BlockSpec((1, 1, NT), lambda b, n, l: (b, 0, n)),
            pl.BlockSpec((1, LT, NT), lambda b, n, l: (b, l, n)),
        ],
        out_specs=pl.BlockSpec((1, LT, NT), lambda b, n, l: (b, l, n)),
        compiler_params=pltpu.CompilerParams(
            dimension_semantics=("parallel",) * 3,
            vmem_limit_bytes=VMEM_LIMIT),
        input_output_aliases={4: 0},       # residual updated in place
    )(x, w, b.reshape(1, Dout), gate.reshape(B, 1, Dout), residual)


# --------------------------------------------------------------------------
# Flash attention (online softmax).  Grid: (B, head_group, Lq, Lk) with the
# main K/V stream on the innermost 'arbitrary' axis; optional short resident
# extra K/V (with additive key mask) folded in at the last K/V step; optional
# fused `residual + scale * attn` epilogue (scale comes from SMEM).
# --------------------------------------------------------------------------
def _flash_kernel(*refs, sm_scale, hg, head_dim, has_extra, has_residual):
    q_ref, k_ref, v_ref = refs[0], refs[1], refs[2]
    i = 3
    if has_extra:
        ek_ref, ev_ref, mask_ref = refs[i], refs[i + 1], refs[i + 2]
        i += 3
    if has_residual:
        res_ref, rscale_ref = refs[i], refs[i + 1]
        i += 2
    o_ref = refs[i]
    m_sc, l_sc, acc_sc = refs[i + 1], refs[i + 2], refs[i + 3]

    D = head_dim
    lk = pl.program_id(3)

    @pl.when(lk == 0)
    def _init():
        m_sc[...] = jnp.full(m_sc.shape, -jnp.inf, jnp.float32)
        l_sc[...] = jnp.zeros(l_sc.shape, jnp.float32)
        acc_sc[...] = jnp.zeros(acc_sc.shape, jnp.float32)

    # pre-scale q once per q tile (bf16 MXU input)
    q = (q_ref[0, 0].astype(jnp.float32) * sm_scale).astype(jnp.bfloat16)

    def online_update(k_blk, v_blk, bias):
        for h in range(hg):
            sl = slice(h * D, (h + 1) * D)
            s = jax.lax.dot_general(q[:, sl], k_blk[:, sl],
                                    (((1,), (1,)), ((), ())),
                                    preferred_element_type=jnp.float32)
            if bias is not None:
                s = s + bias
            m_prev = m_sc[:, h:h + 1]
            m_new = jnp.maximum(m_prev, jnp.max(s, axis=-1, keepdims=True))
            alpha = jnp.exp(m_prev - m_new)
            p = jnp.exp(s - m_new)
            l_sc[:, h:h + 1] = alpha * l_sc[:, h:h + 1] + jnp.sum(p, axis=-1,
                                                                  keepdims=True)
            pv = jax.lax.dot_general(p.astype(jnp.bfloat16), v_blk[:, sl],
                                     (((1,), (0,)), ((), ())),
                                     preferred_element_type=jnp.float32)
            acc_sc[:, sl] = alpha * acc_sc[:, sl] + pv
            m_sc[:, h:h + 1] = m_new

    online_update(k_ref[0, 0], v_ref[0, 0], None)

    @pl.when(lk == pl.num_programs(3) - 1)
    def _finalize():
        if has_extra:
            bias = jnp.where(mask_ref[0] > 0, 0.0, -1e9).astype(jnp.float32)
            online_update(ek_ref[0, 0], ev_ref[0, 0], bias)
        inv_l = pl.reciprocal(l_sc[...], approx=True)        # EUP slot (~free)
        for h in range(hg):
            sl = slice(h * D, (h + 1) * D)
            acc_sc[:, sl] = acc_sc[:, sl] * inv_l[:, h:h + 1]
        out = acc_sc[...]
        if has_residual:
            out = res_ref[0] + rscale_ref[0] * out
        o_ref[0] = out.astype(o_ref.dtype)                   # lane-dense store


def flash_attention(q_src, kv_src, *, heads, extra_kv=None, extra_mask=None,
                    residual=None, residual_scale=None):
    """q_src / kv_src / extra_kv: (3, B, L, Hd) bf16 arrays from ln_mod_qkv."""
    _, B, Lq, Hd = q_src.shape
    Lk = kv_src.shape[2]
    D = Hd // heads
    hg = _heads_per_block(heads, D, ATTN_GROUP_LANES)
    HG = hg * D
    G = heads // hg
    sm_scale = 1.0 / math.sqrt(D)
    LQT = _pick_tile(Lq, LQ_TILE, 8)
    LKT = _pick_tile(Lk, LK_TILE, 8)
    grid = (B, G, Lq // LQT, Lk // LKT)

    has_extra = extra_kv is not None
    has_res = residual is not None

    in_specs = [
        pl.BlockSpec((1, 1, LQT, HG), lambda b, g, lq, lk: (0, b, lq, g)),
        pl.BlockSpec((1, 1, LKT, HG), lambda b, g, lq, lk: (1, b, lk, g)),
        pl.BlockSpec((1, 1, LKT, HG), lambda b, g, lq, lk: (2, b, lk, g)),
    ]
    operands = [q_src, kv_src, kv_src]
    if has_extra:
        Le = extra_kv.shape[2]
        in_specs += [
            pl.BlockSpec((1, 1, Le, HG), lambda b, g, lq, lk: (1, b, 0, g)),
            pl.BlockSpec((1, 1, Le, HG), lambda b, g, lq, lk: (2, b, 0, g)),
            pl.BlockSpec((1, 1, Le), lambda b, g, lq, lk: (b, 0, 0)),
        ]
        operands += [extra_kv, extra_kv, extra_mask.reshape(B, 1, Le)]
    io_aliases = {}
    if has_res:
        res_idx = len(operands)
        in_specs += [
            pl.BlockSpec((1, LQT, HG), lambda b, g, lq, lk: (b, lq, g)),
            pl.BlockSpec(memory_space=pltpu.MemorySpace.SMEM),   # scalar scale
        ]
        operands += [residual, residual_scale.reshape(1).astype(jnp.float32)]
        io_aliases = {res_idx: 0}          # residual updated in place
        out_dtype = residual.dtype
    else:
        out_dtype = jnp.bfloat16

    kernel = functools.partial(
        _flash_kernel, sm_scale=sm_scale, hg=hg, head_dim=D,
        has_extra=has_extra, has_residual=has_res)
    return pl.pallas_call(
        kernel,
        out_shape=jax.ShapeDtypeStruct((B, Lq, Hd), out_dtype),
        grid=grid,
        in_specs=in_specs,
        out_specs=pl.BlockSpec((1, LQT, HG), lambda b, g, lq, lk: (b, lq, g)),
        scratch_shapes=[pltpu.VMEM((LQT, hg), jnp.float32),
                        pltpu.VMEM((LQT, hg), jnp.float32),
                        pltpu.VMEM((LQT, HG), jnp.float32)],
        compiler_params=pltpu.CompilerParams(
            dimension_semantics=("parallel", "parallel", "parallel", "arbitrary"),
            vmem_limit_bytes=VMEM_LIMIT),
        input_output_aliases=io_aliases,
    )(*operands)


# --------------------------------------------------------------------------
# Parameter preparation: pre-cast matmul weights to bf16 once (halves weight
# HBM traffic and VMEM tile footprint; biases / gates / norm weights stay f32).
# --------------------------------------------------------------------------
_BF16_WEIGHTS = ("mod_w", "img_qkv_w", "txt_qkv_w", "aud_qkv_w", "img_proj_w",
                 "txt_proj_w", "img_fc1_w", "img_fc2_w", "txt_fc1_w", "txt_fc2_w")


def prepare_params(params):
    out = dict(params)
    for k in _BF16_WEIGHTS:
        out[k] = params[k].astype(jnp.bfloat16)
    return out


# --------------------------------------------------------------------------
# Forward pass
# --------------------------------------------------------------------------
def mm_double_stream_block_audio(params, img, txt, vec, text_mask, audio_emb,
                                 heads_num):
    B, Limg, Hd = img.shape

    # --- modulation: img_mod and txt_mod fused into one silu+linear GEMM ---
    mod = silu_linear(vec, params["mod_w"], params["mod_b"])      # (B, 12*Hd)
    (i_shift1, i_scale1, i_gate1, i_shift2, i_scale2, i_gate2,
     t_shift1, t_scale1, t_gate1, t_shift2, t_scale2, t_gate2) = \
        jnp.split(mod, 12, axis=-1)

    # --- fused LN -> modulate -> qkv -> per-head RMSNorm(q, k) ---
    img_qkv = ln_mod_qkv(img, i_shift1, i_scale1, params["img_qkv_w"],
                         params["img_qkv_b"], params["img_q_norm_w"],
                         params["img_k_norm_w"], heads=heads_num)
    txt_qkv = ln_mod_qkv(txt, t_shift1, t_scale1, params["txt_qkv_w"],
                         params["txt_qkv_b"], params["txt_q_norm_w"],
                         params["txt_k_norm_w"], heads=heads_num)
    zero_mod = jnp.zeros((B, Hd), jnp.float32)
    aud_qkv = ln_mod_qkv(audio_emb, zero_mod, zero_mod, params["aud_qkv_w"],
                         params["aud_qkv_b"], params["aud_q_norm_w"],
                         params["aud_k_norm_w"], heads=heads_num)
    # TODO(synk): rotary embedding (freqs_cis) + nccl_info sequence-parallel
    # head sharding are not implemented; this reproduces the freqs_cis=None path.

    # --- joint (img + txt) attention, flash style (img KV tiled, txt KV
    #     resident with in-kernel text-key bias); outputs stay lane-dense ---
    img_attn = flash_attention(img_qkv, img_qkv, heads=heads_num,
                               extra_kv=txt_qkv, extra_mask=text_mask)
    txt_attn = flash_attention(txt_qkv, img_qkv, heads=heads_num,
                               extra_kv=txt_qkv, extra_mask=text_mask)

    # --- img residual 1: gated attention projection (in place) ---
    img = gated_linear_residual(img_attn, params["img_proj_w"],
                                params["img_proj_b"], i_gate1, img)

    # --- audio cross attention (q = img_q, kv = audio, all-ones mask skipped)
    #     fused with `img += clamp(audio_scale, max=2) * attn` ---
    aud_scale = jnp.minimum(params["audio_scale"], 2.0)
    img = flash_attention(img_qkv, aud_qkv, heads=heads_num,
                          residual=img, residual_scale=aud_scale)

    # --- img MLP: LN -> modulate -> fc1 | gelu_tanh -> fc2 -> gate -> +res ---
    img_fc1 = ln_mod_linear(img, i_shift2, i_scale2,
                            params["img_fc1_w"], params["img_fc1_b"])
    img = gated_linear_residual(img_fc1, params["img_fc2_w"],
                                params["img_fc2_b"], i_gate2, img,
                                apply_gelu=True)

    # --- txt residual 1 + MLP ---
    txt = gated_linear_residual(txt_attn, params["txt_proj_w"],
                                params["txt_proj_b"], t_gate1, txt)
    txt_fc1 = ln_mod_linear(txt, t_shift2, t_scale2,
                            params["txt_fc1_w"], params["txt_fc1_b"])
    txt = gated_linear_residual(txt_fc1, params["txt_fc2_w"],
                                params["txt_fc2_b"], t_gate2, txt,
                                apply_gelu=True)
    return img, txt


# --------------------------------------------------------------------------
if __name__ == "__main__":
    B, Limg, Ltxt, Laud = 2, 16, 8, 8
    hidden, heads = 32, 4
    mlp_hidden = int(hidden * 4.0)
    D = hidden // heads

    key = jax.random.PRNGKey(0)
    keys = jax.random.split(key, 40)
    ki = iter(keys)

    def w(shape, s=0.02):
        return jax.random.normal(next(ki), shape, jnp.float32) * s

    # Parameter layout (vs the PyTorch module, qkv_bias=True configuration):
    #  * linear weights are stored input-major (torch weight.T)
    #  * mod_w / mod_b = img_mod.linear and txt_mod.linear concatenated along
    #    the output dim: [img 6*hidden | txt 6*hidden]
    #  * qkv weights stored as (3, hidden, hidden) (torch (3*hidden, hidden)
    #    reshaped per q/k/v plane, input-major); biases as (3, 1, hidden)
    params = {
        "mod_w": w((hidden, 12 * hidden)),
        "mod_b": jnp.zeros((12 * hidden,), jnp.float32),
        "img_qkv_w": w((3, hidden, hidden)), "img_qkv_b": w((3, 1, hidden)),
        "img_q_norm_w": jnp.ones((D,), jnp.float32),
        "img_k_norm_w": jnp.ones((D,), jnp.float32),
        "img_proj_w": w((hidden, hidden)), "img_proj_b": w((hidden,)),
        "img_fc1_w": w((hidden, mlp_hidden)), "img_fc1_b": w((mlp_hidden,)),
        "img_fc2_w": w((mlp_hidden, hidden)), "img_fc2_b": w((hidden,)),
        "txt_qkv_w": w((3, hidden, hidden)), "txt_qkv_b": w((3, 1, hidden)),
        "txt_q_norm_w": jnp.ones((D,), jnp.float32),
        "txt_k_norm_w": jnp.ones((D,), jnp.float32),
        "txt_proj_w": w((hidden, hidden)), "txt_proj_b": w((hidden,)),
        "txt_fc1_w": w((hidden, mlp_hidden)), "txt_fc1_b": w((mlp_hidden,)),
        "txt_fc2_w": w((mlp_hidden, hidden)), "txt_fc2_b": w((hidden,)),
        "aud_qkv_w": w((3, hidden, hidden), 0.1),              # xavier stand-in
        "aud_qkv_b": jnp.zeros((3, 1, hidden), jnp.float32),   # init.zeros_
        "aud_q_norm_w": jnp.ones((D,), jnp.float32),
        "aud_k_norm_w": jnp.ones((D,), jnp.float32),
        "audio_scale": jnp.ones((1,), jnp.float32),
    }
    params = prepare_params(params)    # pre-cast matmul weights to bf16

    img = jax.random.normal(next(ki), (B, Limg, hidden), jnp.float32)
    txt = jax.random.normal(next(ki), (B, Ltxt, hidden), jnp.float32)
    vec = jax.random.normal(next(ki), (B, hidden), jnp.float32)
    audio_emb = jax.random.normal(next(ki), (B, Laud, hidden), jnp.float32)
    text_mask = jnp.ones((B, Ltxt), jnp.int32)

    fwd = jax.jit(functools.partial(mm_double_stream_block_audio,
                                    heads_num=heads))
    img_out, txt_out = fwd(params, img, txt, vec, text_mask, audio_emb)
    jax.block_until_ready((img_out, txt_out))
    assert img_out.shape == (B, Limg, hidden)
    assert txt_out.shape == (B, Ltxt, hidden)
    assert jnp.all(jnp.isfinite(img_out)) and jnp.all(jnp.isfinite(txt_out))
    print("KERNEL_OK")
</pallas_src>

<mosaic_0001>
module attributes {stable_mosaic.version = 11 : i64} {
  func.func @_silu_linear_kernel(%arg0: i32, %arg1: memref<2x32xf32, #tpu.memory_space<vmem>>, %arg2: memref<32x384xbf16, #tpu.memory_space<vmem>>, %arg3: memref<1x384xf32, #tpu.memory_space<vmem>>, %arg4: memref<2x384xf32, #tpu.memory_space<vmem>>) attributes {dimension_semantics = [#tpu.dimension_semantics<parallel>], iteration_bounds = array<i64: 1>, scalar_prefetch = 0 : i64, scratch_operands = 0 : i64, tpu.core_type = #tpu.core_type<tc>, window_params = [{pipeline_mode = #tpu.pipeline_mode<synchronous>, transform_indices = @transform_0, window_bounds = array<i64: 2, 32>}, {transform_indices = @transform_1, window_bounds = array<i64: 32, 384>}, {transform_indices = @transform_2, window_bounds = array<i64: 1, 384>}, {transform_indices = @transform_3, window_bounds = array<i64: 2, 384>}]} {
    %c0 = arith.constant 0 : index
    %c0_0 = arith.constant 0 : index
    %0 = vector.load %arg1[%c0, %c0_0] : memref<2x32xf32, #tpu.memory_space<vmem>>, vector<2x32xf32>
    %1 = arith.negf %0 : vector<2x32xf32>
    %2 = math.exp %1 : vector<2x32xf32>
    %cst = arith.constant 1.000000e+00 : f32
    %3 = vector.broadcast %cst : f32 to vector<2x32xf32>
    %4 = arith.addf %3, %2 : vector<2x32xf32>
    %5 = arith.divf %3, %4 : vector<2x32xf32>
    %6 = arith.mulf %0, %5 : vector<2x32xf32>
    %7 = arith.truncf %6 : vector<2x32xf32> to vector<2x32xbf16>
    %c0_1 = arith.constant 0 : index
    %c0_2 = arith.constant 0 : index
    %8 = vector.load %arg2[%c0_1, %c0_2] : memref<32x384xbf16, #tpu.memory_space<vmem>>, vector<32x384xbf16>
    %cst_3 = arith.constant dense<0.000000e+00> : vector<2x384xf32>
    %9 = tpu.matmul %7, %8, %cst_3 {dimension_numbers = #tpu.dot_dimension_numbers<[1], [0], [0], [1], [0, 0, 1, 1], [], []>} : vector<2x32xbf16>, vector<32x384xbf16>, vector<2x384xf32> -> vector<2x384xf32>
    %c0_4 = arith.constant 0 : index
    %c0_5 = arith.constant 0 : index
    %10 = vector.load %arg3[%c0_4, %c0_5] : memref<1x384xf32, #tpu.memory_space<vmem>>, vector<1x384xf32>
    %11 = vector.broadcast %10 : vector<1x384xf32> to vector<2x384xf32>
    %12 = arith.addf %9, %11 : vector<2x384xf32>
    %c0_6 = arith.constant 0 : index
    %c0_7 = arith.constant 0 : index
    %13 = vector.load %arg4[%c0_6, %c0_7] : memref<2x384xf32, #tpu.memory_space<vmem>>, vector<2x384xf32>
    tpu.vector_store %arg4[%c0_6, %c0_7], %12 {strides = array<i32>} : memref<2x384xf32, #tpu.memory_space<vmem>>, vector<2x384xf32>,
    return
  }
  func.func @transform_0(%arg0: i32) -> (i32, i32) {
    %c0_i32 = arith.constant 0 : i32
    %c0_i32_0 = arith.constant 0 : i32
    %c0_i32_1 = arith.constant 0 : i32
    return %c0_i32, %c0_i32_0 : i32, i32
  }
  func.func @transform_1(%arg0: i32) -> (i32, i32) {
    %c0_i32 = arith.constant 0 : i32
    %c0_i32_0 = arith.constant 0 : i32
    return %c0_i32, %arg0 : i32, i32
  }
  func.func @transform_2(%arg0: i32) -> (i32, i32) {
    %c0_i32 = arith.constant 0 : i32
    %c0_i32_0 = arith.constant 0 : i32
    return %c0_i32, %arg0 : i32, i32
  }
  func.func @transform_3(%arg0: i32) -> (i32, i32) {
    %c0_i32 = arith.constant 0 : i32
    %c0_i32_0 = arith.constant 0 : i32
    return %c0_i32, %arg0 : i32, i32
  }
}

module attributes {stable_mosaic.version = 11 : i64} {
  func.func @_ln_mod_qkv_kernel(%arg0: i32, %arg1: i32, %arg2: i32, %arg3: i32, %arg4: memref<1x8x32xbf16, #tpu.memory_space<vmem>>, %arg5: memref<1x1x32xf32, #tpu.memory_space<vmem>>, %arg6: memref<1x1x32xf32, #tpu.memory_space<vmem>>, %arg7: memref<1x32x32xbf16, #tpu.memory_space<vmem>>, %arg8: memref<1x1x32xf32, #tpu.memory_space<vmem>>, %arg9: memref<1x8xf32, #tpu.memory_space<vmem>>, %arg10: memref<1x8xf32, #tpu.memory_space<vmem>>, %arg11: memref<1x1x8x32xbf16, #tpu.memory_space<vmem>>) attributes {dimension_semantics = [#tpu.dimension_semantics<parallel>, #tpu.dimension_semantics<parallel>, #tpu.dimension_semantics<parallel>, #tpu.dimension_semantics<parallel>], iteration_bounds = array<i64: 2, 3, 1, 1>, scalar_prefetch = 0 : i64, scratch_operands = 0 : i64, tpu.core_type = #tpu.core_type<tc>, window_params = [{transform_indices = @transform_0, window_bounds = array<i64: 1, 8, 32>}, {transform_indices = @transform_1, window_bounds = array<i64: 1, 1, 32>}, {transform_indices = @transform_2, window_bounds = array<i64: 1, 1, 32>}, {transform_indices = @transform_3, window_bounds = array<i64: 1, 32, 32>}, {transform_indices = @transform_4, window_bounds = array<i64: 1, 1, 32>}, {pipeline_mode = #tpu.pipeline_mode<synchronous>, transform_indices = @transform_5, window_bounds = array<i64: 1, 8>}, {pipeline_mode = #tpu.pipeline_mode<synchronous>, transform_indices = @transform_6, window_bounds = array<i64: 1, 8>}, {transform_indices = @transform_7, window_bounds = array<i64: 1, 1, 8, 32>}]} {
    %c0 = arith.constant 0 : index
    %c0_0 = arith.constant 0 : index
    %c0_1 = arith.constant 0 : index
    %0 = vector.load %arg4[%c0, %c0_0, %c0_1] : memref<1x8x32xbf16, #tpu.memory_space<vmem>>, vector<1x8x32xbf16>
    %1 = vector.shape_cast %0 : vector<1x8x32xbf16> to vector<8x32xbf16>
    %2 = arith.extf %1 : vector<8x32xbf16> to vector<8x32xf32>
    %c0_2 = arith.constant 0 : index
    %c0_3 = arith.constant 0 : index
    %c0_4 = arith.constant 0 : index
    %3 = vector.load %arg5[%c0_2, %c0_3, %c0_4] : memref<1x1x32xf32, #tpu.memory_space<vmem>>, vector<1x1x32xf32>
    %4 = vector.shape_cast %3 : vector<1x1x32xf32> to vector<1x32xf32>
    %c0_5 = arith.constant 0 : index
    %c0_6 = arith.constant 0 : index
    %c0_7 = arith.constant 0 : index
    %5 = vector.load %arg6[%c0_5, %c0_6, %c0_7] : memref<1x1x32xf32, #tpu.memory_space<vmem>>, vector<1x1x32xf32>
    %6 = vector.shape_cast %5 : vector<1x1x32xf32> to vector<1x32xf32>
    %cst = arith.constant dense<0.000000e+00> : vector<8xf32>
    %7 = vector.multi_reduction <add>, %2, %cst [1] : vector<8x32xf32> to vector<8xf32>
    %8 = vector.shape_cast %7 : vector<8xf32> to vector<8x1xf32>
    %cst_8 = arith.constant 3.200000e+01 : f32
    %9 = vector.broadcast %cst_8 : f32 to vector<8x1xf32>
    %10 = arith.divf %8, %9 : vector<8x1xf32>
    %11 = vector.broadcast %10 : vector<8x1xf32> to vector<8x32xf32>
    %12 = arith.subf %2, %11 : vector<8x32xf32>
    %13 = arith.mulf %12, %12 : vector<8x32xf32>
    %cst_9 = arith.constant dense<0.000000e+00> : vector<8xf32>
    %14 = vector.multi_reduction <add>, %13, %cst_9 [1] : vector<8x32xf32> to vector<8xf32>
    %15 = vector.shape_cast %14 : vector<8xf32> to vector<8x1xf32>
    %cst_10 = arith.constant 3.200000e+01 : f32
    %16 = vector.broadcast %cst_10 : f32 to vector<8x1xf32>
    %17 = arith.divf %15, %16 : vector<8x1xf32>
    %18 = vector.broadcast %10 : vector<8x1xf32> to vector<8x32xf32>
    %19 = arith.subf %2, %18 : vector<8x32xf32>
    %cst_11 = arith.constant 9.99999997E-7 : f32
    %20 = vector.broadcast %cst_11 : f32 to vector<8x1xf32>
    %21 = arith.addf %17, %20 : vector<8x1xf32>
    %22 = math.rsqrt %21 : vector<8x1xf32>
    %23 = vector.broadcast %22 : vector<8x1xf32> to vector<8x32xf32>
    %24 = arith.mulf %19, %23 : vector<8x32xf32>
    %cst_12 = arith.constant 1.000000e+00 : f32
    %25 = vector.broadcast %cst_12 : f32 to vector<1x32xf32>
    %26 = arith.addf %25, %6 : vector<1x32xf32>
    %27 = vector.broadcast %26 : vector<1x32xf32> to vector<8x32xf32>
    %28 = arith.mulf %24, %27 : vector<8x32xf32>
    %29 = vector.broadcast %4 : vector<1x32xf32> to vector<8x32xf32>
    %30 = arith.addf %28, %29 : vector<8x32xf32>
    %31 = arith.truncf %30 : vector<8x32xf32> to vector<8x32xbf16>
    %c0_13 = arith.constant 0 : index
    %c0_14 = arith.constant 0 : index
    %c0_15 = arith.constant 0 : index
    %32 = vector.load %arg7[%c0_13, %c0_14, %c0_15] : memref<1x32x32xbf16, #tpu.memory_space<vmem>>, vector<1x32x32xbf16>
    %33 = vector.shape_cast %32 : vector<1x32x32xbf16> to vector<32x32xbf16>
    %cst_16 = arith.constant dense<0.000000e+00> : vector<8x32xf32>
    %34 = tpu.matmul %31, %33, %cst_16 {dimension_numbers = #tpu.dot_dimension_numbers<[1], [0], [0], [1], [0, 0, 1, 1], [], []>} : vector<8x32xbf16>, vector<32x32xbf16>, vector<8x32xf32> -> vector<8x32xf32>
    %c0_17 = arith.constant 0 : index
    %c0_18 = arith.constant 0 : index
    %c0_19 = arith.constant 0 : index
    %35 = vector.load %arg8[%c0_17, %c0_18, %c0_19] : memref<1x1x32xf32, #tpu.memory_space<vmem>>, vector<1x1x32xf32>
    %36 = vector.shape_cast %35 : vector<1x1x32xf32> to vector<1x32xf32>
    %37 = vector.broadcast %36 : vector<1x32xf32> to vector<8x32xf32>
    %38 = arith.addf %34, %37 : vector<8x32xf32>
    %c2_i32 = arith.constant 2 : i32
    %39 = arith.cmpi eq, %arg1, %c2_i32 : i32
    %40 = arith.extui %39 : i1 to i32
    %c0_i32 = arith.constant 0 : i32
    %41 = arith.cmpi ne, %40, %c0_i32 : i32
    scf.if %41 {
      %45 = arith.truncf %38 : vector<8x32xf32> to vector<8x32xbf16>
      %c0_22 = arith.constant 0 : index
      %c0_23 = arith.constant 0 : index
      %c0_24 = arith.constant 0 : index
      %c0_25 = arith.constant 0 : index
      %46 = vector.load %arg11[%c0_22, %c0_23, %c0_24, %c0_25] : memref<1x1x8x32xbf16, #tpu.memory_space<vmem>>, vector<1x1x8x32xbf16>
      %47 = vector.shape_cast %46 : vector<1x1x8x32xbf16> to vector<8x32xbf16>
      %48 = vector.shape_cast %45 : vector<8x32xbf16> to vector<1x1x8x32xbf16>
      tpu.vector_store %arg11[%c0_22, %c0_23, %c0_24, %c0_25], %48 {strides = array<i32>} : memref<1x1x8x32xbf16, #tpu.memory_space<vmem>>, vector<1x1x8x32xbf16>,
    } else {
    }
    %c2_i32_20 = arith.constant 2 : i32
    %42 = arith.cmpi ne, %arg1, %c2_i32_20 : i32
    %43 = arith.extui %42 : i1 to i32
    %c0_i32_21 = arith.constant 0 : i32
    %44 = arith.cmpi ne, %43, %c0_i32_21 : i32
    scf.if %44 {
      %c0_i32_22 = arith.constant 0 : i32
      %45 = arith.cmpi eq, %arg1, %c0_i32_22 : i32
      %c0_23 = arith.constant 0 : index
      %c0_24 = arith.constant 0 : index
      %46 = vector.load %arg9[%c0_23, %c0_24] : memref<1x8xf32, #tpu.memory_space<vmem>>, vector<1x8xf32>
      %c0_25 = arith.constant 0 : index
      %c0_26 = arith.constant 0 : index
      %47 = vector.load %arg10[%c0_25, %c0_26] : memref<1x8xf32, #tpu.memory_space<vmem>>, vector<1x8xf32>
      %48 = arith.select %45, %46, %47 : vector<1x8xf32>
      %49 = vector.extract_strided_slice %38 {offsets = [0, 0], sizes = [8, 8], strides = [1, 1]} : vector<8x32xf32> to vector<8x8xf32>
      %50 = arith.mulf %49, %49 : vector<8x8xf32>
      %cst_27 = arith.constant dense<0.000000e+00> : vector<8xf32>
      %51 = vector.multi_reduction <add>, %50, %cst_27 [1] : vector<8x8xf32> to vector<8xf32>
      %52 = vector.shape_cast %51 : vector<8xf32> to vector<8x1xf32>
      %cst_28 = arith.constant 8.000000e+00 : f32
      %53 = vector.broadcast %cst_28 : f32 to vector<8x1xf32>
      %54 = arith.divf %52, %53 : vector<8x1xf32>
      %cst_29 = arith.constant 9.99999997E-7 : f32
      %55 = vector.broadcast %cst_29 : f32 to vector<8x1xf32>
      %56 = arith.addf %54, %55 : vector<8x1xf32>
      %57 = math.rsqrt %56 : vector<8x1xf32>
      %58 = vector.broadcast %57 : vector<8x1xf32> to vector<8x8xf32>
      %59 = arith.mulf %49, %58 : vector<8x8xf32>
      %60 = vector.broadcast %48 : vector<1x8xf32> to vector<8x8xf32>
      %61 = arith.mulf %59, %60 : vector<8x8xf32>
      %62 = arith.truncf %61 : vector<8x8xf32> to vector<8x8xbf16>
      %c0_30 = arith.constant 0 : index
      %c0_31 = arith.constant 0 : index
      %c0_32 = arith.constant 0 : index
      %c0_33 = arith.constant 0 : index
      %63 = vector.load %arg11[%c0_30, %c0_31, %c0_32, %c0_33] : memref<1x1x8x32xbf16, #tpu.memory_space<vmem>>, vector<1x1x8x8xbf16>
      %64 = vector.shape_cast %63 : vector<1x1x8x8xbf16> to vector<8x8xbf16>
      %65 = vector.shape_cast %62 : vector<8x8xbf16> to vector<1x1x8x8xbf16>
      tpu.vector_store %arg11[%c0_30, %c0_31, %c0_32, %c0_33], %65 {strides = array<i32>} : memref<1x1x8x32xbf16, #tpu.memory_space<vmem>>, vector<1x1x8x8xbf16>,
      %66 = vector.extract_strided_slice %38 {offsets = [0, 8], sizes = [8, 8], strides = [1, 1]} : vector<8x32xf32> to vector<8x8xf32>
      %67 = arith.mulf %66, %66 : vector<8x8xf32>
      %cst_34 = arith.constant dense<0.000000e+00> : vector<8xf32>
      %68 = vector.multi_reduction <add>, %67, %cst_34 [1] : vector<8x8xf32> to vector<8xf32>
      %69 = vector.shape_cast %68 : vector<8xf32> to vector<8x1xf32>
      %cst_35 = arith.constant 8.000000e+00 : f32
      %70 = vector.broadcast %cst_35 : f32 to vector<8x1xf32>
      %71 = arith.divf %69, %70 : vector<8x1xf32>
      %cst_36 = arith.constant 9.99999997E-7 : f32
      %72 = vector.broadcast %cst_36 : f32 to vector<8x1xf32>
      %73 = arith.addf %71, %72 : vector<8x1xf32>
      %74 = math.rsqrt %73 : vector<8x1xf32>
      %75 = vector.broadcast %74 : vector<8x1xf32> to vector<8x8xf32>
      %76 = arith.mulf %66, %75 : vector<8x8xf32>
      %77 = vector.broadcast %48 : vector<1x8xf32> to vector<8x8xf32>
      %78 = arith.mulf %76, %77 : vector<8x8xf32>
      %79 = arith.truncf %78 : vector<8x8xf32> to vector<8x8xbf16>
      %c0_37 = arith.constant 0 : index
      %c0_38 = arith.constant 0 : index
      %c0_39 = arith.constant 0 : index
      %c8 = arith.constant 8 : index
      %80 = vector.load %arg11[%c0_37, %c0_38, %c0_39, %c8] : memref<1x1x8x32xbf16, #tpu.memory_space<vmem>>, vector<1x1x8x8xbf16>
      %81 = vector.shape_cast %80 : vector<1x1x8x8xbf16> to vector<8x8xbf16>
      %82 = vector.shape_cast %79 : vector<8x8xbf16> to vector<1x1x8x8xbf16>
      tpu.vector_store %arg11[%c0_37, %c0_38, %c0_39, %c8], %82 {strides = array<i32>} : memref<1x1x8x32xbf16, #tpu.memory_space<vmem>>, vector<1x1x8x8xbf16>,
      %83 = vector.extract_strided_slice %38 {offsets = [0, 16], sizes = [8, 8], strides = [1, 1]} : vector<8x32xf32> to vector<8x8xf32>
      %84 = arith.mulf %83, %83 : vector<8x8xf32>
      %cst_40 = arith.constant dense<0.000000e+00> : vector<8xf32>
      %85 = vector.multi_reduction <add>, %84, %cst_40 [1] : vector<8x8xf32> to vector<8xf32>
      %86 = vector.shape_cast %85 : vector<8xf32> to vector<8x1xf32>
      %cst_41 = arith.constant 8.000000e+00 : f32
      %87 = vector.broadcast %cst_41 : f32 to vector<8x1xf32>
      %88 = arith.divf %86, %87 : vector<8x1xf32>
      %cst_42 = arith.constant 9.99999997E-7 : f32
      %89 = vector.broadcast %cst_42 : f32 to vector<8x1xf32>
      %90 = arith.addf %88, %89 : vector<8x1xf32>
      %91 = math.rsqrt %90 : vector<8x1xf32>
      %92 = vector.broadcast %91 : vector<8x1xf32> to vector<8x8xf32>
      %93 = arith.mulf %83, %92 : vector<8x8xf32>
      %94 = vector.broadcast %48 : vector<1x8xf32> to vector<8x8xf32>
      %95 = arith.mulf %93, %94 : vector<8x8xf32>
      %96 = arith.truncf %95 : vector<8x8xf32> to vector<8x8xbf16>
      %c0_43 = arith.constant 0 : index
      %c0_44 = arith.constant 0 : index
      %c0_45 = arith.constant 0 : index
      %c16 = arith.constant 16 : index
      %97 = vector.load %arg11[%c0_43, %c0_44, %c0_45, %c16] : memref<1x1x8x32xbf16, #tpu.memory_space<vmem>>, vector<1x1x8x8xbf16>
      %98 = vector.shape_cast %97 : vector<1x1x8x8xbf16> to vector<8x8xbf16>
      %99 = vector.shape_cast %96 : vector<8x8xbf16> to vector<1x1x8x8xbf16>
      tpu.vector_store %arg11[%c0_43, %c0_44, %c0_45, %c16], %99 {strides = array<i32>} : memref<1x1x8x32xbf16, #tpu.memory_space<vmem>>, vector<1x1x8x8xbf16>,
      %100 = vector.extract_strided_slice %38 {offsets = [0, 24], sizes = [8, 8], strides = [1, 1]} : vector<8x32xf32> to vector<8x8xf32>
      %101 = arith.mulf %100, %100 : vector<8x8xf32>
      %cst_46 = arith.constant dense<0.000000e+00> : vector<8xf32>
      %102 = vector.multi_reduction <add>, %101, %cst_46 [1] : vector<8x8xf32> to vector<8xf32>
      %103 = vector.shape_cast %102 : vector<8xf32> to vector<8x1xf32>
      %cst_47 = arith.constant 8.000000e+00 : f32
      %104 = vector.broadcast %cst_47 : f32 to vector<8x1xf32>
      %105 = arith.divf %103, %104 : vector<8x1xf32>
      %cst_48 = arith.constant 9.99999997E-7 : f32
      %106 = vector.broadcast %cst_48 : f32 to vector<8x1xf32>
      %107 = arith.addf %105, %106 : vector<8x1xf32>
      %108 = math.rsqrt %107 : vector<8x1xf32>
      %109 = vector.broadcast %108 : vector<8x1xf32> to vector<8x8xf32>
      %110 = arith.mulf %100, %109 : vector<8x8xf32>
      %111 = vector.broadcast %48 : vector<1x8xf32> to vector<8x8xf32>
      %112 = arith.mulf %110, %111 : vector<8x8xf32>
      %113 = arith.truncf %112 : vector<8x8xf32> to vector<8x8xbf16>
      %c0_49 = arith.constant 0 : index
      %c0_50 = arith.constant 0 : index
      %c0_51 = arith.constant 0 : index
      %c24 = arith.constant 24 : index
      %114 = vector.load %arg11[%c0_49, %c0_50, %c0_51, %c24] : memref<1x1x8x32xbf16, #tpu.memory_space<vmem>>, vector<1x1x8x8xbf16>
      %115 = vector.shape_cast %114 : vector<1x1x8x8xbf16> to vector<8x8xbf16>
      %116 = vector.shape_cast %113 : vector<8x8xbf16> to vector<1x1x8x8xbf16>
      tpu.vector_store %arg11[%c0_49, %c0_50, %c0_51, %c24], %116 {strides = array<i32>} : memref<1x1x8x32xbf16, #tpu.memory_space<vmem>>, vector<1x1x8x8xbf16>,
    } else {
    }
    return
  }
  func.func @transform_0(%arg0: i32, %arg1: i32, %arg2: i32, %arg3: i32) -> (i32, i32, i32) {
    %c0_i32 = arith.constant 0 : i32
    %c0_i32_0 = arith.constant 0 : i32
    return %arg0, %arg3, %c0_i32 : i32, i32, i32
  }
  func.func @transform_1(%arg0: i32, %arg1: i32, %arg2: i32, %arg3: i32) -> (i32, i32, i32) {
    %c0_i32 = arith.constant 0 : i32
    %c0_i32_0 = arith.constant 0 : i32
    %c0_i32_1 = arith.constant 0 : i32
    return %arg0, %c0_i32, %c0_i32_0 : i32, i32, i32
  }
  func.func @transform_2(%arg0: i32, %arg1: i32, %arg2: i32, %arg3: i32) -> (i32, i32, i32) {
    %c0_i32 = arith.constant 0 : i32
    %c0_i32_0 = arith.constant 0 : i32
    %c0_i32_1 = arith.constant 0 : i32
    return %arg0, %c0_i32, %c0_i32_0 : i32, i32, i32
  }
  func.func @transform_3(%arg0: i32, %arg1: i32, %arg2: i32, %arg3: i32) -> (i32, i32, i32) {
    %c0_i32 = arith.constant 0 : i32
    %c0_i32_0 = arith.constant 0 : i32
    return %arg1, %c0_i32, %arg2 : i32, i32, i32
  }
  func.func @transform_4(%arg0: i32, %arg1: i32, %arg2: i32, %arg3: i32) -> (i32, i32, i32) {
    %c0_i32 = arith.constant 0 : i32
    %c0_i32_0 = arith.constant 0 : i32
    return %arg1, %c0_i32, %arg2 : i32, i32, i32
  }
  func.func @transform_5(%arg0: i32, %arg1: i32, %arg2: i32, %arg3: i32) -> (i32, i32) {
    %c0_i32 = arith.constant 0 : i32
    %c0_i32_0 = arith.constant 0 : i32
    %c0_i32_1 = arith.constant 0 : i32
    return %c0_i32, %c0_i32_0 : i32, i32
  }
  func.func @transform_6(%arg0: i32, %arg1: i32, %arg2: i32, %arg3: i32) -> (i32, i32) {
    %c0_i32 = arith.constant 0 : i32
    %c0_i32_0 = arith.constant 0 : i32
    %c0_i32_1 = arith.constant 0 : i32
    return %c0_i32, %c0_i32_0 : i32, i32
  }
  func.func @transform_7(%arg0: i32, %arg1: i32, %arg2: i32, %arg3: i32) -> (i32, i32, i32, i32) {
    %c0_i32 = arith.constant 0 : i32
    return %arg1, %arg0, %arg3, %arg2 : i32, i32, i32, i32
  }
}

module attributes {stable_mosaic.version = 11 : i64} {
  func.func @_ln_mod_qkv_kernel(%arg0: i32, %arg1: i32, %arg2: i32, %arg3: i32, %arg4: memref<1x8x32xbf16, #tpu.memory_space<vmem>>, %arg5: memref<1x1x32xf32, #tpu.memory_space<vmem>>, %arg6: memref<1x1x32xf32, #tpu.memory_space<vmem>>, %arg7: memref<1x32x32xbf16, #tpu.memory_space<vmem>>, %arg8: memref<1x1x32xf32, #tpu.memory_space<vmem>>, %arg9: memref<1x8xf32, #tpu.memory_space<vmem>>, %arg10: memref<1x8xf32, #tpu.memory_space<vmem>>, %arg11: memref<1x1x8x32xbf16, #tpu.memory_space<vmem>>) attributes {dimension_semantics = [#tpu.dimension_semantics<parallel>, #tpu.dimension_semantics<parallel>, #tpu.dimension_semantics<parallel>, #tpu.dimension_semantics<parallel>], iteration_bounds = array<i64: 2, 3, 1, 1>, scalar_prefetch = 0 : i64, scratch_operands = 0 : i64, tpu.core_type = #tpu.core_type<tc>, window_params = [{transform_indices = @transform_0, window_bounds = array<i64: 1, 8, 32>}, {transform_indices = @transform_1, window_bounds = array<i64: 1, 1, 32>}, {transform_indices = @transform_2, window_bounds = array<i64: 1, 1, 32>}, {transform_indices = @transform_3, window_bounds = array<i64: 1, 32, 32>}, {transform_indices = @transform_4, window_bounds = array<i64: 1, 1, 32>}, {pipeline_mode = #tpu.pipeline_mode<synchronous>, transform_indices = @transform_5, window_bounds = array<i64: 1, 8>}, {pipeline_mode = #tpu.pipeline_mode<synchronous>, transform_indices = @transform_6, window_bounds = array<i64: 1, 8>}, {transform_indices = @transform_7, window_bounds = array<i64: 1, 1, 8, 32>}]} {
    %c0 = arith.constant 0 : index
    %c0_0 = arith.constant 0 : index
    %c0_1 = arith.constant 0 : index
    %0 = vector.load %arg4[%c0, %c0_0, %c0_1] : memref<1x8x32xbf16, #tpu.memory_space<vmem>>, vector<1x8x32xbf16>
    %1 = vector.shape_cast %0 : vector<1x8x32xbf16> to vector<8x32xbf16>
    %2 = arith.extf %1 : vector<8x32xbf16> to vector<8x32xf32>
    %c0_2 = arith.constant 0 : index
    %c0_3 = arith.constant 0 : index
    %c0_4 = arith.constant 0 : index
    %3 = vector.load %arg5[%c0_2, %c0_3, %c0_4] : memref<1x1x32xf32, #tpu.memory_space<vmem>>, vector<1x1x32xf32>
    %4 = vector.shape_cast %3 : vector<1x1x32xf32> to vector<1x32xf32>
    %c0_5 = arith.constant 0 : index
    %c0_6 = arith.constant 0 : index
    %c0_7 = arith.constant 0 : index
    %5 = vector.load %arg6[%c0_5, %c0_6, %c0_7] : memref<1x1x32xf32, #tpu.memory_space<vmem>>, vector<1x1x32xf32>
    %6 = vector.shape_cast %5 : vector<1x1x32xf32> to vector<1x32xf32>
    %cst = arith.constant dense<0.000000e+00> : vector<8xf32>
    %7 = vector.multi_reduction <add>, %2, %cst [1] : vector<8x32xf32> to vector<8xf32>
    %8 = vector.shape_cast %7 : vector<8xf32> to vector<8x1xf32>
    %cst_8 = arith.constant 3.200000e+01 : f32
    %9 = vector.broadcast %cst_8 : f32 to vector<8x1xf32>
    %10 = arith.divf %8, %9 : vector<8x1xf32>
    %11 = vector.broadcast %10 : vector<8x1xf32> to vector<8x32xf32>
    %12 = arith.subf %2, %11 : vector<8x32xf32>
    %13 = arith.mulf %12, %12 : vector<8x32xf32>
    %cst_9 = arith.constant dense<0.000000e+00> : vector<8xf32>
    %14 = vector.multi_reduction <add>, %13, %cst_9 [1] : vector<8x32xf32> to vector<8xf32>
    %15 = vector.shape_cast %14 : vector<8xf32> to vector<8x1xf32>
    %cst_10 = arith.constant 3.200000e+01 : f32
    %16 = vector.broadcast %cst_10 : f32 to vector<8x1xf32>
    %17 = arith.divf %15, %16 : vector<8x1xf32>
    %18 = vector.broadcast %10 : vector<8x1xf32> to vector<8x32xf32>
    %19 = arith.subf %2, %18 : vector<8x32xf32>
    %cst_11 = arith.constant 9.99999997E-7 : f32
    %20 = vector.broadcast %cst_11 : f32 to vector<8x1xf32>
    %21 = arith.addf %17, %20 : vector<8x1xf32>
    %22 = math.rsqrt %21 : vector<8x1xf32>
    %23 = vector.broadcast %22 : vector<8x1xf32> to vector<8x32xf32>
    %24 = arith.mulf %19, %23 : vector<8x32xf32>
    %cst_12 = arith.constant 1.000000e+00 : f32
    %25 = vector.broadcast %cst_12 : f32 to vector<1x32xf32>
    %26 = arith.addf %25, %6 : vector<1x32xf32>
    %27 = vector.broadcast %26 : vector<1x32xf32> to vector<8x32xf32>
    %28 = arith.mulf %24, %27 : vector<8x32xf32>
    %29 = vector.broadcast %4 : vector<1x32xf32> to vector<8x32xf32>
    %30 = arith.addf %28, %29 : vector<8x32xf32>
    %31 = arith.truncf %30 : vector<8x32xf32> to vector<8x32xbf16>
    %c0_13 = arith.constant 0 : index
    %c0_14 = arith.constant 0 : index
    %c0_15 = arith.constant 0 : index
    %32 = vector.load %arg7[%c0_13, %c0_14, %c0_15] : memref<1x32x32xbf16, #tpu.memory_space<vmem>>, vector<1x32x32xbf16>
    %33 = vector.shape_cast %32 : vector<1x32x32xbf16> to vector<32x32xbf16>
    %cst_16 = arith.constant dense<0.000000e+00> : vector<8x32xf32>
    %34 = tpu.matmul %31, %33, %cst_16 {dimension_numbers = #tpu.dot_dimension_numbers<[1], [0], [0], [1], [0, 0, 1, 1], [], []>} : vector<8x32xbf16>, vector<32x32xbf16>, vector<8x32xf32> -> vector<8x32xf32>
    %c0_17 = arith.constant 0 : index
    %c0_18 = arith.constant 0 : index
    %c0_19 = arith.constant 0 : index
    %35 = vector.load %arg8[%c0_17, %c0_18, %c0_19] : memref<1x1x32xf32, #tpu.memory_space<vmem>>, vector<1x1x32xf32>
    %36 = vector.shape_cast %35 : vector<1x1x32xf32> to vector<1x32xf32>
    %37 = vector.broadcast %36 : vector<1x32xf32> to vector<8x32xf32>
    %38 = arith.addf %34, %37 : vector<8x32xf32>
    %c2_i32 = arith.constant 2 : i32
    %39 = arith.cmpi eq, %arg1, %c2_i32 : i32
    %40 = arith.extui %39 : i1 to i32
    %c0_i32 = arith.constant 0 : i32
    %41 = arith.cmpi ne, %40, %c0_i32 : i32
    scf.if %41 {
      %45 = arith.truncf %38 : vector<8x32xf32> to vector<8x32xbf16>
      %c0_22 = arith.constant 0 : index
      %c0_23 = arith.constant 0 : index
      %c0_24 = arith.constant 0 : index
      %c0_25 = arith.constant 0 : index
      %46 = vector.load %arg11[%c0_22, %c0_23, %c0_24, %c0_25] : memref<1x1x8x32xbf16, #tpu.memory_space<vmem>>, vector<1x1x8x32xbf16>
      %47 = vector.shape_cast %46 : vector<1x1x8x32xbf16> to vector<8x32xbf16>
      %48 = vector.shape_cast %45 : vector<8x32xbf16> to vector<1x1x8x32xbf16>
      tpu.vector_store %arg11[%c0_22, %c0_23, %c0_24, %c0_25], %48 {strides = array<i32>} : memref<1x1x8x32xbf16, #tpu.memory_space<vmem>>, vector<1x1x8x32xbf16>,
    } else {
    }
    %c2_i32_20 = arith.constant 2 : i32
    %42 = arith.cmpi ne, %arg1, %c2_i32_20 : i32
    %43 = arith.extui %42 : i1 to i32
    %c0_i32_21 = arith.constant 0 : i32
    %44 = arith.cmpi ne, %43, %c0_i32_21 : i32
    scf.if %44 {
      %c0_i32_22 = arith.constant 0 : i32
      %45 = arith.cmpi eq, %arg1, %c0_i32_22 : i32
      %c0_23 = arith.constant 0 : index
      %c0_24 = arith.constant 0 : index
      %46 = vector.load %arg9[%c0_23, %c0_24] : memref<1x8xf32, #tpu.memory_space<vmem>>, vector<1x8xf32>
      %c0_25 = arith.constant 0 : index
      %c0_26 = arith.constant 0 : index
      %47 = vector.load %arg10[%c0_25, %c0_26] : memref<1x8xf32, #tpu.memory_space<vmem>>, vector<1x8xf32>
      %48 = arith.select %45, %46, %47 : vector<1x8xf32>
      %49 = vector.extract_strided_slice %38 {offsets = [0, 0], sizes = [8, 8], strides = [1, 1]} : vector<8x32xf32> to vector<8x8xf32>
      %50 = arith.mulf %49, %49 : vector<8x8xf32>
      %cst_27 = arith.constant dense<0.000000e+00> : vector<8xf32>
      %51 = vector.multi_reduction <add>, %50, %cst_27 [1] : vector<8x8xf32> to vector<8xf32>
      %52 = vector.shape_cast %51 : vector<8xf32> to vector<8x1xf32>
      %cst_28 = arith.constant 8.000000e+00 : f32
      %53 = vector.broadcast %cst_28 : f32 to vector<8x1xf32>
      %54 = arith.divf %52, %53 : vector<8x1xf32>
      %cst_29 = arith.constant 9.99999997E-7 : f32
      %55 = vector.broadcast %cst_29 : f32 to vector<8x1xf32>
      %56 = arith.addf %54, %55 : vector<8x1xf32>
      %57 = math.rsqrt %56 : vector<8x1xf32>
      %58 = vector.broadcast %57 : vector<8x1xf32> to vector<8x8xf32>
      %59 = arith.mulf %49, %58 : vector<8x8xf32>
      %60 = vector.broadcast %48 : vector<1x8xf32> to vector<8x8xf32>
      %61 = arith.mulf %59, %60 : vector<8x8xf32>
      %62 = arith.truncf %61 : vector<8x8xf32> to vector<8x8xbf16>
      %c0_30 = arith.constant 0 : index
      %c0_31 = arith.constant 0 : index
      %c0_32 = arith.constant 0 : index
      %c0_33 = arith.constant 0 : index
      %63 = vector.load %arg11[%c0_30, %c0_31, %c0_32, %c0_33] : memref<1x1x8x32xbf16, #tpu.memory_space<vmem>>, vector<1x1x8x8xbf16>
      %64 = vector.shape_cast %63 : vector<1x1x8x8xbf16> to vector<8x8xbf16>
      %65 = vector.shape_cast %62 : vector<8x8xbf16> to vector<1x1x8x8xbf16>
      tpu.vector_store %arg11[%c0_30, %c0_31, %c0_32, %c0_33], %65 {strides = array<i32>} : memref<1x1x8x32xbf16, #tpu.memory_space<vmem>>, vector<1x1x8x8xbf16>,
      %66 = vector.extract_strided_slice %38 {offsets = [0, 8], sizes = [8, 8], strides = [1, 1]} : vector<8x32xf32> to vector<8x8xf32>
      %67 = arith.mulf %66, %66 : vector<8x8xf32>
      %cst_34 = arith.constant dense<0.000000e+00> : vector<8xf32>
      %68 = vector.multi_reduction <add>, %67, %cst_34 [1] : vector<8x8xf32> to vector<8xf32>
      %69 = vector.shape_cast %68 : vector<8xf32> to vector<8x1xf32>
      %cst_35 = arith.constant 8.000000e+00 : f32
      %70 = vector.broadcast %cst_35 : f32 to vector<8x1xf32>
      %71 = arith.divf %69, %70 : vector<8x1xf32>
      %cst_36 = arith.constant 9.99999997E-7 : f32
      %72 = vector.broadcast %cst_36 : f32 to vector<8x1xf32>
      %73 = arith.addf %71, %72 : vector<8x1xf32>
      %74 = math.rsqrt %73 : vector<8x1xf32>
      %75 = vector.broadcast %74 : vector<8x1xf32> to vector<8x8xf32>
      %76 = arith.mulf %66, %75 : vector<8x8xf32>
      %77 = vector.broadcast %48 : vector<1x8xf32> to vector<8x8xf32>
      %78 = arith.mulf %76, %77 : vector<8x8xf32>
      %79 = arith.truncf %78 : vector<8x8xf32> to vector<8x8xbf16>
      %c0_37 = arith.constant 0 : index
      %c0_38 = arith.constant 0 : index
      %c0_39 = arith.constant 0 : index
      %c8 = arith.constant 8 : index
      %80 = vector.load %arg11[%c0_37, %c0_38, %c0_39, %c8] : memref<1x1x8x32xbf16, #tpu.memory_space<vmem>>, vector<1x1x8x8xbf16>
      %81 = vector.shape_cast %80 : vector<1x1x8x8xbf16> to vector<8x8xbf16>
      %82 = vector.shape_cast %79 : vector<8x8xbf16> to vector<1x1x8x8xbf16>
      tpu.vector_store %arg11[%c0_37, %c0_38, %c0_39, %c8], %82 {strides = array<i32>} : memref<1x1x8x32xbf16, #tpu.memory_space<vmem>>, vector<1x1x8x8xbf16>,
      %83 = vector.extract_strided_slice %38 {offsets = [0, 16], sizes = [8, 8], strides = [1, 1]} : vector<8x32xf32> to vector<8x8xf32>
      %84 = arith.mulf %83, %83 : vector<8x8xf32>
      %cst_40 = arith.constant dense<0.000000e+00> : vector<8xf32>
      %85 = vector.multi_reduction <add>, %84, %cst_40 [1] : vector<8x8xf32> to vector<8xf32>
      %86 = vector.shape_cast %85 : vector<8xf32> to vector<8x1xf32>
      %cst_41 = arith.constant 8.000000e+00 : f32
      %87 = vector.broadcast %cst_41 : f32 to vector<8x1xf32>
      %88 = arith.divf %86, %87 : vector<8x1xf32>
      %cst_42 = arith.constant 9.99999997E-7 : f32
      %89 = vector.broadcast %cst_42 : f32 to vector<8x1xf32>
      %90 = arith.addf %88, %89 : vector<8x1xf32>
      %91 = math.rsqrt %90 : vector<8x1xf32>
      %92 = vector.broadcast %91 : vector<8x1xf32> to vector<8x8xf32>
      %93 = arith.mulf %83, %92 : vector<8x8xf32>
      %94 = vector.broadcast %48 : vector<1x8xf32> to vector<8x8xf32>
      %95 = arith.mulf %93, %94 : vector<8x8xf32>
      %96 = arith.truncf %95 : vector<8x8xf32> to vector<8x8xbf16>
      %c0_43 = arith.constant 0 : index
      %c0_44 = arith.constant 0 : index
      %c0_45 = arith.constant 0 : index
      %c16 = arith.constant 16 : index
      %97 = vector.load %arg11[%c0_43, %c0_44, %c0_45, %c16] : memref<1x1x8x32xbf16, #tpu.memory_space<vmem>>, vector<1x1x8x8xbf16>
      %98 = vector.shape_cast %97 : vector<1x1x8x8xbf16> to vector<8x8xbf16>
      %99 = vector.shape_cast %96 : vector<8x8xbf16> to vector<1x1x8x8xbf16>
      tpu.vector_store %arg11[%c0_43, %c0_44, %c0_45, %c16], %99 {strides = array<i32>} : memref<1x1x8x32xbf16, #tpu.memory_space<vmem>>, vector<1x1x8x8xbf16>,
      %100 = vector.extract_strided_slice %38 {offsets = [0, 24], sizes = [8, 8], strides = [1, 1]} : vector<8x32xf32> to vector<8x8xf32>
      %101 = arith.mulf %100, %100 : vector<8x8xf32>
      %cst_46 = arith.constant dense<0.000000e+00> : vector<8xf32>
      %102 = vector.multi_reduction <add>, %101, %cst_46 [1] : vector<8x8xf32> to vector<8xf32>
      %103 = vector.shape_cast %102 : vector<8xf32> to vector<8x1xf32>
      %cst_47 = arith.constant 8.000000e+00 : f32
      %104 = vector.broadcast %cst_47 : f32 to vector<8x1xf32>
      %105 = arith.divf %103, %104 : vector<8x1xf32>
      %cst_48 = arith.constant 9.99999997E-7 : f32
      %106 = vector.broadcast %cst_48 : f32 to vector<8x1xf32>
      %107 = arith.addf %105, %106 : vector<8x1xf32>
      %108 = math.rsqrt %107 : vector<8x1xf32>
      %109 = vector.broadcast %108 : vector<8x1xf32> to vector<8x8xf32>
      %110 = arith.mulf %100, %109 : vector<8x8xf32>
      %111 = vector.broadcast %48 : vector<1x8xf32> to vector<8x8xf32>
      %112 = arith.mulf %110, %111 : vector<8x8xf32>
      %113 = arith.truncf %112 : vector<8x8xf32> to vector<8x8xbf16>
      %c0_49 = arith.constant 0 : index
      %c0_50 = arith.constant 0 : index
      %c0_51 = arith.constant 0 : index
      %c24 = arith.constant 24 : index
      %114 = vector.load %arg11[%c0_49, %c0_50, %c0_51, %c24] : memref<1x1x8x32xbf16, #tpu.memory_space<vmem>>, vector<1x1x8x8xbf16>
      %115 = vector.shape_cast %114 : vector<1x1x8x8xbf16> to vector<8x8xbf16>
      %116 = vector.shape_cast %113 : vector<8x8xbf16> to vector<1x1x8x8xbf16>
      tpu.vector_store %arg11[%c0_49, %c0_50, %c0_51, %c24], %116 {strides = array<i32>} : memref<1x1x8x32xbf16, #tpu.memory_space<vmem>>, vector<1x1x8x8xbf16>,
    } else {
    }
    return
  }
  func.func @transform_0(%arg0: i32, %arg1: i32, %arg2: i32, %arg3: i32) -> (i32, i32, i32) {
    %c0_i32 = arith.constant 0 : i32
    %c0_i32_0 = arith.constant 0 : i32
    return %arg0, %arg3, %c0_i32 : i32, i32, i32
  }
  func.func @transform_1(%arg0: i32, %arg1: i32, %arg2: i32, %arg3: i32) -> (i32, i32, i32) {
    %c0_i32 = arith.constant 0 : i32
    %c0_i32_0 = arith.constant 0 : i32
    %c0_i32_1 = arith.constant 0 : i32
    return %arg0, %c0_i32, %c0_i32_0 : i32, i32, i32
  }
  func.func @transform_2(%arg0: i32, %arg1: i32, %arg2: i32, %arg3: i32) -> (i32, i32, i32) {
    %c0_i32 = arith.constant 0 : i32
    %c0_i32_0 = arith.constant 0 : i32
    %c0_i32_1 = arith.constant 0 : i32
    return %arg0, %c0_i32, %c0_i32_0 : i32, i32, i32
  }
  func.func @transform_3(%arg0: i32, %arg1: i32, %arg2: i32, %arg3: i32) -> (i32, i32, i32) {
    %c0_i32 = arith.constant 0 : i32
    %c0_i32_0 = arith.constant 0 : i32
    return %arg1, %c0_i32, %arg2 : i32, i32, i32
  }
  func.func @transform_4(%arg0: i32, %arg1: i32, %arg2: i32, %arg3: i32) -> (i32, i32, i32) {
    %c0_i32 = arith.constant 0 : i32
    %c0_i32_0 = arith.constant 0 : i32
    return %arg1, %c0_i32, %arg2 : i32, i32, i32
  }
  func.func @transform_5(%arg0: i32, %arg1: i32, %arg2: i32, %arg3: i32) -> (i32, i32) {
    %c0_i32 = arith.constant 0 : i32
    %c0_i32_0 = arith.constant 0 : i32
    %c0_i32_1 = arith.constant 0 : i32
    return %c0_i32, %c0_i32_0 : i32, i32
  }
  func.func @transform_6(%arg0: i32, %arg1: i32, %arg2: i32, %arg3: i32) -> (i32, i32) {
    %c0_i32 = arith.constant 0 : i32
    %c0_i32_0 = arith.constant 0 : i32
    %c0_i32_1 = arith.constant 0 : i32
    return %c0_i32, %c0_i32_0 : i32, i32
  }
  func.func @transform_7(%arg0: i32, %arg1: i32, %arg2: i32, %arg3: i32) -> (i32, i32, i32, i32) {
    %c0_i32 = arith.constant 0 : i32
    return %arg1, %arg0, %arg3, %arg2 : i32, i32, i32, i32
  }
}

module attributes {stable_mosaic.version = 11 : i64} {
  func.func @_ln_mod_qkv_kernel(%arg0: i32, %arg1: i32, %arg2: i32, %arg3: i32, %arg4: memref<1x16x32xbf16, #tpu.memory_space<vmem>>, %arg5: memref<1x1x32xf32, #tpu.memory_space<vmem>>, %arg6: memref<1x1x32xf32, #tpu.memory_space<vmem>>, %arg7: memref<1x32x32xbf16, #tpu.memory_space<vmem>>, %arg8: memref<1x1x32xf32, #tpu.memory_space<vmem>>, %arg9: memref<1x8xf32, #tpu.memory_space<vmem>>, %arg10: memref<1x8xf32, #tpu.memory_space<vmem>>, %arg11: memref<1x1x16x32xbf16, #tpu.memory_space<vmem>>) attributes {dimension_semantics = [#tpu.dimension_semantics<parallel>, #tpu.dimension_semantics<parallel>, #tpu.dimension_semantics<parallel>, #tpu.dimension_semantics<parallel>], iteration_bounds = array<i64: 2, 3, 1, 1>, scalar_prefetch = 0 : i64, scratch_operands = 0 : i64, tpu.core_type = #tpu.core_type<tc>, window_params = [{transform_indices = @transform_0, window_bounds = array<i64: 1, 16, 32>}, {transform_indices = @transform_1, window_bounds = array<i64: 1, 1, 32>}, {transform_indices = @transform_2, window_bounds = array<i64: 1, 1, 32>}, {transform_indices = @transform_3, window_bounds = array<i64: 1, 32, 32>}, {transform_indices = @transform_4, window_bounds = array<i64: 1, 1, 32>}, {pipeline_mode = #tpu.pipeline_mode<synchronous>, transform_indices = @transform_5, window_bounds = array<i64: 1, 8>}, {pipeline_mode = #tpu.pipeline_mode<synchronous>, transform_indices = @transform_6, window_bounds = array<i64: 1, 8>}, {transform_indices = @transform_7, window_bounds = array<i64: 1, 1, 16, 32>}]} {
    %c0 = arith.constant 0 : index
    %c0_0 = arith.constant 0 : index
    %c0_1 = arith.constant 0 : index
    %0 = vector.load %arg4[%c0, %c0_0, %c0_1] : memref<1x16x32xbf16, #tpu.memory_space<vmem>>, vector<1x16x32xbf16>
    %1 = vector.shape_cast %0 : vector<1x16x32xbf16> to vector<16x32xbf16>
    %2 = arith.extf %1 : vector<16x32xbf16> to vector<16x32xf32>
    %c0_2 = arith.constant 0 : index
    %c0_3 = arith.constant 0 : index
    %c0_4 = arith.constant 0 : index
    %3 = vector.load %arg5[%c0_2, %c0_3, %c0_4] : memref<1x1x32xf32, #tpu.memory_space<vmem>>, vector<1x1x32xf32>
    %4 = vector.shape_cast %3 : vector<1x1x32xf32> to vector<1x32xf32>
    %c0_5 = arith.constant 0 : index
    %c0_6 = arith.constant 0 : index
    %c0_7 = arith.constant 0 : index
    %5 = vector.load %arg6[%c0_5, %c0_6, %c0_7] : memref<1x1x32xf32, #tpu.memory_space<vmem>>, vector<1x1x32xf32>
    %6 = vector.shape_cast %5 : vector<1x1x32xf32> to vector<1x32xf32>
    %cst = arith.constant dense<0.000000e+00> : vector<16xf32>
    %7 = vector.multi_reduction <add>, %2, %cst [1] : vector<16x32xf32> to vector<16xf32>
    %8 = vector.shape_cast %7 : vector<16xf32> to vector<16x1xf32>
    %cst_8 = arith.constant 3.200000e+01 : f32
    %9 = vector.broadcast %cst_8 : f32 to vector<16x1xf32>
    %10 = arith.divf %8, %9 : vector<16x1xf32>
    %11 = vector.broadcast %10 : vector<16x1xf32> to vector<16x32xf32>
    %12 = arith.subf %2, %11 : vector<16x32xf32>
    %13 = arith.mulf %12, %12 : vector<16x32xf32>
    %cst_9 = arith.constant dense<0.000000e+00> : vector<16xf32>
    %14 = vector.multi_reduction <add>, %13, %cst_9 [1] : vector<16x32xf32> to vector<16xf32>
    %15 = vector.shape_cast %14 : vector<16xf32> to vector<16x1xf32>
    %cst_10 = arith.constant 3.200000e+01 : f32
    %16 = vector.broadcast %cst_10 : f32 to vector<16x1xf32>
    %17 = arith.divf %15, %16 : vector<16x1xf32>
    %18 = vector.broadcast %10 : vector<16x1xf32> to vector<16x32xf32>
    %19 = arith.subf %2, %18 : vector<16x32xf32>
    %cst_11 = arith.constant 9.99999997E-7 : f32
    %20 = vector.broadcast %cst_11 : f32 to vector<16x1xf32>
    %21 = arith.addf %17, %20 : vector<16x1xf32>
    %22 = math.rsqrt %21 : vector<16x1xf32>
    %23 = vector.broadcast %22 : vector<16x1xf32> to vector<16x32xf32>
    %24 = arith.mulf %19, %23 : vector<16x32xf32>
    %cst_12 = arith.constant 1.000000e+00 : f32
    %25 = vector.broadcast %cst_12 : f32 to vector<1x32xf32>
    %26 = arith.addf %25, %6 : vector<1x32xf32>
    %27 = vector.broadcast %26 : vector<1x32xf32> to vector<16x32xf32>
    %28 = arith.mulf %24, %27 : vector<16x32xf32>
    %29 = vector.broadcast %4 : vector<1x32xf32> to vector<16x32xf32>
    %30 = arith.addf %28, %29 : vector<16x32xf32>
    %31 = arith.truncf %30 : vector<16x32xf32> to vector<16x32xbf16>
    %c0_13 = arith.constant 0 : index
    %c0_14 = arith.constant 0 : index
    %c0_15 = arith.constant 0 : index
    %32 = vector.load %arg7[%c0_13, %c0_14, %c0_15] : memref<1x32x32xbf16, #tpu.memory_space<vmem>>, vector<1x32x32xbf16>
    %33 = vector.shape_cast %32 : vector<1x32x32xbf16> to vector<32x32xbf16>
    %cst_16 = arith.constant dense<0.000000e+00> : vector<16x32xf32>
    %34 = tpu.matmul %31, %33, %cst_16 {dimension_numbers = #tpu.dot_dimension_numbers<[1], [0], [0], [1], [0, 0, 1, 1], [], []>} : vector<16x32xbf16>, vector<32x32xbf16>, vector<16x32xf32> -> vector<16x32xf32>
    %c0_17 = arith.constant 0 : index
    %c0_18 = arith.constant 0 : index
    %c0_19 = arith.constant 0 : index
    %35 = vector.load %arg8[%c0_17, %c0_18, %c0_19] : memref<1x1x32xf32, #tpu.memory_space<vmem>>, vector<1x1x32xf32>
    %36 = vector.shape_cast %35 : vector<1x1x32xf32> to vector<1x32xf32>
    %37 = vector.broadcast %36 : vector<1x32xf32> to vector<16x32xf32>
    %38 = arith.addf %34, %37 : vector<16x32xf32>
    %c2_i32 = arith.constant 2 : i32
    %39 = arith.cmpi eq, %arg1, %c2_i32 : i32
    %40 = arith.extui %39 : i1 to i32
    %c0_i32 = arith.constant 0 : i32
    %41 = arith.cmpi ne, %40, %c0_i32 : i32
    scf.if %41 {
      %45 = arith.truncf %38 : vector<16x32xf32> to vector<16x32xbf16>
      %c0_22 = arith.constant 0 : index
      %c0_23 = arith.constant 0 : index
      %c0_24 = arith.constant 0 : index
      %c0_25 = arith.constant 0 : index
      %46 = vector.load %arg11[%c0_22, %c0_23, %c0_24, %c0_25] : memref<1x1x16x32xbf16, #tpu.memory_space<vmem>>, vector<1x1x16x32xbf16>
      %47 = vector.shape_cast %46 : vector<1x1x16x32xbf16> to vector<16x32xbf16>
      %48 = vector.shape_cast %45 : vector<16x32xbf16> to vector<1x1x16x32xbf16>
      tpu.vector_store %arg11[%c0_22, %c0_23, %c0_24, %c0_25], %48 {strides = array<i32>} : memref<1x1x16x32xbf16, #tpu.memory_space<vmem>>, vector<1x1x16x32xbf16>,
    } else {
    }
    %c2_i32_20 = arith.constant 2 : i32
    %42 = arith.cmpi ne, %arg1, %c2_i32_20 : i32
    %43 = arith.extui %42 : i1 to i32
    %c0_i32_21 = arith.constant 0 : i32
    %44 = arith.cmpi ne, %43, %c0_i32_21 : i32
    scf.if %44 {
      %c0_i32_22 = arith.constant 0 : i32
      %45 = arith.cmpi eq, %arg1, %c0_i32_22 : i32
      %c0_23 = arith.constant 0 : index
      %c0_24 = arith.constant 0 : index
      %46 = vector.load %arg9[%c0_23, %c0_24] : memref<1x8xf32, #tpu.memory_space<vmem>>, vector<1x8xf32>
      %c0_25 = arith.constant 0 : index
      %c0_26 = arith.constant 0 : index
      %47 = vector.load %arg10[%c0_25, %c0_26] : memref<1x8xf32, #tpu.memory_space<vmem>>, vector<1x8xf32>
      %48 = arith.select %45, %46, %47 : vector<1x8xf32>
      %49 = vector.extract_strided_slice %38 {offsets = [0, 0], sizes = [16, 8], strides = [1, 1]} : vector<16x32xf32> to vector<16x8xf32>
      %50 = arith.mulf %49, %49 : vector<16x8xf32>
      %cst_27 = arith.constant dense<0.000000e+00> : vector<16xf32>
      %51 = vector.multi_reduction <add>, %50, %cst_27 [1] : vector<16x8xf32> to vector<16xf32>
      %52 = vector.shape_cast %51 : vector<16xf32> to vector<16x1xf32>
      %cst_28 = arith.constant 8.000000e+00 : f32
      %53 = vector.broadcast %cst_28 : f32 to vector<16x1xf32>
      %54 = arith.divf %52, %53 : vector<16x1xf32>
      %cst_29 = arith.constant 9.99999997E-7 : f32
      %55 = vector.broadcast %cst_29 : f32 to vector<16x1xf32>
      %56 = arith.addf %54, %55 : vector<16x1xf32>
      %57 = math.rsqrt %56 : vector<16x1xf32>
      %58 = vector.broadcast %57 : vector<16x1xf32> to vector<16x8xf32>
      %59 = arith.mulf %49, %58 : vector<16x8xf32>
      %60 = vector.broadcast %48 : vector<1x8xf32> to vector<16x8xf32>
      %61 = arith.mulf %59, %60 : vector<16x8xf32>
      %62 = arith.truncf %61 : vector<16x8xf32> to vector<16x8xbf16>
      %c0_30 = arith.constant 0 : index
      %c0_31 = arith.constant 0 : index
      %c0_32 = arith.constant 0 : index
      %c0_33 = arith.constant 0 : index
      %63 = vector.load %arg11[%c0_30, %c0_31, %c0_32, %c0_33] : memref<1x1x16x32xbf16, #tpu.memory_space<vmem>>, vector<1x1x16x8xbf16>
      %64 = vector.shape_cast %63 : vector<1x1x16x8xbf16> to vector<16x8xbf16>
      %65 = vector.shape_cast %62 : vector<16x8xbf16> to vector<1x1x16x8xbf16>
      tpu.vector_store %arg11[%c0_30, %c0_31, %c0_32, %c0_33], %65 {strides = array<i32>} : memref<1x1x16x32xbf16, #tpu.memory_space<vmem>>, vector<1x1x16x8xbf16>,
      %66 = vector.extract_strided_slice %38 {offsets = [0, 8], sizes = [16, 8], strides = [1, 1]} : vector<16x32xf32> to vector<16x8xf32>
      %67 = arith.mulf %66, %66 : vector<16x8xf32>
      %cst_34 = arith.constant dense<0.000000e+00> : vector<16xf32>
      %68 = vector.multi_reduction <add>, %67, %cst_34 [1] : vector<16x8xf32> to vector<16xf32>
      %69 = vector.shape_cast %68 : vector<16xf32> to vector<16x1xf32>
      %cst_35 = arith.constant 8.000000e+00 : f32
      %70 = vector.broadcast %cst_35 : f32 to vector<16x1xf32>
      %71 = arith.divf %69, %70 : vector<16x1xf32>
      %cst_36 = arith.constant 9.99999997E-7 : f32
      %72 = vector.broadcast %cst_36 : f32 to vector<16x1xf32>
      %73 = arith.addf %71, %72 : vector<16x1xf32>
      %74 = math.rsqrt %73 : vector<16x1xf32>
      %75 = vector.broadcast %74 : vector<16x1xf32> to vector<16x8xf32>
      %76 = arith.mulf %66, %75 : vector<16x8xf32>
      %77 = vector.broadcast %48 : vector<1x8xf32> to vector<16x8xf32>
      %78 = arith.mulf %76, %77 : vector<16x8xf32>
      %79 = arith.truncf %78 : vector<16x8xf32> to vector<16x8xbf16>
      %c0_37 = arith.constant 0 : index
      %c0_38 = arith.constant 0 : index
      %c0_39 = arith.constant 0 : index
      %c8 = arith.constant 8 : index
      %80 = vector.load %arg11[%c0_37, %c0_38, %c0_39, %c8] : memref<1x1x16x32xbf16, #tpu.memory_space<vmem>>, vector<1x1x16x8xbf16>
      %81 = vector.shape_cast %80 : vector<1x1x16x8xbf16> to vector<16x8xbf16>
      %82 = vector.shape_cast %79 : vector<16x8xbf16> to vector<1x1x16x8xbf16>
      tpu.vector_store %arg11[%c0_37, %c0_38, %c0_39, %c8], %82 {strides = array<i32>} : memref<1x1x16x32xbf16, #tpu.memory_space<vmem>>, vector<1x1x16x8xbf16>,
      %83 = vector.extract_strided_slice %38 {offsets = [0, 16], sizes = [16, 8], strides = [1, 1]} : vector<16x32xf32> to vector<16x8xf32>
      %84 = arith.mulf %83, %83 : vector<16x8xf32>
      %cst_40 = arith.constant dense<0.000000e+00> : vector<16xf32>
      %85 = vector.multi_reduction <add>, %84, %cst_40 [1] : vector<16x8xf32> to vector<16xf32>
      %86 = vector.shape_cast %85 : vector<16xf32> to vector<16x1xf32>
      %cst_41 = arith.constant 8.000000e+00 : f32
      %87 = vector.broadcast %cst_41 : f32 to vector<16x1xf32>
      %88 = arith.divf %86, %87 : vector<16x1xf32>
      %cst_42 = arith.constant 9.99999997E-7 : f32
      %89 = vector.broadcast %cst_42 : f32 to vector<16x1xf32>
      %90 = arith.addf %88, %89 : vector<16x1xf32>
      %91 = math.rsqrt %90 : vector<16x1xf32>
      %92 = vector.broadcast %91 : vector<16x1xf32> to vector<16x8xf32>
      %93 = arith.mulf %83, %92 : vector<16x8xf32>
      %94 = vector.broadcast %48 : vector<1x8xf32> to vector<16x8xf32>
      %95 = arith.mulf %93, %94 : vector<16x8xf32>
      %96 = arith.truncf %95 : vector<16x8xf32> to vector<16x8xbf16>
      %c0_43 = arith.constant 0 : index
      %c0_44 = arith.constant 0 : index
      %c0_45 = arith.constant 0 : index
      %c16 = arith.constant 16 : index
      %97 = vector.load %arg11[%c0_43, %c0_44, %c0_45, %c16] : memref<1x1x16x32xbf16, #tpu.memory_space<vmem>>, vector<1x1x16x8xbf16>
      %98 = vector.shape_cast %97 : vector<1x1x16x8xbf16> to vector<16x8xbf16>
      %99 = vector.shape_cast %96 : vector<16x8xbf16> to vector<1x1x16x8xbf16>
      tpu.vector_store %arg11[%c0_43, %c0_44, %c0_45, %c16], %99 {strides = array<i32>} : memref<1x1x16x32xbf16, #tpu.memory_space<vmem>>, vector<1x1x16x8xbf16>,
      %100 = vector.extract_strided_slice %38 {offsets = [0, 24], sizes = [16, 8], strides = [1, 1]} : vector<16x32xf32> to vector<16x8xf32>
      %101 = arith.mulf %100, %100 : vector<16x8xf32>
      %cst_46 = arith.constant dense<0.000000e+00> : vector<16xf32>
      %102 = vector.multi_reduction <add>, %101, %cst_46 [1] : vector<16x8xf32> to vector<16xf32>
      %103 = vector.shape_cast %102 : vector<16xf32> to vector<16x1xf32>
      %cst_47 = arith.constant 8.000000e+00 : f32
      %104 = vector.broadcast %cst_47 : f32 to vector<16x1xf32>
      %105 = arith.divf %103, %104 : vector<16x1xf32>
      %cst_48 = arith.constant 9.99999997E-7 : f32
      %106 = vector.broadcast %cst_48 : f32 to vector<16x1xf32>
      %107 = arith.addf %105, %106 : vector<16x1xf32>
      %108 = math.rsqrt %107 : vector<16x1xf32>
      %109 = vector.broadcast %108 : vector<16x1xf32> to vector<16x8xf32>
      %110 = arith.mulf %100, %109 : vector<16x8xf32>
      %111 = vector.broadcast %48 : vector<1x8xf32> to vector<16x8xf32>
      %112 = arith.mulf %110, %111 : vector<16x8xf32>
      %113 = arith.truncf %112 : vector<16x8xf32> to vector<16x8xbf16>
      %c0_49 = arith.constant 0 : index
      %c0_50 = arith.constant 0 : index
      %c0_51 = arith.constant 0 : index
      %c24 = arith.constant 24 : index
      %114 = vector.load %arg11[%c0_49, %c0_50, %c0_51, %c24] : memref<1x1x16x32xbf16, #tpu.memory_space<vmem>>, vector<1x1x16x8xbf16>
      %115 = vector.shape_cast %114 : vector<1x1x16x8xbf16> to vector<16x8xbf16>
      %116 = vector.shape_cast %113 : vector<16x8xbf16> to vector<1x1x16x8xbf16>
      tpu.vector_store %arg11[%c0_49, %c0_50, %c0_51, %c24], %116 {strides = array<i32>} : memref<1x1x16x32xbf16, #tpu.memory_space<vmem>>, vector<1x1x16x8xbf16>,
    } else {
    }
    return
  }
  func.func @transform_0(%arg0: i32, %arg1: i32, %arg2: i32, %arg3: i32) -> (i32, i32, i32) {
    %c0_i32 = arith.constant 0 : i32
    %c0_i32_0 = arith.constant 0 : i32
    return %arg0, %arg3, %c0_i32 : i32, i32, i32
  }
  func.func @transform_1(%arg0: i32, %arg1: i32, %arg2: i32, %arg3: i32) -> (i32, i32, i32) {
    %c0_i32 = arith.constant 0 : i32
    %c0_i32_0 = arith.constant 0 : i32
    %c0_i32_1 = arith.constant 0 : i32
    return %arg0, %c0_i32, %c0_i32_0 : i32, i32, i32
  }
  func.func @transform_2(%arg0: i32, %arg1: i32, %arg2: i32, %arg3: i32) -> (i32, i32, i32) {
    %c0_i32 = arith.constant 0 : i32
    %c0_i32_0 = arith.constant 0 : i32
    %c0_i32_1 = arith.constant 0 : i32
    return %arg0, %c0_i32, %c0_i32_0 : i32, i32, i32
  }
  func.func @transform_3(%arg0: i32, %arg1: i32, %arg2: i32, %arg3: i32) -> (i32, i32, i32) {
    %c0_i32 = arith.constant 0 : i32
    %c0_i32_0 = arith.constant 0 : i32
    return %arg1, %c0_i32, %arg2 : i32, i32, i32
  }
  func.func @transform_4(%arg0: i32, %arg1: i32, %arg2: i32, %arg3: i32) -> (i32, i32, i32) {
    %c0_i32 = arith.constant 0 : i32
    %c0_i32_0 = arith.constant 0 : i32
    return %arg1, %c0_i32, %arg2 : i32, i32, i32
  }
  func.func @transform_5(%arg0: i32, %arg1: i32, %arg2: i32, %arg3: i32) -> (i32, i32) {
    %c0_i32 = arith.constant 0 : i32
    %c0_i32_0 = arith.constant 0 : i32
    %c0_i32_1 = arith.constant 0 : i32
    return %c0_i32, %c0_i32_0 : i32, i32
  }
  func.func @transform_6(%arg0: i32, %arg1: i32, %arg2: i32, %arg3: i32) -> (i32, i32) {
    %c0_i32 = arith.constant 0 : i32
    %c0_i32_0 = arith.constant 0 : i32
    %c0_i32_1 = arith.constant 0 : i32
    return %c0_i32, %c0_i32_0 : i32, i32
  }
  func.func @transform_7(%arg0: i32, %arg1: i32, %arg2: i32, %arg3: i32) -> (i32, i32, i32, i32) {
    %c0_i32 = arith.constant 0 : i32
    return %arg1, %arg0, %arg3, %arg2 : i32, i32, i32, i32
  }
}

module attributes {stable_mosaic.version = 11 : i64} {
  func.func @_gated_linear_res_kernel(%arg0: i32, %arg1: i32, %arg2: i32, %arg3: memref<1x8x32xbf16, #tpu.memory_space<vmem>>, %arg4: memref<32x32xbf16, #tpu.memory_space<vmem>>, %arg5: memref<1x32xf32, #tpu.memory_space<vmem>>, %arg6: memref<1x1x32xf32, #tpu.memory_space<vmem>>, %arg7: memref<1x8x32xf32, #tpu.memory_space<vmem>>, %arg8: memref<1x8x32xf32, #tpu.memory_space<vmem>>) attributes {dimension_semantics = [#tpu.dimension_semantics<parallel>, #tpu.dimension_semantics<parallel>, #tpu.dimension_semantics<parallel>], iteration_bounds = array<i64: 2, 1, 1>, scalar_prefetch = 0 : i64, scratch_operands = 0 : i64, tpu.core_type = #tpu.core_type<tc>, window_params = [{transform_indices = @transform_0, window_bounds = array<i64: 1, 8, 32>}, {transform_indices = @transform_1, window_bounds = array<i64: 32, 32>}, {transform_indices = @transform_2, window_bounds = array<i64: 1, 32>}, {transform_indices = @transform_3, window_bounds = array<i64: 1, 1, 32>}, {transform_indices = @transform_4, window_bounds = array<i64: 1, 8, 32>}, {transform_indices = @transform_5, window_bounds = array<i64: 1, 8, 32>}]} {
    %c0 = arith.constant 0 : index
    %c0_0 = arith.constant 0 : index
    %c0_1 = arith.constant 0 : index
    %0 = vector.load %arg3[%c0, %c0_0, %c0_1] : memref<1x8x32xbf16, #tpu.memory_space<vmem>>, vector<1x8x32xbf16>
    %1 = vector.shape_cast %0 : vector<1x8x32xbf16> to vector<8x32xbf16>
    %2 = arith.extf %1 : vector<8x32xbf16> to vector<8x32xf32>
    %3 = arith.truncf %2 : vector<8x32xf32> to vector<8x32xbf16>
    %c0_2 = arith.constant 0 : index
    %c0_3 = arith.constant 0 : index
    %4 = vector.load %arg4[%c0_2, %c0_3] : memref<32x32xbf16, #tpu.memory_space<vmem>>, vector<32x32xbf16>
    %cst = arith.constant dense<0.000000e+00> : vector<8x32xf32>
    %5 = tpu.matmul %3, %4, %cst {dimension_numbers = #tpu.dot_dimension_numbers<[1], [0], [0], [1], [0, 0, 1, 1], [], []>} : vector<8x32xbf16>, vector<32x32xbf16>, vector<8x32xf32> -> vector<8x32xf32>
    %c0_4 = arith.constant 0 : index
    %c0_5 = arith.constant 0 : index
    %6 = vector.load %arg5[%c0_4, %c0_5] : memref<1x32xf32, #tpu.memory_space<vmem>>, vector<1x32xf32>
    %7 = vector.broadcast %6 : vector<1x32xf32> to vector<8x32xf32>
    %8 = arith.addf %5, %7 : vector<8x32xf32>
    %c0_6 = arith.constant 0 : index
    %c0_7 = arith.constant 0 : index
    %c0_8 = arith.constant 0 : index
    %9 = vector.load %arg7[%c0_6, %c0_7, %c0_8] : memref<1x8x32xf32, #tpu.memory_space<vmem>>, vector<1x8x32xf32>
    %10 = vector.shape_cast %9 : vector<1x8x32xf32> to vector<8x32xf32>
    %c0_9 = arith.constant 0 : index
    %c0_10 = arith.constant 0 : index
    %c0_11 = arith.constant 0 : index
    %11 = vector.load %arg6[%c0_9, %c0_10, %c0_11] : memref<1x1x32xf32, #tpu.memory_space<vmem>>, vector<1x1x32xf32>
    %12 = vector.shape_cast %11 : vector<1x1x32xf32> to vector<1x32xf32>
    %13 = vector.broadcast %12 : vector<1x32xf32> to vector<8x32xf32>
    %14 = arith.mulf %13, %8 : vector<8x32xf32>
    %15 = arith.addf %10, %14 : vector<8x32xf32>
    %c0_12 = arith.constant 0 : index
    %c0_13 = arith.constant 0 : index
    %c0_14 = arith.constant 0 : index
    %16 = vector.load %arg8[%c0_12, %c0_13, %c0_14] : memref<1x8x32xf32, #tpu.memory_space<vmem>>, vector<1x8x32xf32>
    %17 = vector.shape_cast %16 : vector<1x8x32xf32> to vector<8x32xf32>
    %18 = vector.shape_cast %15 : vector<8x32xf32> to vector<1x8x32xf32>
    tpu.vector_store %arg8[%c0_12, %c0_13, %c0_14], %18 {strides = array<i32>} : memref<1x8x32xf32, #tpu.memory_space<vmem>>, vector<1x8x32xf32>,
    return
  }
  func.func @transform_0(%arg0: i32, %arg1: i32, %arg2: i32) -> (i32, i32, i32) {
    %c0_i32 = arith.constant 0 : i32
    %c0_i32_0 = arith.constant 0 : i32
    return %arg0, %arg2, %c0_i32 : i32, i32, i32
  }
  func.func @transform_1(%arg0: i32, %arg1: i32, %arg2: i32) -> (i32, i32) {
    %c0_i32 = arith.constant 0 : i32
    %c0_i32_0 = arith.constant 0 : i32
    return %c0_i32, %arg1 : i32, i32
  }
  func.func @transform_2(%arg0: i32, %arg1: i32, %arg2: i32) -> (i32, i32) {
    %c0_i32 = arith.constant 0 : i32
    %c0_i32_0 = arith.constant 0 : i32
    return %c0_i32, %arg1 : i32, i32
  }
  func.func @transform_3(%arg0: i32, %arg1: i32, %arg2: i32) -> (i32, i32, i32) {
    %c0_i32 = arith.constant 0 : i32
    %c0_i32_0 = arith.constant 0 : i32
    return %arg0, %c0_i32, %arg1 : i32, i32, i32
  }
  func.func @transform_4(%arg0: i32, %arg1: i32, %arg2: i32) -> (i32, i32, i32) {
    %c0_i32 = arith.constant 0 : i32
    return %arg0, %arg2, %arg1 : i32, i32, i32
  }
  func.func @transform_5(%arg0: i32, %arg1: i32, %arg2: i32) -> (i32, i32, i32) {
    %c0_i32 = arith.constant 0 : i32
    return %arg0, %arg2, %arg1 : i32, i32, i32
  }
}

module attributes {stable_mosaic.version = 11 : i64} {
  func.func @_flash_kernel(%arg0: i32, %arg1: i32, %arg2: i32, %arg3: i32, %arg4: memref<1x1x8x32xbf16, #tpu.memory_space<vmem>>, %arg5: memref<1x1x16x32xbf16, #tpu.memory_space<vmem>>, %arg6: memref<1x1x16x32xbf16, #tpu.memory_space<vmem>>, %arg7: memref<1x1x8x32xbf16, #tpu.memory_space<vmem>>, %arg8: memref<1x1x8x32xbf16, #tpu.memory_space<vmem>>, %arg9: memref<1x1x8xi32, #tpu.memory_space<vmem>>, %arg10: memref<1x8x32xbf16, #tpu.memory_space<vmem>>, %arg11: memref<8x4xf32, #tpu.memory_space<vmem>>, %arg12: memref<8x4xf32, #tpu.memory_space<vmem>>, %arg13: memref<8x32xf32, #tpu.memory_space<vmem>>) attributes {dimension_semantics = [#tpu.dimension_semantics<parallel>, #tpu.dimension_semantics<parallel>, #tpu.dimension_semantics<parallel>, #tpu.dimension_semantics<arbitrary>], iteration_bounds = array<i64: 2, 1, 1, 1>, scalar_prefetch = 0 : i64, scratch_operands = 3 : i64, tpu.core_type = #tpu.core_type<tc>, window_params = [{transform_indices = @transform_0, window_bounds = array<i64: 1, 1, 8, 32>}, {transform_indices = @transform_1, window_bounds = array<i64: 1, 1, 16, 32>}, {transform_indices = @transform_2, window_bounds = array<i64: 1, 1, 16, 32>}, {transform_indices = @transform_3, window_bounds = array<i64: 1, 1, 8, 32>}, {transform_indices = @transform_4, window_bounds = array<i64: 1, 1, 8, 32>}, {transform_indices = @transform_5, window_bounds = array<i64: 1, 1, 8>}, {transform_indices = @transform_6, window_bounds = array<i64: 1, 8, 32>}]} {
    %c0_i32 = arith.constant 0 : i32
    %0 = arith.cmpi eq, %arg3, %c0_i32 : i32
    %1 = arith.extui %0 : i1 to i32
    %c0_i32_0 = arith.constant 0 : i32
    %2 = arith.cmpi ne, %1, %c0_i32_0 : i32
    scf.if %2 {
      %cst_72 = arith.constant 0xFF800000 : f32
      %124 = vector.broadcast %cst_72 : f32 to vector<8x4xf32>
      %c0_73 = arith.constant 0 : index
      %c0_74 = arith.constant 0 : index
      %125 = vector.load %arg11[%c0_73, %c0_74] : memref<8x4xf32, #tpu.memory_space<vmem>>, vector<8x4xf32>
      tpu.vector_store %arg11[%c0_73, %c0_74], %124 {strides = array<i32>} : memref<8x4xf32, #tpu.memory_space<vmem>>, vector<8x4xf32>,
      %cst_75 = arith.constant 0.000000e+00 : f32
      %126 = vector.broadcast %cst_75 : f32 to vector<8x4xf32>
      %c0_76 = arith.constant 0 : index
      %c0_77 = arith.constant 0 : index
      %127 = vector.load %arg12[%c0_76, %c0_77] : memref<8x4xf32, #tpu.memory_space<vmem>>, vector<8x4xf32>
      tpu.vector_store %arg12[%c0_76, %c0_77], %126 {strides = array<i32>} : memref<8x4xf32, #tpu.memory_space<vmem>>, vector<8x4xf32>,
      %cst_78 = arith.constant 0.000000e+00 : f32
      %128 = vector.broadcast %cst_78 : f32 to vector<8x32xf32>
      %c0_79 = arith.constant 0 : index
      %c0_80 = arith.constant 0 : index
      %129 = vector.load %arg13[%c0_79, %c0_80] : memref<8x32xf32, #tpu.memory_space<vmem>>, vector<8x32xf32>
      tpu.vector_store %arg13[%c0_79, %c0_80], %128 {strides = array<i32>} : memref<8x32xf32, #tpu.memory_space<vmem>>, vector<8x32xf32>,
    } else {
    }
    %c0 = arith.constant 0 : index
    %c0_1 = arith.constant 0 : index
    %c0_2 = arith.constant 0 : index
    %c0_3 = arith.constant 0 : index
    %3 = vector.load %arg4[%c0, %c0_1, %c0_2, %c0_3] : memref<1x1x8x32xbf16, #tpu.memory_space<vmem>>, vector<1x1x8x32xbf16>
    %4 = vector.shape_cast %3 : vector<1x1x8x32xbf16> to vector<8x32xbf16>
    %5 = arith.extf %4 : vector<8x32xbf16> to vector<8x32xf32>
    %cst = arith.constant 0.353553385 : f32
    %6 = vector.broadcast %cst : f32 to vector<8x32xf32>
    %7 = arith.mulf %5, %6 : vector<8x32xf32>
    %8 = arith.truncf %7 : vector<8x32xf32> to vector<8x32xbf16>
    %c0_4 = arith.constant 0 : index
    %c0_5 = arith.constant 0 : index
    %c0_6 = arith.constant 0 : index
    %c0_7 = arith.constant 0 : index
    %9 = vector.load %arg5[%c0_4, %c0_5, %c0_6, %c0_7] : memref<1x1x16x32xbf16, #tpu.memory_space<vmem>>, vector<1x1x16x32xbf16>
    %10 = vector.shape_cast %9 : vector<1x1x16x32xbf16> to vector<16x32xbf16>
    %c0_8 = arith.constant 0 : index
    %c0_9 = arith.constant 0 : index
    %c0_10 = arith.constant 0 : index
    %c0_11 = arith.constant 0 : index
    %11 = vector.load %arg6[%c0_8, %c0_9, %c0_10, %c0_11] : memref<1x1x16x32xbf16, #tpu.memory_space<vmem>>, vector<1x1x16x32xbf16>
    %12 = vector.shape_cast %11 : vector<1x1x16x32xbf16> to vector<16x32xbf16>
    %13 = vector.extract_strided_slice %8 {offsets = [0, 0], sizes = [8, 8], strides = [1, 1]} : vector<8x32xbf16> to vector<8x8xbf16>
    %14 = vector.extract_strided_slice %10 {offsets = [0, 0], sizes = [16, 8], strides = [1, 1]} : vector<16x32xbf16> to vector<16x8xbf16>
    %cst_12 = arith.constant dense<0.000000e+00> : vector<8x16xf32>
    %15 = tpu.matmul %13, %14, %cst_12 {dimension_numbers = #tpu.dot_dimension_numbers<[1], [1], [0], [0], [0, 0, 1, 0], [], []>} : vector<8x8xbf16>, vector<16x8xbf16>, vector<8x16xf32> -> vector<8x16xf32>
    %c0_13 = arith.constant 0 : index
    %c0_14 = arith.constant 0 : index
    %16 = vector.load %arg11[%c0_13, %c0_14] : memref<8x4xf32, #tpu.memory_space<vmem>>, vector<8x1xf32>
    %cst_15 = arith.constant dense<0xFF800000> : vector<8xf32>
    %17 = vector.multi_reduction <maximumf>, %15, %cst_15 [1] : vector<8x16xf32> to vector<8xf32>
    %18 = vector.shape_cast %17 : vector<8xf32> to vector<8x1xf32>
    %19 = arith.maximumf %16, %18 : vector<8x1xf32>
    %20 = arith.subf %16, %19 : vector<8x1xf32>
    %21 = math.exp %20 : vector<8x1xf32>
    %22 = vector.broadcast %19 : vector<8x1xf32> to vector<8x16xf32>
    %23 = arith.subf %15, %22 : vector<8x16xf32>
    %24 = math.exp %23 : vector<8x16xf32>
    %c0_16 = arith.constant 0 : index
    %c0_17 = arith.constant 0 : index
    %25 = vector.load %arg12[%c0_16, %c0_17] : memref<8x4xf32, #tpu.memory_space<vmem>>, vector<8x1xf32>
    %26 = arith.mulf %21, %25 : vector<8x1xf32>
    %cst_18 = arith.constant dense<0.000000e+00> : vector<8xf32>
    %27 = vector.multi_reduction <add>, %24, %cst_18 [1] : vector<8x16xf32> to vector<8xf32>
    %28 = vector.shape_cast %27 : vector<8xf32> to vector<8x1xf32>
    %29 = arith.addf %26, %28 : vector<8x1xf32>
    %c0_19 = arith.constant 0 : index
    %c0_20 = arith.constant 0 : index
    %30 = vector.load %arg12[%c0_19, %c0_20] : memref<8x4xf32, #tpu.memory_space<vmem>>, vector<8x1xf32>
    tpu.vector_store %arg12[%c0_19, %c0_20], %29 {strides = array<i32>} : memref<8x4xf32, #tpu.memory_space<vmem>>, vector<8x1xf32>,
    %31 = arith.truncf %24 : vector<8x16xf32> to vector<8x16xbf16>
    %32 = vector.extract_strided_slice %12 {offsets = [0, 0], sizes = [16, 8], strides = [1, 1]} : vector<16x32xbf16> to vector<16x8xbf16>
    %cst_21 = arith.constant dense<0.000000e+00> : vector<8x8xf32>
    %33 = tpu.matmul %31, %32, %cst_21 {dimension_numbers = #tpu.dot_dimension_numbers<[1], [0], [0], [1], [0, 0, 1, 1], [], []>} : vector<8x16xbf16>, vector<16x8xbf16>, vector<8x8xf32> -> vector<8x8xf32>
    %c0_22 = arith.constant 0 : index
    %c0_23 = arith.constant 0 : index
    %34 = vector.load %arg13[%c0_22, %c0_23] : memref<8x32xf32, #tpu.memory_space<vmem>>, vector<8x8xf32>
    %35 = vector.broadcast %21 : vector<8x1xf32> to vector<8x8xf32>
    %36 = arith.mulf %35, %34 : vector<8x8xf32>
    %37 = arith.addf %36, %33 : vector<8x8xf32>
    %c0_24 = arith.constant 0 : index
    %c0_25 = arith.constant 0 : index
    %38 = vector.load %arg13[%c0_24, %c0_25] : memref<8x32xf32, #tpu.memory_space<vmem>>, vector<8x8xf32>
    tpu.vector_store %arg13[%c0_24, %c0_25], %37 {strides = array<i32>} : memref<8x32xf32, #tpu.memory_space<vmem>>, vector<8x8xf32>,
    %c0_26 = arith.constant 0 : index
    %c0_27 = arith.constant 0 : index
    %39 = vector.load %arg11[%c0_26, %c0_27] : memref<8x4xf32, #tpu.memory_space<vmem>>, vector<8x1xf32>
    tpu.vector_store %arg11[%c0_26, %c0_27], %19 {strides = array<i32>} : memref<8x4xf32, #tpu.memory_space<vmem>>, vector<8x1xf32>,
    %40 = vector.extract_strided_slice %8 {offsets = [0, 8], sizes = [8, 8], strides = [1, 1]} : vector<8x32xbf16> to vector<8x8xbf16>
    %41 = vector.extract_strided_slice %10 {offsets = [0, 8], sizes = [16, 8], strides = [1, 1]} : vector<16x32xbf16> to vector<16x8xbf16>
    %cst_28 = arith.constant dense<0.000000e+00> : vector<8x16xf32>
    %42 = tpu.matmul %40, %41, %cst_28 {dimension_numbers = #tpu.dot_dimension_numbers<[1], [1], [0], [0], [0, 0, 1, 0], [], []>} : vector<8x8xbf16>, vector<16x8xbf16>, vector<8x16xf32> -> vector<8x16xf32>
    %c0_29 = arith.constant 0 : index
    %c1 = arith.constant 1 : index
    %43 = vector.load %arg11[%c0_29, %c1] : memref<8x4xf32, #tpu.memory_space<vmem>>, vector<8x1xf32>
    %cst_30 = arith.constant dense<0xFF800000> : vector<8xf32>
    %44 = vector.multi_reduction <maximumf>, %42, %cst_30 [1] : vector<8x16xf32> to vector<8xf32>
    %45 = vector.shape_cast %44 : vector<8xf32> to vector<8x1xf32>
    %46 = arith.maximumf %43, %45 : vector<8x1xf32>
    %47 = arith.subf %43, %46 : vector<8x1xf32>
    %48 = math.exp %47 : vector<8x1xf32>
    %49 = vector.broadcast %46 : vector<8x1xf32> to vector<8x16xf32>
    %50 = arith.subf %42, %49 : vector<8x16xf32>
    %51 = math.exp %50 : vector<8x16xf32>
    %c0_31 = arith.constant 0 : index
    %c1_32 = arith.constant 1 : index
    %52 = vector.load %arg12[%c0_31, %c1_32] : memref<8x4xf32, #tpu.memory_space<vmem>>, vector<8x1xf32>
    %53 = arith.mulf %48, %52 : vector<8x1xf32>
    %cst_33 = arith.constant dense<0.000000e+00> : vector<8xf32>
    %54 = vector.multi_reduction <add>, %51, %cst_33 [1] : vector<8x16xf32> to vector<8xf32>
    %55 = vector.shape_cast %54 : vector<8xf32> to vector<8x1xf32>
    %56 = arith.addf %53, %55 : vector<8x1xf32>
    %c0_34 = arith.constant 0 : index
    %c1_35 = arith.constant 1 : index
    %57 = vector.load %arg12[%c0_34, %c1_35] : memref<8x4xf32, #tpu.memory_space<vmem>>, vector<8x1xf32>
    tpu.vector_store %arg12[%c0_34, %c1_35], %56 {strides = array<i32>} : memref<8x4xf32, #tpu.memory_space<vmem>>, vector<8x1xf32>,
    %58 = arith.truncf %51 : vector<8x16xf32> to vector<8x16xbf16>
    %59 = vector.extract_strided_slice %12 {offsets = [0, 8], sizes = [16, 8], strides = [1, 1]} : vector<16x32xbf16> to vector<16x8xbf16>
    %cst_36 = arith.constant dense<0.000000e+00> : vector<8x8xf32>
    %60 = tpu.matmul %58, %59, %cst_36 {dimension_numbers = #tpu.dot_dimension_numbers<[1], [0], [0], [1], [0, 0, 1, 1], [], []>} : vector<8x16xbf16>, vector<16x8xbf16>, vector<8x8xf32> -> vector<8x8xf32>
    %c0_37 = arith.constant 0 : index
    %c8 = arith.constant 8 : index
    %61 = vector.load %arg13[%c0_37, %c8] : memref<8x32xf32, #tpu.memory_space<vmem>>, vector<8x8xf32>
    %62 = vector.broadcast %48 : vector<8x1xf32> to vector<8x8xf32>
    %63 = arith.mulf %62, %61 : vector<8x8xf32>
    %64 = arith.addf %63, %60 : vector<8x8xf32>
    %c0_38 = arith.constant 0 : index
    %c8_39 = arith.constant 8 : index
    %65 = vector.load %arg13[%c0_38, %c8_39] : memref<8x32xf32, #tpu.memory_space<vmem>>, vector<8x8xf32>
    tpu.vector_store %arg13[%c0_38, %c8_39], %64 {strides = array<i32>} : memref<8x32xf32, #tpu.memory_space<vmem>>, vector<8x8xf32>,
    %c0_40 = arith.constant 0 : index
    %c1_41 = arith.constant 1 : index
    %66 = vector.load %arg11[%c0_40, %c1_41] : memref<8x4xf32, #tpu.memory_space<vmem>>, vector<8x1xf32>
    tpu.vector_store %arg11[%c0_40, %c1_41], %46 {strides = array<i32>} : memref<8x4xf32, #tpu.memory_space<vmem>>, vector<8x1xf32>,
    %67 = vector.extract_strided_slice %8 {offsets = [0, 16], sizes = [8, 8], strides = [1, 1]} : vector<8x32xbf16> to vector<8x8xbf16>
    %68 = vector.extract_strided_slice %10 {offsets = [0, 16], sizes = [16, 8], strides = [1, 1]} : vector<16x32xbf16> to vector<16x8xbf16>
    %cst_42 = arith.constant dense<0.000000e+00> : vector<8x16xf32>
    %69 = tpu.matmul %67, %68, %cst_42 {dimension_numbers = #tpu.dot_dimension_numbers<[1], [1], [0], [0], [0, 0, 1, 0], [], []>} : vector<8x8xbf16>, vector<16x8xbf16>, vector<8x16xf32> -> vector<8x16xf32>
    %c0_43 = arith.constant 0 : index
    %c2 = arith.constant 2 : index
    %70 = vector.load %arg11[%c0_43, %c2] : memref<8x4xf32, #tpu.memory_space<vmem>>, vector<8x1xf32>
    %cst_44 = arith.constant dense<0xFF800000> : vector<8xf32>
    %71 = vector.multi_reduction <maximumf>, %69, %cst_44 [1] : vector<8x16xf32> to vector<8xf32>
    %72 = vector.shape_cast %71 : vector<8xf32> to vector<8x1xf32>
    %73 = arith.maximumf %70, %72 : vector<8x1xf32>
    %74 = arith.subf %70, %73 : vector<8x1xf32>
    %75 = math.exp %74 : vector<8x1xf32>
    %76 = vector.broadcast %73 : vector<8x1xf32> to vector<8x16xf32>
    %77 = arith.subf %69, %76 : vector<8x16xf32>
    %78 = math.exp %77 : vector<8x16xf32>
    %c0_45 = arith.constant 0 : index
    %c2_46 = arith.constant 2 : index
    %79 = vector.load %arg12[%c0_45, %c2_46] : memref<8x4xf32, #tpu.memory_space<vmem>>, vector<8x1xf32>
    %80 = arith.mulf %75, %79 : vector<8x1xf32>
    %cst_47 = arith.constant dense<0.000000e+00> : vector<8xf32>
    %81 = vector.multi_reduction <add>, %78, %cst_47 [1] : vector<8x16xf32> to vector<8xf32>
    %82 = vector.shape_cast %81 : vector<8xf32> to vector<8x1xf32>
    %83 = arith.addf %80, %82 : vector<8x1xf32>
    %c0_48 = arith.constant 0 : index
    %c2_49 = arith.constant 2 : index
    %84 = vector.load %arg12[%c0_48, %c2_49] : memref<8x4xf32, #tpu.memory_space<vmem>>, vector<8x1xf32>
    tpu.vector_store %arg12[%c0_48, %c2_49], %83 {strides = array<i32>} : memref<8x4xf32, #tpu.memory_space<vmem>>, vector<8x1xf32>,
    %85 = arith.truncf %78 : vector<8x16xf32> to vector<8x16xbf16>
    %86 = vector.extract_strided_slice %12 {offsets = [0, 16], sizes = [16, 8], strides = [1, 1]} : vector<16x32xbf16> to vector<16x8xbf16>
    %cst_50 = arith.constant dense<0.000000e+00> : vector<8x8xf32>
    %87 = tpu.matmul %85, %86, %cst_50 {dimension_numbers = #tpu.dot_dimension_numbers<[1], [0], [0], [1], [0, 0, 1, 1], [], []>} : vector<8x16xbf16>, vector<16x8xbf16>, vector<8x8xf32> -> vector<8x8xf32>
    %c0_51 = arith.constant 0 : index
    %c16 = arith.constant 16 : index
    %88 = vector.load %arg13[%c0_51, %c16] : memref<8x32xf32, #tpu.memory_space<vmem>>, vector<8x8xf32>
    %89 = vector.broadcast %75 : vector<8x1xf32> to vector<8x8xf32>
    %90 = arith.mulf %89, %88 : vector<8x8xf32>
    %91 = arith.addf %90, %87 : vector<8x8xf32>
    %c0_52 = arith.constant 0 : index
    %c16_53 = arith.constant 16 : index
    %92 = vector.load %arg13[%c0_52, %c16_53] : memref<8x32xf32, #tpu.memory_space<vmem>>, vector<8x8xf32>
    tpu.vector_store %arg13[%c0_52, %c16_53], %91 {strides = array<i32>} : memref<8x32xf32, #tpu.memory_space<vmem>>, vector<8x8xf32>,
    %c0_54 = arith.constant 0 : index
    %c2_55 = arith.constant 2 : index
    %93 = vector.load %arg11[%c0_54, %c2_55] : memref<8x4xf32, #tpu.memory_space<vmem>>, vector<8x1xf32>
    tpu.vector_store %arg11[%c0_54, %c2_55], %73 {strides = array<i32>} : memref<8x4xf32, #tpu.memory_space<vmem>>, vector<8x1xf32>,
    %94 = vector.extract_strided_slice %8 {offsets = [0, 24], sizes = [8, 8], strides = [1, 1]} : vector<8x32xbf16> to vector<8x8xbf16>
    %95 = vector.extract_strided_slice %10 {offsets = [0, 24], sizes = [16, 8], strides = [1, 1]} : vector<16x32xbf16> to vector<16x8xbf16>
    %cst_56 = arith.constant dense<0.000000e+00> : vector<8x16xf32>
    %96 = tpu.matmul %94, %95, %cst_56 {dimension_numbers = #tpu.dot_dimension_numbers<[1], [1], [0], [0], [0, 0, 1, 0], [], []>} : vector<8x8xbf16>, vector<16x8xbf16>, vector<8x16xf32> -> vector<8x16xf32>
    %c0_57 = arith.constant 0 : index
    %c3 = arith.constant 3 : index
    %97 = vector.load %arg11[%c0_57, %c3] : memref<8x4xf32, #tpu.memory_space<vmem>>, vector<8x1xf32>
    %cst_58 = arith.constant dense<0xFF800000> : vector<8xf32>
    %98 = vector.multi_reduction <maximumf>, %96, %cst_58 [1] : vector<8x16xf32> to vector<8xf32>
    %99 = vector.shape_cast %98 : vector<8xf32> to vector<8x1xf32>
    %100 = arith.maximumf %97, %99 : vector<8x1xf32>
    %101 = arith.subf %97, %100 : vector<8x1xf32>
    %102 = math.exp %101 : vector<8x1xf32>
    %103 = vector.broadcast %100 : vector<8x1xf32> to vector<8x16xf32>
    %104 = arith.subf %96, %103 : vector<8x16xf32>
    %105 = math.exp %104 : vector<8x16xf32>
    %c0_59 = arith.constant 0 : index
    %c3_60 = arith.constant 3 : index
    %106 = vector.load %arg12[%c0_59, %c3_60] : memref<8x4xf32, #tpu.memory_space<vmem>>, vector<8x1xf32>
    %107 = arith.mulf %102, %106 : vector<8x1xf32>
    %cst_61 = arith.constant dense<0.000000e+00> : vector<8xf32>
    %108 = vector.multi_reduction <add>, %105, %cst_61 [1] : vector<8x16xf32> to vector<8xf32>
    %109 = vector.shape_cast %108 : vector<8xf32> to vector<8x1xf32>
    %110 = arith.addf %107, %109 : vector<8x1xf32>
    %c0_62 = arith.constant 0 : index
    %c3_63 = arith.constant 3 : index
    %111 = vector.load %arg12[%c0_62, %c3_63] : memref<8x4xf32, #tpu.memory_space<vmem>>, vector<8x1xf32>
    tpu.vector_store %arg12[%c0_62, %c3_63], %110 {strides = array<i32>} : memref<8x4xf32, #tpu.memory_space<vmem>>, vector<8x1xf32>,
    %112 = arith.truncf %105 : vector<8x16xf32> to vector<8x16xbf16>
    %113 = vector.extract_strided_slice %12 {offsets = [0, 24], sizes = [16, 8], strides = [1, 1]} : vector<16x32xbf16> to vector<16x8xbf16>
    %cst_64 = arith.constant dense<0.000000e+00> : vector<8x8xf32>
    %114 = tpu.matmul %112, %113, %cst_64 {dimension_numbers = #tpu.dot_dimension_numbers<[1], [0], [0], [1], [0, 0, 1, 1], [], []>} : vector<8x16xbf16>, vector<16x8xbf16>, vector<8x8xf32> -> vector<8x8xf32>
    %c0_65 = arith.constant 0 : index
    %c24 = arith.constant 24 : index
    %115 = vector.load %arg13[%c0_65, %c24] : memref<8x32xf32, #tpu.memory_space<vmem>>, vector<8x8xf32>
    %116 = vector.broadcast %102 : vector<8x1xf32> to vector<8x8xf32>
    %117 = arith.mulf %116, %115 : vector<8x8xf32>
    %118 = arith.addf %117, %114 : vector<8x8xf32>
    %c0_66 = arith.constant 0 : index
    %c24_67 = arith.constant 24 : index
    %119 = vector.load %arg13[%c0_66, %c24_67] : memref<8x32xf32, #tpu.memory_space<vmem>>, vector<8x8xf32>
    tpu.vector_store %arg13[%c0_66, %c24_67], %118 {strides = array<i32>} : memref<8x32xf32, #tpu.memory_space<vmem>>, vector<8x8xf32>,
    %c0_68 = arith.constant 0 : index
    %c3_69 = arith.constant 3 : index
    %120 = vector.load %arg11[%c0_68, %c3_69] : memref<8x4xf32, #tpu.memory_space<vmem>>, vector<8x1xf32>
    tpu.vector_store %arg11[%c0_68, %c3_69], %100 {strides = array<i32>} : memref<8x4xf32, #tpu.memory_space<vmem>>, vector<8x1xf32>,
    %c0_i32_70 = arith.constant 0 : i32
    %121 = arith.cmpi eq, %arg3, %c0_i32_70 : i32
    %122 = arith.extui %121 : i1 to i32
    %c0_i32_71 = arith.constant 0 : i32
    %123 = arith.cmpi ne, %122, %c0_i32_71 : i32
    scf.if %123 {
      %c0_72 = arith.constant 0 : index
      %c0_73 = arith.constant 0 : index
      %c0_74 = arith.constant 0 : index
      %124 = vector.load %arg9[%c0_72, %c0_73, %c0_74] : memref<1x1x8xi32, #tpu.memory_space<vmem>>, vector<1x1x8xi32>
      %125 = vector.shape_cast %124 : vector<1x1x8xi32> to vector<1x8xi32>
      %c0_i32_75 = arith.constant 0 : i32
      %126 = vector.broadcast %c0_i32_75 : i32 to vector<1x8xi32>
      %127 = arith.cmpi sgt, %125, %126 : vector<1x8xi32>
      %cst_76 = arith.constant 0.000000e+00 : f32
      %cst_77 = arith.constant -1.000000e+09 : f32
      %128 = vector.broadcast %cst_76 : f32 to vector<1x8xf32>
      %129 = vector.broadcast %cst_77 : f32 to vector<1x8xf32>
      %130 = arith.select %127, %128, %129 : vector<1x8xi1>, vector<1x8xf32>
      %c0_78 = arith.constant 0 : index
      %c0_79 = arith.constant 0 : index
      %c0_80 = arith.constant 0 : index
      %c0_81 = arith.constant 0 : index
      %131 = vector.load %arg7[%c0_78, %c0_79, %c0_80, %c0_81] : memref<1x1x8x32xbf16, #tpu.memory_space<vmem>>, vector<1x1x8x32xbf16>
      %132 = vector.shape_cast %131 : vector<1x1x8x32xbf16> to vector<8x32xbf16>
      %c0_82 = arith.constant 0 : index
      %c0_83 = arith.constant 0 : index
      %c0_84 = arith.constant 0 : index
      %c0_85 = arith.constant 0 : index
      %133 = vector.load %arg8[%c0_82, %c0_83, %c0_84, %c0_85] : memref<1x1x8x32xbf16, #tpu.memory_space<vmem>>, vector<1x1x8x32xbf16>
      %134 = vector.shape_cast %133 : vector<1x1x8x32xbf16> to vector<8x32xbf16>
      %135 = vector.extract_strided_slice %8 {offsets = [0, 0], sizes = [8, 8], strides = [1, 1]} : vector<8x32xbf16> to vector<8x8xbf16>
      %136 = vector.extract_strided_slice %132 {offsets = [0, 0], sizes = [8, 8], strides = [1, 1]} : vector<8x32xbf16> to vector<8x8xbf16>
      %cst_86 = arith.constant dense<0.000000e+00> : vector<8x8xf32>
      %137 = tpu.matmul %135, %136, %cst_86 {dimension_numbers = #tpu.dot_dimension_numbers<[1], [1], [0], [0], [0, 0, 1, 0], [], []>} : vector<8x8xbf16>, vector<8x8xbf16>, vector<8x8xf32> -> vector<8x8xf32>
      %138 = vector.broadcast %130 : vector<1x8xf32> to vector<8x8xf32>
      %139 = arith.addf %137, %138 : vector<8x8xf32>
      %c0_87 = arith.constant 0 : index
      %c0_88 = arith.constant 0 : index
      %140 = vector.load %arg11[%c0_87, %c0_88] : memref<8x4xf32, #tpu.memory_space<vmem>>, vector<8x1xf32>
      %cst_89 = arith.constant dense<0xFF800000> : vector<8xf32>
      %141 = vector.multi_reduction <maximumf>, %139, %cst_89 [1] : vector<8x8xf32> to vector<8xf32>
      %142 = vector.shape_cast %141 : vector<8xf32> to vector<8x1xf32>
      %143 = arith.maximumf %140, %142 : vector<8x1xf32>
      %144 = arith.subf %140, %143 : vector<8x1xf32>
      %145 = math.exp %144 : vector<8x1xf32>
      %146 = vector.broadcast %143 : vector<8x1xf32> to vector<8x8xf32>
      %147 = arith.subf %139, %146 : vector<8x8xf32>
      %148 = math.exp %147 : vector<8x8xf32>
      %c0_90 = arith.constant 0 : index
      %c0_91 = arith.constant 0 : index
      %149 = vector.load %arg12[%c0_90, %c0_91] : memref<8x4xf32, #tpu.memory_space<vmem>>, vector<8x1xf32>
      %150 = arith.mulf %145, %149 : vector<8x1xf32>
      %cst_92 = arith.constant dense<0.000000e+00> : vector<8xf32>
      %151 = vector.multi_reduction <add>, %148, %cst_92 [1] : vector<8x8xf32> to vector<8xf32>
      %152 = vector.shape_cast %151 : vector<8xf32> to vector<8x1xf32>
      %153 = arith.addf %150, %152 : vector<8x1xf32>
      %c0_93 = arith.constant 0 : index
      %c0_94 = arith.constant 0 : index
      %154 = vector.load %arg12[%c0_93, %c0_94] : memref<8x4xf32, #tpu.memory_space<vmem>>, vector<8x1xf32>
      tpu.vector_store %arg12[%c0_93, %c0_94], %153 {strides = array<i32>} : memref<8x4xf32, #tpu.memory_space<vmem>>, vector<8x1xf32>,
      %155 = arith.truncf %148 : vector<8x8xf32> to vector<8x8xbf16>
      %156 = vector.extract_strided_slice %134 {offsets = [0, 0], sizes = [8, 8], strides = [1, 1]} : vector<8x32xbf16> to vector<8x8xbf16>
      %cst_95 = arith.constant dense<0.000000e+00> : vector<8x8xf32>
      %157 = tpu.matmul %155, %156, %cst_95 {dimension_numbers = #tpu.dot_dimension_numbers<[1], [0], [0], [1], [0, 0, 1, 1], [], []>} : vector<8x8xbf16>, vector<8x8xbf16>, vector<8x8xf32> -> vector<8x8xf32>
      %c0_96 = arith.constant 0 : index
      %c0_97 = arith.constant 0 : index
      %158 = vector.load %arg13[%c0_96, %c0_97] : memref<8x32xf32, #tpu.memory_space<vmem>>, vector<8x8xf32>
      %159 = vector.broadcast %145 : vector<8x1xf32> to vector<8x8xf32>
      %160 = arith.mulf %159, %158 : vector<8x8xf32>
      %161 = arith.addf %160, %157 : vector<8x8xf32>
      %c0_98 = arith.constant 0 : index
      %c0_99 = arith.constant 0 : index
      %162 = vector.load %arg13[%c0_98, %c0_99] : memref<8x32xf32, #tpu.memory_space<vmem>>, vector<8x8xf32>
      tpu.vector_store %arg13[%c0_98, %c0_99], %161 {strides = array<i32>} : memref<8x32xf32, #tpu.memory_space<vmem>>, vector<8x8xf32>,
      %c0_100 = arith.constant 0 : index
      %c0_101 = arith.constant 0 : index
      %163 = vector.load %arg11[%c0_100, %c0_101] : memref<8x4xf32, #tpu.memory_space<vmem>>, vector<8x1xf32>
      tpu.vector_store %arg11[%c0_100, %c0_101], %143 {strides = array<i32>} : memref<8x4xf32, #tpu.memory_space<vmem>>, vector<8x1xf32>,
      %164 = vector.extract_strided_slice %8 {offsets = [0, 8], sizes = [8, 8], strides = [1, 1]} : vector<8x32xbf16> to vector<8x8xbf16>
      %165 = vector.extract_strided_slice %132 {offsets = [0, 8], sizes = [8, 8], strides = [1, 1]} : vector<8x32xbf16> to vector<8x8xbf16>
      %cst_102 = arith.constant dense<0.000000e+00> : vector<8x8xf32>
      %166 = tpu.matmul %164, %165, %cst_102 {dimension_numbers = #tpu.dot_dimension_numbers<[1], [1], [0], [0], [0, 0, 1, 0], [], []>} : vector<8x8xbf16>, vector<8x8xbf16>, vector<8x8xf32> -> vector<8x8xf32>
      %167 = vector.broadcast %130 : vector<1x8xf32> to vector<8x8xf32>
      %168 = arith.addf %166, %167 : vector<8x8xf32>
      %c0_103 = arith.constant 0 : index
      %c1_104 = arith.constant 1 : index
      %169 = vector.load %arg11[%c0_103, %c1_104] : memref<8x4xf32, #tpu.memory_space<vmem>>, vector<8x1xf32>
      %cst_105 = arith.constant dense<0xFF800000> : vector<8xf32>
      %170 = vector.multi_reduction <maximumf>, %168, %cst_105 [1] : vector<8x8xf32> to vector<8xf32>
      %171 = vector.shape_cast %170 : vector<8xf32> to vector<8x1xf32>
      %172 = arith.maximumf %169, %171 : vector<8x1xf32>
      %173 = arith.subf %169, %172 : vector<8x1xf32>
      %174 = math.exp %173 : vector<8x1xf32>
      %175 = vector.broadcast %172 : vector<8x1xf32> to vector<8x8xf32>
      %176 = arith.subf %168, %175 : vector<8x8xf32>
      %177 = math.exp %176 : vector<8x8xf32>
      %c0_106 = arith.constant 0 : index
      %c1_107 = arith.constant 1 : index
      %178 = vector.load %arg12[%c0_106, %c1_107] : memref<8x4xf32, #tpu.memory_space<vmem>>, vector<8x1xf32>
      %179 = arith.mulf %174, %178 : vector<8x1xf32>
      %cst_108 = arith.constant dense<0.000000e+00> : vector<8xf32>
      %180 = vector.multi_reduction <add>, %177, %cst_108 [1] : vector<8x8xf32> to vector<8xf32>
      %181 = vector.shape_cast %180 : vector<8xf32> to vector<8x1xf32>
      %182 = arith.addf %179, %181 : vector<8x1xf32>
      %c0_109 = arith.constant 0 : index
      %c1_110 = arith.constant 1 : index
      %183 = vector.load %arg12[%c0_109, %c1_110] : memref<8x4xf32, #tpu.memory_space<vmem>>, vector<8x1xf32>
      tpu.vector_store %arg12[%c0_109, %c1_110], %182 {strides = array<i32>} : memref<8x4xf32, #tpu.memory_space<vmem>>, vector<8x1xf32>,
      %184 = arith.truncf %177 : vector<8x8xf32> to vector<8x8xbf16>
      %185 = vector.extract_strided_slice %134 {offsets = [0, 8], sizes = [8, 8], strides = [1, 1]} : vector<8x32xbf16> to vector<8x8xbf16>
      %cst_111 = arith.constant dense<0.000000e+00> : vector<8x8xf32>
      %186 = tpu.matmul %184, %185, %cst_111 {dimension_numbers = #tpu.dot_dimension_numbers<[1], [0], [0], [1], [0, 0, 1, 1], [], []>} : vector<8x8xbf16>, vector<8x8xbf16>, vector<8x8xf32> -> vector<8x8xf32>
      %c0_112 = arith.constant 0 : index
      %c8_113 = arith.constant 8 : index
      %187 = vector.load %arg13[%c0_112, %c8_113] : memref<8x32xf32, #tpu.memory_space<vmem>>, vector<8x8xf32>
      %188 = vector.broadcast %174 : vector<8x1xf32> to vector<8x8xf32>
      %189 = arith.mulf %188, %187 : vector<8x8xf32>
      %190 = arith.addf %189, %186 : vector<8x8xf32>
      %c0_114 = arith.constant 0 : index
      %c8_115 = arith.constant 8 : index
      %191 = vector.load %arg13[%c0_114, %c8_115] : memref<8x32xf32, #tpu.memory_space<vmem>>, vector<8x8xf32>
      tpu.vector_store %arg13[%c0_114, %c8_115], %190 {strides = array<i32>} : memref<8x32xf32, #tpu.memory_space<vmem>>, vector<8x8xf32>,
      %c0_116 = arith.constant 0 : index
      %c1_117 = arith.constant 1 : index
      %192 = vector.load %arg11[%c0_116, %c1_117] : memref<8x4xf32, #tpu.memory_space<vmem>>, vector<8x1xf32>
      tpu.vector_store %arg11[%c0_116, %c1_117], %172 {strides = array<i32>} : memref<8x4xf32, #tpu.memory_space<vmem>>, vector<8x1xf32>,
      %193 = vector.extract_strided_slice %8 {offsets = [0, 16], sizes = [8, 8], strides = [1, 1]} : vector<8x32xbf16> to vector<8x8xbf16>
      %194 = vector.extract_strided_slice %132 {offsets = [0, 16], sizes = [8, 8], strides = [1, 1]} : vector<8x32xbf16> to vector<8x8xbf16>
      %cst_118 = arith.constant dense<0.000000e+00> : vector<8x8xf32>
      %195 = tpu.matmul %193, %194, %cst_118 {dimension_numbers = #tpu.dot_dimension_numbers<[1], [1], [0], [0], [0, 0, 1, 0], [], []>} : vector<8x8xbf16>, vector<8x8xbf16>, vector<8x8xf32> -> vector<8x8xf32>
      %196 = vector.broadcast %130 : vector<1x8xf32> to vector<8x8xf32>
      %197 = arith.addf %195, %196 : vector<8x8xf32>
      %c0_119 = arith.constant 0 : index
      %c2_120 = arith.constant 2 : index
      %198 = vector.load %arg11[%c0_119, %c2_120] : memref<8x4xf32, #tpu.memory_space<vmem>>, vector<8x1xf32>
      %cst_121 = arith.constant dense<0xFF800000> : vector<8xf32>
      %199 = vector.multi_reduction <maximumf>, %197, %cst_121 [1] : vector<8x8xf32> to vector<8xf32>
      %200 = vector.shape_cast %199 : vector<8xf32> to vector<8x1xf32>
      %201 = arith.maximumf %198, %200 : vector<8x1xf32>
      %202 = arith.subf %198, %201 : vector<8x1xf32>
      %203 = math.exp %202 : vector<8x1xf32>
      %204 = vector.broadcast %201 : vector<8x1xf32> to vector<8x8xf32>
      %205 = arith.subf %197, %204 : vector<8x8xf32>
      %206 = math.exp %205 : vector<8x8xf32>
      %c0_122 = arith.constant 0 : index
      %c2_123 = arith.constant 2 : index
      %207 = vector.load %arg12[%c0_122, %c2_123] : memref<8x4xf32, #tpu.memory_space<vmem>>, vector<8x1xf32>
      %208 = arith.mulf %203, %207 : vector<8x1xf32>
      %cst_124 = arith.constant dense<0.000000e+00> : vector<8xf32>
      %209 = vector.multi_reduction <add>, %206, %cst_124 [1] : vector<8x8xf32> to vector<8xf32>
      %210 = vector.shape_cast %209 : vector<8xf32> to vector<8x1xf32>
      %211 = arith.addf %208, %210 : vector<8x1xf32>
      %c0_125 = arith.constant 0 : index
      %c2_126 = arith.constant 2 : index
      %212 = vector.load %arg12[%c0_125, %c2_126] : memref<8x4xf32, #tpu.memory_space<vmem>>, vector<8x1xf32>
      tpu.vector_store %arg12[%c0_125, %c2_126], %211 {strides = array<i32>} : memref<8x4xf32, #tpu.memory_space<vmem>>, vector<8x1xf32>,
      %213 = arith.truncf %206 : vector<8x8xf32> to vector<8x8xbf16>
      %214 = vector.extract_strided_slice %134 {offsets = [0, 16], sizes = [8, 8], strides = [1, 1]} : vector<8x32xbf16> to vector<8x8xbf16>
      %cst_127 = arith.constant dense<0.000000e+00> : vector<8x8xf32>
      %215 = tpu.matmul %213, %214, %cst_127 {dimension_numbers = #tpu.dot_dimension_numbers<[1], [0], [0], [1], [0, 0, 1, 1], [], []>} : vector<8x8xbf16>, vector<8x8xbf16>, vector<8x8xf32> -> vector<8x8xf32>
      %c0_128 = arith.constant 0 : index
      %c16_129 = arith.constant 16 : index
      %216 = vector.load %arg13[%c0_128, %c16_129] : memref<8x32xf32, #tpu.memory_space<vmem>>, vector<8x8xf32>
      %217 = vector.broadcast %203 : vector<8x1xf32> to vector<8x8xf32>
      %218 = arith.mulf %217, %216 : vector<8x8xf32>
      %219 = arith.addf %218, %215 : vector<8x8xf32>
      %c0_130 = arith.constant 0 : index
      %c16_131 = arith.constant 16 : index
      %220 = vector.load %arg13[%c0_130, %c16_131] : memref<8x32xf32, #tpu.memory_space<vmem>>, vector<8x8xf32>
      tpu.vector_store %arg13[%c0_130, %c16_131], %219 {strides = array<i32>} : memref<8x32xf32, #tpu.memory_space<vmem>>, vector<8x8xf32>,
      %c0_132 = arith.constant 0 : index
      %c2_133 = arith.constant 2 : index
      %221 = vector.load %arg11[%c0_132, %c2_133] : memref<8x4xf32, #tpu.memory_space<vmem>>, vector<8x1xf32>
      tpu.vector_store %arg11[%c0_132, %c2_133], %201 {strides = array<i32>} : memref<8x4xf32, #tpu.memory_space<vmem>>, vector<8x1xf32>,
      %222 = vector.extract_strided_slice %8 {offsets = [0, 24], sizes = [8, 8], strides = [1, 1]} : vector<8x32xbf16> to vector<8x8xbf16>
      %223 = vector.extract_strided_slice %132 {offsets = [0, 24], sizes = [8, 8], strides = [1, 1]} : vector<8x32xbf16> to vector<8x8xbf16>
      %cst_134 = arith.constant dense<0.000000e+00> : vector<8x8xf32>
      %224 = tpu.matmul %222, %223, %cst_134 {dimension_numbers = #tpu.dot_dimension_numbers<[1], [1], [0], [0], [0, 0, 1, 0], [], []>} : vector<8x8xbf16>, vector<8x8xbf16>, vector<8x8xf32> -> vector<8x8xf32>
      %225 = vector.broadcast %130 : vector<1x8xf32> to vector<8x8xf32>
      %226 = arith.addf %224, %225 : vector<8x8xf32>
      %c0_135 = arith.constant 0 : index
      %c3_136 = arith.constant 3 : index
      %227 = vector.load %arg11[%c0_135, %c3_136] : memref<8x4xf32, #tpu.memory_space<vmem>>, vector<8x1xf32>
      %cst_137 = arith.constant dense<0xFF800000> : vector<8xf32>
      %228 = vector.multi_reduction <maximumf>, %226, %cst_137 [1] : vector<8x8xf32> to vector<8xf32>
      %229 = vector.shape_cast %228 : vector<8xf32> to vector<8x1xf32>
      %230 = arith.maximumf %227, %229 : vector<8x1xf32>
      %231 = arith.subf %227, %230 : vector<8x1xf32>
      %232 = math.exp %231 : vector<8x1xf32>
      %233 = vector.broadcast %230 : vector<8x1xf32> to vector<8x8xf32>
      %234 = arith.subf %226, %233 : vector<8x8xf32>
      %235 = math.exp %234 : vector<8x8xf32>
      %c0_138 = arith.constant 0 : index
      %c3_139 = arith.constant 3 : index
      %236 = vector.load %arg12[%c0_138, %c3_139] : memref<8x4xf32, #tpu.memory_space<vmem>>, vector<8x1xf32>
      %237 = arith.mulf %232, %236 : vector<8x1xf32>
      %cst_140 = arith.constant dense<0.000000e+00> : vector<8xf32>
      %238 = vector.multi_reduction <add>, %235, %cst_140 [1] : vector<8x8xf32> to vector<8xf32>
      %239 = vector.shape_cast %238 : vector<8xf32> to vector<8x1xf32>
      %240 = arith.addf %237, %239 : vector<8x1xf32>
      %c0_141 = arith.constant 0 : index
      %c3_142 = arith.constant 3 : index
      %241 = vector.load %arg12[%c0_141, %c3_142] : memref<8x4xf32, #tpu.memory_space<vmem>>, vector<8x1xf32>
      tpu.vector_store %arg12[%c0_141, %c3_142], %240 {strides = array<i32>} : memref<8x4xf32, #tpu.memory_space<vmem>>, vector<8x1xf32>,
      %242 = arith.truncf %235 : vector<8x8xf32> to vector<8x8xbf16>
      %243 = vector.extract_strided_slice %134 {offsets = [0, 24], sizes = [8, 8], strides = [1, 1]} : vector<8x32xbf16> to vector<8x8xbf16>
      %cst_143 = arith.constant dense<0.000000e+00> : vector<8x8xf32>
      %244 = tpu.matmul %242, %243, %cst_143 {dimension_numbers = #tpu.dot_dimension_numbers<[1], [0], [0], [1], [0, 0, 1, 1], [], []>} : vector<8x8xbf16>, vector<8x8xbf16>, vector<8x8xf32> -> vector<8x8xf32>
      %c0_144 = arith.constant 0 : index
      %c24_145 = arith.constant 24 : index
      %245 = vector.load %arg13[%c0_144, %c24_145] : memref<8x32xf32, #tpu.memory_space<vmem>>, vector<8x8xf32>
      %246 = vector.broadcast %232 : vector<8x1xf32> to vector<8x8xf32>
      %247 = arith.mulf %246, %245 : vector<8x8xf32>
      %248 = arith.addf %247, %244 : vector<8x8xf32>
      %c0_146 = arith.constant 0 : index
      %c24_147 = arith.constant 24 : index
      %249 = vector.load %arg13[%c0_146, %c24_147] : memref<8x32xf32, #tpu.memory_space<vmem>>, vector<8x8xf32>
      tpu.vector_store %arg13[%c0_146, %c24_147], %248 {strides = array<i32>} : memref<8x32xf32, #tpu.memory_space<vmem>>, vector<8x8xf32>,
      %c0_148 = arith.constant 0 : index
      %c3_149 = arith.constant 3 : index
      %250 = vector.load %arg11[%c0_148, %c3_149] : memref<8x4xf32, #tpu.memory_space<vmem>>, vector<8x1xf32>
      tpu.vector_store %arg11[%c0_148, %c3_149], %230 {strides = array<i32>} : memref<8x4xf32, #tpu.memory_space<vmem>>, vector<8x1xf32>,
      %c0_150 = arith.constant 0 : index
      %c0_151 = arith.constant 0 : index
      %251 = vector.load %arg12[%c0_150, %c0_151] : memref<8x4xf32, #tpu.memory_space<vmem>>, vector<8x4xf32>
      %252 = tpu.reciprocal %251 {approx = true} : vector<8x4xf32> -> vector<8x4xf32>
      %c0_152 = arith.constant 0 : index
      %c0_153 = arith.constant 0 : index
      %253 = vector.load %arg13[%c0_152, %c0_153] : memref<8x32xf32, #tpu.memory_space<vmem>>, vector<8x8xf32>
      %254 = vector.extract_strided_slice %252 {offsets = [0, 0], sizes = [8, 1], strides = [1, 1]} : vector<8x4xf32> to vector<8x1xf32>
      %255 = vector.broadcast %254 : vector<8x1xf32> to vector<8x8xf32>
      %256 = arith.mulf %253, %255 : vector<8x8xf32>
      %c0_154 = arith.constant 0 : index
      %c0_155 = arith.constant 0 : index
      %257 = vector.load %arg13[%c0_154, %c0_155] : memref<8x32xf32, #tpu.memory_space<vmem>>, vector<8x8xf32>
      tpu.vector_store %arg13[%c0_154, %c0_155], %256 {strides = array<i32>} : memref<8x32xf32, #tpu.memory_space<vmem>>, vector<8x8xf32>,
      %c0_156 = arith.constant 0 : index
      %c8_157 = arith.constant 8 : index
      %258 = vector.load %arg13[%c0_156, %c8_157] : memref<8x32xf32, #tpu.memory_space<vmem>>, vector<8x8xf32>
      %259 = vector.extract_strided_slice %252 {offsets = [0, 1], sizes = [8, 1], strides = [1, 1]} : vector<8x4xf32> to vector<8x1xf32>
      %260 = vector.broadcast %259 : vector<8x1xf32> to vector<8x8xf32>
      %261 = arith.mulf %258, %260 : vector<8x8xf32>
      %c0_158 = arith.constant 0 : index
      %c8_159 = arith.constant 8 : index
      %262 = vector.load %arg13[%c0_158, %c8_159] : memref<8x32xf32, #tpu.memory_space<vmem>>, vector<8x8xf32>
      tpu.vector_store %arg13[%c0_158, %c8_159], %261 {strides = array<i32>} : memref<8x32xf32, #tpu.memory_space<vmem>>, vector<8x8xf32>,
      %c0_160 = arith.constant 0 : index
      %c16_161 = arith.constant 16 : index
      %263 = vector.load %arg13[%c0_160, %c16_161] : memref<8x32xf32, #tpu.memory_space<vmem>>, vector<8x8xf32>
      %264 = vector.extract_strided_slice %252 {offsets = [0, 2], sizes = [8, 1], strides = [1, 1]} : vector<8x4xf32> to vector<8x1xf32>
      %265 = vector.broadcast %264 : vector<8x1xf32> to vector<8x8xf32>
      %266 = arith.mulf %263, %265 : vector<8x8xf32>
      %c0_162 = arith.constant 0 : index
      %c16_163 = arith.constant 16 : index
      %267 = vector.load %arg13[%c0_162, %c16_163] : memref<8x32xf32, #tpu.memory_space<vmem>>, vector<8x8xf32>
      tpu.vector_store %arg13[%c0_162, %c16_163], %266 {strides = array<i32>} : memref<8x32xf32, #tpu.memory_space<vmem>>, vector<8x8xf32>,
      %c0_164 = arith.constant 0 : index
      %c24_165 = arith.constant 24 : index
      %268 = vector.load %arg13[%c0_164, %c24_165] : memref<8x32xf32, #tpu.memory_space<vmem>>, vector<8x8xf32>
      %269 = vector.extract_strided_slice %252 {offsets = [0, 3], sizes = [8, 1], strides = [1, 1]} : vector<8x4xf32> to vector<8x1xf32>
      %270 = vector.broadcast %269 : vector<8x1xf32> to vector<8x8xf32>
      %271 = arith.mulf %268, %270 : vector<8x8xf32>
      %c0_166 = arith.constant 0 : index
      %c24_167 = arith.constant 24 : index
      %272 = vector.load %arg13[%c0_166, %c24_167] : memref<8x32xf32, #tpu.memory_space<vmem>>, vector<8x8xf32>
      tpu.vector_store %arg13[%c0_166, %c24_167], %271 {strides = array<i32>} : memref<8x32xf32, #tpu.memory_space<vmem>>, vector<8x8xf32>,
      %c0_168 = arith.constant 0 : index
      %c0_169 = arith.constant 0 : index
      %273 = vector.load %arg13[%c0_168, %c0_169] : memref<8x32xf32, #tpu.memory_space<vmem>>, vector<8x32xf32>
      %274 = arith.truncf %273 : vector<8x32xf32> to vector<8x32xbf16>
      %c0_170 = arith.constant 0 : index
      %c0_171 = arith.constant 0 : index
      %c0_172 = arith.constant 0 : index
      %275 = vector.load %arg10[%c0_170, %c0_171, %c0_172] : memref<1x8x32xbf16, #tpu.memory_space<vmem>>, vector<1x8x32xbf16>
      %276 = vector.shape_cast %275 : vector<1x8x32xbf16> to vector<8x32xbf16>
      %277 = vector.shape_cast %274 : vector<8x32xbf16> to vector<1x8x32xbf16>
      tpu.vector_store %arg10[%c0_170, %c0_171, %c0_172], %277 {strides = array<i32>} : memref<1x8x32xbf16, #tpu.memory_space<vmem>>, vector<1x8x32xbf16>,
    } else {
    }
    return
  }
  func.func @transform_0(%arg0: i32, %arg1: i32, %arg2: i32, %arg3: i32) -> (i32, i32, i32, i32) {
    %c0_i32 = arith.constant 0 : i32
    %c0_i32_0 = arith.constant 0 : i32
    return %c0_i32, %arg0, %arg2, %arg1 : i32, i32, i32, i32
  }
  func.func @transform_1(%arg0: i32, %arg1: i32, %arg2: i32, %arg3: i32) -> (i32, i32, i32, i32) {
    %c1_i32 = arith.constant 1 : i32
    %c0_i32 = arith.constant 0 : i32
    return %c1_i32, %arg0, %arg3, %arg1 : i32, i32, i32, i32
  }
  func.func @transform_2(%arg0: i32, %arg1: i32, %arg2: i32, %arg3: i32) -> (i32, i32, i32, i32) {
    %c2_i32 = arith.constant 2 : i32
    %c0_i32 = arith.constant 0 : i32
    return %c2_i32, %arg0, %arg3, %arg1 : i32, i32, i32, i32
  }
  func.func @transform_3(%arg0: i32, %arg1: i32, %arg2: i32, %arg3: i32) -> (i32, i32, i32, i32) {
    %c1_i32 = arith.constant 1 : i32
    %c0_i32 = arith.constant 0 : i32
    %c0_i32_0 = arith.constant 0 : i32
    return %c1_i32, %arg0, %c0_i32, %arg1 : i32, i32, i32, i32
  }
  func.func @transform_4(%arg0: i32, %arg1: i32, %arg2: i32, %arg3: i32) -> (i32, i32, i32, i32) {
    %c2_i32 = arith.constant 2 : i32
    %c0_i32 = arith.constant 0 : i32
    %c0_i32_0 = arith.constant 0 : i32
    return %c2_i32, %arg0, %c0_i32, %arg1 : i32, i32, i32, i32
  }
  func.func @transform_5(%arg0: i32, %arg1: i32, %arg2: i32, %arg3: i32) -> (i32, i32, i32) {
    %c0_i32 = arith.constant 0 : i32
    %c0_i32_0 = arith.constant 0 : i32
    %c0_i32_1 = arith.constant 0 : i32
    return %arg0, %c0_i32, %c0_i32_0 : i32, i32, i32
  }
  func.func @transform_6(%arg0: i32, %arg1: i32, %arg2: i32, %arg3: i32) -> (i32, i32, i32) {
    %c0_i32 = arith.constant 0 : i32
    return %arg0, %arg2, %arg1 : i32, i32, i32
  }
}

module attributes {stable_mosaic.version = 11 : i64} {
  func.func @_gated_linear_res_kernel(%arg0: i32, %arg1: i32, %arg2: i32, %arg3: memref<1x16x32xbf16, #tpu.memory_space<vmem>>, %arg4: memref<32x32xbf16, #tpu.memory_space<vmem>>, %arg5: memref<1x32xf32, #tpu.memory_space<vmem>>, %arg6: memref<1x1x32xf32, #tpu.memory_space<vmem>>, %arg7: memref<1x16x32xf32, #tpu.memory_space<vmem>>, %arg8: memref<1x16x32xf32, #tpu.memory_space<vmem>>) attributes {dimension_semantics = [#tpu.dimension_semantics<parallel>, #tpu.dimension_semantics<parallel>, #tpu.dimension_semantics<parallel>], iteration_bounds = array<i64: 2, 1, 1>, scalar_prefetch = 0 : i64, scratch_operands = 0 : i64, tpu.core_type = #tpu.core_type<tc>, window_params = [{transform_indices = @transform_0, window_bounds = array<i64: 1, 16, 32>}, {transform_indices = @transform_1, window_bounds = array<i64: 32, 32>}, {transform_indices = @transform_2, window_bounds = array<i64: 1, 32>}, {transform_indices = @transform_3, window_bounds = array<i64: 1, 1, 32>}, {transform_indices = @transform_4, window_bounds = array<i64: 1, 16, 32>}, {transform_indices = @transform_5, window_bounds = array<i64: 1, 16, 32>}]} {
    %c0 = arith.constant 0 : index
    %c0_0 = arith.constant 0 : index
    %c0_1 = arith.constant 0 : index
    %0 = vector.load %arg3[%c0, %c0_0, %c0_1] : memref<1x16x32xbf16, #tpu.memory_space<vmem>>, vector<1x16x32xbf16>
    %1 = vector.shape_cast %0 : vector<1x16x32xbf16> to vector<16x32xbf16>
    %2 = arith.extf %1 : vector<16x32xbf16> to vector<16x32xf32>
    %3 = arith.truncf %2 : vector<16x32xf32> to vector<16x32xbf16>
    %c0_2 = arith.constant 0 : index
    %c0_3 = arith.constant 0 : index
    %4 = vector.load %arg4[%c0_2, %c0_3] : memref<32x32xbf16, #tpu.memory_space<vmem>>, vector<32x32xbf16>
    %cst = arith.constant dense<0.000000e+00> : vector<16x32xf32>
    %5 = tpu.matmul %3, %4, %cst {dimension_numbers = #tpu.dot_dimension_numbers<[1], [0], [0], [1], [0, 0, 1, 1], [], []>} : vector<16x32xbf16>, vector<32x32xbf16>, vector<16x32xf32> -> vector<16x32xf32>
    %c0_4 = arith.constant 0 : index
    %c0_5 = arith.constant 0 : index
    %6 = vector.load %arg5[%c0_4, %c0_5] : memref<1x32xf32, #tpu.memory_space<vmem>>, vector<1x32xf32>
    %7 = vector.broadcast %6 : vector<1x32xf32> to vector<16x32xf32>
    %8 = arith.addf %5, %7 : vector<16x32xf32>
    %c0_6 = arith.constant 0 : index
    %c0_7 = arith.constant 0 : index
    %c0_8 = arith.constant 0 : index
    %9 = vector.load %arg7[%c0_6, %c0_7, %c0_8] : memref<1x16x32xf32, #tpu.memory_space<vmem>>, vector<1x16x32xf32>
    %10 = vector.shape_cast %9 : vector<1x16x32xf32> to vector<16x32xf32>
    %c0_9 = arith.constant 0 : index
    %c0_10 = arith.constant 0 : index
    %c0_11 = arith.constant 0 : index
    %11 = vector.load %arg6[%c0_9, %c0_10, %c0_11] : memref<1x1x32xf32, #tpu.memory_space<vmem>>, vector<1x1x32xf32>
    %12 = vector.shape_cast %11 : vector<1x1x32xf32> to vector<1x32xf32>
    %13 = vector.broadcast %12 : vector<1x32xf32> to vector<16x32xf32>
    %14 = arith.mulf %13, %8 : vector<16x32xf32>
    %15 = arith.addf %10, %14 : vector<16x32xf32>
    %c0_12 = arith.constant 0 : index
    %c0_13 = arith.constant 0 : index
    %c0_14 = arith.constant 0 : index
    %16 = vector.load %arg8[%c0_12, %c0_13, %c0_14] : memref<1x16x32xf32, #tpu.memory_space<vmem>>, vector<1x16x32xf32>
    %17 = vector.shape_cast %16 : vector<1x16x32xf32> to vector<16x32xf32>
    %18 = vector.shape_cast %15 : vector<16x32xf32> to vector<1x16x32xf32>
    tpu.vector_store %arg8[%c0_12, %c0_13, %c0_14], %18 {strides = array<i32>} : memref<1x16x32xf32, #tpu.memory_space<vmem>>, vector<1x16x32xf32>,
    return
  }
  func.func @transform_0(%arg0: i32, %arg1: i32, %arg2: i32) -> (i32, i32, i32) {
    %c0_i32 = arith.constant 0 : i32
    %c0_i32_0 = arith.constant 0 : i32
    return %arg0, %arg2, %c0_i32 : i32, i32, i32
  }
  func.func @transform_1(%arg0: i32, %arg1: i32, %arg2: i32) -> (i32, i32) {
    %c0_i32 = arith.constant 0 : i32
    %c0_i32_0 = arith.constant 0 : i32
    return %c0_i32, %arg1 : i32, i32
  }
  func.func @transform_2(%arg0: i32, %arg1: i32, %arg2: i32) -> (i32, i32) {
    %c0_i32 = arith.constant 0 : i32
    %c0_i32_0 = arith.constant 0 : i32
    return %c0_i32, %arg1 : i32, i32
  }
  func.func @transform_3(%arg0: i32, %arg1: i32, %arg2: i32) -> (i32, i32, i32) {
    %c0_i32 = arith.constant 0 : i32
    %c0_i32_0 = arith.constant 0 : i32
    return %arg0, %c0_i32, %arg1 : i32, i32, i32
  }
  func.func @transform_4(%arg0: i32, %arg1: i32, %arg2: i32) -> (i32, i32, i32) {
    %c0_i32 = arith.constant 0 : i32
    return %arg0, %arg2, %arg1 : i32, i32, i32
  }
  func.func @transform_5(%arg0: i32, %arg1: i32, %arg2: i32) -> (i32, i32, i32) {
    %c0_i32 = arith.constant 0 : i32
    return %arg0, %arg2, %arg1 : i32, i32, i32
  }
}

module attributes {stable_mosaic.version = 11 : i64} {
  func.func @_flash_kernel(%arg0: i32, %arg1: i32, %arg2: i32, %arg3: i32, %arg4: memref<1x1x16x32xbf16, #tpu.memory_space<vmem>>, %arg5: memref<1x1x16x32xbf16, #tpu.memory_space<vmem>>, %arg6: memref<1x1x16x32xbf16, #tpu.memory_space<vmem>>, %arg7: memref<1x1x8x32xbf16, #tpu.memory_space<vmem>>, %arg8: memref<1x1x8x32xbf16, #tpu.memory_space<vmem>>, %arg9: memref<1x1x8xi32, #tpu.memory_space<vmem>>, %arg10: memref<1x16x32xbf16, #tpu.memory_space<vmem>>, %arg11: memref<16x4xf32, #tpu.memory_space<vmem>>, %arg12: memref<16x4xf32, #tpu.memory_space<vmem>>, %arg13: memref<16x32xf32, #tpu.memory_space<vmem>>) attributes {dimension_semantics = [#tpu.dimension_semantics<parallel>, #tpu.dimension_semantics<parallel>, #tpu.dimension_semantics<parallel>, #tpu.dimension_semantics<arbitrary>], iteration_bounds = array<i64: 2, 1, 1, 1>, scalar_prefetch = 0 : i64, scratch_operands = 3 : i64, tpu.core_type = #tpu.core_type<tc>, window_params = [{transform_indices = @transform_0, window_bounds = array<i64: 1, 1, 16, 32>}, {transform_indices = @transform_1, window_bounds = array<i64: 1, 1, 16, 32>}, {transform_indices = @transform_2, window_bounds = array<i64: 1, 1, 16, 32>}, {transform_indices = @transform_3, window_bounds = array<i64: 1, 1, 8, 32>}, {transform_indices = @transform_4, window_bounds = array<i64: 1, 1, 8, 32>}, {transform_indices = @transform_5, window_bounds = array<i64: 1, 1, 8>}, {transform_indices = @transform_6, window_bounds = array<i64: 1, 16, 32>}]} {
    %c0_i32 = arith.constant 0 : i32
    %0 = arith.cmpi eq, %arg3, %c0_i32 : i32
    %1 = arith.extui %0 : i1 to i32
    %c0_i32_0 = arith.constant 0 : i32
    %2 = arith.cmpi ne, %1, %c0_i32_0 : i32
    scf.if %2 {
      %cst_72 = arith.constant 0xFF800000 : f32
      %124 = vector.broadcast %cst_72 : f32 to vector<16x4xf32>
      %c0_73 = arith.constant 0 : index
      %c0_74 = arith.constant 0 : index
      %125 = vector.load %arg11[%c0_73, %c0_74] : memref<16x4xf32, #tpu.memory_space<vmem>>, vector<16x4xf32>
      tpu.vector_store %arg11[%c0_73, %c0_74], %124 {strides = array<i32>} : memref<16x4xf32, #tpu.memory_space<vmem>>, vector<16x4xf32>,
      %cst_75 = arith.constant 0.000000e+00 : f32
      %126 = vector.broadcast %cst_75 : f32 to vector<16x4xf32>
      %c0_76 = arith.constant 0 : index
      %c0_77 = arith.constant 0 : index
      %127 = vector.load %arg12[%c0_76, %c0_77] : memref<16x4xf32, #tpu.memory_space<vmem>>, vector<16x4xf32>
      tpu.vector_store %arg12[%c0_76, %c0_77], %126 {strides = array<i32>} : memref<16x4xf32, #tpu.memory_space<vmem>>, vector<16x4xf32>,
      %cst_78 = arith.constant 0.000000e+00 : f32
      %128 = vector.broadcast %cst_78 : f32 to vector<16x32xf32>
      %c0_79 = arith.constant 0 : index
      %c0_80 = arith.constant 0 : index
      %129 = vector.load %arg13[%c0_79, %c0_80] : memref<16x32xf32, #tpu.memory_space<vmem>>, vector<16x32xf32>
      tpu.vector_store %arg13[%c0_79, %c0_80], %128 {strides = array<i32>} : memref<16x32xf32, #tpu.memory_space<vmem>>, vector<16x32xf32>,
    } else {
    }
    %c0 = arith.constant 0 : index
    %c0_1 = arith.constant 0 : index
    %c0_2 = arith.constant 0 : index
    %c0_3 = arith.constant 0 : index
    %3 = vector.load %arg4[%c0, %c0_1, %c0_2, %c0_3] : memref<1x1x16x32xbf16, #tpu.memory_space<vmem>>, vector<1x1x16x32xbf16>
    %4 = vector.shape_cast %3 : vector<1x1x16x32xbf16> to vector<16x32xbf16>
    %5 = arith.extf %4 : vector<16x32xbf16> to vector<16x32xf32>
    %cst = arith.constant 0.353553385 : f32
    %6 = vector.broadcast %cst : f32 to vector<16x32xf32>
    %7 = arith.mulf %5, %6 : vector<16x32xf32>
    %8 = arith.truncf %7 : vector<16x32xf32> to vector<16x32xbf16>
    %c0_4 = arith.constant 0 : index
    %c0_5 = arith.constant 0 : index
    %c0_6 = arith.constant 0 : index
    %c0_7 = arith.constant 0 : index
    %9 = vector.load %arg5[%c0_4, %c0_5, %c0_6, %c0_7] : memref<1x1x16x32xbf16, #tpu.memory_space<vmem>>, vector<1x1x16x32xbf16>
    %10 = vector.shape_cast %9 : vector<1x1x16x32xbf16> to vector<16x32xbf16>
    %c0_8 = arith.constant 0 : index
    %c0_9 = arith.constant 0 : index
    %c0_10 = arith.constant 0 : index
    %c0_11 = arith.constant 0 : index
    %11 = vector.load %arg6[%c0_8, %c0_9, %c0_10, %c0_11] : memref<1x1x16x32xbf16, #tpu.memory_space<vmem>>, vector<1x1x16x32xbf16>
    %12 = vector.shape_cast %11 : vector<1x1x16x32xbf16> to vector<16x32xbf16>
    %13 = vector.extract_strided_slice %8 {offsets = [0, 0], sizes = [16, 8], strides = [1, 1]} : vector<16x32xbf16> to vector<16x8xbf16>
    %14 = vector.extract_strided_slice %10 {offsets = [0, 0], sizes = [16, 8], strides = [1, 1]} : vector<16x32xbf16> to vector<16x8xbf16>
    %cst_12 = arith.constant dense<0.000000e+00> : vector<16x16xf32>
    %15 = tpu.matmul %13, %14, %cst_12 {dimension_numbers = #tpu.dot_dimension_numbers<[1], [1], [0], [0], [0, 0, 1, 0], [], []>} : vector<16x8xbf16>, vector<16x8xbf16>, vector<16x16xf32> -> vector<16x16xf32>
    %c0_13 = arith.constant 0 : index
    %c0_14 = arith.constant 0 : index
    %16 = vector.load %arg11[%c0_13, %c0_14] : memref<16x4xf32, #tpu.memory_space<vmem>>, vector<16x1xf32>
    %cst_15 = arith.constant dense<0xFF800000> : vector<16xf32>
    %17 = vector.multi_reduction <maximumf>, %15, %cst_15 [1] : vector<16x16xf32> to vector<16xf32>
    %18 = vector.shape_cast %17 : vector<16xf32> to vector<16x1xf32>
    %19 = arith.maximumf %16, %18 : vector<16x1xf32>
    %20 = arith.subf %16, %19 : vector<16x1xf32>
    %21 = math.exp %20 : vector<16x1xf32>
    %22 = vector.broadcast %19 : vector<16x1xf32> to vector<16x16xf32>
    %23 = arith.subf %15, %22 : vector<16x16xf32>
    %24 = math.exp %23 : vector<16x16xf32>
    %c0_16 = arith.constant 0 : index
    %c0_17 = arith.constant 0 : index
    %25 = vector.load %arg12[%c0_16, %c0_17] : memref<16x4xf32, #tpu.memory_space<vmem>>, vector<16x1xf32>
    %26 = arith.mulf %21, %25 : vector<16x1xf32>
    %cst_18 = arith.constant dense<0.000000e+00> : vector<16xf32>
    %27 = vector.multi_reduction <add>, %24, %cst_18 [1] : vector<16x16xf32> to vector<16xf32>
    %28 = vector.shape_cast %27 : vector<16xf32> to vector<16x1xf32>
    %29 = arith.addf %26, %28 : vector<16x1xf32>
    %c0_19 = arith.constant 0 : index
    %c0_20 = arith.constant 0 : index
    %30 = vector.load %arg12[%c0_19, %c0_20] : memref<16x4xf32, #tpu.memory_space<vmem>>, vector<16x1xf32>
    tpu.vector_store %arg12[%c0_19, %c0_20], %29 {strides = array<i32>} : memref<16x4xf32, #tpu.memory_space<vmem>>, vector<16x1xf32>,
    %31 = arith.truncf %24 : vector<16x16xf32> to vector<16x16xbf16>
    %32 = vector.extract_strided_slice %12 {offsets = [0, 0], sizes = [16, 8], strides = [1, 1]} : vector<16x32xbf16> to vector<16x8xbf16>
    %cst_21 = arith.constant dense<0.000000e+00> : vector<16x8xf32>
    %33 = tpu.matmul %31, %32, %cst_21 {dimension_numbers = #tpu.dot_dimension_numbers<[1], [0], [0], [1], [0, 0, 1, 1], [], []>} : vector<16x16xbf16>, vector<16x8xbf16>, vector<16x8xf32> -> vector<16x8xf32>
    %c0_22 = arith.constant 0 : index
    %c0_23 = arith.constant 0 : index
    %34 = vector.load %arg13[%c0_22, %c0_23] : memref<16x32xf32, #tpu.memory_space<vmem>>, vector<16x8xf32>
    %35 = vector.broadcast %21 : vector<16x1xf32> to vector<16x8xf32>
    %36 = arith.mulf %35, %34 : vector<16x8xf32>
    %37 = arith.addf %36, %33 : vector<16x8xf32>
    %c0_24 = arith.constant 0 : index
    %c0_25 = arith.constant 0 : index
    %38 = vector.load %arg13[%c0_24, %c0_25] : memref<16x32xf32, #tpu.memory_space<vmem>>, vector<16x8xf32>
    tpu.vector_store %arg13[%c0_24, %c0_25], %37 {strides = array<i32>} : memref<16x32xf32, #tpu.memory_space<vmem>>, vector<16x8xf32>,
    %c0_26 = arith.constant 0 : index
    %c0_27 = arith.constant 0 : index
    %39 = vector.load %arg11[%c0_26, %c0_27] : memref<16x4xf32, #tpu.memory_space<vmem>>, vector<16x1xf32>
    tpu.vector_store %arg11[%c0_26, %c0_27], %19 {strides = array<i32>} : memref<16x4xf32, #tpu.memory_space<vmem>>, vector<16x1xf32>,
    %40 = vector.extract_strided_slice %8 {offsets = [0, 8], sizes = [16, 8], strides = [1, 1]} : vector<16x32xbf16> to vector<16x8xbf16>
    %41 = vector.extract_strided_slice %10 {offsets = [0, 8], sizes = [16, 8], strides = [1, 1]} : vector<16x32xbf16> to vector<16x8xbf16>
    %cst_28 = arith.constant dense<0.000000e+00> : vector<16x16xf32>
    %42 = tpu.matmul %40, %41, %cst_28 {dimension_numbers = #tpu.dot_dimension_numbers<[1], [1], [0], [0], [0, 0, 1, 0], [], []>} : vector<16x8xbf16>, vector<16x8xbf16>, vector<16x16xf32> -> vector<16x16xf32>
    %c0_29 = arith.constant 0 : index
    %c1 = arith.constant 1 : index
    %43 = vector.load %arg11[%c0_29, %c1] : memref<16x4xf32, #tpu.memory_space<vmem>>, vector<16x1xf32>
    %cst_30 = arith.constant dense<0xFF800000> : vector<16xf32>
    %44 = vector.multi_reduction <maximumf>, %42, %cst_30 [1] : vector<16x16xf32> to vector<16xf32>
    %45 = vector.shape_cast %44 : vector<16xf32> to vector<16x1xf32>
    %46 = arith.maximumf %43, %45 : vector<16x1xf32>
    %47 = arith.subf %43, %46 : vector<16x1xf32>
    %48 = math.exp %47 : vector<16x1xf32>
    %49 = vector.broadcast %46 : vector<16x1xf32> to vector<16x16xf32>
    %50 = arith.subf %42, %49 : vector<16x16xf32>
    %51 = math.exp %50 : vector<16x16xf32>
    %c0_31 = arith.constant 0 : index
    %c1_32 = arith.constant 1 : index
    %52 = vector.load %arg12[%c0_31, %c1_32] : memref<16x4xf32, #tpu.memory_space<vmem>>, vector<16x1xf32>
    %53 = arith.mulf %48, %52 : vector<16x1xf32>
    %cst_33 = arith.constant dense<0.000000e+00> : vector<16xf32>
    %54 = vector.multi_reduction <add>, %51, %cst_33 [1] : vector<16x16xf32> to vector<16xf32>
    %55 = vector.shape_cast %54 : vector<16xf32> to vector<16x1xf32>
    %56 = arith.addf %53, %55 : vector<16x1xf32>
    %c0_34 = arith.constant 0 : index
    %c1_35 = arith.constant 1 : index
    %57 = vector.load %arg12[%c0_34, %c1_35] : memref<16x4xf32, #tpu.memory_space<vmem>>, vector<16x1xf32>
    tpu.vector_store %arg12[%c0_34, %c1_35], %56 {strides = array<i32>} : memref<16x4xf32, #tpu.memory_space<vmem>>, vector<16x1xf32>,
    %58 = arith.truncf %51 : vector<16x16xf32> to vector<16x16xbf16>
    %59 = vector.extract_strided_slice %12 {offsets = [0, 8], sizes = [16, 8], strides = [1, 1]} : vector<16x32xbf16> to vector<16x8xbf16>
    %cst_36 = arith.constant dense<0.000000e+00> : vector<16x8xf32>
    %60 = tpu.matmul %58, %59, %cst_36 {dimension_numbers = #tpu.dot_dimension_numbers<[1], [0], [0], [1], [0, 0, 1, 1], [], []>} : vector<16x16xbf16>, vector<16x8xbf16>, vector<16x8xf32> -> vector<16x8xf32>
    %c0_37 = arith.constant 0 : index
    %c8 = arith.constant 8 : index
    %61 = vector.load %arg13[%c0_37, %c8] : memref<16x32xf32, #tpu.memory_space<vmem>>, vector<16x8xf32>
    %62 = vector.broadcast %48 : vector<16x1xf32> to vector<16x8xf32>
    %63 = arith.mulf %62, %61 : vector<16x8xf32>
    %64 = arith.addf %63, %60 : vector<16x8xf32>
    %c0_38 = arith.constant 0 : index
    %c8_39 = arith.constant 8 : index
    %65 = vector.load %arg13[%c0_38, %c8_39] : memref<16x32xf32, #tpu.memory_space<vmem>>, vector<16x8xf32>
    tpu.vector_store %arg13[%c0_38, %c8_39], %64 {strides = array<i32>} : memref<16x32xf32, #tpu.memory_space<vmem>>, vector<16x8xf32>,
    %c0_40 = arith.constant 0 : index
    %c1_41 = arith.constant 1 : index
    %66 = vector.load %arg11[%c0_40, %c1_41] : memref<16x4xf32, #tpu.memory_space<vmem>>, vector<16x1xf32>
    tpu.vector_store %arg11[%c0_40, %c1_41], %46 {strides = array<i32>} : memref<16x4xf32, #tpu.memory_space<vmem>>, vector<16x1xf32>,
    %67 = vector.extract_strided_slice %8 {offsets = [0, 16], sizes = [16, 8], strides = [1, 1]} : vector<16x32xbf16> to vector<16x8xbf16>
    %68 = vector.extract_strided_slice %10 {offsets = [0, 16], sizes = [16, 8], strides = [1, 1]} : vector<16x32xbf16> to vector<16x8xbf16>
    %cst_42 = arith.constant dense<0.000000e+00> : vector<16x16xf32>
    %69 = tpu.matmul %67, %68, %cst_42 {dimension_numbers = #tpu.dot_dimension_numbers<[1], [1], [0], [0], [0, 0, 1, 0], [], []>} : vector<16x8xbf16>, vector<16x8xbf16>, vector<16x16xf32> -> vector<16x16xf32>
    %c0_43 = arith.constant 0 : index
    %c2 = arith.constant 2 : index
    %70 = vector.load %arg11[%c0_43, %c2] : memref<16x4xf32, #tpu.memory_space<vmem>>, vector<16x1xf32>
    %cst_44 = arith.constant dense<0xFF800000> : vector<16xf32>
    %71 = vector.multi_reduction <maximumf>, %69, %cst_44 [1] : vector<16x16xf32> to vector<16xf32>
    %72 = vector.shape_cast %71 : vector<16xf32> to vector<16x1xf32>
    %73 = arith.maximumf %70, %72 : vector<16x1xf32>
    %74 = arith.subf %70, %73 : vector<16x1xf32>
    %75 = math.exp %74 : vector<16x1xf32>
    %76 = vector.broadcast %73 : vector<16x1xf32> to vector<16x16xf32>
    %77 = arith.subf %69, %76 : vector<16x16xf32>
    %78 = math.exp %77 : vector<16x16xf32>
    %c0_45 = arith.constant 0 : index
    %c2_46 = arith.constant 2 : index
    %79 = vector.load %arg12[%c0_45, %c2_46] : memref<16x4xf32, #tpu.memory_space<vmem>>, vector<16x1xf32>
    %80 = arith.mulf %75, %79 : vector<16x1xf32>
    %cst_47 = arith.constant dense<0.000000e+00> : vector<16xf32>
    %81 = vector.multi_reduction <add>, %78, %cst_47 [1] : vector<16x16xf32> to vector<16xf32>
    %82 = vector.shape_cast %81 : vector<16xf32> to vector<16x1xf32>
    %83 = arith.addf %80, %82 : vector<16x1xf32>
    %c0_48 = arith.constant 0 : index
    %c2_49 = arith.constant 2 : index
    %84 = vector.load %arg12[%c0_48, %c2_49] : memref<16x4xf32, #tpu.memory_space<vmem>>, vector<16x1xf32>
    tpu.vector_store %arg12[%c0_48, %c2_49], %83 {strides = array<i32>} : memref<16x4xf32, #tpu.memory_space<vmem>>, vector<16x1xf32>,
    %85 = arith.truncf %78 : vector<16x16xf32> to vector<16x16xbf16>
    %86 = vector.extract_strided_slice %12 {offsets = [0, 16], sizes = [16, 8], strides = [1, 1]} : vector<16x32xbf16> to vector<16x8xbf16>
    %cst_50 = arith.constant dense<0.000000e+00> : vector<16x8xf32>
    %87 = tpu.matmul %85, %86, %cst_50 {dimension_numbers = #tpu.dot_dimension_numbers<[1], [0], [0], [1], [0, 0, 1, 1], [], []>} : vector<16x16xbf16>, vector<16x8xbf16>, vector<16x8xf32> -> vector<16x8xf32>
    %c0_51 = arith.constant 0 : index
    %c16 = arith.constant 16 : index
    %88 = vector.load %arg13[%c0_51, %c16] : memref<16x32xf32, #tpu.memory_space<vmem>>, vector<16x8xf32>
    %89 = vector.broadcast %75 : vector<16x1xf32> to vector<16x8xf32>
    %90 = arith.mulf %89, %88 : vector<16x8xf32>
    %91 = arith.addf %90, %87 : vector<16x8xf32>
    %c0_52 = arith.constant 0 : index
    %c16_53 = arith.constant 16 : index
    %92 = vector.load %arg13[%c0_52, %c16_53] : memref<16x32xf32, #tpu.memory_space<vmem>>, vector<16x8xf32>
    tpu.vector_store %arg13[%c0_52, %c16_53], %91 {strides = array<i32>} : memref<16x32xf32, #tpu.memory_space<vmem>>, vector<16x8xf32>,
    %c0_54 = arith.constant 0 : index
    %c2_55 = arith.constant 2 : index
    %93 = vector.load %arg11[%c0_54, %c2_55] : memref<16x4xf32, #tpu.memory_space<vmem>>, vector<16x1xf32>
    tpu.vector_store %arg11[%c0_54, %c2_55], %73 {strides = array<i32>} : memref<16x4xf32, #tpu.memory_space<vmem>>, vector<16x1xf32>,
    %94 = vector.extract_strided_slice %8 {offsets = [0, 24], sizes = [16, 8], strides = [1, 1]} : vector<16x32xbf16> to vector<16x8xbf16>
    %95 = vector.extract_strided_slice %10 {offsets = [0, 24], sizes = [16, 8], strides = [1, 1]} : vector<16x32xbf16> to vector<16x8xbf16>
    %cst_56 = arith.constant dense<0.000000e+00> : vector<16x16xf32>
    %96 = tpu.matmul %94, %95, %cst_56 {dimension_numbers = #tpu.dot_dimension_numbers<[1], [1], [0], [0], [0, 0, 1, 0], [], []>} : vector<16x8xbf16>, vector<16x8xbf16>, vector<16x16xf32> -> vector<16x16xf32>
    %c0_57 = arith.constant 0 : index
    %c3 = arith.constant 3 : index
    %97 = vector.load %arg11[%c0_57, %c3] : memref<16x4xf32, #tpu.memory_space<vmem>>, vector<16x1xf32>
    %cst_58 = arith.constant dense<0xFF800000> : vector<16xf32>
    %98 = vector.multi_reduction <maximumf>, %96, %cst_58 [1] : vector<16x16xf32> to vector<16xf32>
    %99 = vector.shape_cast %98 : vector<16xf32> to vector<16x1xf32>
    %100 = arith.maximumf %97, %99 : vector<16x1xf32>
    %101 = arith.subf %97, %100 : vector<16x1xf32>
    %102 = math.exp %101 : vector<16x1xf32>
    %103 = vector.broadcast %100 : vector<16x1xf32> to vector<16x16xf32>
    %104 = arith.subf %96, %103 : vector<16x16xf32>
    %105 = math.exp %104 : vector<16x16xf32>
    %c0_59 = arith.constant 0 : index
    %c3_60 = arith.constant 3 : index
    %106 = vector.load %arg12[%c0_59, %c3_60] : memref<16x4xf32, #tpu.memory_space<vmem>>, vector<16x1xf32>
    %107 = arith.mulf %102, %106 : vector<16x1xf32>
    %cst_61 = arith.constant dense<0.000000e+00> : vector<16xf32>
    %108 = vector.multi_reduction <add>, %105, %cst_61 [1] : vector<16x16xf32> to vector<16xf32>
    %109 = vector.shape_cast %108 : vector<16xf32> to vector<16x1xf32>
    %110 = arith.addf %107, %109 : vector<16x1xf32>
    %c0_62 = arith.constant 0 : index
    %c3_63 = arith.constant 3 : index
    %111 = vector.load %arg12[%c0_62, %c3_63] : memref<16x4xf32, #tpu.memory_space<vmem>>, vector<16x1xf32>
    tpu.vector_store %arg12[%c0_62, %c3_63], %110 {strides = array<i32>} : memref<16x4xf32, #tpu.memory_space<vmem>>, vector<16x1xf32>,
    %112 = arith.truncf %105 : vector<16x16xf32> to vector<16x16xbf16>
    %113 = vector.extract_strided_slice %12 {offsets = [0, 24], sizes = [16, 8], strides = [1, 1]} : vector<16x32xbf16> to vector<16x8xbf16>
    %cst_64 = arith.constant dense<0.000000e+00> : vector<16x8xf32>
    %114 = tpu.matmul %112, %113, %cst_64 {dimension_numbers = #tpu.dot_dimension_numbers<[1], [0], [0], [1], [0, 0, 1, 1], [], []>} : vector<16x16xbf16>, vector<16x8xbf16>, vector<16x8xf32> -> vector<16x8xf32>
    %c0_65 = arith.constant 0 : index
    %c24 = arith.constant 24 : index
    %115 = vector.load %arg13[%c0_65, %c24] : memref<16x32xf32, #tpu.memory_space<vmem>>, vector<16x8xf32>
    %116 = vector.broadcast %102 : vector<16x1xf32> to vector<16x8xf32>
    %117 = arith.mulf %116, %115 : vector<16x8xf32>
    %118 = arith.addf %117, %114 : vector<16x8xf32>
    %c0_66 = arith.constant 0 : index
    %c24_67 = arith.constant 24 : index
    %119 = vector.load %arg13[%c0_66, %c24_67] : memref<16x32xf32, #tpu.memory_space<vmem>>, vector<16x8xf32>
    tpu.vector_store %arg13[%c0_66, %c24_67], %118 {strides = array<i32>} : memref<16x32xf32, #tpu.memory_space<vmem>>, vector<16x8xf32>,
    %c0_68 = arith.constant 0 : index
    %c3_69 = arith.constant 3 : index
    %120 = vector.load %arg11[%c0_68, %c3_69] : memref<16x4xf32, #tpu.memory_space<vmem>>, vector<16x1xf32>
    tpu.vector_store %arg11[%c0_68, %c3_69], %100 {strides = array<i32>} : memref<16x4xf32, #tpu.memory_space<vmem>>, vector<16x1xf32>,
    %c0_i32_70 = arith.constant 0 : i32
    %121 = arith.cmpi eq, %arg3, %c0_i32_70 : i32
    %122 = arith.extui %121 : i1 to i32
    %c0_i32_71 = arith.constant 0 : i32
    %123 = arith.cmpi ne, %122, %c0_i32_71 : i32
    scf.if %123 {
      %c0_72 = arith.constant 0 : index
      %c0_73 = arith.constant 0 : index
      %c0_74 = arith.constant 0 : index
      %124 = vector.load %arg9[%c0_72, %c0_73, %c0_74] : memref<1x1x8xi32, #tpu.memory_space<vmem>>, vector<1x1x8xi32>
      %125 = vector.shape_cast %124 : vector<1x1x8xi32> to vector<1x8xi32>
      %c0_i32_75 = arith.constant 0 : i32
      %126 = vector.broadcast %c0_i32_75 : i32 to vector<1x8xi32>
      %127 = arith.cmpi sgt, %125, %126 : vector<1x8xi32>
      %cst_76 = arith.constant 0.000000e+00 : f32
      %cst_77 = arith.constant -1.000000e+09 : f32
      %128 = vector.broadcast %cst_76 : f32 to vector<1x8xf32>
      %129 = vector.broadcast %cst_77 : f32 to vector<1x8xf32>
      %130 = arith.select %127, %128, %129 : vector<1x8xi1>, vector<1x8xf32>
      %c0_78 = arith.constant 0 : index
      %c0_79 = arith.constant 0 : index
      %c0_80 = arith.constant 0 : index
      %c0_81 = arith.constant 0 : index
      %131 = vector.load %arg7[%c0_78, %c0_79, %c0_80, %c0_81] : memref<1x1x8x32xbf16, #tpu.memory_space<vmem>>, vector<1x1x8x32xbf16>
      %132 = vector.shape_cast %131 : vector<1x1x8x32xbf16> to vector<8x32xbf16>
      %c0_82 = arith.constant 0 : index
      %c0_83 = arith.constant 0 : index
      %c0_84 = arith.constant 0 : index
      %c0_85 = arith.constant 0 : index
      %133 = vector.load %arg8[%c0_82, %c0_83, %c0_84, %c0_85] : memref<1x1x8x32xbf16, #tpu.memory_space<vmem>>, vector<1x1x8x32xbf16>
      %134 = vector.shape_cast %133 : vector<1x1x8x32xbf16> to vector<8x32xbf16>
      %135 = vector.extract_strided_slice %8 {offsets = [0, 0], sizes = [16, 8], strides = [1, 1]} : vector<16x32xbf16> to vector<16x8xbf16>
      %136 = vector.extract_strided_slice %132 {offsets = [0, 0], sizes = [8, 8], strides = [1, 1]} : vector<8x32xbf16> to vector<8x8xbf16>
      %cst_86 = arith.constant dense<0.000000e+00> : vector<16x8xf32>
      %137 = tpu.matmul %135, %136, %cst_86 {dimension_numbers = #tpu.dot_dimension_numbers<[1], [1], [0], [0], [0, 0, 1, 0], [], []>} : vector<16x8xbf16>, vector<8x8xbf16>, vector<16x8xf32> -> vector<16x8xf32>
      %138 = vector.broadcast %130 : vector<1x8xf32> to vector<16x8xf32>
      %139 = arith.addf %137, %138 : vector<16x8xf32>
      %c0_87 = arith.constant 0 : index
      %c0_88 = arith.constant 0 : index
      %140 = vector.load %arg11[%c0_87, %c0_88] : memref<16x4xf32, #tpu.memory_space<vmem>>, vector<16x1xf32>
      %cst_89 = arith.constant dense<0xFF800000> : vector<16xf32>
      %141 = vector.multi_reduction <maximumf>, %139, %cst_89 [1] : vector<16x8xf32> to vector<16xf32>
      %142 = vector.shape_cast %141 : vector<16xf32> to vector<16x1xf32>
      %143 = arith.maximumf %140, %142 : vector<16x1xf32>
      %144 = arith.subf %140, %143 : vector<16x1xf32>
      %145 = math.exp %144 : vector<16x1xf32>
      %146 = vector.broadcast %143 : vector<16x1xf32> to vector<16x8xf32>
      %147 = arith.subf %139, %146 : vector<16x8xf32>
      %148 = math.exp %147 : vector<16x8xf32>
      %c0_90 = arith.constant 0 : index
      %c0_91 = arith.constant 0 : index
      %149 = vector.load %arg12[%c0_90, %c0_91] : memref<16x4xf32, #tpu.memory_space<vmem>>, vector<16x1xf32>
      %150 = arith.mulf %145, %149 : vector<16x1xf32>
      %cst_92 = arith.constant dense<0.000000e+00> : vector<16xf32>
      %151 = vector.multi_reduction <add>, %148, %cst_92 [1] : vector<16x8xf32> to vector<16xf32>
      %152 = vector.shape_cast %151 : vector<16xf32> to vector<16x1xf32>
      %153 = arith.addf %150, %152 : vector<16x1xf32>
      %c0_93 = arith.constant 0 : index
      %c0_94 = arith.constant 0 : index
      %154 = vector.load %arg12[%c0_93, %c0_94] : memref<16x4xf32, #tpu.memory_space<vmem>>, vector<16x1xf32>
      tpu.vector_store %arg12[%c0_93, %c0_94], %153 {strides = array<i32>} : memref<16x4xf32, #tpu.memory_space<vmem>>, vector<16x1xf32>,
      %155 = arith.truncf %148 : vector<16x8xf32> to vector<16x8xbf16>
      %156 = vector.extract_strided_slice %134 {offsets = [0, 0], sizes = [8, 8], strides = [1, 1]} : vector<8x32xbf16> to vector<8x8xbf16>
      %cst_95 = arith.constant dense<0.000000e+00> : vector<16x8xf32>
      %157 = tpu.matmul %155, %156, %cst_95 {dimension_numbers = #tpu.dot_dimension_numbers<[1], [0], [0], [1], [0, 0, 1, 1], [], []>} : vector<16x8xbf16>, vector<8x8xbf16>, vector<16x8xf32> -> vector<16x8xf32>
      %c0_96 = arith.constant 0 : index
      %c0_97 = arith.constant 0 : index
      %158 = vector.load %arg13[%c0_96, %c0_97] : memref<16x32xf32, #tpu.memory_space<vmem>>, vector<16x8xf32>
      %159 = vector.broadcast %145 : vector<16x1xf32> to vector<16x8xf32>
      %160 = arith.mulf %159, %158 : vector<16x8xf32>
      %161 = arith.addf %160, %157 : vector<16x8xf32>
      %c0_98 = arith.constant 0 : index
      %c0_99 = arith.constant 0 : index
      %162 = vector.load %arg13[%c0_98, %c0_99] : memref<16x32xf32, #tpu.memory_space<vmem>>, vector<16x8xf32>
      tpu.vector_store %arg13[%c0_98, %c0_99], %161 {strides = array<i32>} : memref<16x32xf32, #tpu.memory_space<vmem>>, vector<16x8xf32>,
      %c0_100 = arith.constant 0 : index
      %c0_101 = arith.constant 0 : index
      %163 = vector.load %arg11[%c0_100, %c0_101] : memref<16x4xf32, #tpu.memory_space<vmem>>, vector<16x1xf32>
      tpu.vector_store %arg11[%c0_100, %c0_101], %143 {strides = array<i32>} : memref<16x4xf32, #tpu.memory_space<vmem>>, vector<16x1xf32>,
      %164 = vector.extract_strided_slice %8 {offsets = [0, 8], sizes = [16, 8], strides = [1, 1]} : vector<16x32xbf16> to vector<16x8xbf16>
      %165 = vector.extract_strided_slice %132 {offsets = [0, 8], sizes = [8, 8], strides = [1, 1]} : vector<8x32xbf16> to vector<8x8xbf16>
      %cst_102 = arith.constant dense<0.000000e+00> : vector<16x8xf32>
      %166 = tpu.matmul %164, %165, %cst_102 {dimension_numbers = #tpu.dot_dimension_numbers<[1], [1], [0], [0], [0, 0, 1, 0], [], []>} : vector<16x8xbf16>, vector<8x8xbf16>, vector<16x8xf32> -> vector<16x8xf32>
      %167 = vector.broadcast %130 : vector<1x8xf32> to vector<16x8xf32>
      %168 = arith.addf %166, %167 : vector<16x8xf32>
      %c0_103 = arith.constant 0 : index
      %c1_104 = arith.constant 1 : index
      %169 = vector.load %arg11[%c0_103, %c1_104] : memref<16x4xf32, #tpu.memory_space<vmem>>, vector<16x1xf32>
      %cst_105 = arith.constant dense<0xFF800000> : vector<16xf32>
      %170 = vector.multi_reduction <maximumf>, %168, %cst_105 [1] : vector<16x8xf32> to vector<16xf32>
      %171 = vector.shape_cast %170 : vector<16xf32> to vector<16x1xf32>
      %172 = arith.maximumf %169, %171 : vector<16x1xf32>
      %173 = arith.subf %169, %172 : vector<16x1xf32>
      %174 = math.exp %173 : vector<16x1xf32>
      %175 = vector.broadcast %172 : vector<16x1xf32> to vector<16x8xf32>
      %176 = arith.subf %168, %175 : vector<16x8xf32>
      %177 = math.exp %176 : vector<16x8xf32>
      %c0_106 = arith.constant 0 : index
      %c1_107 = arith.constant 1 : index
      %178 = vector.load %arg12[%c0_106, %c1_107] : memref<16x4xf32, #tpu.memory_space<vmem>>, vector<16x1xf32>
      %179 = arith.mulf %174, %178 : vector<16x1xf32>
      %cst_108 = arith.constant dense<0.000000e+00> : vector<16xf32>
      %180 = vector.multi_reduction <add>, %177, %cst_108 [1] : vector<16x8xf32> to vector<16xf32>
      %181 = vector.shape_cast %180 : vector<16xf32> to vector<16x1xf32>
      %182 = arith.addf %179, %181 : vector<16x1xf32>
      %c0_109 = arith.constant 0 : index
      %c1_110 = arith.constant 1 : index
      %183 = vector.load %arg12[%c0_109, %c1_110] : memref<16x4xf32, #tpu.memory_space<vmem>>, vector<16x1xf32>
      tpu.vector_store %arg12[%c0_109, %c1_110], %182 {strides = array<i32>} : memref<16x4xf32, #tpu.memory_space<vmem>>, vector<16x1xf32>,
      %184 = arith.truncf %177 : vector<16x8xf32> to vector<16x8xbf16>
      %185 = vector.extract_strided_slice %134 {offsets = [0, 8], sizes = [8, 8], strides = [1, 1]} : vector<8x32xbf16> to vector<8x8xbf16>
      %cst_111 = arith.constant dense<0.000000e+00> : vector<16x8xf32>
      %186 = tpu.matmul %184, %185, %cst_111 {dimension_numbers = #tpu.dot_dimension_numbers<[1], [0], [0], [1], [0, 0, 1, 1], [], []>} : vector<16x8xbf16>, vector<8x8xbf16>, vector<16x8xf32> -> vector<16x8xf32>
      %c0_112 = arith.constant 0 : index
      %c8_113 = arith.constant 8 : index
      %187 = vector.load %arg13[%c0_112, %c8_113] : memref<16x32xf32, #tpu.memory_space<vmem>>, vector<16x8xf32>
      %188 = vector.broadcast %174 : vector<16x1xf32> to vector<16x8xf32>
      %189 = arith.mulf %188, %187 : vector<16x8xf32>
      %190 = arith.addf %189, %186 : vector<16x8xf32>
      %c0_114 = arith.constant 0 : index
      %c8_115 = arith.constant 8 : index
      %191 = vector.load %arg13[%c0_114, %c8_115] : memref<16x32xf32, #tpu.memory_space<vmem>>, vector<16x8xf32>
      tpu.vector_store %arg13[%c0_114, %c8_115], %190 {strides = array<i32>} : memref<16x32xf32, #tpu.memory_space<vmem>>, vector<16x8xf32>,
      %c0_116 = arith.constant 0 : index
      %c1_117 = arith.constant 1 : index
      %192 = vector.load %arg11[%c0_116, %c1_117] : memref<16x4xf32, #tpu.memory_space<vmem>>, vector<16x1xf32>
      tpu.vector_store %arg11[%c0_116, %c1_117], %172 {strides = array<i32>} : memref<16x4xf32, #tpu.memory_space<vmem>>, vector<16x1xf32>,
      %193 = vector.extract_strided_slice %8 {offsets = [0, 16], sizes = [16, 8], strides = [1, 1]} : vector<16x32xbf16> to vector<16x8xbf16>
      %194 = vector.extract_strided_slice %132 {offsets = [0, 16], sizes = [8, 8], strides = [1, 1]} : vector<8x32xbf16> to vector<8x8xbf16>
      %cst_118 = arith.constant dense<0.000000e+00> : vector<16x8xf32>
      %195 = tpu.matmul %193, %194, %cst_118 {dimension_numbers = #tpu.dot_dimension_numbers<[1], [1], [0], [0], [0, 0, 1, 0], [], []>} : vector<16x8xbf16>, vector<8x8xbf16>, vector<16x8xf32> -> vector<16x8xf32>
      %196 = vector.broadcast %130 : vector<1x8xf32> to vector<16x8xf32>
      %197 = arith.addf %195, %196 : vector<16x8xf32>
      %c0_119 = arith.constant 0 : index
      %c2_120 = arith.constant 2 : index
      %198 = vector.load %arg11[%c0_119, %c2_120] : memref<16x4xf32, #tpu.memory_space<vmem>>, vector<16x1xf32>
      %cst_121 = arith.constant dense<0xFF800000> : vector<16xf32>
      %199 = vector.multi_reduction <maximumf>, %197, %cst_121 [1] : vector<16x8xf32> to vector<16xf32>
      %200 = vector.shape_cast %199 : vector<16xf32> to vector<16x1xf32>
      %201 = arith.maximumf %198, %200 : vector<16x1xf32>
      %202 = arith.subf %198, %201 : vector<16x1xf32>
      %203 = math.exp %202 : vector<16x1xf32>
      %204 = vector.broadcast %201 : vector<16x1xf32> to vector<16x8xf32>
      %205 = arith.subf %197, %204 : vector<16x8xf32>
      %206 = math.exp %205 : vector<16x8xf32>
      %c0_122 = arith.constant 0 : index
      %c2_123 = arith.constant 2 : index
      %207 = vector.load %arg12[%c0_122, %c2_123] : memref<16x4xf32, #tpu.memory_space<vmem>>, vector<16x1xf32>
      %208 = arith.mulf %203, %207 : vector<16x1xf32>
      %cst_124 = arith.constant dense<0.000000e+00> : vector<16xf32>
      %209 = vector.multi_reduction <add>, %206, %cst_124 [1] : vector<16x8xf32> to vector<16xf32>
      %210 = vector.shape_cast %209 : vector<16xf32> to vector<16x1xf32>
      %211 = arith.addf %208, %210 : vector<16x1xf32>
      %c0_125 = arith.constant 0 : index
      %c2_126 = arith.constant 2 : index
      %212 = vector.load %arg12[%c0_125, %c2_126] : memref<16x4xf32, #tpu.memory_space<vmem>>, vector<16x1xf32>
      tpu.vector_store %arg12[%c0_125, %c2_126], %211 {strides = array<i32>} : memref<16x4xf32, #tpu.memory_space<vmem>>, vector<16x1xf32>,
      %213 = arith.truncf %206 : vector<16x8xf32> to vector<16x8xbf16>
      %214 = vector.extract_strided_slice %134 {offsets = [0, 16], sizes = [8, 8], strides = [1, 1]} : vector<8x32xbf16> to vector<8x8xbf16>
      %cst_127 = arith.constant dense<0.000000e+00> : vector<16x8xf32>
      %215 = tpu.matmul %213, %214, %cst_127 {dimension_numbers = #tpu.dot_dimension_numbers<[1], [0], [0], [1], [0, 0, 1, 1], [], []>} : vector<16x8xbf16>, vector<8x8xbf16>, vector<16x8xf32> -> vector<16x8xf32>
      %c0_128 = arith.constant 0 : index
      %c16_129 = arith.constant 16 : index
      %216 = vector.load %arg13[%c0_128, %c16_129] : memref<16x32xf32, #tpu.memory_space<vmem>>, vector<16x8xf32>
      %217 = vector.broadcast %203 : vector<16x1xf32> to vector<16x8xf32>
      %218 = arith.mulf %217, %216 : vector<16x8xf32>
      %219 = arith.addf %218, %215 : vector<16x8xf32>
      %c0_130 = arith.constant 0 : index
      %c16_131 = arith.constant 16 : index
      %220 = vector.load %arg13[%c0_130, %c16_131] : memref<16x32xf32, #tpu.memory_space<vmem>>, vector<16x8xf32>
      tpu.vector_store %arg13[%c0_130, %c16_131], %219 {strides = array<i32>} : memref<16x32xf32, #tpu.memory_space<vmem>>, vector<16x8xf32>,
      %c0_132 = arith.constant 0 : index
      %c2_133 = arith.constant 2 : index
      %221 = vector.load %arg11[%c0_132, %c2_133] : memref<16x4xf32, #tpu.memory_space<vmem>>, vector<16x1xf32>
      tpu.vector_store %arg11[%c0_132, %c2_133], %201 {strides = array<i32>} : memref<16x4xf32, #tpu.memory_space<vmem>>, vector<16x1xf32>,
      %222 = vector.extract_strided_slice %8 {offsets = [0, 24], sizes = [16, 8], strides = [1, 1]} : vector<16x32xbf16> to vector<16x8xbf16>
      %223 = vector.extract_strided_slice %132 {offsets = [0, 24], sizes = [8, 8], strides = [1, 1]} : vector<8x32xbf16> to vector<8x8xbf16>
      %cst_134 = arith.constant dense<0.000000e+00> : vector<16x8xf32>
      %224 = tpu.matmul %222, %223, %cst_134 {dimension_numbers = #tpu.dot_dimension_numbers<[1], [1], [0], [0], [0, 0, 1, 0], [], []>} : vector<16x8xbf16>, vector<8x8xbf16>, vector<16x8xf32> -> vector<16x8xf32>
      %225 = vector.broadcast %130 : vector<1x8xf32> to vector<16x8xf32>
      %226 = arith.addf %224, %225 : vector<16x8xf32>
      %c0_135 = arith.constant 0 : index
      %c3_136 = arith.constant 3 : index
      %227 = vector.load %arg11[%c0_135, %c3_136] : memref<16x4xf32, #tpu.memory_space<vmem>>, vector<16x1xf32>
      %cst_137 = arith.constant dense<0xFF800000> : vector<16xf32>
      %228 = vector.multi_reduction <maximumf>, %226, %cst_137 [1] : vector<16x8xf32> to vector<16xf32>
      %229 = vector.shape_cast %228 : vector<16xf32> to vector<16x1xf32>
      %230 = arith.maximumf %227, %229 : vector<16x1xf32>
      %231 = arith.subf %227, %230 : vector<16x1xf32>
      %232 = math.exp %231 : vector<16x1xf32>
      %233 = vector.broadcast %230 : vector<16x1xf32> to vector<16x8xf32>
      %234 = arith.subf %226, %233 : vector<16x8xf32>
      %235 = math.exp %234 : vector<16x8xf32>
      %c0_138 = arith.constant 0 : index
      %c3_139 = arith.constant 3 : index
      %236 = vector.load %arg12[%c0_138, %c3_139] : memref<16x4xf32, #tpu.memory_space<vmem>>, vector<16x1xf32>
      %237 = arith.mulf %232, %236 : vector<16x1xf32>
      %cst_140 = arith.constant dense<0.000000e+00> : vector<16xf32>
      %238 = vector.multi_reduction <add>, %235, %cst_140 [1] : vector<16x8xf32> to vector<16xf32>
      %239 = vector.shape_cast %238 : vector<16xf32> to vector<16x1xf32>
      %240 = arith.addf %237, %239 : vector<16x1xf32>
      %c0_141 = arith.constant 0 : index
      %c3_142 = arith.constant 3 : index
      %241 = vector.load %arg12[%c0_141, %c3_142] : memref<16x4xf32, #tpu.memory_space<vmem>>, vector<16x1xf32>
      tpu.vector_store %arg12[%c0_141, %c3_142], %240 {strides = array<i32>} : memref<16x4xf32, #tpu.memory_space<vmem>>, vector<16x1xf32>,
      %242 = arith.truncf %235 : vector<16x8xf32> to vector<16x8xbf16>
      %243 = vector.extract_strided_slice %134 {offsets = [0, 24], sizes = [8, 8], strides = [1, 1]} : vector<8x32xbf16> to vector<8x8xbf16>
      %cst_143 = arith.constant dense<0.000000e+00> : vector<16x8xf32>
      %244 = tpu.matmul %242, %243, %cst_143 {dimension_numbers = #tpu.dot_dimension_numbers<[1], [0], [0], [1], [0, 0, 1, 1], [], []>} : vector<16x8xbf16>, vector<8x8xbf16>, vector<16x8xf32> -> vector<16x8xf32>
      %c0_144 = arith.constant 0 : index
      %c24_145 = arith.constant 24 : index
      %245 = vector.load %arg13[%c0_144, %c24_145] : memref<16x32xf32, #tpu.memory_space<vmem>>, vector<16x8xf32>
      %246 = vector.broadcast %232 : vector<16x1xf32> to vector<16x8xf32>
      %247 = arith.mulf %246, %245 : vector<16x8xf32>
      %248 = arith.addf %247, %244 : vector<16x8xf32>
      %c0_146 = arith.constant 0 : index
      %c24_147 = arith.constant 24 : index
      %249 = vector.load %arg13[%c0_146, %c24_147] : memref<16x32xf32, #tpu.memory_space<vmem>>, vector<16x8xf32>
      tpu.vector_store %arg13[%c0_146, %c24_147], %248 {strides = array<i32>} : memref<16x32xf32, #tpu.memory_space<vmem>>, vector<16x8xf32>,
      %c0_148 = arith.constant 0 : index
      %c3_149 = arith.constant 3 : index
      %250 = vector.load %arg11[%c0_148, %c3_149] : memref<16x4xf32, #tpu.memory_space<vmem>>, vector<16x1xf32>
      tpu.vector_store %arg11[%c0_148, %c3_149], %230 {strides = array<i32>} : memref<16x4xf32, #tpu.memory_space<vmem>>, vector<16x1xf32>,
      %c0_150 = arith.constant 0 : index
      %c0_151 = arith.constant 0 : index
      %251 = vector.load %arg12[%c0_150, %c0_151] : memref<16x4xf32, #tpu.memory_space<vmem>>, vector<16x4xf32>
      %252 = tpu.reciprocal %251 {approx = true} : vector<16x4xf32> -> vector<16x4xf32>
      %c0_152 = arith.constant 0 : index
      %c0_153 = arith.constant 0 : index
      %253 = vector.load %arg13[%c0_152, %c0_153] : memref<16x32xf32, #tpu.memory_space<vmem>>, vector<16x8xf32>
      %254 = vector.extract_strided_slice %252 {offsets = [0, 0], sizes = [16, 1], strides = [1, 1]} : vector<16x4xf32> to vector<16x1xf32>
      %255 = vector.broadcast %254 : vector<16x1xf32> to vector<16x8xf32>
      %256 = arith.mulf %253, %255 : vector<16x8xf32>
      %c0_154 = arith.constant 0 : index
      %c0_155 = arith.constant 0 : index
      %257 = vector.load %arg13[%c0_154, %c0_155] : memref<16x32xf32, #tpu.memory_space<vmem>>, vector<16x8xf32>
      tpu.vector_store %arg13[%c0_154, %c0_155], %256 {strides = array<i32>} : memref<16x32xf32, #tpu.memory_space<vmem>>, vector<16x8xf32>,
      %c0_156 = arith.constant 0 : index
      %c8_157 = arith.constant 8 : index
      %258 = vector.load %arg13[%c0_156, %c8_157] : memref<16x32xf32, #tpu.memory_space<vmem>>, vector<16x8xf32>
      %259 = vector.extract_strided_slice %252 {offsets = [0, 1], sizes = [16, 1], strides = [1, 1]} : vector<16x4xf32> to vector<16x1xf32>
      %260 = vector.broadcast %259 : vector<16x1xf32> to vector<16x8xf32>
      %261 = arith.mulf %258, %260 : vector<16x8xf32>
      %c0_158 = arith.constant 0 : index
      %c8_159 = arith.constant 8 : index
      %262 = vector.load %arg13[%c0_158, %c8_159] : memref<16x32xf32, #tpu.memory_space<vmem>>, vector<16x8xf32>
      tpu.vector_store %arg13[%c0_158, %c8_159], %261 {strides = array<i32>} : memref<16x32xf32, #tpu.memory_space<vmem>>, vector<16x8xf32>,
      %c0_160 = arith.constant 0 : index
      %c16_161 = arith.constant 16 : index
      %263 = vector.load %arg13[%c0_160, %c16_161] : memref<16x32xf32, #tpu.memory_space<vmem>>, vector<16x8xf32>
      %264 = vector.extract_strided_slice %252 {offsets = [0, 2], sizes = [16, 1], strides = [1, 1]} : vector<16x4xf32> to vector<16x1xf32>
      %265 = vector.broadcast %264 : vector<16x1xf32> to vector<16x8xf32>
      %266 = arith.mulf %263, %265 : vector<16x8xf32>
      %c0_162 = arith.constant 0 : index
      %c16_163 = arith.constant 16 : index
      %267 = vector.load %arg13[%c0_162, %c16_163] : memref<16x32xf32, #tpu.memory_space<vmem>>, vector<16x8xf32>
      tpu.vector_store %arg13[%c0_162, %c16_163], %266 {strides = array<i32>} : memref<16x32xf32, #tpu.memory_space<vmem>>, vector<16x8xf32>,
      %c0_164 = arith.constant 0 : index
      %c24_165 = arith.constant 24 : index
      %268 = vector.load %arg13[%c0_164, %c24_165] : memref<16x32xf32, #tpu.memory_space<vmem>>, vector<16x8xf32>
      %269 = vector.extract_strided_slice %252 {offsets = [0, 3], sizes = [16, 1], strides = [1, 1]} : vector<16x4xf32> to vector<16x1xf32>
      %270 = vector.broadcast %269 : vector<16x1xf32> to vector<16x8xf32>
      %271 = arith.mulf %268, %270 : vector<16x8xf32>
      %c0_166 = arith.constant 0 : index
      %c24_167 = arith.constant 24 : index
      %272 = vector.load %arg13[%c0_166, %c24_167] : memref<16x32xf32, #tpu.memory_space<vmem>>, vector<16x8xf32>
      tpu.vector_store %arg13[%c0_166, %c24_167], %271 {strides = array<i32>} : memref<16x32xf32, #tpu.memory_space<vmem>>, vector<16x8xf32>,
      %c0_168 = arith.constant 0 : index
      %c0_169 = arith.constant 0 : index
      %273 = vector.load %arg13[%c0_168, %c0_169] : memref<16x32xf32, #tpu.memory_space<vmem>>, vector<16x32xf32>
      %274 = arith.truncf %273 : vector<16x32xf32> to vector<16x32xbf16>
      %c0_170 = arith.constant 0 : index
      %c0_171 = arith.constant 0 : index
      %c0_172 = arith.constant 0 : index
      %275 = vector.load %arg10[%c0_170, %c0_171, %c0_172] : memref<1x16x32xbf16, #tpu.memory_space<vmem>>, vector<1x16x32xbf16>
      %276 = vector.shape_cast %275 : vector<1x16x32xbf16> to vector<16x32xbf16>
      %277 = vector.shape_cast %274 : vector<16x32xbf16> to vector<1x16x32xbf16>
      tpu.vector_store %arg10[%c0_170, %c0_171, %c0_172], %277 {strides = array<i32>} : memref<1x16x32xbf16, #tpu.memory_space<vmem>>, vector<1x16x32xbf16>,
    } else {
    }
    return
  }
  func.func @transform_0(%arg0: i32, %arg1: i32, %arg2: i32, %arg3: i32) -> (i32, i32, i32, i32) {
    %c0_i32 = arith.constant 0 : i32
    %c0_i32_0 = arith.constant 0 : i32
    return %c0_i32, %arg0, %arg2, %arg1 : i32, i32, i32, i32
  }
  func.func @transform_1(%arg0: i32, %arg1: i32, %arg2: i32, %arg3: i32) -> (i32, i32, i32, i32) {
    %c1_i32 = arith.constant 1 : i32
    %c0_i32 = arith.constant 0 : i32
    return %c1_i32, %arg0, %arg3, %arg1 : i32, i32, i32, i32
  }
  func.func @transform_2(%arg0: i32, %arg1: i32, %arg2: i32, %arg3: i32) -> (i32, i32, i32, i32) {
    %c2_i32 = arith.constant 2 : i32
    %c0_i32 = arith.constant 0 : i32
    return %c2_i32, %arg0, %arg3, %arg1 : i32, i32, i32, i32
  }
  func.func @transform_3(%arg0: i32, %arg1: i32, %arg2: i32, %arg3: i32) -> (i32, i32, i32, i32) {
    %c1_i32 = arith.constant 1 : i32
    %c0_i32 = arith.constant 0 : i32
    %c0_i32_0 = arith.constant 0 : i32
    return %c1_i32, %arg0, %c0_i32, %arg1 : i32, i32, i32, i32
  }
  func.func @transform_4(%arg0: i32, %arg1: i32, %arg2: i32, %arg3: i32) -> (i32, i32, i32, i32) {
    %c2_i32 = arith.constant 2 : i32
    %c0_i32 = arith.constant 0 : i32
    %c0_i32_0 = arith.constant 0 : i32
    return %c2_i32, %arg0, %c0_i32, %arg1 : i32, i32, i32, i32
  }
  func.func @transform_5(%arg0: i32, %arg1: i32, %arg2: i32, %arg3: i32) -> (i32, i32, i32) {
    %c0_i32 = arith.constant 0 : i32
    %c0_i32_0 = arith.constant 0 : i32
    %c0_i32_1 = arith.constant 0 : i32
    return %arg0, %c0_i32, %c0_i32_0 : i32, i32, i32
  }
  func.func @transform_6(%arg0: i32, %arg1: i32, %arg2: i32, %arg3: i32) -> (i32, i32, i32) {
    %c0_i32 = arith.constant 0 : i32
    return %arg0, %arg2, %arg1 : i32, i32, i32
  }
}

module attributes {stable_mosaic.version = 11 : i64} {
  func.func @_flash_kernel(%arg0: i32, %arg1: i32, %arg2: i32, %arg3: i32, %arg4: memref<1x1x16x32xbf16, #tpu.memory_space<vmem>>, %arg5: memref<1x1x8x32xbf16, #tpu.memory_space<vmem>>, %arg6: memref<1x1x8x32xbf16, #tpu.memory_space<vmem>>, %arg7: memref<1x16x32xf32, #tpu.memory_space<vmem>>, %arg8: memref<1xf32, #tpu.memory_space<smem>>, %arg9: memref<1x16x32xf32, #tpu.memory_space<vmem>>, %arg10: memref<16x4xf32, #tpu.memory_space<vmem>>, %arg11: memref<16x4xf32, #tpu.memory_space<vmem>>, %arg12: memref<16x32xf32, #tpu.memory_space<vmem>>) attributes {dimension_semantics = [#tpu.dimension_semantics<parallel>, #tpu.dimension_semantics<parallel>, #tpu.dimension_semantics<parallel>, #tpu.dimension_semantics<arbitrary>], iteration_bounds = array<i64: 2, 1, 1, 1>, scalar_prefetch = 0 : i64, scratch_operands = 3 : i64, tpu.core_type = #tpu.core_type<tc>, window_params = [{transform_indices = @transform_0, window_bounds = array<i64: 1, 1, 16, 32>}, {transform_indices = @transform_1, window_bounds = array<i64: 1, 1, 8, 32>}, {transform_indices = @transform_2, window_bounds = array<i64: 1, 1, 8, 32>}, {transform_indices = @transform_3, window_bounds = array<i64: 1, 16, 32>}, {transform_indices = @transform_4, window_bounds = array<i64: 1>}, {transform_indices = @transform_5, window_bounds = array<i64: 1, 16, 32>}]} {
    %c0_i32 = arith.constant 0 : i32
    %0 = arith.cmpi eq, %arg3, %c0_i32 : i32
    %1 = arith.extui %0 : i1 to i32
    %c0_i32_0 = arith.constant 0 : i32
    %2 = arith.cmpi ne, %1, %c0_i32_0 : i32
    scf.if %2 {
      %cst_72 = arith.constant 0xFF800000 : f32
      %124 = vector.broadcast %cst_72 : f32 to vector<16x4xf32>
      %c0_73 = arith.constant 0 : index
      %c0_74 = arith.constant 0 : index
      %125 = vector.load %arg10[%c0_73, %c0_74] : memref<16x4xf32, #tpu.memory_space<vmem>>, vector<16x4xf32>
      tpu.vector_store %arg10[%c0_73, %c0_74], %124 {strides = array<i32>} : memref<16x4xf32, #tpu.memory_space<vmem>>, vector<16x4xf32>,
      %cst_75 = arith.constant 0.000000e+00 : f32
      %126 = vector.broadcast %cst_75 : f32 to vector<16x4xf32>
      %c0_76 = arith.constant 0 : index
      %c0_77 = arith.constant 0 : index
      %127 = vector.load %arg11[%c0_76, %c0_77] : memref<16x4xf32, #tpu.memory_space<vmem>>, vector<16x4xf32>
      tpu.vector_store %arg11[%c0_76, %c0_77], %126 {strides = array<i32>} : memref<16x4xf32, #tpu.memory_space<vmem>>, vector<16x4xf32>,
      %cst_78 = arith.constant 0.000000e+00 : f32
      %128 = vector.broadcast %cst_78 : f32 to vector<16x32xf32>
      %c0_79 = arith.constant 0 : index
      %c0_80 = arith.constant 0 : index
      %129 = vector.load %arg12[%c0_79, %c0_80] : memref<16x32xf32, #tpu.memory_space<vmem>>, vector<16x32xf32>
      tpu.vector_store %arg12[%c0_79, %c0_80], %128 {strides = array<i32>} : memref<16x32xf32, #tpu.memory_space<vmem>>, vector<16x32xf32>,
    } else {
    }
    %c0 = arith.constant 0 : index
    %c0_1 = arith.constant 0 : index
    %c0_2 = arith.constant 0 : index
    %c0_3 = arith.constant 0 : index
    %3 = vector.load %arg4[%c0, %c0_1, %c0_2, %c0_3] : memref<1x1x16x32xbf16, #tpu.memory_space<vmem>>, vector<1x1x16x32xbf16>
    %4 = vector.shape_cast %3 : vector<1x1x16x32xbf16> to vector<16x32xbf16>
    %5 = arith.extf %4 : vector<16x32xbf16> to vector<16x32xf32>
    %cst = arith.constant 0.353553385 : f32
    %6 = vector.broadcast %cst : f32 to vector<16x32xf32>
    %7 = arith.mulf %5, %6 : vector<16x32xf32>
    %8 = arith.truncf %7 : vector<16x32xf32> to vector<16x32xbf16>
    %c0_4 = arith.constant 0 : index
    %c0_5 = arith.constant 0 : index
    %c0_6 = arith.constant 0 : index
    %c0_7 = arith.constant 0 : index
    %9 = vector.load %arg5[%c0_4, %c0_5, %c0_6, %c0_7] : memref<1x1x8x32xbf16, #tpu.memory_space<vmem>>, vector<1x1x8x32xbf16>
    %10 = vector.shape_cast %9 : vector<1x1x8x32xbf16> to vector<8x32xbf16>
    %c0_8 = arith.constant 0 : index
    %c0_9 = arith.constant 0 : index
    %c0_10 = arith.constant 0 : index
    %c0_11 = arith.constant 0 : index
    %11 = vector.load %arg6[%c0_8, %c0_9, %c0_10, %c0_11] : memref<1x1x8x32xbf16, #tpu.memory_space<vmem>>, vector<1x1x8x32xbf16>
    %12 = vector.shape_cast %11 : vector<1x1x8x32xbf16> to vector<8x32xbf16>
    %13 = vector.extract_strided_slice %8 {offsets = [0, 0], sizes = [16, 8], strides = [1, 1]} : vector<16x32xbf16> to vector<16x8xbf16>
    %14 = vector.extract_strided_slice %10 {offsets = [0, 0], sizes = [8, 8], strides = [1, 1]} : vector<8x32xbf16> to vector<8x8xbf16>
    %cst_12 = arith.constant dense<0.000000e+00> : vector<16x8xf32>
    %15 = tpu.matmul %13, %14, %cst_12 {dimension_numbers = #tpu.dot_dimension_numbers<[1], [1], [0], [0], [0, 0, 1, 0], [], []>} : vector<16x8xbf16>, vector<8x8xbf16>, vector<16x8xf32> -> vector<16x8xf32>
    %c0_13 = arith.constant 0 : index
    %c0_14 = arith.constant 0 : index
    %16 = vector.load %arg10[%c0_13, %c0_14] : memref<16x4xf32, #tpu.memory_space<vmem>>, vector<16x1xf32>
    %cst_15 = arith.constant dense<0xFF800000> : vector<16xf32>
    %17 = vector.multi_reduction <maximumf>, %15, %cst_15 [1] : vector<16x8xf32> to vector<16xf32>
    %18 = vector.shape_cast %17 : vector<16xf32> to vector<16x1xf32>
    %19 = arith.maximumf %16, %18 : vector<16x1xf32>
    %20 = arith.subf %16, %19 : vector<16x1xf32>
    %21 = math.exp %20 : vector<16x1xf32>
    %22 = vector.broadcast %19 : vector<16x1xf32> to vector<16x8xf32>
    %23 = arith.subf %15, %22 : vector<16x8xf32>
    %24 = math.exp %23 : vector<16x8xf32>
    %c0_16 = arith.constant 0 : index
    %c0_17 = arith.constant 0 : index
    %25 = vector.load %arg11[%c0_16, %c0_17] : memref<16x4xf32, #tpu.memory_space<vmem>>, vector<16x1xf32>
    %26 = arith.mulf %21, %25 : vector<16x1xf32>
    %cst_18 = arith.constant dense<0.000000e+00> : vector<16xf32>
    %27 = vector.multi_reduction <add>, %24, %cst_18 [1] : vector<16x8xf32> to vector<16xf32>
    %28 = vector.shape_cast %27 : vector<16xf32> to vector<16x1xf32>
    %29 = arith.addf %26, %28 : vector<16x1xf32>
    %c0_19 = arith.constant 0 : index
    %c0_20 = arith.constant 0 : index
    %30 = vector.load %arg11[%c0_19, %c0_20] : memref<16x4xf32, #tpu.memory_space<vmem>>, vector<16x1xf32>
    tpu.vector_store %arg11[%c0_19, %c0_20], %29 {strides = array<i32>} : memref<16x4xf32, #tpu.memory_space<vmem>>, vector<16x1xf32>,
    %31 = arith.truncf %24 : vector<16x8xf32> to vector<16x8xbf16>
    %32 = vector.extract_strided_slice %12 {offsets = [0, 0], sizes = [8, 8], strides = [1, 1]} : vector<8x32xbf16> to vector<8x8xbf16>
    %cst_21 = arith.constant dense<0.000000e+00> : vector<16x8xf32>
    %33 = tpu.matmul %31, %32, %cst_21 {dimension_numbers = #tpu.dot_dimension_numbers<[1], [0], [0], [1], [0, 0, 1, 1], [], []>} : vector<16x8xbf16>, vector<8x8xbf16>, vector<16x8xf32> -> vector<16x8xf32>
    %c0_22 = arith.constant 0 : index
    %c0_23 = arith.constant 0 : index
    %34 = vector.load %arg12[%c0_22, %c0_23] : memref<16x32xf32, #tpu.memory_space<vmem>>, vector<16x8xf32>
    %35 = vector.broadcast %21 : vector<16x1xf32> to vector<16x8xf32>
    %36 = arith.mulf %35, %34 : vector<16x8xf32>
    %37 = arith.addf %36, %33 : vector<16x8xf32>
    %c0_24 = arith.constant 0 : index
    %c0_25 = arith.constant 0 : index
    %38 = vector.load %arg12[%c0_24, %c0_25] : memref<16x32xf32, #tpu.memory_space<vmem>>, vector<16x8xf32>
    tpu.vector_store %arg12[%c0_24, %c0_25], %37 {strides = array<i32>} : memref<16x32xf32, #tpu.memory_space<vmem>>, vector<16x8xf32>,
    %c0_26 = arith.constant 0 : index
    %c0_27 = arith.constant 0 : index
    %39 = vector.load %arg10[%c0_26, %c0_27] : memref<16x4xf32, #tpu.memory_space<vmem>>, vector<16x1xf32>
    tpu.vector_store %arg10[%c0_26, %c0_27], %19 {strides = array<i32>} : memref<16x4xf32, #tpu.memory_space<vmem>>, vector<16x1xf32>,
    %40 = vector.extract_strided_slice %8 {offsets = [0, 8], sizes = [16, 8], strides = [1, 1]} : vector<16x32xbf16> to vector<16x8xbf16>
    %41 = vector.extract_strided_slice %10 {offsets = [0, 8], sizes = [8, 8], strides = [1, 1]} : vector<8x32xbf16> to vector<8x8xbf16>
    %cst_28 = arith.constant dense<0.000000e+00> : vector<16x8xf32>
    %42 = tpu.matmul %40, %41, %cst_28 {dimension_numbers = #tpu.dot_dimension_numbers<[1], [1], [0], [0], [0, 0, 1, 0], [], []>} : vector<16x8xbf16>, vector<8x8xbf16>, vector<16x8xf32> -> vector<16x8xf32>
    %c0_29 = arith.constant 0 : index
    %c1 = arith.constant 1 : index
    %43 = vector.load %arg10[%c0_29, %c1] : memref<16x4xf32, #tpu.memory_space<vmem>>, vector<16x1xf32>
    %cst_30 = arith.constant dense<0xFF800000> : vector<16xf32>
    %44 = vector.multi_reduction <maximumf>, %42, %cst_30 [1] : vector<16x8xf32> to vector<16xf32>
    %45 = vector.shape_cast %44 : vector<16xf32> to vector<16x1xf32>
    %46 = arith.maximumf %43, %45 : vector<16x1xf32>
    %47 = arith.subf %43, %46 : vector<16x1xf32>
    %48 = math.exp %47 : vector<16x1xf32>
    %49 = vector.broadcast %46 : vector<16x1xf32> to vector<16x8xf32>
    %50 = arith.subf %42, %49 : vector<16x8xf32>
    %51 = math.exp %50 : vector<16x8xf32>
    %c0_31 = arith.constant 0 : index
    %c1_32 = arith.constant 1 : index
    %52 = vector.load %arg11[%c0_31, %c1_32] : memref<16x4xf32, #tpu.memory_space<vmem>>, vector<16x1xf32>
    %53 = arith.mulf %48, %52 : vector<16x1xf32>
    %cst_33 = arith.constant dense<0.000000e+00> : vector<16xf32>
    %54 = vector.multi_reduction <add>, %51, %cst_33 [1] : vector<16x8xf32> to vector<16xf32>
    %55 = vector.shape_cast %54 : vector<16xf32> to vector<16x1xf32>
    %56 = arith.addf %53, %55 : vector<16x1xf32>
    %c0_34 = arith.constant 0 : index
    %c1_35 = arith.constant 1 : index
    %57 = vector.load %arg11[%c0_34, %c1_35] : memref<16x4xf32, #tpu.memory_space<vmem>>, vector<16x1xf32>
    tpu.vector_store %arg11[%c0_34, %c1_35], %56 {strides = array<i32>} : memref<16x4xf32, #tpu.memory_space<vmem>>, vector<16x1xf32>,
    %58 = arith.truncf %51 : vector<16x8xf32> to vector<16x8xbf16>
    %59 = vector.extract_strided_slice %12 {offsets = [0, 8], sizes = [8, 8], strides = [1, 1]} : vector<8x32xbf16> to vector<8x8xbf16>
    %cst_36 = arith.constant dense<0.000000e+00> : vector<16x8xf32>
    %60 = tpu.matmul %58, %59, %cst_36 {dimension_numbers = #tpu.dot_dimension_numbers<[1], [0], [0], [1], [0, 0, 1, 1], [], []>} : vector<16x8xbf16>, vector<8x8xbf16>, vector<16x8xf32> -> vector<16x8xf32>
    %c0_37 = arith.constant 0 : index
    %c8 = arith.constant 8 : index
    %61 = vector.load %arg12[%c0_37, %c8] : memref<16x32xf32, #tpu.memory_space<vmem>>, vector<16x8xf32>
    %62 = vector.broadcast %48 : vector<16x1xf32> to vector<16x8xf32>
    %63 = arith.mulf %62, %61 : vector<16x8xf32>
    %64 = arith.addf %63, %60 : vector<16x8xf32>
    %c0_38 = arith.constant 0 : index
    %c8_39 = arith.constant 8 : index
    %65 = vector.load %arg12[%c0_38, %c8_39] : memref<16x32xf32, #tpu.memory_space<vmem>>, vector<16x8xf32>
    tpu.vector_store %arg12[%c0_38, %c8_39], %64 {strides = array<i32>} : memref<16x32xf32, #tpu.memory_space<vmem>>, vector<16x8xf32>,
    %c0_40 = arith.constant 0 : index
    %c1_41 = arith.constant 1 : index
    %66 = vector.load %arg10[%c0_40, %c1_41] : memref<16x4xf32, #tpu.memory_space<vmem>>, vector<16x1xf32>
    tpu.vector_store %arg10[%c0_40, %c1_41], %46 {strides = array<i32>} : memref<16x4xf32, #tpu.memory_space<vmem>>, vector<16x1xf32>,
    %67 = vector.extract_strided_slice %8 {offsets = [0, 16], sizes = [16, 8], strides = [1, 1]} : vector<16x32xbf16> to vector<16x8xbf16>
    %68 = vector.extract_strided_slice %10 {offsets = [0, 16], sizes = [8, 8], strides = [1, 1]} : vector<8x32xbf16> to vector<8x8xbf16>
    %cst_42 = arith.constant dense<0.000000e+00> : vector<16x8xf32>
    %69 = tpu.matmul %67, %68, %cst_42 {dimension_numbers = #tpu.dot_dimension_numbers<[1], [1], [0], [0], [0, 0, 1, 0], [], []>} : vector<16x8xbf16>, vector<8x8xbf16>, vector<16x8xf32> -> vector<16x8xf32>
    %c0_43 = arith.constant 0 : index
    %c2 = arith.constant 2 : index
    %70 = vector.load %arg10[%c0_43, %c2] : memref<16x4xf32, #tpu.memory_space<vmem>>, vector<16x1xf32>
    %cst_44 = arith.constant dense<0xFF800000> : vector<16xf32>
    %71 = vector.multi_reduction <maximumf>, %69, %cst_44 [1] : vector<16x8xf32> to vector<16xf32>
    %72 = vector.shape_cast %71 : vector<16xf32> to vector<16x1xf32>
    %73 = arith.maximumf %70, %72 : vector<16x1xf32>
    %74 = arith.subf %70, %73 : vector<16x1xf32>
    %75 = math.exp %74 : vector<16x1xf32>
    %76 = vector.broadcast %73 : vector<16x1xf32> to vector<16x8xf32>
    %77 = arith.subf %69, %76 : vector<16x8xf32>
    %78 = math.exp %77 : vector<16x8xf32>
    %c0_45 = arith.constant 0 : index
    %c2_46 = arith.constant 2 : index
    %79 = vector.load %arg11[%c0_45, %c2_46] : memref<16x4xf32, #tpu.memory_space<vmem>>, vector<16x1xf32>
    %80 = arith.mulf %75, %79 : vector<16x1xf32>
    %cst_47 = arith.constant dense<0.000000e+00> : vector<16xf32>
    %81 = vector.multi_reduction <add>, %78, %cst_47 [1] : vector<16x8xf32> to vector<16xf32>
    %82 = vector.shape_cast %81 : vector<16xf32> to vector<16x1xf32>
    %83 = arith.addf %80, %82 : vector<16x1xf32>
    %c0_48 = arith.constant 0 : index
    %c2_49 = arith.constant 2 : index
    %84 = vector.load %arg11[%c0_48, %c2_49] : memref<16x4xf32, #tpu.memory_space<vmem>>, vector<16x1xf32>
    tpu.vector_store %arg11[%c0_48, %c2_49], %83 {strides = array<i32>} : memref<16x4xf32, #tpu.memory_space<vmem>>, vector<16x1xf32>,
    %85 = arith.truncf %78 : vector<16x8xf32> to vector<16x8xbf16>
    %86 = vector.extract_strided_slice %12 {offsets = [0, 16], sizes = [8, 8], strides = [1, 1]} : vector<8x32xbf16> to vector<8x8xbf16>
    %cst_50 = arith.constant dense<0.000000e+00> : vector<16x8xf32>
    %87 = tpu.matmul %85, %86, %cst_50 {dimension_numbers = #tpu.dot_dimension_numbers<[1], [0], [0], [1], [0, 0, 1, 1], [], []>} : vector<16x8xbf16>, vector<8x8xbf16>, vector<16x8xf32> -> vector<16x8xf32>
    %c0_51 = arith.constant 0 : index
    %c16 = arith.constant 16 : index
    %88 = vector.load %arg12[%c0_51, %c16] : memref<16x32xf32, #tpu.memory_space<vmem>>, vector<16x8xf32>
    %89 = vector.broadcast %75 : vector<16x1xf32> to vector<16x8xf32>
    %90 = arith.mulf %89, %88 : vector<16x8xf32>
    %91 = arith.addf %90, %87 : vector<16x8xf32>
    %c0_52 = arith.constant 0 : index
    %c16_53 = arith.constant 16 : index
    %92 = vector.load %arg12[%c0_52, %c16_53] : memref<16x32xf32, #tpu.memory_space<vmem>>, vector<16x8xf32>
    tpu.vector_store %arg12[%c0_52, %c16_53], %91 {strides = array<i32>} : memref<16x32xf32, #tpu.memory_space<vmem>>, vector<16x8xf32>,
    %c0_54 = arith.constant 0 : index
    %c2_55 = arith.constant 2 : index
    %93 = vector.load %arg10[%c0_54, %c2_55] : memref<16x4xf32, #tpu.memory_space<vmem>>, vector<16x1xf32>
    tpu.vector_store %arg10[%c0_54, %c2_55], %73 {strides = array<i32>} : memref<16x4xf32, #tpu.memory_space<vmem>>, vector<16x1xf32>,
    %94 = vector.extract_strided_slice %8 {offsets = [0, 24], sizes = [16, 8], strides = [1, 1]} : vector<16x32xbf16> to vector<16x8xbf16>
    %95 = vector.extract_strided_slice %10 {offsets = [0, 24], sizes = [8, 8], strides = [1, 1]} : vector<8x32xbf16> to vector<8x8xbf16>
    %cst_56 = arith.constant dense<0.000000e+00> : vector<16x8xf32>
    %96 = tpu.matmul %94, %95, %cst_56 {dimension_numbers = #tpu.dot_dimension_numbers<[1], [1], [0], [0], [0, 0, 1, 0], [], []>} : vector<16x8xbf16>, vector<8x8xbf16>, vector<16x8xf32> -> vector<16x8xf32>
    %c0_57 = arith.constant 0 : index
    %c3 = arith.constant 3 : index
    %97 = vector.load %arg10[%c0_57, %c3] : memref<16x4xf32, #tpu.memory_space<vmem>>, vector<16x1xf32>
    %cst_58 = arith.constant dense<0xFF800000> : vector<16xf32>
    %98 = vector.multi_reduction <maximumf>, %96, %cst_58 [1] : vector<16x8xf32> to vector<16xf32>
    %99 = vector.shape_cast %98 : vector<16xf32> to vector<16x1xf32>
    %100 = arith.maximumf %97, %99 : vector<16x1xf32>
    %101 = arith.subf %97, %100 : vector<16x1xf32>
    %102 = math.exp %101 : vector<16x1xf32>
    %103 = vector.broadcast %100 : vector<16x1xf32> to vector<16x8xf32>
    %104 = arith.subf %96, %103 : vector<16x8xf32>
    %105 = math.exp %104 : vector<16x8xf32>
    %c0_59 = arith.constant 0 : index
    %c3_60 = arith.constant 3 : index
    %106 = vector.load %arg11[%c0_59, %c3_60] : memref<16x4xf32, #tpu.memory_space<vmem>>, vector<16x1xf32>
    %107 = arith.mulf %102, %106 : vector<16x1xf32>
    %cst_61 = arith.constant dense<0.000000e+00> : vector<16xf32>
    %108 = vector.multi_reduction <add>, %105, %cst_61 [1] : vector<16x8xf32> to vector<16xf32>
    %109 = vector.shape_cast %108 : vector<16xf32> to vector<16x1xf32>
    %110 = arith.addf %107, %109 : vector<16x1xf32>
    %c0_62 = arith.constant 0 : index
    %c3_63 = arith.constant 3 : index
    %111 = vector.load %arg11[%c0_62, %c3_63] : memref<16x4xf32, #tpu.memory_space<vmem>>, vector<16x1xf32>
    tpu.vector_store %arg11[%c0_62, %c3_63], %110 {strides = array<i32>} : memref<16x4xf32, #tpu.memory_space<vmem>>, vector<16x1xf32>,
    %112 = arith.truncf %105 : vector<16x8xf32> to vector<16x8xbf16>
    %113 = vector.extract_strided_slice %12 {offsets = [0, 24], sizes = [8, 8], strides = [1, 1]} : vector<8x32xbf16> to vector<8x8xbf16>
    %cst_64 = arith.constant dense<0.000000e+00> : vector<16x8xf32>
    %114 = tpu.matmul %112, %113, %cst_64 {dimension_numbers = #tpu.dot_dimension_numbers<[1], [0], [0], [1], [0, 0, 1, 1], [], []>} : vector<16x8xbf16>, vector<8x8xbf16>, vector<16x8xf32> -> vector<16x8xf32>
    %c0_65 = arith.constant 0 : index
    %c24 = arith.constant 24 : index
    %115 = vector.load %arg12[%c0_65, %c24] : memref<16x32xf32, #tpu.memory_space<vmem>>, vector<16x8xf32>
    %116 = vector.broadcast %102 : vector<16x1xf32> to vector<16x8xf32>
    %117 = arith.mulf %116, %115 : vector<16x8xf32>
    %118 = arith.addf %117, %114 : vector<16x8xf32>
    %c0_66 = arith.constant 0 : index
    %c24_67 = arith.constant 24 : index
    %119 = vector.load %arg12[%c0_66, %c24_67] : memref<16x32xf32, #tpu.memory_space<vmem>>, vector<16x8xf32>
    tpu.vector_store %arg12[%c0_66, %c24_67], %118 {strides = array<i32>} : memref<16x32xf32, #tpu.memory_space<vmem>>, vector<16x8xf32>,
    %c0_68 = arith.constant 0 : index
    %c3_69 = arith.constant 3 : index
    %120 = vector.load %arg10[%c0_68, %c3_69] : memref<16x4xf32, #tpu.memory_space<vmem>>, vector<16x1xf32>
    tpu.vector_store %arg10[%c0_68, %c3_69], %100 {strides = array<i32>} : memref<16x4xf32, #tpu.memory_space<vmem>>, vector<16x1xf32>,
    %c0_i32_70 = arith.constant 0 : i32
    %121 = arith.cmpi eq, %arg3, %c0_i32_70 : i32
    %122 = arith.extui %121 : i1 to i32
    %c0_i32_71 = arith.constant 0 : i32
    %123 = arith.cmpi ne, %122, %c0_i32_71 : i32
    scf.if %123 {
      %c0_72 = arith.constant 0 : index
      %c0_73 = arith.constant 0 : index
      %124 = vector.load %arg11[%c0_72, %c0_73] : memref<16x4xf32, #tpu.memory_space<vmem>>, vector<16x4xf32>
      %125 = tpu.reciprocal %124 {approx = true} : vector<16x4xf32> -> vector<16x4xf32>
      %c0_74 = arith.constant 0 : index
      %c0_75 = arith.constant 0 : index
      %126 = vector.load %arg12[%c0_74, %c0_75] : memref<16x32xf32, #tpu.memory_space<vmem>>, vector<16x8xf32>
      %127 = vector.extract_strided_slice %125 {offsets = [0, 0], sizes = [16, 1], strides = [1, 1]} : vector<16x4xf32> to vector<16x1xf32>
      %128 = vector.broadcast %127 : vector<16x1xf32> to vector<16x8xf32>
      %129 = arith.mulf %126, %128 : vector<16x8xf32>
      %c0_76 = arith.constant 0 : index
      %c0_77 = arith.constant 0 : index
      %130 = vector.load %arg12[%c0_76, %c0_77] : memref<16x32xf32, #tpu.memory_space<vmem>>, vector<16x8xf32>
      tpu.vector_store %arg12[%c0_76, %c0_77], %129 {strides = array<i32>} : memref<16x32xf32, #tpu.memory_space<vmem>>, vector<16x8xf32>,
      %c0_78 = arith.constant 0 : index
      %c8_79 = arith.constant 8 : index
      %131 = vector.load %arg12[%c0_78, %c8_79] : memref<16x32xf32, #tpu.memory_space<vmem>>, vector<16x8xf32>
      %132 = vector.extract_strided_slice %125 {offsets = [0, 1], sizes = [16, 1], strides = [1, 1]} : vector<16x4xf32> to vector<16x1xf32>
      %133 = vector.broadcast %132 : vector<16x1xf32> to vector<16x8xf32>
      %134 = arith.mulf %131, %133 : vector<16x8xf32>
      %c0_80 = arith.constant 0 : index
      %c8_81 = arith.constant 8 : index
      %135 = vector.load %arg12[%c0_80, %c8_81] : memref<16x32xf32, #tpu.memory_space<vmem>>, vector<16x8xf32>
      tpu.vector_store %arg12[%c0_80, %c8_81], %134 {strides = array<i32>} : memref<16x32xf32, #tpu.memory_space<vmem>>, vector<16x8xf32>,
      %c0_82 = arith.constant 0 : index
      %c16_83 = arith.constant 16 : index
      %136 = vector.load %arg12[%c0_82, %c16_83] : memref<16x32xf32, #tpu.memory_space<vmem>>, vector<16x8xf32>
      %137 = vector.extract_strided_slice %125 {offsets = [0, 2], sizes = [16, 1], strides = [1, 1]} : vector<16x4xf32> to vector<16x1xf32>
      %138 = vector.broadcast %137 : vector<16x1xf32> to vector<16x8xf32>
      %139 = arith.mulf %136, %138 : vector<16x8xf32>
      %c0_84 = arith.constant 0 : index
      %c16_85 = arith.constant 16 : index
      %140 = vector.load %arg12[%c0_84, %c16_85] : memref<16x32xf32, #tpu.memory_space<vmem>>, vector<16x8xf32>
      tpu.vector_store %arg12[%c0_84, %c16_85], %139 {strides = array<i32>} : memref<16x32xf32, #tpu.memory_space<vmem>>, vector<16x8xf32>,
      %c0_86 = arith.constant 0 : index
      %c24_87 = arith.constant 24 : index
      %141 = vector.load %arg12[%c0_86, %c24_87] : memref<16x32xf32, #tpu.memory_space<vmem>>, vector<16x8xf32>
      %142 = vector.extract_strided_slice %125 {offsets = [0, 3], sizes = [16, 1], strides = [1, 1]} : vector<16x4xf32> to vector<16x1xf32>
      %143 = vector.broadcast %142 : vector<16x1xf32> to vector<16x8xf32>
      %144 = arith.mulf %141, %143 : vector<16x8xf32>
      %c0_88 = arith.constant 0 : index
      %c24_89 = arith.constant 24 : index
      %145 = vector.load %arg12[%c0_88, %c24_89] : memref<16x32xf32, #tpu.memory_space<vmem>>, vector<16x8xf32>
      tpu.vector_store %arg12[%c0_88, %c24_89], %144 {strides = array<i32>} : memref<16x32xf32, #tpu.memory_space<vmem>>, vector<16x8xf32>,
      %c0_90 = arith.constant 0 : index
      %c0_91 = arith.constant 0 : index
      %146 = vector.load %arg12[%c0_90, %c0_91] : memref<16x32xf32, #tpu.memory_space<vmem>>, vector<16x32xf32>
      %c0_92 = arith.constant 0 : index
      %c0_93 = arith.constant 0 : index
      %c0_94 = arith.constant 0 : index
      %147 = vector.load %arg7[%c0_92, %c0_93, %c0_94] : memref<1x16x32xf32, #tpu.memory_space<vmem>>, vector<1x16x32xf32>
      %148 = vector.shape_cast %147 : vector<1x16x32xf32> to vector<16x32xf32>
      %c0_95 = arith.constant 0 : index
      %149 = memref.load %arg8[%c0_95] : memref<1xf32, #tpu.memory_space<smem>>
      %150 = vector.broadcast %149 : f32 to vector<16x32xf32>
      %151 = arith.mulf %150, %146 : vector<16x32xf32>
      %152 = arith.addf %148, %151 : vector<16x32xf32>
      %c0_96 = arith.constant 0 : index
      %c0_97 = arith.constant 0 : index
      %c0_98 = arith.constant 0 : index
      %153 = vector.load %arg9[%c0_96, %c0_97, %c0_98] : memref<1x16x32xf32, #tpu.memory_space<vmem>>, vector<1x16x32xf32>
      %154 = vector.shape_cast %153 : vector<1x16x32xf32> to vector<16x32xf32>
      %155 = vector.shape_cast %152 : vector<16x32xf32> to vector<1x16x32xf32>
      tpu.vector_store %arg9[%c0_96, %c0_97, %c0_98], %155 {strides = array<i32>} : memref<1x16x32xf32, #tpu.memory_space<vmem>>, vector<1x16x32xf32>,
    } else {
    }
    return
  }
  func.func @transform_0(%arg0: i32, %arg1: i32, %arg2: i32, %arg3: i32) -> (i32, i32, i32, i32) {
    %c0_i32 = arith.constant 0 : i32
    %c0_i32_0 = arith.constant 0 : i32
    return %c0_i32, %arg0, %arg2, %arg1 : i32, i32, i32, i32
  }
  func.func @transform_1(%arg0: i32, %arg1: i32, %arg2: i32, %arg3: i32) -> (i32, i32, i32, i32) {
    %c1_i32 = arith.constant 1 : i32
    %c0_i32 = arith.constant 0 : i32
    return %c1_i32, %arg0, %arg3, %arg1 : i32, i32, i32, i32
  }
  func.func @transform_2(%arg0: i32, %arg1: i32, %arg2: i32, %arg3: i32) -> (i32, i32, i32, i32) {
    %c2_i32 = arith.constant 2 : i32
    %c0_i32 = arith.constant 0 : i32
    return %c2_i32, %arg0, %arg3, %arg1 : i32, i32, i32, i32
  }
  func.func @transform_3(%arg0: i32, %arg1: i32, %arg2: i32, %arg3: i32) -> (i32, i32, i32) {
    %c0_i32 = arith.constant 0 : i32
    return %arg0, %arg2, %arg1 : i32, i32, i32
  }
  func.func @transform_4(%arg0: i32, %arg1: i32, %arg2: i32, %arg3: i32) -> i32 {
    %c0_i32 = arith.constant 0 : i32
    %c0_i32_0 = arith.constant 0 : i32
    return %c0_i32 : i32
  }
  func.func @transform_5(%arg0: i32, %arg1: i32, %arg2: i32, %arg3: i32) -> (i32, i32, i32) {
    %c0_i32 = arith.constant 0 : i32
    return %arg0, %arg2, %arg1 : i32, i32, i32
  }
}

module attributes {stable_mosaic.version = 11 : i64} {
  func.func @_ln_mod_linear_kernel(%arg0: i32, %arg1: i32, %arg2: i32, %arg3: memref<1x8x32xbf16, #tpu.memory_space<vmem>>, %arg4: memref<1x1x32xf32, #tpu.memory_space<vmem>>, %arg5: memref<1x1x32xf32, #tpu.memory_space<vmem>>, %arg6: memref<32x128xbf16, #tpu.memory_space<vmem>>, %arg7: memref<1x128xf32, #tpu.memory_space<vmem>>, %arg8: memref<1x8x128xbf16, #tpu.memory_space<vmem>>) attributes {dimension_semantics = [#tpu.dimension_semantics<parallel>, #tpu.dimension_semantics<parallel>, #tpu.dimension_semantics<parallel>], iteration_bounds = array<i64: 2, 1, 1>, scalar_prefetch = 0 : i64, scratch_operands = 0 : i64, tpu.core_type = #tpu.core_type<tc>, window_params = [{transform_indices = @transform_0, window_bounds = array<i64: 1, 8, 32>}, {transform_indices = @transform_1, window_bounds = array<i64: 1, 1, 32>}, {transform_indices = @transform_2, window_bounds = array<i64: 1, 1, 32>}, {transform_indices = @transform_3, window_bounds = array<i64: 32, 128>}, {transform_indices = @transform_4, window_bounds = array<i64: 1, 128>}, {transform_indices = @transform_5, window_bounds = array<i64: 1, 8, 128>}]} {
    %c0 = arith.constant 0 : index
    %c0_0 = arith.constant 0 : index
    %c0_1 = arith.constant 0 : index
    %0 = vector.load %arg3[%c0, %c0_0, %c0_1] : memref<1x8x32xbf16, #tpu.memory_space<vmem>>, vector<1x8x32xbf16>
    %1 = vector.shape_cast %0 : vector<1x8x32xbf16> to vector<8x32xbf16>
    %2 = arith.extf %1 : vector<8x32xbf16> to vector<8x32xf32>
    %c0_2 = arith.constant 0 : index
    %c0_3 = arith.constant 0 : index
    %c0_4 = arith.constant 0 : index
    %3 = vector.load %arg4[%c0_2, %c0_3, %c0_4] : memref<1x1x32xf32, #tpu.memory_space<vmem>>, vector<1x1x32xf32>
    %4 = vector.shape_cast %3 : vector<1x1x32xf32> to vector<1x32xf32>
    %c0_5 = arith.constant 0 : index
    %c0_6 = arith.constant 0 : index
    %c0_7 = arith.constant 0 : index
    %5 = vector.load %arg5[%c0_5, %c0_6, %c0_7] : memref<1x1x32xf32, #tpu.memory_space<vmem>>, vector<1x1x32xf32>
    %6 = vector.shape_cast %5 : vector<1x1x32xf32> to vector<1x32xf32>
    %cst = arith.constant dense<0.000000e+00> : vector<8xf32>
    %7 = vector.multi_reduction <add>, %2, %cst [1] : vector<8x32xf32> to vector<8xf32>
    %8 = vector.shape_cast %7 : vector<8xf32> to vector<8x1xf32>
    %cst_8 = arith.constant 3.200000e+01 : f32
    %9 = vector.broadcast %cst_8 : f32 to vector<8x1xf32>
    %10 = arith.divf %8, %9 : vector<8x1xf32>
    %11 = vector.broadcast %10 : vector<8x1xf32> to vector<8x32xf32>
    %12 = arith.subf %2, %11 : vector<8x32xf32>
    %13 = arith.mulf %12, %12 : vector<8x32xf32>
    %cst_9 = arith.constant dense<0.000000e+00> : vector<8xf32>
    %14 = vector.multi_reduction <add>, %13, %cst_9 [1] : vector<8x32xf32> to vector<8xf32>
    %15 = vector.shape_cast %14 : vector<8xf32> to vector<8x1xf32>
    %cst_10 = arith.constant 3.200000e+01 : f32
    %16 = vector.broadcast %cst_10 : f32 to vector<8x1xf32>
    %17 = arith.divf %15, %16 : vector<8x1xf32>
    %18 = vector.broadcast %10 : vector<8x1xf32> to vector<8x32xf32>
    %19 = arith.subf %2, %18 : vector<8x32xf32>
    %cst_11 = arith.constant 9.99999997E-7 : f32
    %20 = vector.broadcast %cst_11 : f32 to vector<8x1xf32>
    %21 = arith.addf %17, %20 : vector<8x1xf32>
    %22 = math.rsqrt %21 : vector<8x1xf32>
    %23 = vector.broadcast %22 : vector<8x1xf32> to vector<8x32xf32>
    %24 = arith.mulf %19, %23 : vector<8x32xf32>
    %cst_12 = arith.constant 1.000000e+00 : f32
    %25 = vector.broadcast %cst_12 : f32 to vector<1x32xf32>
    %26 = arith.addf %25, %6 : vector<1x32xf32>
    %27 = vector.broadcast %26 : vector<1x32xf32> to vector<8x32xf32>
    %28 = arith.mulf %24, %27 : vector<8x32xf32>
    %29 = vector.broadcast %4 : vector<1x32xf32> to vector<8x32xf32>
    %30 = arith.addf %28, %29 : vector<8x32xf32>
    %31 = arith.truncf %30 : vector<8x32xf32> to vector<8x32xbf16>
    %c0_13 = arith.constant 0 : index
    %c0_14 = arith.constant 0 : index
    %32 = vector.load %arg6[%c0_13, %c0_14] : memref<32x128xbf16, #tpu.memory_space<vmem>>, vector<32x128xbf16>
    %cst_15 = arith.constant dense<0.000000e+00> : vector<8x128xf32>
    %33 = tpu.matmul %31, %32, %cst_15 {dimension_numbers = #tpu.dot_dimension_numbers<[1], [0], [0], [1], [0, 0, 1, 1], [], []>} : vector<8x32xbf16>, vector<32x128xbf16>, vector<8x128xf32> -> vector<8x128xf32>
    %c0_16 = arith.constant 0 : index
    %c0_17 = arith.constant 0 : index
    %34 = vector.load %arg7[%c0_16, %c0_17] : memref<1x128xf32, #tpu.memory_space<vmem>>, vector<1x128xf32>
    %35 = vector.broadcast %34 : vector<1x128xf32> to vector<8x128xf32>
    %36 = arith.addf %33, %35 : vector<8x128xf32>
    %37 = arith.truncf %36 : vector<8x128xf32> to vector<8x128xbf16>
    %c0_18 = arith.constant 0 : index
    %c0_19 = arith.constant 0 : index
    %c0_20 = arith.constant 0 : index
    %38 = vector.load %arg8[%c0_18, %c0_19, %c0_20] : memref<1x8x128xbf16, #tpu.memory_space<vmem>>, vector<1x8x128xbf16>
    %39 = vector.shape_cast %38 : vector<1x8x128xbf16> to vector<8x128xbf16>
    %40 = vector.shape_cast %37 : vector<8x128xbf16> to vector<1x8x128xbf16>
    tpu.vector_store %arg8[%c0_18, %c0_19, %c0_20], %40 {strides = array<i32>} : memref<1x8x128xbf16, #tpu.memory_space<vmem>>, vector<1x8x128xbf16>,
    return
  }
  func.func @transform_0(%arg0: i32, %arg1: i32, %arg2: i32) -> (i32, i32, i32) {
    %c0_i32 = arith.constant 0 : i32
    %c0_i32_0 = arith.constant 0 : i32
    return %arg0, %arg2, %c0_i32 : i32, i32, i32
  }
  func.func @transform_1(%arg0: i32, %arg1: i32, %arg2: i32) -> (i32, i32, i32) {
    %c0_i32 = arith.constant 0 : i32
    %c0_i32_0 = arith.constant 0 : i32
    %c0_i32_1 = arith.constant 0 : i32
    return %arg0, %c0_i32, %c0_i32_0 : i32, i32, i32
  }
  func.func @transform_2(%arg0: i32, %arg1: i32, %arg2: i32) -> (i32, i32, i32) {
    %c0_i32 = arith.constant 0 : i32
    %c0_i32_0 = arith.constant 0 : i32
    %c0_i32_1 = arith.constant 0 : i32
    return %arg0, %c0_i32, %c0_i32_0 : i32, i32, i32
  }
  func.func @transform_3(%arg0: i32, %arg1: i32, %arg2: i32) -> (i32, i32) {
    %c0_i32 = arith.constant 0 : i32
    %c0_i32_0 = arith.constant 0 : i32
    return %c0_i32, %arg1 : i32, i32
  }
  func.func @transform_4(%arg0: i32, %arg1: i32, %arg2: i32) -> (i32, i32) {
    %c0_i32 = arith.constant 0 : i32
    %c0_i32_0 = arith.constant 0 : i32
    return %c0_i32, %arg1 : i32, i32
  }
  func.func @transform_5(%arg0: i32, %arg1: i32, %arg2: i32) -> (i32, i32, i32) {
    %c0_i32 = arith.constant 0 : i32
    return %arg0, %arg2, %arg1 : i32, i32, i32
  }
}

module attributes {stable_mosaic.version = 11 : i64} {
  func.func @_ln_mod_linear_kernel(%arg0: i32, %arg1: i32, %arg2: i32, %arg3: memref<1x16x32xbf16, #tpu.memory_space<vmem>>, %arg4: memref<1x1x32xf32, #tpu.memory_space<vmem>>, %arg5: memref<1x1x32xf32, #tpu.memory_space<vmem>>, %arg6: memref<32x128xbf16, #tpu.memory_space<vmem>>, %arg7: memref<1x128xf32, #tpu.memory_space<vmem>>, %arg8: memref<1x16x128xbf16, #tpu.memory_space<vmem>>) attributes {dimension_semantics = [#tpu.dimension_semantics<parallel>, #tpu.dimension_semantics<parallel>, #tpu.dimension_semantics<parallel>], iteration_bounds = array<i64: 2, 1, 1>, scalar_prefetch = 0 : i64, scratch_operands = 0 : i64, tpu.core_type = #tpu.core_type<tc>, window_params = [{transform_indices = @transform_0, window_bounds = array<i64: 1, 16, 32>}, {transform_indices = @transform_1, window_bounds = array<i64: 1, 1, 32>}, {transform_indices = @transform_2, window_bounds = array<i64: 1, 1, 32>}, {transform_indices = @transform_3, window_bounds = array<i64: 32, 128>}, {transform_indices = @transform_4, window_bounds = array<i64: 1, 128>}, {transform_indices = @transform_5, window_bounds = array<i64: 1, 16, 128>}]} {
    %c0 = arith.constant 0 : index
    %c0_0 = arith.constant 0 : index
    %c0_1 = arith.constant 0 : index
    %0 = vector.load %arg3[%c0, %c0_0, %c0_1] : memref<1x16x32xbf16, #tpu.memory_space<vmem>>, vector<1x16x32xbf16>
    %1 = vector.shape_cast %0 : vector<1x16x32xbf16> to vector<16x32xbf16>
    %2 = arith.extf %1 : vector<16x32xbf16> to vector<16x32xf32>
    %c0_2 = arith.constant 0 : index
    %c0_3 = arith.constant 0 : index
    %c0_4 = arith.constant 0 : index
    %3 = vector.load %arg4[%c0_2, %c0_3, %c0_4] : memref<1x1x32xf32, #tpu.memory_space<vmem>>, vector<1x1x32xf32>
    %4 = vector.shape_cast %3 : vector<1x1x32xf32> to vector<1x32xf32>
    %c0_5 = arith.constant 0 : index
    %c0_6 = arith.constant 0 : index
    %c0_7 = arith.constant 0 : index
    %5 = vector.load %arg5[%c0_5, %c0_6, %c0_7] : memref<1x1x32xf32, #tpu.memory_space<vmem>>, vector<1x1x32xf32>
    %6 = vector.shape_cast %5 : vector<1x1x32xf32> to vector<1x32xf32>
    %cst = arith.constant dense<0.000000e+00> : vector<16xf32>
    %7 = vector.multi_reduction <add>, %2, %cst [1] : vector<16x32xf32> to vector<16xf32>
    %8 = vector.shape_cast %7 : vector<16xf32> to vector<16x1xf32>
    %cst_8 = arith.constant 3.200000e+01 : f32
    %9 = vector.broadcast %cst_8 : f32 to vector<16x1xf32>
    %10 = arith.divf %8, %9 : vector<16x1xf32>
    %11 = vector.broadcast %10 : vector<16x1xf32> to vector<16x32xf32>
    %12 = arith.subf %2, %11 : vector<16x32xf32>
    %13 = arith.mulf %12, %12 : vector<16x32xf32>
    %cst_9 = arith.constant dense<0.000000e+00> : vector<16xf32>
    %14 = vector.multi_reduction <add>, %13, %cst_9 [1] : vector<16x32xf32> to vector<16xf32>
    %15 = vector.shape_cast %14 : vector<16xf32> to vector<16x1xf32>
    %cst_10 = arith.constant 3.200000e+01 : f32
    %16 = vector.broadcast %cst_10 : f32 to vector<16x1xf32>
    %17 = arith.divf %15, %16 : vector<16x1xf32>
    %18 = vector.broadcast %10 : vector<16x1xf32> to vector<16x32xf32>
    %19 = arith.subf %2, %18 : vector<16x32xf32>
    %cst_11 = arith.constant 9.99999997E-7 : f32
    %20 = vector.broadcast %cst_11 : f32 to vector<16x1xf32>
    %21 = arith.addf %17, %20 : vector<16x1xf32>
    %22 = math.rsqrt %21 : vector<16x1xf32>
    %23 = vector.broadcast %22 : vector<16x1xf32> to vector<16x32xf32>
    %24 = arith.mulf %19, %23 : vector<16x32xf32>
    %cst_12 = arith.constant 1.000000e+00 : f32
    %25 = vector.broadcast %cst_12 : f32 to vector<1x32xf32>
    %26 = arith.addf %25, %6 : vector<1x32xf32>
    %27 = vector.broadcast %26 : vector<1x32xf32> to vector<16x32xf32>
    %28 = arith.mulf %24, %27 : vector<16x32xf32>
    %29 = vector.broadcast %4 : vector<1x32xf32> to vector<16x32xf32>
    %30 = arith.addf %28, %29 : vector<16x32xf32>
    %31 = arith.truncf %30 : vector<16x32xf32> to vector<16x32xbf16>
    %c0_13 = arith.constant 0 : index
    %c0_14 = arith.constant 0 : index
    %32 = vector.load %arg6[%c0_13, %c0_14] : memref<32x128xbf16, #tpu.memory_space<vmem>>, vector<32x128xbf16>
    %cst_15 = arith.constant dense<0.000000e+00> : vector<16x128xf32>
    %33 = tpu.matmul %31, %32, %cst_15 {dimension_numbers = #tpu.dot_dimension_numbers<[1], [0], [0], [1], [0, 0, 1, 1], [], []>} : vector<16x32xbf16>, vector<32x128xbf16>, vector<16x128xf32> -> vector<16x128xf32>
    %c0_16 = arith.constant 0 : index
    %c0_17 = arith.constant 0 : index
    %34 = vector.load %arg7[%c0_16, %c0_17] : memref<1x128xf32, #tpu.memory_space<vmem>>, vector<1x128xf32>
    %35 = vector.broadcast %34 : vector<1x128xf32> to vector<16x128xf32>
    %36 = arith.addf %33, %35 : vector<16x128xf32>
    %37 = arith.truncf %36 : vector<16x128xf32> to vector<16x128xbf16>
    %c0_18 = arith.constant 0 : index
    %c0_19 = arith.constant 0 : index
    %c0_20 = arith.constant 0 : index
    %38 = vector.load %arg8[%c0_18, %c0_19, %c0_20] : memref<1x16x128xbf16, #tpu.memory_space<vmem>>, vector<1x16x128xbf16>
    %39 = vector.shape_cast %38 : vector<1x16x128xbf16> to vector<16x128xbf16>
    %40 = vector.shape_cast %37 : vector<16x128xbf16> to vector<1x16x128xbf16>
    tpu.vector_store %arg8[%c0_18, %c0_19, %c0_20], %40 {strides = array<i32>} : memref<1x16x128xbf16, #tpu.memory_space<vmem>>, vector<1x16x128xbf16>,
    return
  }
  func.func @transform_0(%arg0: i32, %arg1: i32, %arg2: i32) -> (i32, i32, i32) {
    %c0_i32 = arith.constant 0 : i32
    %c0_i32_0 = arith.constant 0 : i32
    return %arg0, %arg2, %c0_i32 : i32, i32, i32
  }
  func.func @transform_1(%arg0: i32, %arg1: i32, %arg2: i32) -> (i32, i32, i32) {
    %c0_i32 = arith.constant 0 : i32
    %c0_i32_0 = arith.constant 0 : i32
    %c0_i32_1 = arith.constant 0 : i32
    return %arg0, %c0_i32, %c0_i32_0 : i32, i32, i32
  }
  func.func @transform_2(%arg0: i32, %arg1: i32, %arg2: i32) -> (i32, i32, i32) {
    %c0_i32 = arith.constant 0 : i32
    %c0_i32_0 = arith.constant 0 : i32
    %c0_i32_1 = arith.constant 0 : i32
    return %arg0, %c0_i32, %c0_i32_0 : i32, i32, i32
  }
  func.func @transform_3(%arg0: i32, %arg1: i32, %arg2: i32) -> (i32, i32) {
    %c0_i32 = arith.constant 0 : i32
    %c0_i32_0 = arith.constant 0 : i32
    return %c0_i32, %arg1 : i32, i32
  }
  func.func @transform_4(%arg0: i32, %arg1: i32, %arg2: i32) -> (i32, i32) {
    %c0_i32 = arith.constant 0 : i32
    %c0_i32_0 = arith.constant 0 : i32
    return %c0_i32, %arg1 : i32, i32
  }
  func.func @transform_5(%arg0: i32, %arg1: i32, %arg2: i32) -> (i32, i32, i32) {
    %c0_i32 = arith.constant 0 : i32
    return %arg0, %arg2, %arg1 : i32, i32, i32
  }
}

module attributes {stable_mosaic.version = 11 : i64} {
  func.func @_gated_linear_res_kernel(%arg0: i32, %arg1: i32, %arg2: i32, %arg3: memref<1x16x128xbf16, #tpu.memory_space<vmem>>, %arg4: memref<128x32xbf16, #tpu.memory_space<vmem>>, %arg5: memref<1x32xf32, #tpu.memory_space<vmem>>, %arg6: memref<1x1x32xf32, #tpu.memory_space<vmem>>, %arg7: memref<1x16x32xf32, #tpu.memory_space<vmem>>, %arg8: memref<1x16x32xf32, #tpu.memory_space<vmem>>) attributes {dimension_semantics = [#tpu.dimension_semantics<parallel>, #tpu.dimension_semantics<parallel>, #tpu.dimension_semantics<parallel>], iteration_bounds = array<i64: 2, 1, 1>, scalar_prefetch = 0 : i64, scratch_operands = 0 : i64, tpu.core_type = #tpu.core_type<tc>, window_params = [{transform_indices = @transform_0, window_bounds = array<i64: 1, 16, 128>}, {transform_indices = @transform_1, window_bounds = array<i64: 128, 32>}, {transform_indices = @transform_2, window_bounds = array<i64: 1, 32>}, {transform_indices = @transform_3, window_bounds = array<i64: 1, 1, 32>}, {transform_indices = @transform_4, window_bounds = array<i64: 1, 16, 32>}, {transform_indices = @transform_5, window_bounds = array<i64: 1, 16, 32>}]} {
    %c0 = arith.constant 0 : index
    %c0_0 = arith.constant 0 : index
    %c0_1 = arith.constant 0 : index
    %0 = vector.load %arg3[%c0, %c0_0, %c0_1] : memref<1x16x128xbf16, #tpu.memory_space<vmem>>, vector<1x16x128xbf16>
    %1 = vector.shape_cast %0 : vector<1x16x128xbf16> to vector<16x128xbf16>
    %2 = arith.extf %1 : vector<16x128xbf16> to vector<16x128xf32>
    %cst = arith.constant 5.000000e-01 : f32
    %3 = vector.broadcast %cst : f32 to vector<16x128xf32>
    %4 = arith.mulf %3, %2 : vector<16x128xf32>
    %cst_2 = arith.constant 4.471500e-02 : f32
    %5 = vector.broadcast %cst_2 : f32 to vector<16x128xf32>
    %6 = arith.mulf %5, %2 : vector<16x128xf32>
    %7 = arith.mulf %6, %2 : vector<16x128xf32>
    %8 = arith.mulf %7, %2 : vector<16x128xf32>
    %9 = arith.addf %2, %8 : vector<16x128xf32>
    %cst_3 = arith.constant 0.797884583 : f32
    %10 = vector.broadcast %cst_3 : f32 to vector<16x128xf32>
    %11 = arith.mulf %10, %9 : vector<16x128xf32>
    %12 = math.tanh %11 : vector<16x128xf32>
    %cst_4 = arith.constant 1.000000e+00 : f32
    %13 = vector.broadcast %cst_4 : f32 to vector<16x128xf32>
    %14 = arith.addf %13, %12 : vector<16x128xf32>
    %15 = arith.mulf %4, %14 : vector<16x128xf32>
    %16 = arith.truncf %15 : vector<16x128xf32> to vector<16x128xbf16>
    %c0_5 = arith.constant 0 : index
    %c0_6 = arith.constant 0 : index
    %17 = vector.load %arg4[%c0_5, %c0_6] : memref<128x32xbf16, #tpu.memory_space<vmem>>, vector<128x32xbf16>
    %cst_7 = arith.constant dense<0.000000e+00> : vector<16x32xf32>
    %18 = tpu.matmul %16, %17, %cst_7 {dimension_numbers = #tpu.dot_dimension_numbers<[1], [0], [0], [1], [0, 0, 1, 1], [], []>} : vector<16x128xbf16>, vector<128x32xbf16>, vector<16x32xf32> -> vector<16x32xf32>
    %c0_8 = arith.constant 0 : index
    %c0_9 = arith.constant 0 : index
    %19 = vector.load %arg5[%c0_8, %c0_9] : memref<1x32xf32, #tpu.memory_space<vmem>>, vector<1x32xf32>
    %20 = vector.broadcast %19 : vector<1x32xf32> to vector<16x32xf32>
    %21 = arith.addf %18, %20 : vector<16x32xf32>
    %c0_10 = arith.constant 0 : index
    %c0_11 = arith.constant 0 : index
    %c0_12 = arith.constant 0 : index
    %22 = vector.load %arg7[%c0_10, %c0_11, %c0_12] : memref<1x16x32xf32, #tpu.memory_space<vmem>>, vector<1x16x32xf32>
    %23 = vector.shape_cast %22 : vector<1x16x32xf32> to vector<16x32xf32>
    %c0_13 = arith.constant 0 : index
    %c0_14 = arith.constant 0 : index
    %c0_15 = arith.constant 0 : index
    %24 = vector.load %arg6[%c0_13, %c0_14, %c0_15] : memref<1x1x32xf32, #tpu.memory_space<vmem>>, vector<1x1x32xf32>
    %25 = vector.shape_cast %24 : vector<1x1x32xf32> to vector<1x32xf32>
    %26 = vector.broadcast %25 : vector<1x32xf32> to vector<16x32xf32>
    %27 = arith.mulf %26, %21 : vector<16x32xf32>
    %28 = arith.addf %23, %27 : vector<16x32xf32>
    %c0_16 = arith.constant 0 : index
    %c0_17 = arith.constant 0 : index
    %c0_18 = arith.constant 0 : index
    %29 = vector.load %arg8[%c0_16, %c0_17, %c0_18] : memref<1x16x32xf32, #tpu.memory_space<vmem>>, vector<1x16x32xf32>
    %30 = vector.shape_cast %29 : vector<1x16x32xf32> to vector<16x32xf32>
    %31 = vector.shape_cast %28 : vector<16x32xf32> to vector<1x16x32xf32>
    tpu.vector_store %arg8[%c0_16, %c0_17, %c0_18], %31 {strides = array<i32>} : memref<1x16x32xf32, #tpu.memory_space<vmem>>, vector<1x16x32xf32>,
    return
  }
  func.func @transform_0(%arg0: i32, %arg1: i32, %arg2: i32) -> (i32, i32, i32) {
    %c0_i32 = arith.constant 0 : i32
    %c0_i32_0 = arith.constant 0 : i32
    return %arg0, %arg2, %c0_i32 : i32, i32, i32
  }
  func.func @transform_1(%arg0: i32, %arg1: i32, %arg2: i32) -> (i32, i32) {
    %c0_i32 = arith.constant 0 : i32
    %c0_i32_0 = arith.constant 0 : i32
    return %c0_i32, %arg1 : i32, i32
  }
  func.func @transform_2(%arg0: i32, %arg1: i32, %arg2: i32) -> (i32, i32) {
    %c0_i32 = arith.constant 0 : i32
    %c0_i32_0 = arith.constant 0 : i32
    return %c0_i32, %arg1 : i32, i32
  }
  func.func @transform_3(%arg0: i32, %arg1: i32, %arg2: i32) -> (i32, i32, i32) {
    %c0_i32 = arith.constant 0 : i32
    %c0_i32_0 = arith.constant 0 : i32
    return %arg0, %c0_i32, %arg1 : i32, i32, i32
  }
  func.func @transform_4(%arg0: i32, %arg1: i32, %arg2: i32) -> (i32, i32, i32) {
    %c0_i32 = arith.constant 0 : i32
    return %arg0, %arg2, %arg1 : i32, i32, i32
  }
  func.func @transform_5(%arg0: i32, %arg1: i32, %arg2: i32) -> (i32, i32, i32) {
    %c0_i32 = arith.constant 0 : i32
    return %arg0, %arg2, %arg1 : i32, i32, i32
  }
}

module attributes {stable_mosaic.version = 11 : i64} {
  func.func @_gated_linear_res_kernel(%arg0: i32, %arg1: i32, %arg2: i32, %arg3: memref<1x8x128xbf16, #tpu.memory_space<vmem>>, %arg4: memref<128x32xbf16, #tpu.memory_space<vmem>>, %arg5: memref<1x32xf32, #tpu.memory_space<vmem>>, %arg6: memref<1x1x32xf32, #tpu.memory_space<vmem>>, %arg7: memref<1x8x32xf32, #tpu.memory_space<vmem>>, %arg8: memref<1x8x32xf32, #tpu.memory_space<vmem>>) attributes {dimension_semantics = [#tpu.dimension_semantics<parallel>, #tpu.dimension_semantics<parallel>, #tpu.dimension_semantics<parallel>], iteration_bounds = array<i64: 2, 1, 1>, scalar_prefetch = 0 : i64, scratch_operands = 0 : i64, tpu.core_type = #tpu.core_type<tc>, window_params = [{transform_indices = @transform_0, window_bounds = array<i64: 1, 8, 128>}, {transform_indices = @transform_1, window_bounds = array<i64: 128, 32>}, {transform_indices = @transform_2, window_bounds = array<i64: 1, 32>}, {transform_indices = @transform_3, window_bounds = array<i64: 1, 1, 32>}, {transform_indices = @transform_4, window_bounds = array<i64: 1, 8, 32>}, {transform_indices = @transform_5, window_bounds = array<i64: 1, 8, 32>}]} {
    %c0 = arith.constant 0 : index
    %c0_0 = arith.constant 0 : index
    %c0_1 = arith.constant 0 : index
    %0 = vector.load %arg3[%c0, %c0_0, %c0_1] : memref<1x8x128xbf16, #tpu.memory_space<vmem>>, vector<1x8x128xbf16>
    %1 = vector.shape_cast %0 : vector<1x8x128xbf16> to vector<8x128xbf16>
    %2 = arith.extf %1 : vector<8x128xbf16> to vector<8x128xf32>
    %cst = arith.constant 5.000000e-01 : f32
    %3 = vector.broadcast %cst : f32 to vector<8x128xf32>
    %4 = arith.mulf %3, %2 : vector<8x128xf32>
    %cst_2 = arith.constant 4.471500e-02 : f32
    %5 = vector.broadcast %cst_2 : f32 to vector<8x128xf32>
    %6 = arith.mulf %5, %2 : vector<8x128xf32>
    %7 = arith.mulf %6, %2 : vector<8x128xf32>
    %8 = arith.mulf %7, %2 : vector<8x128xf32>
    %9 = arith.addf %2, %8 : vector<8x128xf32>
    %cst_3 = arith.constant 0.797884583 : f32
    %10 = vector.broadcast %cst_3 : f32 to vector<8x128xf32>
    %11 = arith.mulf %10, %9 : vector<8x128xf32>
    %12 = math.tanh %11 : vector<8x128xf32>
    %cst_4 = arith.constant 1.000000e+00 : f32
    %13 = vector.broadcast %cst_4 : f32 to vector<8x128xf32>
    %14 = arith.addf %13, %12 : vector<8x128xf32>
    %15 = arith.mulf %4, %14 : vector<8x128xf32>
    %16 = arith.truncf %15 : vector<8x128xf32> to vector<8x128xbf16>
    %c0_5 = arith.constant 0 : index
    %c0_6 = arith.constant 0 : index
    %17 = vector.load %arg4[%c0_5, %c0_6] : memref<128x32xbf16, #tpu.memory_space<vmem>>, vector<128x32xbf16>
    %cst_7 = arith.constant dense<0.000000e+00> : vector<8x32xf32>
    %18 = tpu.matmul %16, %17, %cst_7 {dimension_numbers = #tpu.dot_dimension_numbers<[1], [0], [0], [1], [0, 0, 1, 1], [], []>} : vector<8x128xbf16>, vector<128x32xbf16>, vector<8x32xf32> -> vector<8x32xf32>
    %c0_8 = arith.constant 0 : index
    %c0_9 = arith.constant 0 : index
    %19 = vector.load %arg5[%c0_8, %c0_9] : memref<1x32xf32, #tpu.memory_space<vmem>>, vector<1x32xf32>
    %20 = vector.broadcast %19 : vector<1x32xf32> to vector<8x32xf32>
    %21 = arith.addf %18, %20 : vector<8x32xf32>
    %c0_10 = arith.constant 0 : index
    %c0_11 = arith.constant 0 : index
    %c0_12 = arith.constant 0 : index
    %22 = vector.load %arg7[%c0_10, %c0_11, %c0_12] : memref<1x8x32xf32, #tpu.memory_space<vmem>>, vector<1x8x32xf32>
    %23 = vector.shape_cast %22 : vector<1x8x32xf32> to vector<8x32xf32>
    %c0_13 = arith.constant 0 : index
    %c0_14 = arith.constant 0 : index
    %c0_15 = arith.constant 0 : index
    %24 = vector.load %arg6[%c0_13, %c0_14, %c0_15] : memref<1x1x32xf32, #tpu.memory_space<vmem>>, vector<1x1x32xf32>
    %25 = vector.shape_cast %24 : vector<1x1x32xf32> to vector<1x32xf32>
    %26 = vector.broadcast %25 : vector<1x32xf32> to vector<8x32xf32>
    %27 = arith.mulf %26, %21 : vector<8x32xf32>
    %28 = arith.addf %23, %27 : vector<8x32xf32>
    %c0_16 = arith.constant 0 : index
    %c0_17 = arith.constant 0 : index
    %c0_18 = arith.constant 0 : index
    %29 = vector.load %arg8[%c0_16, %c0_17, %c0_18] : memref<1x8x32xf32, #tpu.memory_space<vmem>>, vector<1x8x32xf32>
    %30 = vector.shape_cast %29 : vector<1x8x32xf32> to vector<8x32xf32>
    %31 = vector.shape_cast %28 : vector<8x32xf32> to vector<1x8x32xf32>
    tpu.vector_store %arg8[%c0_16, %c0_17, %c0_18], %31 {strides = array<i32>} : memref<1x8x32xf32, #tpu.memory_space<vmem>>, vector<1x8x32xf32>,
    return
  }
  func.func @transform_0(%arg0: i32, %arg1: i32, %arg2: i32) -> (i32, i32, i32) {
    %c0_i32 = arith.constant 0 : i32
    %c0_i32_0 = arith.constant 0 : i32
    return %arg0, %arg2, %c0_i32 : i32, i32, i32
  }
  func.func @transform_1(%arg0: i32, %arg1: i32, %arg2: i32) -> (i32, i32) {
    %c0_i32 = arith.constant 0 : i32
    %c0_i32_0 = arith.constant 0 : i32
    return %c0_i32, %arg1 : i32, i32
  }
  func.func @transform_2(%arg0: i32, %arg1: i32, %arg2: i32) -> (i32, i32) {
    %c0_i32 = arith.constant 0 : i32
    %c0_i32_0 = arith.constant 0 : i32
    return %c0_i32, %arg1 : i32, i32
  }
  func.func @transform_3(%arg0: i32, %arg1: i32, %arg2: i32) -> (i32, i32, i32) {
    %c0_i32 = arith.constant 0 : i32
    %c0_i32_0 = arith.constant 0 : i32
    return %arg0, %c0_i32, %arg1 : i32, i32, i32
  }
  func.func @transform_4(%arg0: i32, %arg1: i32, %arg2: i32) -> (i32, i32, i32) {
    %c0_i32 = arith.constant 0 : i32
    return %arg0, %arg2, %arg1 : i32, i32, i32
  }
  func.func @transform_5(%arg0: i32, %arg1: i32, %arg2: i32) -> (i32, i32, i32) {
    %c0_i32 = arith.constant 0 : i32
    return %arg0, %arg2, %arg1 : i32, i32, i32
  }
}

</mosaic_0001>

<bundles_post_ra>
// kernel: mm_double_stream_block_audio.13
= control target key start
LH: loop header
LB: loop body
LE: loop exit
PB: predicated region body
PF: predicated region fallthrough
CT: control target
= control target key end

     0   :  { %vm85_vm4 = vcmask 261120   ;;  %vm133_vm5 = vcmask 1041408   ;;  %vm135_vm6 = vcmask 1043456   ;;  %s246_s1 = inlined_call_operand.vmem [shape: bf16[32,384], index: 1, kind: input, shape index: {}]   ;;  %s247_s0 = inlined_call_operand.vmem [shape: f32[2,32], index: 0, kind: input, shape index: {}]   ;;  %s248_s2 = inlined_call_operand.vmem [shape: f32[1,384], index: 2, kind: input, shape index: {}]   ;;  %s249_s3 = inlined_call_operand.vmem [shape: f32[2,384], index: 3, kind: output, shape index: {}]  }
   0x1   :  { %v158_v0 = vld [vmem:[%s246_s1 + $0x18] sm:$0xf]  ;;  %v175_v1 = vld [vmem:[%s246_s1 + $0x20] sm:$0xf0]  ;;  %v174_v2 = vld [vmem:[%s246_s1 + $0x1c] sm:$0xf] }
   0x2   :  { %v159_v3 = vor.u32 %v175_v1, %v158_v0  ;;  %v160_v4 = vld [vmem:[%s246_s1 + $0x24] sm:$0xf0]  ;;  %v166_v5 = vld [vmem:[%s246_s1 + $0x20] sm:$0xf]  ;;  %v176_v6 = vld [vmem:[%s246_s1 + $0x28] sm:$0xf0] }
   0x3   :  { %v163_v7 = vor.u32 %v174_v2, %v160_v4  ;;  %v167_v8 = vor.u32 %v176_v6, %v166_v5  ;;  %v146_v9 = vld [vmem:[%s246_s1] sm:$0xf]  ;;  %v172_v10 = vld [vmem:[%s246_s1 + $0x8] sm:$0xf0]  ;;  %v171_v11 = vld [vmem:[%s246_s1 + $0x4] sm:$0xf] }
   0x4   :  { %95 = vmatpush.bf16.msra.mxu0 %v159_v3  ;;  %v147_v12 = vor.u32 %v172_v10, %v146_v9  ;;  %v148_v13 = vld [vmem:[%s246_s1 + $0xc] sm:$0xf0]  ;;  %v154_v14 = vld [vmem:[%s246_s1 + $0x8] sm:$0xf]  ;;  %v173_v15 = vld [vmem:[%s246_s1 + $0x10] sm:$0xf0] }
   0x5   :  { %108 = vmatpush.bf16.msra.mxu1 %v163_v7  ;;  %121 = vmatpush.bf16.msra.mxu2 %v167_v8  ;;  %v151_v16 = vor.u32 %v171_v11, %v148_v13  ;;  %v155_v17 = vor.u32 %v173_v15, %v154_v14  ;;  %v15_v18 = vld [vmem:[%s247_s0] sm:$0x3] }
   0x6   :  { %v143_v19 = vmul.f32 -1.442695, %v15_v18  ;;  %v45_v34 = vld [vmem:[%s248_s2] sm:$0x7] }
   0x7   :  { %v48_v35 = vperm.slane %v45_v34, 1  ;;  %v47_v38 = vperm.slane %v45_v34, 0  ;;  %v49_v40 = vperm.slane %v45_v34, 2 }
   0x8   :  { %96 = vmatpush.bf16.msra.mxu0 %v147_v12  ;;  %177 = vpow2.f32 %v143_v19 }
   0x9   :  { %109 = vmatpush.bf16.msra.mxu1 %v151_v16  ;;  %122 = vmatpush.bf16.msra.mxu2 %v155_v17 }
   0xe   :  { %v178_v20 = vpop.eup %177 }
   0xf   :  { %v19_v21 = vadd.f32 1.0, %v178_v20 }
  0x11   :  { %179 = vrcp.f32 %v19_v21  ;;  %v31_v24 = vand.u32 2147483648, %v19_v21  ;;  %vm25_vm0 = vweird.f32 %v19_v21  ;;  %v29_v26 = vand.u32 2147483647, %v19_v21 }
  0x13   :  { %v32_v28 = vor.u32 1.1754944e-38, %v31_v24  ;;  %vm30_vm3 = vcmp.eq.f32.partialorder %v29_v26, 8.507059e+37 }
  0x17   :  { %v180_v22 = vpop.eup %179 }
  0x18   :  { %v21_v23 = vmul.f32 %v180_v22, %v19_v21  ;;  %vm26_vm1 = vweird.f32 %v180_v22 }
  0x19   :  { %vm27_vm2 = vmor %vm25_vm0, %vm26_vm1 }
  0x1a   :  { %v22_v25 = vsub.f32 1.0, %v21_v23 }
  0x1c   :  { %v23_v27 = vmul.f32 %v180_v22, %v22_v25 }
  0x1e   :  { %v24_v29 = vadd.f32 %v180_v22, %v23_v27 }
  0x20   :  { %v28_v30 = vsel %vm27_vm2, %v180_v22, %v24_v29 }
  0x21   :  { %v33_v31 = vsel %vm30_vm3, %v32_v28, %v28_v30 }
  0x22   :  { %v35_v32 = vmul.f32 %v33_v31, %v15_v18 }
  0x24   :  { %v36_v33 = vpack.c.bf16 %v35_v32, %v35_v32 }
  0x26   :  { %168 = vmatmul.msk.bf16.vlgmr.msra.gmra.mxu0 %vm85_vm4, %v36_v33  ;;  %169 = vmatmul.msk.bf16.vlgmr.msra.gmra.mxu1 %vm85_vm4, %v36_v33 }
  0x27   :  { %170 = vmatmul.msk.bf16.vlgmr.msra.gmra.mxu2 %vm85_vm4, %v36_v33 }
  0xa3   :  { %v98_v36 = vpop.f32.mrf.mxu0  ;;  %v111_v37 = vpop.f32.mrf.mxu1 }
  0xa4   :  { %v112_v39 = vadd.f32 %v111_v37, %v48_v35  ;;  %v99_v41 = vadd.f32 %v98_v36, %v47_v38 }
  0xa6   :  { %v131_v42 = vrot.slane %v112_v39, 6 }
  0xa8   :  { %v134_v47 = vsel %vm133_vm5, %v99_v41, %v131_v42 }
  0xaa   :  { %v124_v43 = vpop.f32.mrf.mxu2 }
  0xab   :  { %v125_v44 = vadd.f32 %v124_v43, %v49_v40  ;;  %v100_v45 = vpop.f32.mrf.mxu0  ;;  %v113_v46 = vpop.f32.mrf.mxu1 }
  0xad   :  { %v132_v48 = vrot.slane %v125_v44, 4 }
  0xaf   :  { %v136_v49 = vsel %vm135_vm6, %v134_v47, %v132_v48 }
  0xb0   :  { %138 = vst [vmem:[%s249_s3] sm:$0x3f] %v136_v49 }
  0xb2   :  { %v126_v50 = vpop.f32.mrf.mxu2 }

// kernel: mm_double_stream_block_audio.15
= control target key start
LH: loop header
LB: loop body
LE: loop exit
PB: predicated region body
PF: predicated region fallthrough
CT: control target
= control target key end

     0   :  { %s966_s24 = smov 0   ;;  %s968_s25 = smov 0   ;;  %s1078_s0 = inlined_call_operand.vmem [shape: bf16[2,8,32], index: 0, kind: input, shape index: {}]   ;;  %s1079_s1 = inlined_call_operand.vmem [shape: f32[2,1,32], index: 1, kind: input, shape index: {}]   ;;  %s1080_s2 = inlined_call_operand.vmem [shape: f32[2,1,32], index: 2, kind: input, shape index: {}]   ;;  %s1081_s3 = inlined_call_operand.vmem [shape: bf16[3,32,32], index: 3, kind: input, shape index: {}]   ;;  %s1082_s4 = inlined_call_operand.vmem [shape: f32[3,1,32], index: 4, kind: input, shape index: {}]   ;;  %s1083_s5 = inlined_call_operand.vmem [shape: f32[1,8], index: 5, kind: input, shape index: {}]   ;;  %s1084_s6 = inlined_call_operand.vmem [shape: f32[1,8], index: 6, kind: input, shape index: {}]   ;;  %s1085_s7 = inlined_call_operand.vmem [shape: bf16[3,2,8,32], index: 7, kind: output, shape index: {}]  }
   0x1   :  { %1086 = sst [smem:[#allocation2_spill]] %s1078_s0  ;;  %s970_s26 = smov 0  }
   0x2   :  { %s972_s27 = smov 0   ;;  %s974_s28 = smov 0  }
   0x3 LB: > { %s39_s29 = sadd.s32 1, %s908_s26  ;;  %s43_s30 = sadd.s32 1, %s912_s27  ;;  %s916_s28 = sphi %s974_s28, %s17_s28   ;;  %s912_s27 = sphi %s972_s27, %s1091_s27   ;;  %s908_s26 = sphi %s970_s26, %s1090_s26   ;;  %s904_s25 = sphi %s968_s25, %s1089_s25   ;;  %s900_s24 = sphi %s966_s24, %s1088_s24  }
   0x4   : > { %p41_p0 = scmp.ge.s32.totalorder %s39_s29, 3  ;;  %p792_p1 = scmp.ge.s32.totalorder %s916_s28, 1 }
   0x5   : > { %p317_p2 = scmp.lt.s32.totalorder %s916_s28, 7 }
   0x6   : > { %s1093_s29 = smov (%p41_p0, %s39_s29), 0  ;;  %s1095_s30 = smov (!%p41_p0, %s43_s30), %s912_s27 }
   0x7   : > { %p318_p3 = pnand %p792_p1, %p317_p2  ;;  %p45_p4 = scmp.ge.s32.totalorder %s1095_s30, 2 }
   0x8   : > { %p380_p5 = scmp.lt.s32.totalorder (!%p318_p3), %s904_s25, 1  ;;  %s1087_s0 = sld [smem:[#allocation2_spill]] (!%p318_p3) }
   0x9   : > { %s1097_s30 = smov (%p45_p4, %s1095_s30), 0  ;;  %321 = sbr.rel (%p318_p3) target bundleno = 706 (0x2c2), region = 48 }
   0xa   : > { %p393_p6 = scmp.lt.s32.totalorder (!%p318_p3), %s900_s24, 2  ;;  %p807_p7 = scmp.ne.s32.totalorder (!%p318_p3), %s900_s24, 2 }
   0xe   : > { %s1099_s25 = smov (!%p380_p5, %s904_s25), 1  ;;  %vm426_vm0 = vcmask 261120   ;;  %v918_v3 = vmov 32.0  }
   0xf   : > { %s793_s8 = sshll.u32 %s1099_s25, 2  ;;  %864 = vrcp.f32 %v918_v3  ;;  %s389_s16 = scalar_lea.vmem %s1079_s1, %s1099_s25 }
  0x10   : > { %s386_s11 = scalar_lea.vmem %s1087_s0, %s793_s8  ;;  %s392_s15 = scalar_lea.vmem %s1080_s2, %s1099_s25  ;;  %v862_v31 = vld [vmem:[%s389_s16] ss:$0 sm:$0xff] }
  0x11   : > { %v422_v0 = vld [vmem:[%s386_s11] sm:$0xf]  ;;  %s1008_s12 = scalar_select %p393_p6, %s900_s24, 2 }
  0x12   : > { %v423_v1 = vunpack.c.l.bf16 %v422_v0  ;;  %v425_v23 = vld [vmem:[%s392_s15] sm:$0x1] }
  0x13   : > { %s796_s13 = sshll.u32 %s1008_s12, 1  ;;  %s406_s8 = scalar_lea.vmem %s1082_s4, %s1008_s12  ;;  %v456_v25 = vadd.f32 1.0, %v425_v23 }
  0x14   : > { %v427_v2 = vsel %vm426_vm0, %v423_v1, 0.0  ;;  %s418_s17 = sadd.s32 %s796_s13, %s1099_s25  ;;  %s811_s9 = sshll.u32 %s1008_s12, 4  ;;  %v863_v35 = vld [vmem:[%s406_s8] ss:$0 sm:$0xff] }
  0x15   : > { %428 = vadd.xlane.f32.xlu0 %v427_v2  ;;  %v865_v4 = vpop.eup %864  ;;  %s797_s18 = sshll.u32 %s418_s17, 2  ;;  %s400_s0 = scalar_lea.vmem %s1081_s3, %s811_s9  ;;  %v458_v28 = vperm.slane %v456_v25, 0 }
  0x16   : > { %v431_v5 = vmul.f32 32.0, %v865_v4  ;;  %vm435_vm1 = vweird.f32 %v865_v4  ;;  %s1019_s21 = scalar_lea.vmem %s1085_s7, %s797_s18  ;;  %v813_v15 = vld [vmem:[%s400_s0 + $0x8] sm:$0xff]  ;;  %v812_v16 = vld [vmem:[%s400_s0] sm:$0xff] }
  0x17   : > { %495 = vmatpush.bf16.msra.mxu0 %v813_v15 }
  0x18   : > { %v432_v6 = vsub.f32 1.0, %v431_v5 }
  0x1a   : > { %v433_v7 = vmul.f32 %v865_v4, %v432_v6 }
  0x1b   : > { %496 = vmatpush.bf16.msra.mxu0 %v812_v16 }
  0x1c   : > { %v434_v8 = vadd.f32 %v865_v4, %v433_v7 }
  0x1e   : > { %v436_v9 = vsel %vm435_vm1, %v865_v4, %v434_v8 }
  0x88   : > { %v429_v10 = vpop.xlane.xlu0 %428 }
  0x89   : > { %v437_v11 = vmul.f32 %v436_v9, %v429_v10 }
  0x8b   : > { %v438_v12 = vsub.f32 %v423_v1, %v437_v11 }
  0x8d   : > { %v439_v13 = vmul.f32 %v438_v12, %v438_v12 }
  0x8f   : > { %v440_v14 = vsel %vm426_vm0, %v439_v13, 0.0 }
  0x90   : > { %441 = vadd.xlane.f32.xlu0 %v440_v14 }
 0x103   : > { %v442_v17 = vpop.xlane.xlu0 %441 }
 0x104   : > { %v443_v18 = vmul.f32 %v442_v17, %v436_v9 }
 0x106   : > { %v444_v19 = vadd.f32 1e-06, %v443_v18 }
 0x108   : > { %866 = vrsqrt.f32 %v444_v19  ;;  %vm451_vm3 = vweird.f32 %v444_v19 }
 0x10e   : > { %v867_v20 = vpop.eup %866 }
 0x10f   : > { %v446_v21 = vmul.f32 %v867_v20, %v444_v19  ;;  %vm452_vm2 = vweird.f32 %v867_v20 }
 0x110   : > { %vm453_vm4 = vmor %vm451_vm3, %vm452_vm2 }
 0x111   : > { %v447_v22 = vmul.f32 %v867_v20, %v446_v21 }
 0x113   : > { %v448_v24 = vmul.f32 0.5, %v447_v22 }
 0x115   : > { %v449_v26 = vsub.f32 1.5, %v448_v24 }
 0x117   : > { %v450_v27 = vmul.f32 %v867_v20, %v449_v26 }
 0x119   : > { %v454_v29 = vsel %vm453_vm4, %v867_v20, %v450_v27 }
 0x11a   : > { %v455_v30 = vmul.f32 %v454_v29, %v438_v12 }
 0x11c   : > { %v460_v32 = vmul.f32 %v458_v28, %v455_v30 }
 0x11e   : > { %v464_v33 = vadd.f32 %v862_v31, %v460_v32 }
 0x120   : > { %v465_v34 = vpack.c.bf16 %v464_v33, %v464_v33 }
 0x122   : > { %806 = vmatmul.msk.bf16.vlgmr.msra.gmra.mxu0 %vm426_vm0, %v465_v34 }
 0x19f   : > { %v498_v36 = vpop.f32.mrf.mxu0 }
 0x1a0   : > { %v1039_v37 = vadd.f32 %v863_v35, %v498_v36 }
 0x1a3   : > { %505 = sbr.rel (%p807_p7) target bundleno = 427 (0x1ab), region = 52 }
 0x1a7   : > { %v500_v38 = vpop.f32.mrf.mxu0 }
 0x1a8   : > { %v506_v39 = vpack.c.bf16 %v1039_v37, %v1039_v37  ;;  %vm507_vm5 = vcmask 257024  }
 0x1aa   : > { %508 = vst.msk [vmem:[%s1019_s21] sm:$0xf] %vm507_vm5, %v506_v39 }
 0x1ab PF: > { %p808_p8 = scmp.eq.s32.totalorder %s900_s24, 2 }
 0x1ac   : > { %s919_s12 = smov (!%p808_p8), 104   ;;  %s920_s16 = smov (!%p808_p8), 120  }
 0x1ad   : > { %512 = sbr.rel (%p808_p8) target bundleno = 706 (0x2c2), region = 56  ;;  %s921_s17 = smov (!%p808_p8), 112  }
 0x1ae   : > { %p513_p9 = scmp.eq.s32.totalorder (!%p808_p8), %s900_s24, 0  ;;  %s923_s8 = smov (!%p808_p8), 8  }
 0x1af   : > { %s924_s24 = smov (!%p808_p8), 16   ;;  %s925_s9 = smov (!%p808_p8), 24  }
 0x1b2   : > { %v520_v40 = vmul.f32 %v1039_v37, %v1039_v37  ;;  %vm521_vm6 = vcmask 64512   ;;  %s516_s18 = scalar_select %p513_p9, 1, 0  ;;  %v514_v49 = vld [vmem:[%s1083_s5] sm:$0x1]  ;;  %v922_v53 = vmov 8.0  }
 0x1b3   : > { %v515_v50 = vld [vmem:[%s1084_s6] sm:$0x1]  ;;  %868 = vrcp.f32 %v922_v53  ;;  %vm550_vm12 = vcmask 60416   ;;  %vm577_vm2 = vcmask 126016  }
 0x1b4   : > { %605 = vrot.lane.b32.xlu1 %v520_v40, %s919_s12  ;;  %553 = vrot.lane.b32.xlu0 %v520_v40, %s920_s16  ;;  %v522_v41 = vsel %vm521_vm6, %v520_v40, 0.0  ;;  %v517_v48 = vstv %s516_s18 }
 0x1b5   : > { %vm518_vm7 = vcmp.eq.s32.totalorder %v517_v48, 1 }
 0x1b6   : > { %v519_v51 = vsel %vm518_vm7, %v514_v49, %v515_v50  ;;  %vm603_vm7 = vcmask 191616  }
 0x1b7   : > { %v546_v52 = vperm.slane %v519_v51, 0 }
 0x1b9   : > { %v869_v54 = vpop.eup %868 }
 0x1ba   : > { %v526_v55 = vmul.f32 8.0, %v869_v54  ;;  %vm530_vm8 = vweird.f32 %v869_v54 }
 0x1bc   : > { %579 = vrot.lane.b32.xlu0 %v520_v40, %s921_s17  ;;  %v527_v56 = vsub.f32 1.0, %v526_v55 }
 0x1be   : > { %v528_v57 = vmul.f32 %v869_v54, %v527_v56 }
 0x1c0   : > { %v529_v58 = vadd.f32 %v869_v54, %v528_v57 }
 0x1c2   : > { %v531_v59 = vsel %vm530_vm8, %v869_v54, %v529_v58  ;;  %vm629_vm8 = vcmask 257216  }
 0x1de   : > { %523 = vadd.xlane.f32.xlu1 %v522_v41 }
 0x226   : > { %v606_v42 = vpop.permute.xlu1 %605  ;;  %v554_v43 = vpop.permute.xlu0 %553 }
 0x227   : > { %v608_v44 = vsel %vm521_vm6, %v606_v42, 0.0  ;;  %v556_v45 = vsel %vm521_vm6, %v554_v43, 0.0 }
 0x228   : > { %609 = vadd.xlane.f32.xlu0 %v608_v44  ;;  %557 = vadd.xlane.f32.xlu2 %v556_v45 }
 0x22e   : > { %v580_v46 = vpop.permute.xlu0 %579 }
 0x22f   : > { %v582_v47 = vsel %vm521_vm6, %v580_v46, 0.0 }
 0x230   : > { %583 = vadd.xlane.f32.xlu2 %v582_v47 }
 0x248   : > { %572 = vrot.lane.b32.xlu2 %v546_v52, %s923_s8 }
 0x250   : > { %598 = vrot.lane.b32.xlu2 %v546_v52, %s924_s24 }
 0x251   : > { %v524_v60 = vpop.xlane.xlu1 %523 }
 0x252   : > { %v532_v61 = vmul.f32 %v531_v59, %v524_v60 }
 0x254   : > { %v533_v62 = vadd.f32 1e-06, %v532_v61 }
 0x256   : > { %870 = vrsqrt.f32 %v533_v62  ;;  %vm540_vm9 = vweird.f32 %v533_v62 }
 0x258   : > { %624 = vrot.lane.b32.xlu2 %v546_v52, %s925_s9 }
 0x25c   : > { %v871_v63 = vpop.eup %870 }
 0x25d   : > { %v535_v0 = vmul.f32 %v871_v63, %v533_v62  ;;  %vm541_vm10 = vweird.f32 %v871_v63 }
 0x25e   : > { %vm542_vm11 = vmor %vm540_vm9, %vm541_vm10 }
 0x25f   : > { %v536_v1 = vmul.f32 %v871_v63, %v535_v0 }
 0x261   : > { %v537_v2 = vmul.f32 0.5, %v536_v1 }
 0x263   : > { %v538_v3 = vsub.f32 1.5, %v537_v2 }
 0x265   : > { %v539_v4 = vmul.f32 %v871_v63, %v538_v3 }
 0x267   : > { %v543_v5 = vsel %vm542_vm11, %v871_v63, %v539_v4 }
 0x268   : > { %v544_v6 = vmul.f32 %v543_v5, %v1039_v37 }
 0x26a   : > { %v548_v7 = vmul.f32 %v546_v52, %v544_v6 }
 0x26c   : > { %v549_v8 = vpack.c.bf16 %v548_v7, %v548_v7 }
 0x26e   : > { %551 = vst.msk [vmem:[%s1019_s21] sm:$0xf] %vm550_vm12, %v549_v8 }
 0x29b   : > { %v558_v9 = vpop.xlane.xlu2 %557  ;;  %v610_v10 = vpop.xlane.xlu0 %609 }
 0x29c   : > { %v559_v11 = vmul.f32 %v558_v9, %v531_v59  ;;  %v611_v12 = vmul.f32 %v610_v10, %v531_v59 }
 0x29e   : > { %v560_v13 = vadd.f32 1e-06, %v559_v11  ;;  %v612_v14 = vadd.f32 1e-06, %v611_v12 }
 0x2a0   : > { %872 = vrsqrt.f32 %v560_v13  ;;  %vm567_vm14 = vweird.f32 %v560_v13  ;;  %vm619_vm0 = vweird.f32 %v612_v14 }
 0x2a1   : > { %874 = vrsqrt.f32 %v612_v14 }
 0x2a3   : > { %v584_v15 = vpop.xlane.xlu2 %583 }
 0x2a4   : > { %v585_v16 = vmul.f32 %v584_v15, %v531_v59 }
 0x2a6   : > { %v873_v17 = vpop.eup %872  ;;  %v586_v18 = vadd.f32 1e-06, %v585_v16 }
 0x2a7   : > { %v875_v19 = vpop.eup %874  ;;  %v562_v20 = vmul.f32 %v873_v17, %v560_v13  ;;  %vm568_vm13 = vweird.f32 %v873_v17 }
 0x2a8   : > { %v614_v21 = vmul.f32 %v875_v19, %v612_v14  ;;  %876 = vrsqrt.f32 %v586_v18  ;;  %vm569_vm15 = vmor %vm567_vm14, %vm568_vm13  ;;  %vm620_vm1 = vweird.f32 %v875_v19  ;;  %vm593_vm5 = vweird.f32 %v586_v18 }
 0x2a9   : > { %v563_v22 = vmul.f32 %v873_v17, %v562_v20  ;;  %vm621_vm4 = vmor %vm619_vm0, %vm620_vm1 }
 0x2aa   : > { %v615_v23 = vmul.f32 %v875_v19, %v614_v21 }
 0x2ab   : > { %v564_v24 = vmul.f32 0.5, %v563_v22  ;;  %v573_v25 = vpop.permute.xlu2 %572 }
 0x2ac   : > { %v616_v26 = vmul.f32 0.5, %v615_v23 }
 0x2ad   : > { %v565_v27 = vsub.f32 1.5, %v564_v24 }
 0x2ae   : > { %v877_v28 = vpop.eup %876  ;;  %v617_v29 = vsub.f32 1.5, %v616_v26 }
 0x2af   : > { %v588_v30 = vmul.f32 %v877_v28, %v586_v18  ;;  %v566_v31 = vmul.f32 %v873_v17, %v565_v27  ;;  %vm594_vm3 = vweird.f32 %v877_v28 }
 0x2b0   : > { %v618_v38 = vmul.f32 %v875_v19, %v617_v29  ;;  %vm595_vm6 = vmor %vm593_vm5, %vm594_vm3 }
 0x2b1   : > { %v589_v32 = vmul.f32 %v877_v28, %v588_v30  ;;  %v570_v33 = vsel %vm569_vm15, %v873_v17, %v566_v31 }
 0x2b2   : > { %v571_v34 = vmul.f32 %v570_v33, %v1039_v37  ;;  %v622_v43 = vsel %vm621_vm4, %v875_v19, %v618_v38 }
 0x2b3   : > { %v590_v35 = vmul.f32 0.5, %v589_v32  ;;  %v599_v36 = vpop.permute.xlu2 %598  ;;  %v623_v46 = vmul.f32 %v622_v43, %v1039_v37 }
 0x2b4   : > { %v575_v39 = vmul.f32 %v573_v25, %v571_v34 }
 0x2b5   : > { %v591_v40 = vsub.f32 1.5, %v590_v35 }
 0x2b6   : > { %v576_v41 = vpack.c.bf16 %v575_v39, %v575_v39 }
 0x2b7   : > { %v592_v42 = vmul.f32 %v877_v28, %v591_v40 }
 0x2b8   : > { %578 = vst.msk [vmem:[%s1019_s21] sm:$0xf] %vm577_vm2, %v576_v41 }
 0x2b9   : > { %v596_v44 = vsel %vm595_vm6, %v877_v28, %v592_v42 }
 0x2ba   : > { %v597_v45 = vmul.f32 %v596_v44, %v1039_v37 }
 0x2bb   : > { %v625_v47 = vpop.permute.xlu2 %624 }
 0x2bc   : > { %v601_v48 = vmul.f32 %v599_v36, %v597_v45  ;;  %v627_v49 = vmul.f32 %v625_v47, %v623_v46 }
 0x2be   : > { %v602_v50 = vpack.c.bf16 %v601_v48, %v601_v48  ;;  %v628_v51 = vpack.c.bf16 %v627_v49, %v627_v49 }
 0x2c0   : > { %604 = vst.msk [vmem:[%s1019_s21] sm:$0xf] %vm603_vm7, %v602_v50 }
 0x2c1   : > { %630 = vst.msk [vmem:[%s1019_s21] sm:$0xf] %vm629_vm8, %v628_v51 }
 0x2c2 PF: > { %s17_s28 = sadd.s32 1, %s916_s28   ;;  %s1088_s24 = smov %s908_s26 }
 0x2c3   : > { %p14_p10 = scmp.ge.s32.totalorder %s17_s28, 8   ;;  %s1089_s25 = smov %s912_s27 }
 0x2c4   : > { %s1090_s26 = smov %s1093_s29  ;;  %s1091_s27 = smov %s1097_s30 }
 0x2c5   :  { %16 = sbr.rel (!%p14_p10) target bundleno = 3 (0x3), region = 98 }

// kernel: mm_double_stream_block_audio.16
= control target key start
LH: loop header
LB: loop body
LE: loop exit
PB: predicated region body
PF: predicated region fallthrough
CT: control target
= control target key end

     0   :  { %12 = vsyncpa [#allocation3], 0  ;;  %s1261_s0 = inlined_call_operand.vmem [shape: bf16[2,8,32], index: 0, kind: input, shape index: {}]   ;;  %s1262_s1 = inlined_call_operand.vmem [shape: f32[2,1,32], index: 1, kind: input, shape index: {}, may-alias: {1,2}]   ;;  %s1263_s2 = inlined_call_operand.vmem [shape: f32[2,1,32], index: 2, kind: input, shape index: {}, may-alias: {1,2}]   ;;  %s1264_s3 = inlined_call_operand.hbm [shape: bf16[3,32,32], index: 3, kind: input, shape index: {}]   ;;  %s1265_s4 = inlined_call_operand.vmem [shape: f32[3,1,32], index: 4, kind: input, shape index: {}]   ;;  %s1266_s5 = inlined_call_operand.vmem [shape: f32[1,8], index: 5, kind: input, shape index: {}]   ;;  %s1267_s6 = inlined_call_operand.vmem [shape: f32[1,8], index: 6, kind: input, shape index: {}]   ;;  %s1268_s7 = inlined_call_operand.vmem [shape: bf16[3,2,8,32], index: 7, kind: output, shape index: {}]  }
   0x1   :  { %14 = vsyncpa [#allocation3 + $0x1], 0  ;;  %s1083_s24 = smov 0   ;;  %s1085_s25 = smov 0  }
   0x2   :  { %s1087_s26 = smov 0   ;;  %s1089_s27 = smov 0  }
   0x3   :  { %s1091_s28 = smov 0   ;;  %s1093_s29 = smov 0  }
   0x4   :  { %s1095_s30 = smov 0   ;;  %s1097_s8 = smov 0  }
   0x5 LB: > { %s810_s9 = sadd.s32 4294967295, %s1031_s8   ;;  %s42_s10 = sadd.s32 1, %s1023_s29  ;;  %s1031_s8 = sphi %s1097_s8, %s20_s8   ;;  %s1027_s30 = sphi %s1095_s30, %s1282_s30   ;;  %s1023_s29 = sphi %s1093_s29, %s1281_s29   ;;  %s1019_s28 = sphi %s1091_s28, %s1280_s28   ;;  %s1015_s27 = sphi %s1089_s27, %s1279_s27   ;;  %s1011_s26 = sphi %s1087_s26, %s1278_s26   ;;  %s1007_s25 = sphi %s1085_s25, %s1277_s25   ;;  %s1003_s24 = sphi %s1083_s24, %s1276_s24  }
   0x6   : > { %p44_p0 = scmp.ge.s32.totalorder %s42_s10, 3  ;;  %s46_s11 = sadd.s32 1, %s1027_s30 }
   0x7   : > { %s135_s12 = sadd.s32 1, %s1011_s26  ;;  %p142_p1 = scmp.ne.s32.totalorder %s1011_s26, %s1007_s25 }
   0x8   : > { %s1284_s10 = smov (%p44_p0, %s42_s10), 0  ;;  %s1286_s11 = smov (!%p44_p0, %s46_s11), %s1027_s30 }
   0x9   : > { %1270 = sst [smem:[#allocation5_spill]] %s1284_s10  ;;  %s130_s13 = ssub.s32 %s1023_s29, %s1284_s10 }
   0xa   : > { %p143_p2 = scmp.eq.s32.totalorder %s1031_s8, 0  ;;  %p48_p3 = scmp.ge.s32.totalorder %s1286_s11, 2 }
   0xb   : > { %p133_p4 = scmp.eq.s32.totalorder %s130_s13, 0  ;;  %p148_p6 = scmp.ne.s32.totalorder %s1007_s25, %s1003_s24 }
   0xc   : > { %p1133_p5 = por %p143_p2, %p142_p1  ;;  %s1288_s11 = smov (%p48_p3, %s1286_s11), 0 }
   0xd   : > { %1272 = sst [smem:[#allocation6_spill]] %s1288_s11  ;;  %p149_p7 = scmp.eq.s32.totalorder %s810_s9, 0 }
   0xe   : > { %s1141_s15 = scalar_select %p133_p4, %s1011_s26, %s135_s12  }
   0xf   : > { %p844_p8 = scmp.lt.s32.totalorder %s1031_s8, 6  ;;  %s302_s16 = sand.u32 1, %s1011_s26  }
  0x10   : > { %p1145_p9 = por %p149_p7, %p148_p6  ;;  %s814_s18 = sshll.u32 %s302_s16, 4 }
  0x11   : > { %s835_s19 = sshll.u32 %s1023_s29, 4  ;;  %s306_s24 = scalar_lea.vmem [#allocation2], %s814_s18 }
  0x12   : > { %s312_s22 = scalar_lea.hbm %s1264_s3, %s835_s19  ;;  %s315_s13 = sshll.u32 %s306_s24, 4  ;;  %s316_s13 = int_to_ptr.vmem [resolvable:$true] %s315_s13 }
  0x13   : > { %s313_s23 = sshll.u32 %s312_s22, 4  ;;  %p841_p10 = pnand %p844_p8, %p1133_p5  ;;  %s314_s23 = int_to_ptr.hbm [resolvable:$true] %s313_s23 }
  0x14   : > { %p817_p11 = scmp.ge.s32.totalorder %s1031_s8, 1  ;;  %p332_p12 = scmp.lt.s32.totalorder %s1031_s8, 7 }
  0x15   : > { %s303_s9 = scalar_lea.sflag [#allocation3], %s302_s16  ;;  %s1033_s12 = smov 64  }
  0x16   : > { %s1034_s11 = smov 4   ;;  %p333_p13 = pnand %p817_p11, %p332_p12 }
  0x17   : > { %843 = dma.hbm_to_vmem [thread:$0]  (!%p841_p10), %s314_s23, 256, %s316_s13, %s303_s9, %s1033_s12, %s1033_s12, %s1034_s11  }
  0x18   : > { %336 = sbr.rel (%p333_p13) target bundleno = 724 (0x2d4), region = 48  ;;  %s338_s10 = sand.u32 (!%p333_p13), 1, %s1007_s25  }
  0x19   : > { %s1158_s20 = sshll.u32 (!%p333_p13), %s338_s10, 4  ;;  %s339_s18 = scalar_lea.sflag (!%p333_p13), [#allocation3], %s338_s10 }
  0x1a   : > { %s342_s19 = scalar_lea.vmem (!%p333_p13), [#allocation2], %s1158_s20 }
  0x1d   : > { %998 = dma.done.wait (%p1145_p9), %s339_s18, 256  }
  0x1e   : > { %1000 = vsyncadd (%p1145_p9), %s339_s18, 4294967040  ;;  %p402_p0 = scmp.lt.s32.totalorder %s1019_s28, 1  ;;  %vm440_vm0 = vcmask 261120   ;;  %v1035_v3 = vmov 32.0   ;;  %p415_p1 = scmp.lt.s32.totalorder %s1015_s27, 2  ;;  %v837_v15 = vld [vmem:[%s342_s19 + $0x8] sm:$0xff] }
  0x1f   : > { %921 = vrcp.f32 %v1035_v3  ;;  %509 = vmatpush.bf16.msra.mxu0 %v837_v15  ;;  %v836_v16 = vld [vmem:[%s342_s19] sm:$0xff]  ;;  %p831_p2 = scmp.ne.s32.totalorder %s1015_s27, 2 }
  0x20   : > { %s1290_s28 = smov (!%p402_p0, %s1019_s28), 1 }
  0x21   : > { %s819_s11 = sshll.u32 %s1290_s28, 2  ;;  %s411_s22 = scalar_lea.vmem %s1262_s1, %s1290_s28 }
  0x22   : > { %s408_s21 = scalar_lea.vmem %s1261_s0, %s819_s11  ;;  %s414_s24 = scalar_lea.vmem %s1263_s2, %s1290_s28  ;;  %v919_v31 = vld [vmem:[%s411_s22] ss:$0 sm:$0xff] }
  0x23   : > { %v436_v0 = vld [vmem:[%s408_s21] sm:$0xf]  ;;  %s1181_s23 = scalar_select %p415_p1, %s1015_s27, 2  ;;  %510 = vmatpush.bf16.msra.mxu0 %v836_v16 }
  0x24   : > { %v437_v1 = vunpack.c.l.bf16 %v436_v0  ;;  %v439_v23 = vld [vmem:[%s414_s24] sm:$0x1] }
  0x25   : > { %v922_v4 = vpop.eup %921  ;;  %s420_s9 = scalar_lea.vmem %s1265_s4, %s1181_s23  ;;  %s820_s12 = sshll.u32 %s1181_s23, 1  ;;  %v470_v25 = vadd.f32 1.0, %v439_v23 }
  0x26   : > { %v441_v2 = vsel %vm440_vm0, %v437_v1, 0.0  ;;  %v445_v5 = vmul.f32 32.0, %v922_v4  ;;  %vm449_vm1 = vweird.f32 %v922_v4  ;;  %s432_s18 = sadd.s32 %s820_s12, %s1290_s28  ;;  %v920_v35 = vld [vmem:[%s420_s9] ss:$0 sm:$0xff] }
  0x27   : > { %442 = vadd.xlane.f32.xlu0 %v441_v2  ;;  %s821_s11 = sshll.u32 %s432_s18, 2  ;;  %v472_v28 = vperm.slane %v470_v25, 0 }
  0x28   : > { %v446_v6 = vsub.f32 1.0, %v445_v5  ;;  %s1192_s21 = scalar_lea.vmem %s1268_s7, %s821_s11 }
  0x2a   : > { %v447_v7 = vmul.f32 %v922_v4, %v446_v6 }
  0x2c   : > { %v448_v8 = vadd.f32 %v922_v4, %v447_v7 }
  0x2e   : > { %v450_v9 = vsel %vm449_vm1, %v922_v4, %v448_v8 }
  0x9a   : > { %v443_v10 = vpop.xlane.xlu0 %442 }
  0x9b   : > { %v451_v11 = vmul.f32 %v450_v9, %v443_v10 }
  0x9d   : > { %v452_v12 = vsub.f32 %v437_v1, %v451_v11 }
  0x9f   : > { %v453_v13 = vmul.f32 %v452_v12, %v452_v12 }
  0xa1   : > { %v454_v14 = vsel %vm440_vm0, %v453_v13, 0.0 }
  0xa2   : > { %455 = vadd.xlane.f32.xlu0 %v454_v14 }
 0x115   : > { %v456_v17 = vpop.xlane.xlu0 %455 }
 0x116   : > { %v457_v18 = vmul.f32 %v456_v17, %v450_v9 }
 0x118   : > { %v458_v19 = vadd.f32 1e-06, %v457_v18 }
 0x11a   : > { %923 = vrsqrt.f32 %v458_v19  ;;  %vm465_vm3 = vweird.f32 %v458_v19 }
 0x120   : > { %v924_v20 = vpop.eup %923 }
 0x121   : > { %v460_v21 = vmul.f32 %v924_v20, %v458_v19  ;;  %vm466_vm2 = vweird.f32 %v924_v20 }
 0x122   : > { %vm467_vm4 = vmor %vm465_vm3, %vm466_vm2 }
 0x123   : > { %v461_v22 = vmul.f32 %v924_v20, %v460_v21 }
 0x125   : > { %v462_v24 = vmul.f32 0.5, %v461_v22 }
 0x127   : > { %v463_v26 = vsub.f32 1.5, %v462_v24 }
 0x129   : > { %v464_v27 = vmul.f32 %v924_v20, %v463_v26 }
 0x12b   : > { %v468_v29 = vsel %vm467_vm4, %v924_v20, %v464_v27 }
 0x12c   : > { %v469_v30 = vmul.f32 %v468_v29, %v452_v12 }
 0x12e   : > { %v474_v32 = vmul.f32 %v472_v28, %v469_v30 }
 0x130   : > { %v478_v33 = vadd.f32 %v919_v31, %v474_v32 }
 0x132   : > { %v479_v34 = vpack.c.bf16 %v478_v33, %v478_v33 }
 0x134   : > { %830 = vmatmul.msk.bf16.vlgmr.msra.gmra.mxu0 %vm440_vm0, %v479_v34 }
 0x1b1   : > { %v512_v36 = vpop.f32.mrf.mxu0 }
 0x1b2   : > { %v1213_v37 = vadd.f32 %v920_v35, %v512_v36 }
 0x1b5   : > { %519 = sbr.rel (%p831_p2) target bundleno = 445 (0x1bd), region = 56 }
 0x1b9   : > { %v514_v38 = vpop.f32.mrf.mxu0 }
 0x1ba   : > { %v520_v39 = vpack.c.bf16 %v1213_v37, %v1213_v37  ;;  %vm521_vm5 = vcmask 257024  }
 0x1bc   : > { %522 = vst.msk [vmem:[%s1192_s21] sm:$0xf] %vm521_vm5, %v520_v39 }
 0x1bd PF: > { %p832_p3 = scmp.eq.s32.totalorder %s1015_s27, 2 }
 0x1be   : > { %s1036_s28 = smov (!%p832_p3), 104   ;;  %s1037_s22 = smov (!%p832_p3), 120  }
 0x1bf   : > { %526 = sbr.rel (%p832_p3) target bundleno = 724 (0x2d4), region = 60  ;;  %s1038_s23 = smov (!%p832_p3), 112  }
 0x1c0   : > { %p527_p4 = scmp.eq.s32.totalorder (!%p832_p3), %s1015_s27, 0  ;;  %s1040_s10 = smov (!%p832_p3), 8  }
 0x1c1   : > { %s1041_s27 = smov (!%p832_p3), 16   ;;  %s1042_s17 = smov (!%p832_p3), 24  }
 0x1c4   : > { %v534_v40 = vmul.f32 %v1213_v37, %v1213_v37  ;;  %vm535_vm6 = vcmask 64512   ;;  %s530_s9 = scalar_select %p527_p4, 1, 0  ;;  %v528_v49 = vld [vmem:[%s1266_s5] sm:$0x1]  ;;  %v1039_v53 = vmov 8.0  }
 0x1c5   : > { %v529_v50 = vld [vmem:[%s1267_s6] sm:$0x1]  ;;  %925 = vrcp.f32 %v1039_v53  ;;  %vm564_vm12 = vcmask 60416   ;;  %vm591_vm2 = vcmask 126016  }
 0x1c6   : > { %619 = vrot.lane.b32.xlu1 %v534_v40, %s1036_s28  ;;  %567 = vrot.lane.b32.xlu0 %v534_v40, %s1037_s22  ;;  %v536_v41 = vsel %vm535_vm6, %v534_v40, 0.0  ;;  %v531_v48 = vstv %s530_s9 }
 0x1c7   : > { %vm532_vm7 = vcmp.eq.s32.totalorder %v531_v48, 1 }
 0x1c8   : > { %v533_v51 = vsel %vm532_vm7, %v528_v49, %v529_v50  ;;  %vm617_vm7 = vcmask 191616  }
 0x1c9   : > { %v560_v52 = vperm.slane %v533_v51, 0 }
 0x1cb   : > { %v926_v54 = vpop.eup %925 }
 0x1cc   : > { %v540_v55 = vmul.f32 8.0, %v926_v54  ;;  %vm544_vm8 = vweird.f32 %v926_v54 }
 0x1ce   : > { %593 = vrot.lane.b32.xlu0 %v534_v40, %s1038_s23  ;;  %v541_v56 = vsub.f32 1.0, %v540_v55 }
 0x1d0   : > { %v542_v57 = vmul.f32 %v926_v54, %v541_v56 }
 0x1d2   : > { %v543_v58 = vadd.f32 %v926_v54, %v542_v57 }
 0x1d4   : > { %v545_v59 = vsel %vm544_vm8, %v926_v54, %v543_v58  ;;  %vm643_vm8 = vcmask 257216  }
 0x1f0   : > { %537 = vadd.xlane.f32.xlu1 %v536_v41 }
 0x238   : > { %v620_v42 = vpop.permute.xlu1 %619  ;;  %v568_v43 = vpop.permute.xlu0 %567 }
 0x239   : > { %v622_v44 = vsel %vm535_vm6, %v620_v42, 0.0  ;;  %v570_v45 = vsel %vm535_vm6, %v568_v43, 0.0 }
 0x23a   : > { %623 = vadd.xlane.f32.xlu0 %v622_v44  ;;  %571 = vadd.xlane.f32.xlu2 %v570_v45 }
 0x240   : > { %v594_v46 = vpop.permute.xlu0 %593 }
 0x241   : > { %v596_v47 = vsel %vm535_vm6, %v594_v46, 0.0 }
 0x242   : > { %597 = vadd.xlane.f32.xlu2 %v596_v47 }
 0x25a   : > { %586 = vrot.lane.b32.xlu2 %v560_v52, %s1040_s10 }
 0x262   : > { %612 = vrot.lane.b32.xlu2 %v560_v52, %s1041_s27 }
 0x263   : > { %v538_v60 = vpop.xlane.xlu1 %537 }
 0x264   : > { %v546_v61 = vmul.f32 %v545_v59, %v538_v60 }
 0x266   : > { %v547_v62 = vadd.f32 1e-06, %v546_v61 }
 0x268   : > { %927 = vrsqrt.f32 %v547_v62  ;;  %vm554_vm9 = vweird.f32 %v547_v62 }
 0x26a   : > { %638 = vrot.lane.b32.xlu2 %v560_v52, %s1042_s17 }
 0x26e   : > { %v928_v63 = vpop.eup %927 }
 0x26f   : > { %v549_v0 = vmul.f32 %v928_v63, %v547_v62  ;;  %vm555_vm10 = vweird.f32 %v928_v63 }
 0x270   : > { %vm556_vm11 = vmor %vm554_vm9, %vm555_vm10 }
 0x271   : > { %v550_v1 = vmul.f32 %v928_v63, %v549_v0 }
 0x273   : > { %v551_v2 = vmul.f32 0.5, %v550_v1 }
 0x275   : > { %v552_v3 = vsub.f32 1.5, %v551_v2 }
 0x277   : > { %v553_v4 = vmul.f32 %v928_v63, %v552_v3 }
 0x279   : > { %v557_v5 = vsel %vm556_vm11, %v928_v63, %v553_v4 }
 0x27a   : > { %v558_v6 = vmul.f32 %v557_v5, %v1213_v37 }
 0x27c   : > { %v562_v7 = vmul.f32 %v560_v52, %v558_v6 }
 0x27e   : > { %v563_v8 = vpack.c.bf16 %v562_v7, %v562_v7 }
 0x280   : > { %565 = vst.msk [vmem:[%s1192_s21] sm:$0xf] %vm564_vm12, %v563_v8 }
 0x2ad   : > { %v572_v9 = vpop.xlane.xlu2 %571  ;;  %v624_v10 = vpop.xlane.xlu0 %623 }
 0x2ae   : > { %v573_v11 = vmul.f32 %v572_v9, %v545_v59  ;;  %v625_v12 = vmul.f32 %v624_v10, %v545_v59 }
 0x2b0   : > { %v574_v13 = vadd.f32 1e-06, %v573_v11  ;;  %v626_v14 = vadd.f32 1e-06, %v625_v12 }
 0x2b2   : > { %929 = vrsqrt.f32 %v574_v13  ;;  %vm581_vm14 = vweird.f32 %v574_v13  ;;  %vm633_vm0 = vweird.f32 %v626_v14 }
 0x2b3   : > { %931 = vrsqrt.f32 %v626_v14 }
 0x2b5   : > { %v598_v15 = vpop.xlane.xlu2 %597 }
 0x2b6   : > { %v599_v16 = vmul.f32 %v598_v15, %v545_v59 }
 0x2b8   : > { %v930_v17 = vpop.eup %929  ;;  %v600_v18 = vadd.f32 1e-06, %v599_v16 }
 0x2b9   : > { %v932_v19 = vpop.eup %931  ;;  %v576_v20 = vmul.f32 %v930_v17, %v574_v13  ;;  %vm582_vm13 = vweird.f32 %v930_v17 }
 0x2ba   : > { %v628_v21 = vmul.f32 %v932_v19, %v626_v14  ;;  %933 = vrsqrt.f32 %v600_v18  ;;  %vm583_vm15 = vmor %vm581_vm14, %vm582_vm13  ;;  %vm634_vm1 = vweird.f32 %v932_v19  ;;  %vm607_vm5 = vweird.f32 %v600_v18 }
 0x2bb   : > { %v577_v22 = vmul.f32 %v930_v17, %v576_v20  ;;  %vm635_vm4 = vmor %vm633_vm0, %vm634_vm1 }
 0x2bc   : > { %v629_v23 = vmul.f32 %v932_v19, %v628_v21 }
 0x2bd   : > { %v578_v24 = vmul.f32 0.5, %v577_v22  ;;  %v587_v25 = vpop.permute.xlu2 %586 }
 0x2be   : > { %v630_v26 = vmul.f32 0.5, %v629_v23 }
 0x2bf   : > { %v579_v27 = vsub.f32 1.5, %v578_v24 }
 0x2c0   : > { %v934_v28 = vpop.eup %933  ;;  %v631_v29 = vsub.f32 1.5, %v630_v26 }
 0x2c1   : > { %v602_v30 = vmul.f32 %v934_v28, %v600_v18  ;;  %v580_v31 = vmul.f32 %v930_v17, %v579_v27  ;;  %vm608_vm3 = vweird.f32 %v934_v28 }
 0x2c2   : > { %v632_v38 = vmul.f32 %v932_v19, %v631_v29  ;;  %vm609_vm6 = vmor %vm607_vm5, %vm608_vm3 }
 0x2c3   : > { %v603_v32 = vmul.f32 %v934_v28, %v602_v30  ;;  %v584_v33 = vsel %vm583_vm15, %v930_v17, %v580_v31 }
 0x2c4   : > { %v585_v34 = vmul.f32 %v584_v33, %v1213_v37  ;;  %v636_v43 = vsel %vm635_vm4, %v932_v19, %v632_v38 }
 0x2c5   : > { %v604_v35 = vmul.f32 0.5, %v603_v32  ;;  %v613_v36 = vpop.permute.xlu2 %612  ;;  %v637_v46 = vmul.f32 %v636_v43, %v1213_v37 }
 0x2c6   : > { %v589_v39 = vmul.f32 %v587_v25, %v585_v34 }
 0x2c7   : > { %v605_v40 = vsub.f32 1.5, %v604_v35 }
 0x2c8   : > { %v590_v41 = vpack.c.bf16 %v589_v39, %v589_v39 }
 0x2c9   : > { %v606_v42 = vmul.f32 %v934_v28, %v605_v40 }
 0x2ca   : > { %592 = vst.msk [vmem:[%s1192_s21] sm:$0xf] %vm591_vm2, %v590_v41 }
 0x2cb   : > { %v610_v44 = vsel %vm609_vm6, %v934_v28, %v606_v42 }
 0x2cc   : > { %v611_v45 = vmul.f32 %v610_v44, %v1213_v37 }
 0x2cd   : > { %v639_v47 = vpop.permute.xlu2 %638 }
 0x2ce   : > { %v615_v48 = vmul.f32 %v613_v36, %v611_v45  ;;  %v641_v49 = vmul.f32 %v639_v47, %v637_v46 }
 0x2d0   : > { %v616_v50 = vpack.c.bf16 %v615_v48, %v615_v48  ;;  %v642_v51 = vpack.c.bf16 %v641_v49, %v641_v49 }
 0x2d2   : > { %618 = vst.msk [vmem:[%s1192_s21] sm:$0xf] %vm617_vm7, %v616_v50 }
 0x2d3   : > { %644 = vst.msk [vmem:[%s1192_s21] sm:$0xf] %vm643_vm8, %v642_v51 }
 0x2d4 PF: > { %s20_s8 = sadd.s32 1, %s1031_s8   ;;  %s1274_s20 = sld [smem:[#allocation5_spill]] }
 0x2d5   : > { %p17_p5 = scmp.ge.s32.totalorder %s20_s8, 8   ;;  %s1275_s19 = sld [smem:[#allocation6_spill]] }
 0x2d6   : > { %s1276_s24 = smov %s1007_s25  ;;  %s1277_s25 = smov %s1011_s26 }
 0x2d7   : > { %s1278_s26 = smov %s1141_s15  ;;  %s1279_s27 = smov %s1023_s29 }
 0x2d8   : > { %s1280_s28 = smov %s1027_s30  ;;  %19 = sbr.rel (!%p17_p5) target bundleno = 5 (0x5), region = 108 }
 0x2da   : > { %s1281_s29 = smov %s1274_s20 }
 0x2db   : > { %s1282_s30 = smov %s1275_s19 }
 0x2dd   :  { %684 = vsyncpa [#allocation3], 1 }
 0x2de   :  { %686 = vsyncpa [#allocation3 + $0x1], 1 }

// kernel: mm_double_stream_block_audio.14
= control target key start
LH: loop header
LB: loop body
LE: loop exit
PB: predicated region body
PF: predicated region fallthrough
CT: control target
= control target key end

     0   :  { %s1125_s24 = smov 0   ;;  %s1127_s25 = smov 0   ;;  %s1305_s0 = inlined_call_operand.vmem [shape: bf16[2,16,32], index: 0, kind: input, shape index: {}]   ;;  %s1306_s1 = inlined_call_operand.vmem [shape: f32[2,1,32], index: 1, kind: input, shape index: {}]   ;;  %s1307_s2 = inlined_call_operand.vmem [shape: f32[2,1,32], index: 2, kind: input, shape index: {}]   ;;  %s1308_s3 = inlined_call_operand.vmem [shape: bf16[3,32,32], index: 3, kind: input, shape index: {}]   ;;  %s1309_s4 = inlined_call_operand.vmem [shape: f32[3,1,32], index: 4, kind: input, shape index: {}]   ;;  %s1310_s5 = inlined_call_operand.vmem [shape: f32[1,8], index: 5, kind: input, shape index: {}]   ;;  %s1311_s6 = inlined_call_operand.vmem [shape: f32[1,8], index: 6, kind: input, shape index: {}]   ;;  %s1312_s7 = inlined_call_operand.vmem [shape: bf16[3,2,16,32], index: 7, kind: output, shape index: {}]  }
   0x1   :  { %s1129_s26 = smov 0   ;;  %s1131_s27 = smov 0  }
   0x2   :  { %s1133_s28 = smov 0  }
   0x3 LB: > { %s39_s29 = sadd.s32 1, %s1067_s26  ;;  %s43_s30 = sadd.s32 1, %s1071_s27  ;;  %s1075_s28 = sphi %s1133_s28, %s17_s28   ;;  %s1071_s27 = sphi %s1131_s27, %s1320_s27   ;;  %s1067_s26 = sphi %s1129_s26, %s1319_s26   ;;  %s1063_s25 = sphi %s1127_s25, %s1318_s25   ;;  %s1059_s24 = sphi %s1125_s24, %s1317_s24  }
   0x4   : > { %p41_p0 = scmp.ge.s32.totalorder %s39_s29, 3  ;;  %p934_p1 = scmp.ge.s32.totalorder %s1075_s28, 1 }
   0x5   : > { %p320_p2 = scmp.lt.s32.totalorder %s1075_s28, 7 }
   0x6   : > { %s1322_s29 = smov (%p41_p0, %s39_s29), 0  ;;  %s1324_s30 = smov (!%p41_p0, %s43_s30), %s1071_s27 }
   0x7   : > { %p321_p3 = pnand %p934_p1, %p320_p2  ;;  %p45_p4 = scmp.ge.s32.totalorder %s1324_s30, 2 }
   0x8   : > { %p388_p5 = scmp.lt.s32.totalorder (!%p321_p3), %s1063_s25, 1  ;;  %p403_p6 = scmp.lt.s32.totalorder (!%p321_p3), %s1059_s24, 2 }
   0x9   : > { %s1326_s30 = smov (%p45_p4, %s1324_s30), 0  ;;  %324 = sbr.rel (%p321_p3) target bundleno = 723 (0x2d3), region = 48 }
   0xa   : > { %p951_p7 = scmp.ne.s32.totalorder (!%p321_p3), %s1059_s24, 2 }
   0xe   : > { %s1328_s25 = smov (!%p388_p5, %s1063_s25), 1  ;;  %vm441_vm0 = vcmask 261120   ;;  %v1077_v5 = vmov 32.0  }
   0xf   : > { %s955_s8 = sshll.u32 %s1328_s25, 3  ;;  %1013 = vrcp.f32 %v1077_v5  ;;  %s399_s14 = scalar_lea.vmem %s1306_s1, %s1328_s25 }
  0x10   : > { %s395_s11 = scalar_lea.vmem %s1305_s0, %s955_s8  ;;  %s939_s16 = sshll.u32 %s1328_s25, 1  ;;  %v1011_v50 = vld [vmem:[%s399_s14] ss:$0 sm:$0xff] }
  0x11   : > { %v960_v0 = vld [vmem:[%s395_s11] sm:$0xff]   ;;  %s1173_s15 = scalar_select %p403_p6, %s1059_s24, 2 }
  0x12   : > { %v961_v1 = vunpack.c.l.bf16 %v960_v0  ;;  %v962_v3 = vunpack.c.h.bf16 %v960_v0 }
  0x13   : > { %s940_s17 = sshll.u32 %s1173_s15, 2  ;;  %s416_s9 = scalar_lea.vmem %s1309_s4, %s1173_s15 }
  0x14   : > { %v442_v2 = vsel %vm441_vm0, %v961_v1, 0.0  ;;  %v445_v4 = vsel %vm441_vm0, %v962_v3, 0.0  ;;  %s430_s18 = sadd.s32 %s940_s17, %s939_s16  ;;  %s956_s10 = sshll.u32 %s1173_s15, 4  ;;  %v1012_v55 = vld [vmem:[%s416_s9] ss:$0 sm:$0xff] }
  0x15   : > { %443 = vadd.xlane.f32.xlu0 %v442_v2  ;;  %v1014_v6 = vpop.eup %1013  ;;  %s941_s19 = sshll.u32 %s430_s18, 2  ;;  %s410_s13 = scalar_lea.vmem %s1308_s3, %s956_s10 }
  0x16   : > { %v449_v7 = vmul.f32 32.0, %v1014_v6  ;;  %vm453_vm1 = vweird.f32 %v1014_v6  ;;  %s1180_s22 = scalar_lea.vmem %s1312_s7, %s941_s19  ;;  %v958_v22 = vld [vmem:[%s410_s13 + $0x8] sm:$0xff]  ;;  %v957_v24 = vld [vmem:[%s410_s13] sm:$0xff]  ;;  %s402_s18 = scalar_lea.vmem %s1307_s2, %s1328_s25 }
  0x17   : > { %534 = vmatpush.bf16.msra.mxu0 %v958_v22  ;;  %v440_v38 = vld [vmem:[%s402_s18] sm:$0x1] }
  0x18   : > { %v450_v8 = vsub.f32 1.0, %v449_v7  ;;  %v493_v40 = vadd.f32 1.0, %v440_v38 }
  0x1a   : > { %v451_v9 = vmul.f32 %v1014_v6, %v450_v8  ;;  %v495_v45 = vperm.slane %v493_v40, 0 }
  0x1b   : > { %535 = vmatpush.bf16.msra.mxu0 %v957_v24 }
  0x1c   : > { %v452_v10 = vadd.f32 %v1014_v6, %v451_v9 }
  0x1d   : > { %446 = vadd.xlane.f32.xlu0 %v445_v4 }
  0x1e   : > { %v454_v11 = vsel %vm453_vm1, %v1014_v6, %v452_v10 }
  0x88   : > { %v444_v12 = vpop.xlane.xlu0 %443 }
  0x89   : > { %v455_v13 = vmul.f32 %v454_v11, %v444_v12 }
  0x8b   : > { %v457_v14 = vsub.f32 %v961_v1, %v455_v13 }
  0x8d   : > { %v459_v15 = vmul.f32 %v457_v14, %v457_v14 }
  0x8f   : > { %v461_v16 = vsel %vm441_vm0, %v459_v15, 0.0 }
  0x90   : > { %462 = vadd.xlane.f32.xlu1 %v461_v16  ;;  %v447_v17 = vpop.xlane.xlu0 %446 }
  0x91   : > { %v456_v18 = vmul.f32 %v454_v11, %v447_v17 }
  0x93   : > { %v458_v19 = vsub.f32 %v962_v3, %v456_v18 }
  0x95   : > { %v460_v20 = vmul.f32 %v458_v19, %v458_v19 }
  0x97   : > { %v464_v21 = vsel %vm441_vm0, %v460_v20, 0.0 }
  0x98   : > { %465 = vadd.xlane.f32.xlu1 %v464_v21 }
 0x103   : > { %v463_v23 = vpop.xlane.xlu1 %462 }
 0x104   : > { %v467_v25 = vmul.f32 %v463_v23, %v454_v11 }
 0x106   : > { %v469_v26 = vadd.f32 1e-06, %v467_v25 }
 0x108   : > { %1015 = vrsqrt.f32 %v469_v26  ;;  %vm477_vm3 = vweird.f32 %v469_v26 }
 0x10b   : > { %v466_v27 = vpop.xlane.xlu1 %465 }
 0x10c   : > { %v468_v28 = vmul.f32 %v466_v27, %v454_v11 }
 0x10e   : > { %v1016_v29 = vpop.eup %1015  ;;  %v470_v30 = vadd.f32 1e-06, %v468_v28 }
 0x10f   : > { %v472_v31 = vmul.f32 %v1016_v29, %v469_v26  ;;  %vm478_vm2 = vweird.f32 %v1016_v29 }
 0x110   : > { %1017 = vrsqrt.f32 %v470_v30  ;;  %vm479_vm4 = vmor %vm477_vm3, %vm478_vm2  ;;  %vm487_vm6 = vweird.f32 %v470_v30 }
 0x111   : > { %v473_v32 = vmul.f32 %v1016_v29, %v472_v31 }
 0x113   : > { %v474_v33 = vmul.f32 0.5, %v473_v32 }
 0x115   : > { %v475_v34 = vsub.f32 1.5, %v474_v33 }
 0x116   : > { %v1018_v35 = vpop.eup %1017 }
 0x117   : > { %v476_v36 = vmul.f32 %v1016_v29, %v475_v34  ;;  %v482_v37 = vmul.f32 %v1018_v35, %v470_v30  ;;  %vm488_vm5 = vweird.f32 %v1018_v35 }
 0x118   : > { %vm489_vm7 = vmor %vm487_vm6, %vm488_vm5 }
 0x119   : > { %v483_v39 = vmul.f32 %v1018_v35, %v482_v37  ;;  %v480_v41 = vsel %vm479_vm4, %v1016_v29, %v476_v36 }
 0x11a   : > { %v491_v44 = vmul.f32 %v480_v41, %v457_v14 }
 0x11b   : > { %v484_v42 = vmul.f32 0.5, %v483_v39 }
 0x11c   : > { %v497_v49 = vmul.f32 %v495_v45, %v491_v44 }
 0x11d   : > { %v485_v43 = vsub.f32 1.5, %v484_v42 }
 0x11e   : > { %v502_v52 = vadd.f32 %v1011_v50, %v497_v49 }
 0x11f   : > { %v486_v46 = vmul.f32 %v1018_v35, %v485_v43 }
 0x121   : > { %v490_v47 = vsel %vm489_vm7, %v1018_v35, %v486_v46 }
 0x122   : > { %v492_v48 = vmul.f32 %v490_v47, %v458_v19 }
 0x124   : > { %v498_v51 = vmul.f32 %v495_v45, %v492_v48 }
 0x126   : > { %v503_v53 = vadd.f32 %v1011_v50, %v498_v51 }
 0x128   : > { %v504_v54 = vpack.c.bf16 %v503_v53, %v502_v52 }
 0x12a   : > { %950 = vmatmul.msk.bf16.vlgmr.msra.gmra.mxu0 %vm441_vm0, %v504_v54 }
 0x1a7   : > { %v537_v56 = vpop.f32.mrf.mxu0 }
 0x1a8   : > { %v1205_v57 = vadd.f32 %v1012_v55, %v537_v56 }
 0x1ac   : > { %545 = sbr.rel (%p951_p7) target bundleno = 437 (0x1b5), region = 52 }
 0x1af   : > { %v539_v58 = vpop.f32.mrf.mxu0 }
 0x1b0   : > { %v1207_v59 = vadd.f32 %v1012_v55, %v539_v58 }
 0x1b1   : > { %v546_v60 = vpack.c.bf16 %v1205_v57, %v1205_v57  ;;  %vm548_vm8 = vcmask 257024  }
 0x1b2   : > { %v547_v61 = vpack.c.bf16 %v1207_v59, %v1207_v59 }
 0x1b3   : > { %549 = vst.msk [vmem:[%s1180_s22] sm:$0xf] %vm548_vm8, %v546_v60 }
 0x1b4   : > { %550 = vst.msk [vmem:[%s1180_s22 + $0x4] sm:$0xf] %vm548_vm8, %v547_v61 }
 0x1b5 PF: > { %p952_p8 = scmp.eq.s32.totalorder %s1059_s24, 2 }
 0x1b6   : > { %s1078_s25 = smov (!%p952_p8), 112   ;;  %s1079_s14 = smov (!%p952_p8), 120  }
 0x1b7   : > { %554 = sbr.rel (%p952_p8) target bundleno = 723 (0x2d3), region = 56  ;;  %s1080_s15 = smov (!%p952_p8), 104  }
 0x1b8   : > { %p555_p9 = scmp.eq.s32.totalorder (!%p952_p8), %s1059_s24, 0  ;;  %s1082_s24 = smov (!%p952_p8), 24  }
 0x1b9   : > { %s1083_s13 = smov (!%p952_p8), 8   ;;  %s1084_s16 = smov (!%p952_p8), 16  }
 0x1bc   : > { %v562_v62 = vmul.f32 %v1205_v57, %v1205_v57  ;;  %v563_v63 = vmul.f32 %v1207_v59, %v1207_v59  ;;  %vm564_vm9 = vcmask 64512   ;;  %s558_s8 = scalar_select %p555_p9, 1, 0  ;;  %v556_v15 = vld [vmem:[%s1310_s5] sm:$0x1]  ;;  %v1081_v18 = vmov 8.0  }
 0x1bd   : > { %v557_v16 = vld [vmem:[%s1311_s6] sm:$0x1]  ;;  %1019 = vrcp.f32 %v1081_v18  ;;  %vm611_vm2 = vcmask 60416  }
 0x1be   : > { %664 = vrot.lane.b32.xlu1 %v562_v62, %s1078_s25  ;;  %616 = vrot.lane.b32.xlu0 %v562_v62, %s1079_s14  ;;  %v565_v0 = vsel %vm564_vm9, %v562_v62, 0.0  ;;  %v568_v1 = vsel %vm564_vm9, %v563_v63, 0.0  ;;  %v559_v14 = vstv %s558_s8 }
 0x1bf   : > { %712 = vrot.lane.b32.xlu2 %v562_v62, %s1080_s15  ;;  %vm560_vm10 = vcmp.eq.s32.totalorder %v559_v14, 1 }
 0x1c0   : > { %v561_v17 = vsel %vm560_vm10, %v556_v15, %v557_v16 }
 0x1c1   : > { %v605_v19 = vperm.slane %v561_v17, 0 }
 0x1c3   : > { %v1020_v20 = vpop.eup %1019 }
 0x1c4   : > { %v572_v21 = vmul.f32 8.0, %v1020_v20  ;;  %vm576_vm11 = vweird.f32 %v1020_v20 }
 0x1c6   : > { %666 = vrot.lane.b32.xlu1 %v563_v63, %s1078_s25  ;;  %618 = vrot.lane.b32.xlu0 %v563_v63, %s1079_s14  ;;  %v573_v22 = vsub.f32 1.0, %v572_v21 }
 0x1c7   : > { %714 = vrot.lane.b32.xlu2 %v563_v63, %s1080_s15 }
 0x1c8   : > { %v574_v23 = vmul.f32 %v1020_v20, %v573_v22 }
 0x1ca   : > { %v575_v24 = vadd.f32 %v1020_v20, %v574_v23 }
 0x1cc   : > { %v1236_v25 = vsel %vm576_vm11, %v1020_v20, %v575_v24 }
 0x1f0   : > { %566 = vadd.xlane.f32.xlu0 %v565_v0  ;;  %569 = vadd.xlane.f32.xlu1 %v568_v1 }
 0x219   : > { %v713_v2 = vpop.permute.xlu2 %712 }
 0x21a   : > { %v718_v13 = vsel %vm564_vm9, %v713_v2, 0.0 }
 0x221   : > { %v715_v7 = vpop.permute.xlu2 %714 }
 0x222   : > { %v721_v10 = vsel %vm564_vm9, %v715_v7, 0.0 }
 0x230   : > { %v665_v3 = vpop.permute.xlu1 %664  ;;  %v617_v4 = vpop.permute.xlu0 %616 }
 0x231   : > { %v622_v5 = vsel %vm564_vm9, %v617_v4, 0.0  ;;  %v670_v6 = vsel %vm564_vm9, %v665_v3, 0.0 }
 0x232   : > { %623 = vadd.xlane.f32.xlu2 %v622_v5  ;;  %671 = vadd.xlane.f32.xlu0 %v670_v6 }
 0x238   : > { %v667_v8 = vpop.permute.xlu1 %666  ;;  %v619_v9 = vpop.permute.xlu0 %618 }
 0x239   : > { %v673_v11 = vsel %vm564_vm9, %v667_v8, 0.0  ;;  %v625_v12 = vsel %vm564_vm9, %v619_v9, 0.0 }
 0x23a   : > { %674 = vadd.xlane.f32.xlu1 %v673_v11  ;;  %626 = vadd.xlane.f32.xlu2 %v625_v12 }
 0x23b   : > { %722 = vadd.xlane.f32.xlu0 %v721_v10 }
 0x242   : > { %719 = vadd.xlane.f32.xlu2 %v718_v13 }
 0x24f   : > { %750 = vrot.lane.b32.xlu0 %v605_v19, %s1082_s24 }
 0x253   : > { %654 = vrot.lane.b32.xlu1 %v605_v19, %s1083_s13 }
 0x25a   : > { %702 = vrot.lane.b32.xlu2 %v605_v19, %s1084_s16 }
 0x263   : > { %v567_v26 = vpop.xlane.xlu0 %566  ;;  %v570_v28 = vpop.xlane.xlu1 %569 }
 0x264   : > { %v578_v27 = vmul.f32 %v1236_v25, %v567_v26  ;;  %v579_v30 = vmul.f32 %v1236_v25, %v570_v28 }
 0x266   : > { %v580_v29 = vadd.f32 1e-06, %v578_v27  ;;  %v581_v31 = vadd.f32 1e-06, %v579_v30 }
 0x268   : > { %1021 = vrsqrt.f32 %v580_v29  ;;  %vm588_vm12 = vweird.f32 %v580_v29  ;;  %vm598_vm15 = vweird.f32 %v581_v31 }
 0x269   : > { %1023 = vrsqrt.f32 %v581_v31 }
 0x26e   : > { %v1022_v32 = vpop.eup %1021 }
 0x26f   : > { %v583_v33 = vmul.f32 %v1022_v32, %v580_v29  ;;  %v1024_v34 = vpop.eup %1023  ;;  %vm589_vm13 = vweird.f32 %v1022_v32 }
 0x270   : > { %v593_v36 = vmul.f32 %v1024_v34, %v581_v31  ;;  %vm590_vm14 = vmor %vm588_vm12, %vm589_vm13  ;;  %vm599_vm0 = vweird.f32 %v1024_v34 }
 0x271   : > { %v584_v35 = vmul.f32 %v1022_v32, %v583_v33  ;;  %vm600_vm1 = vmor %vm598_vm15, %vm599_vm0 }
 0x272   : > { %v594_v38 = vmul.f32 %v1024_v34, %v593_v36 }
 0x273   : > { %v585_v37 = vmul.f32 0.5, %v584_v35 }
 0x274   : > { %v595_v40 = vmul.f32 0.5, %v594_v38 }
 0x275   : > { %v586_v39 = vsub.f32 1.5, %v585_v37 }
 0x276   : > { %v596_v42 = vsub.f32 1.5, %v595_v40 }
 0x277   : > { %v587_v41 = vmul.f32 %v1022_v32, %v586_v39 }
 0x278   : > { %v597_v44 = vmul.f32 %v1024_v34, %v596_v42 }
 0x279   : > { %v591_v43 = vsel %vm590_vm14, %v1022_v32, %v587_v41 }
 0x27a   : > { %v602_v45 = vmul.f32 %v591_v43, %v1205_v57  ;;  %v601_v46 = vsel %vm600_vm1, %v1024_v34, %v597_v44 }
 0x27b   : > { %v603_v48 = vmul.f32 %v601_v46, %v1207_v59 }
 0x27c   : > { %v607_v47 = vmul.f32 %v605_v19, %v602_v45 }
 0x27d   : > { %v608_v50 = vmul.f32 %v605_v19, %v603_v48 }
 0x27e   : > { %v609_v49 = vpack.c.bf16 %v607_v47, %v607_v47 }
 0x27f   : > { %v610_v51 = vpack.c.bf16 %v608_v50, %v608_v50 }
 0x280   : > { %612 = vst.msk [vmem:[%s1180_s22] sm:$0xf] %vm611_vm2, %v609_v49 }
 0x281   : > { %613 = vst.msk [vmem:[%s1180_s22 + $0x4] sm:$0xf] %vm611_vm2, %v610_v51 }
 0x2a5   : > { %v624_v52 = vpop.xlane.xlu2 %623  ;;  %v672_v53 = vpop.xlane.xlu0 %671 }
 0x2a6   : > { %v628_v54 = vmul.f32 %v624_v52, %v1236_v25  ;;  %v676_v55 = vmul.f32 %v672_v53, %v1236_v25 }
 0x2a8   : > { %v630_v56 = vadd.f32 1e-06, %v628_v54  ;;  %v678_v58 = vadd.f32 1e-06, %v676_v55 }
 0x2aa   : > { %1025 = vrsqrt.f32 %v630_v56  ;;  %vm686_vm3 = vweird.f32 %v678_v58  ;;  %vm638_vm6 = vweird.f32 %v630_v56 }
 0x2ab   : > { %1027 = vrsqrt.f32 %v678_v58 }
 0x2ad   : > { %v675_v60 = vpop.xlane.xlu1 %674  ;;  %v627_v61 = vpop.xlane.xlu2 %626 }
 0x2ae   : > { %v677_v62 = vmul.f32 %v675_v60, %v1236_v25  ;;  %v629_v63 = vmul.f32 %v627_v61, %v1236_v25  ;;  %v723_v0 = vpop.xlane.xlu0 %722 }
 0x2af   : > { %v725_v1 = vmul.f32 %v723_v0, %v1236_v25 }
 0x2b0   : > { %v1249_v2 = vpop.eup %1025  ;;  %v679_v3 = vadd.f32 1e-06, %v677_v62  ;;  %v631_v4 = vadd.f32 1e-06, %v629_v63 }
 0x2b1   : > { %v1028_v5 = vpop.eup %1027  ;;  %v633_v6 = vmul.f32 %v1249_v2, %v630_v56  ;;  %v727_v7 = vadd.f32 1e-06, %v725_v1  ;;  %vm639_vm5 = vweird.f32 %v1249_v2 }
 0x2b2   : > { %v681_v8 = vmul.f32 %v1028_v5, %v678_v58  ;;  %1029 = vrsqrt.f32 %v679_v3  ;;  %vm687_vm4 = vweird.f32 %v1028_v5  ;;  %vm696_vm7 = vweird.f32 %v679_v3  ;;  %vm1266_vm12 = vmor %vm638_vm6, %vm639_vm5 }
 0x2b3   : > { %v634_v9 = vmul.f32 %v1249_v2, %v633_v6  ;;  %1031 = vrsqrt.f32 %v631_v4  ;;  %vm1260_vm8 = vmor %vm686_vm3, %vm687_vm4  ;;  %vm744_vm10 = vweird.f32 %v727_v7  ;;  %vm648_vm14 = vweird.f32 %v631_v4 }
 0x2b4   : > { %v682_v10 = vmul.f32 %v1028_v5, %v681_v8  ;;  %1033 = vrsqrt.f32 %v727_v7  ;;  %vm661_vm3 = vcmask 126016   ;;  %vm709_vm4 = vcmask 191616  }
 0x2b5   : > { %v635_v11 = vmul.f32 0.5, %v634_v9  ;;  %v720_v12 = vpop.xlane.xlu2 %719 }
 0x2b6   : > { %v683_v13 = vmul.f32 0.5, %v682_v10  ;;  %v724_v14 = vmul.f32 %v720_v12, %v1236_v25 }
 0x2b7   : > { %v636_v19 = vsub.f32 1.5, %v635_v11 }
 0x2b8   : > { %v1030_v15 = vpop.eup %1029  ;;  %v684_v16 = vsub.f32 1.5, %v683_v13  ;;  %v1254_v17 = vadd.f32 1e-06, %v724_v14 }
 0x2b9   : > { %v1032_v18 = vpop.eup %1031  ;;  %v691_v20 = vmul.f32 %v1030_v15, %v679_v3  ;;  %v637_v25 = vmul.f32 %v1249_v2, %v636_v19  ;;  %vm697_vm9 = vweird.f32 %v1030_v15 }
 0x2ba   : > { %v1034_v21 = vpop.eup %1033  ;;  %v643_v22 = vmul.f32 %v1032_v18, %v631_v4  ;;  %1035 = vrsqrt.f32 %v1254_v17  ;;  %v685_v26 = vmul.f32 %v1028_v5, %v684_v16  ;;  %vm649_vm13 = vweird.f32 %v1032_v18  ;;  %vm698_vm15 = vmor %vm696_vm7, %vm697_vm9 }
 0x2bb   : > { %v692_v23 = vmul.f32 %v1030_v15, %v691_v20  ;;  %v739_v24 = vmul.f32 %v1034_v21, %v727_v7  ;;  %vm745_vm11 = vweird.f32 %v1034_v21  ;;  %v641_v41 = vsel %vm1266_vm12, %v1249_v2, %v637_v25  ;;  %vm650_vm0 = vmor %vm648_vm14, %vm649_vm13 }
 0x2bc   : > { %v644_v27 = vmul.f32 %v1032_v18, %v643_v22  ;;  %v689_v34 = vsel %vm1260_vm8, %v1028_v5, %v685_v26  ;;  %vm746_vm1 = vmor %vm744_vm10, %vm745_vm11  ;;  %v652_v50 = vmul.f32 %v641_v41, %v1205_v57  ;;  %vm734_vm5 = vweird.f32 %v1254_v17 }
 0x2bd   : > { %v693_v28 = vmul.f32 0.5, %v692_v23  ;;  %v740_v29 = vmul.f32 %v1034_v21, %v739_v24  ;;  %v700_v42 = vmul.f32 %v689_v34, %v1205_v57  ;;  %v703_v46 = vpop.permute.xlu2 %702  ;;  %vm757_vm7 = vcmask 257216  }
 0x2be   : > { %v645_v30 = vmul.f32 0.5, %v644_v27 }
 0x2bf   : > { %v694_v32 = vsub.f32 1.5, %v693_v28  ;;  %v741_v33 = vmul.f32 0.5, %v740_v29  ;;  %v705_v56 = vmul.f32 %v703_v46, %v700_v42 }
 0x2c0   : > { %v1036_v35 = vpop.eup %1035  ;;  %v646_v36 = vsub.f32 1.5, %v645_v30 }
 0x2c1   : > { %v742_v38 = vsub.f32 1.5, %v741_v33  ;;  %v729_v39 = vmul.f32 %v1036_v35, %v1254_v17  ;;  %v695_v40 = vmul.f32 %v1030_v15, %v694_v32  ;;  %v751_v53 = vpop.permute.xlu0 %750  ;;  %vm735_vm2 = vweird.f32 %v1036_v35 }
 0x2c2   : > { %v647_v43 = vmul.f32 %v1032_v18, %v646_v36  ;;  %v707_v5 = vpack.c.bf16 %v705_v56, %v705_v56  ;;  %vm736_vm6 = vmor %vm734_vm5, %vm735_vm2 }
 0x2c3   : > { %v730_v44 = vmul.f32 %v1036_v35, %v729_v39  ;;  %v699_v45 = vsel %vm698_vm15, %v1030_v15, %v695_v40  ;;  %v743_v47 = vmul.f32 %v1034_v21, %v742_v38 }
 0x2c4   : > { %v701_v48 = vmul.f32 %v699_v45, %v1207_v59  ;;  %v651_v49 = vsel %vm650_vm0, %v1032_v18, %v647_v43 }
 0x2c5   : > { %v731_v51 = vmul.f32 0.5, %v730_v44  ;;  %v747_v52 = vsel %vm746_vm1, %v1034_v21, %v743_v47  ;;  %v653_v54 = vmul.f32 %v651_v49, %v1207_v59  ;;  %v655_v55 = vpop.permute.xlu1 %654 }
 0x2c6   : > { %v706_v58 = vmul.f32 %v703_v46, %v701_v48  ;;  %v749_v60 = vmul.f32 %v747_v52, %v1207_v59  ;;  %v657_v61 = vmul.f32 %v655_v55, %v652_v50 }
 0x2c7   : > { %v732_v62 = vsub.f32 1.5, %v731_v51  ;;  %v658_v63 = vmul.f32 %v655_v55, %v653_v54 }
 0x2c8   : > { %v754_v0 = vmul.f32 %v751_v53, %v749_v60  ;;  %v659_v1 = vpack.c.bf16 %v657_v61, %v657_v61  ;;  %v708_v2 = vpack.c.bf16 %v706_v58, %v706_v58 }
 0x2c9   : > { %v733_v3 = vmul.f32 %v1036_v35, %v732_v62  ;;  %v660_v4 = vpack.c.bf16 %v658_v63, %v658_v63 }
 0x2ca   : > { %662 = vst.msk [vmem:[%s1180_s22] sm:$0xf] %vm661_vm3, %v659_v1  ;;  %v756_v7 = vpack.c.bf16 %v754_v0, %v754_v0 }
 0x2cb   : > { %v737_v59 = vsel %vm736_vm6, %v1036_v35, %v733_v3  ;;  %663 = vst.msk [vmem:[%s1180_s22 + $0x4] sm:$0xf] %vm661_vm3, %v660_v4 }
 0x2cc   : > { %v748_v6 = vmul.f32 %v737_v59, %v1205_v57  ;;  %710 = vst.msk [vmem:[%s1180_s22] sm:$0xf] %vm709_vm4, %v707_v5 }
 0x2cd   : > { %711 = vst.msk [vmem:[%s1180_s22 + $0x4] sm:$0xf] %vm709_vm4, %v708_v2 }
 0x2ce   : > { %v753_v8 = vmul.f32 %v751_v53, %v748_v6  ;;  %759 = vst.msk [vmem:[%s1180_s22 + $0x4] sm:$0xf] %vm757_vm7, %v756_v7 }
 0x2d0   : > { %v755_v9 = vpack.c.bf16 %v753_v8, %v753_v8 }
 0x2d2   : > { %758 = vst.msk [vmem:[%s1180_s22] sm:$0xf] %vm757_vm7, %v755_v9 }
 0x2d3 PF: > { %s17_s28 = sadd.s32 1, %s1075_s28   ;;  %s1317_s24 = smov %s1067_s26 }
 0x2d4   : > { %p14_p10 = scmp.ge.s32.totalorder %s17_s28, 8   ;;  %s1318_s25 = smov %s1071_s27 }
 0x2d5   : > { %s1319_s26 = smov %s1322_s29  ;;  %s1320_s27 = smov %s1326_s30 }
 0x2d6   :  { %16 = sbr.rel (!%p14_p10) target bundleno = 3 (0x3), region = 98 }

// kernel: mm_double_stream_block_audio.23
= control target key start
LH: loop header
LB: loop body
LE: loop exit
PB: predicated region body
PF: predicated region fallthrough
CT: control target
= control target key end

     0   :  { %s656_s18 = smov 0   ;;  %s658_s19 = smov 0   ;;  %s704_s0 = inlined_call_operand.vmem [shape: bf16[2,8,32], index: 0, kind: input, shape index: {}]   ;;  %s705_s1 = inlined_call_operand.vmem [shape: bf16[32,32], index: 1, kind: input, shape index: {}]   ;;  %s706_s2 = inlined_call_operand.vmem [shape: f32[1,32], index: 2, kind: input, shape index: {}]   ;;  %s707_s3 = inlined_call_operand.vmem [shape: f32[2,1,32], index: 3, kind: input, shape index: {}]   ;;  %s708_s4 = inlined_call_operand.vmem [shape: f32[2,8,32], index: 4, kind: input, shape index: {}, may-alias: {4,5}]   ;;  %s709_s5 = inlined_call_operand.vmem [shape: f32[2,8,32], index: 5, kind: output, shape index: {}, may-alias: {4,5}]  }
   0x1   :  { %s660_s20 = smov 0  }
   0x2 LB: > { %s34_s21 = sadd.s32 1, %s620_s19  ;;  %p559_p0 = scmp.ge.s32.totalorder %s624_s20, 1  ;;  %s624_s20 = sphi %s660_s20, %s15_s20   ;;  %s620_s19 = sphi %s658_s19, %s711_s19   ;;  %s616_s18 = sphi %s656_s18, %s710_s18  }
   0x3   : > { %p36_p1 = scmp.ge.s32.totalorder %s34_s21, 2  ;;  %p263_p2 = scmp.lt.s32.totalorder %s624_s20, 3 }
   0x5   : > { %s713_s21 = smov (%p36_p1, %s34_s21), 0  ;;  %p264_p3 = pnand %p559_p0, %p263_p2 }
   0x6   : > { %p321_p4 = scmp.lt.s32.totalorder (!%p264_p3), %s616_s18, 1 }
   0x7   : > { %267 = sbr.rel (%p264_p3) target bundleno = 154 (0x9a), region = 40 }
   0xc   : > { %v575_v0 = vld [vmem:[%s705_s1 + $0x8] sm:$0xff]  ;;  %v574_v1 = vld [vmem:[%s705_s1] sm:$0xff]  ;;  %s715_s18 = smov (!%p321_p4, %s616_s18), 1  ;;  %vm383_vm0 = vcmask 261120  }
   0xd   : > { %393 = vmatpush.bf16.msra.mxu0 %v575_v0  ;;  %s560_s26 = sshll.u32 %s715_s18, 2  ;;  %s340_s29 = scalar_lea.vmem %s707_s3, %s715_s18  ;;  %v600_v3 = vld [vmem:[%s706_s2] ss:$0 sm:$0xff] }
   0xe   : > { %s327_s7 = scalar_lea.vmem %s704_s0, %s560_s26  ;;  %s561_s8 = sshll.u32 %s715_s18, 3  ;;  %v601_v4 = vld [vmem:[%s340_s29] ss:$0 sm:$0xff] }
   0xf   : > { %v362_v2 = vld [vmem:[%s327_s7] sm:$0xf]  ;;  %s350_s13 = scalar_lea.vmem %s708_s4, %s561_s8  ;;  %s360_s16 = scalar_lea.vmem %s709_s5, %s561_s8 }
  0x10   : > { %v400_v7 = vld [vmem:[%s350_s13] sm:$0xff] }
  0x11   : > { %394 = vmatpush.bf16.msra.mxu0 %v574_v1 }
  0x14   : > { %571 = vmatmul.msk.bf16.vlgmr.msra.gmra.mxu0 %vm383_vm0, %v362_v2 }
  0x91   : > { %v396_v5 = vpop.f32.mrf.mxu0 }
  0x92   : > { %v397_v6 = vadd.f32 %v600_v3, %v396_v5 }
  0x94   : > { %v405_v8 = vmul.f32 %v601_v4, %v397_v6 }
  0x96   : > { %v406_v9 = vadd.f32 %v405_v8, %v400_v7 }
  0x98   : > { %407 = vst.msk [vmem:[%s360_s16] sm:$0xff] %vm383_vm0, %v406_v9 }
  0x99   : > { %v398_v10 = vpop.f32.mrf.mxu0 }
  0x9a PF: > { %s15_s20 = sadd.s32 1, %s624_s20   ;;  %s710_s18 = smov %s620_s19 }
  0x9b   : > { %p12_p5 = scmp.ge.s32.totalorder %s15_s20, 4   ;;  %s711_s19 = smov %s713_s21 }
  0x9d   :  { %14 = sbr.rel (!%p12_p5) target bundleno = 2 (0x2), region = 82 }

// kernel: mm_double_stream_block_audio.19
= control target key start
LH: loop header
LB: loop body
LE: loop exit
PB: predicated region body
PF: predicated region fallthrough
CT: control target
= control target key end

     0   :  { %s714_s18 = smov 0   ;;  %s716_s19 = smov 0   ;;  %s765_s0 = inlined_call_operand.vmem [shape: bf16[2,16,32], index: 0, kind: input, shape index: {}]   ;;  %s766_s1 = inlined_call_operand.vmem [shape: bf16[32,32], index: 1, kind: input, shape index: {}]   ;;  %s767_s2 = inlined_call_operand.vmem [shape: f32[1,32], index: 2, kind: input, shape index: {}]   ;;  %s768_s3 = inlined_call_operand.vmem [shape: f32[2,1,32], index: 3, kind: input, shape index: {}]   ;;  %s769_s4 = inlined_call_operand.vmem [shape: f32[2,16,32], index: 4, kind: input, shape index: {}, may-alias: {4,5}]   ;;  %s770_s5 = inlined_call_operand.vmem [shape: f32[2,16,32], index: 5, kind: output, shape index: {}, may-alias: {4,5}]  }
   0x1   :  { %s718_s20 = smov 0  }
   0x2 LB: > { %s34_s21 = sadd.s32 1, %s678_s19  ;;  %p606_p0 = scmp.ge.s32.totalorder %s682_s20, 1  ;;  %s682_s20 = sphi %s718_s20, %s15_s20   ;;  %s678_s19 = sphi %s716_s19, %s772_s19   ;;  %s674_s18 = sphi %s714_s18, %s771_s18  }
   0x3   : > { %p36_p1 = scmp.ge.s32.totalorder %s34_s21, 2  ;;  %p269_p2 = scmp.lt.s32.totalorder %s682_s20, 3 }
   0x5   : > { %s774_s21 = smov (%p36_p1, %s34_s21), 0  ;;  %p270_p3 = pnand %p606_p0, %p269_p2 }
   0x6   : > { %p334_p4 = scmp.lt.s32.totalorder (!%p270_p3), %s674_s18, 1 }
   0x7   : > { %273 = sbr.rel (%p270_p3) target bundleno = 161 (0xa1), region = 40 }
   0xc   : > { %v633_v0 = vld [vmem:[%s766_s1 + $0x8] sm:$0xff]  ;;  %v632_v1 = vld [vmem:[%s766_s1] sm:$0xff]  ;;  %s776_s18 = smov (!%p334_p4, %s674_s18), 1  ;;  %vm410_vm0 = vcmask 261120  }
   0xd   : > { %420 = vmatpush.bf16.msra.mxu0 %v633_v0  ;;  %s628_s26 = sshll.u32 %s776_s18, 3  ;;  %s355_s29 = scalar_lea.vmem %s768_s3, %s776_s18  ;;  %v658_v3 = vld [vmem:[%s767_s2] ss:$0 sm:$0xff] }
   0xe   : > { %s341_s7 = scalar_lea.vmem %s765_s0, %s628_s26  ;;  %s629_s8 = sshll.u32 %s776_s18, 4  ;;  %v659_v4 = vld [vmem:[%s355_s29] ss:$0 sm:$0xff] }
   0xf   : > { %v631_v2 = vld [vmem:[%s341_s7] sm:$0xff]  ;;  %s367_s13 = scalar_lea.vmem %s769_s4, %s629_s8  ;;  %s380_s16 = scalar_lea.vmem %s770_s5, %s629_s8 }
  0x10   : > { %v428_v7 = vld [vmem:[%s367_s13] sm:$0xff]  ;;  %v429_v9 = vld [vmem:[%s367_s13 + $0x8] sm:$0xff] }
  0x11   : > { %421 = vmatpush.bf16.msra.mxu0 %v632_v1 }
  0x14   : > { %625 = vmatmul.msk.bf16.vlgmr.msra.gmra.mxu0 %vm410_vm0, %v631_v2 }
  0x91   : > { %v423_v5 = vpop.f32.mrf.mxu0 }
  0x92   : > { %v424_v6 = vadd.f32 %v658_v3, %v423_v5 }
  0x94   : > { %v434_v8 = vmul.f32 %v659_v4, %v424_v6 }
  0x96   : > { %v436_v10 = vadd.f32 %v434_v8, %v428_v7 }
  0x98   : > { %438 = vst.msk [vmem:[%s380_s16] sm:$0xff] %vm410_vm0, %v436_v10 }
  0x99   : > { %v425_v11 = vpop.f32.mrf.mxu0 }
  0x9a   : > { %v426_v12 = vadd.f32 %v658_v3, %v425_v11 }
  0x9c   : > { %v435_v13 = vmul.f32 %v659_v4, %v426_v12 }
  0x9e   : > { %v437_v14 = vadd.f32 %v435_v13, %v429_v9 }
  0xa0   : > { %439 = vst.msk [vmem:[%s380_s16 + $0x8] sm:$0xff] %vm410_vm0, %v437_v14 }
  0xa1 PF: > { %s15_s20 = sadd.s32 1, %s682_s20   ;;  %s771_s18 = smov %s678_s19 }
  0xa2   : > { %p12_p5 = scmp.ge.s32.totalorder %s15_s20, 4   ;;  %s772_s19 = smov %s774_s21 }
  0xa4   :  { %14 = sbr.rel (!%p12_p5) target bundleno = 2 (0x2), region = 82 }

// kernel: mm_double_stream_block_audio.24
= control target key start
LH: loop header
LB: loop body
LE: loop exit
PB: predicated region body
PF: predicated region fallthrough
CT: control target
= control target key end

     0   :  { %s649_s18 = smov 0   ;;  %s651_s19 = smov 0   ;;  %s709_s0 = inlined_call_operand.vmem [shape: bf16[2,8,32], index: 0, kind: input, shape index: {}]   ;;  %s710_s1 = inlined_call_operand.vmem [shape: f32[2,1,32], index: 1, kind: input, shape index: {}]   ;;  %s711_s2 = inlined_call_operand.vmem [shape: f32[2,1,32], index: 2, kind: input, shape index: {}]   ;;  %s712_s3 = inlined_call_operand.vmem [shape: bf16[32,128], index: 3, kind: input, shape index: {}]   ;;  %s713_s4 = inlined_call_operand.vmem [shape: f32[1,128], index: 4, kind: input, shape index: {}]   ;;  %s714_s5 = inlined_call_operand.vmem [shape: bf16[2,8,128], index: 5, kind: output, shape index: {}]  }
   0x1   :  { %s653_s20 = smov 0  }
   0x2 LB: > { %s34_s21 = sadd.s32 1, %s612_s19  ;;  %p547_p0 = scmp.ge.s32.totalorder %s616_s20, 1  ;;  %s616_s20 = sphi %s653_s20, %s15_s20   ;;  %s612_s19 = sphi %s651_s19, %s716_s19   ;;  %s608_s18 = sphi %s649_s18, %s715_s18  }
   0x3   : > { %p36_p1 = scmp.ge.s32.totalorder %s34_s21, 2  ;;  %p247_p2 = scmp.lt.s32.totalorder %s616_s20, 3 }
   0x5   : > { %s718_s21 = smov (%p36_p1, %s34_s21), 0  ;;  %p248_p3 = pnand %p547_p0, %p247_p2 }
   0x6   : > { %p295_p4 = scmp.lt.s32.totalorder (!%p248_p3), %s608_s18, 1 }
   0x7   : > { %251 = sbr.rel (%p248_p3) target bundleno = 422 (0x1a6), region = 40 }
   0xc   : > { %s720_s18 = smov (!%p295_p4, %s608_s18), 1  ;;  %vm330_vm0 = vcmask 261120   ;;  %v618_v3 = vmov 32.0   ;;  %v562_v15 = vld [vmem:[%s712_s3 + $0x8] sm:$0xff]  ;;  %v561_v16 = vld [vmem:[%s712_s3] sm:$0xff] }
   0xd   : > { %s548_s22 = sshll.u32 %s720_s18, 2  ;;  %590 = vrcp.f32 %v618_v3  ;;  %s304_s28 = scalar_lea.vmem %s710_s1, %s720_s18  ;;  %399 = vmatpush.bf16.msra.mxu0 %v562_v15  ;;  %v589_v35 = vld [vmem:[%s713_s4] ss:$0 sm:$0xff] }
   0xe   : > { %s301_s25 = scalar_lea.vmem %s709_s0, %s548_s22  ;;  %s307_s10 = scalar_lea.vmem %s711_s2, %s720_s18  ;;  %v588_v31 = vld [vmem:[%s304_s28] ss:$0 sm:$0xff] }
   0xf   : > { %v326_v0 = vld [vmem:[%s301_s25] sm:$0xf]  ;;  %s324_s15 = scalar_lea.vmem %s714_s5, %s548_s22 }
  0x10   : > { %v327_v1 = vunpack.c.l.bf16 %v326_v0  ;;  %v329_v23 = vld [vmem:[%s307_s10] sm:$0x1] }
  0x11   : > { %400 = vmatpush.bf16.msra.mxu0 %v561_v16  ;;  %v360_v25 = vadd.f32 1.0, %v329_v23 }
  0x12   : > { %v331_v2 = vsel %vm330_vm0, %v327_v1, 0.0 }
  0x13   : > { %332 = vadd.xlane.f32.xlu0 %v331_v2  ;;  %v591_v4 = vpop.eup %590  ;;  %v362_v28 = vperm.slane %v360_v25, 0 }
  0x14   : > { %v335_v5 = vmul.f32 32.0, %v591_v4  ;;  %vm339_vm1 = vweird.f32 %v591_v4 }
  0x16   : > { %v336_v6 = vsub.f32 1.0, %v335_v5 }
  0x18   : > { %v337_v7 = vmul.f32 %v591_v4, %v336_v6 }
  0x1a   : > { %v338_v8 = vadd.f32 %v591_v4, %v337_v7 }
  0x1c   : > { %v340_v9 = vsel %vm339_vm1, %v591_v4, %v338_v8 }
  0x86   : > { %v333_v10 = vpop.xlane.xlu0 %332 }
  0x87   : > { %v341_v11 = vmul.f32 %v340_v9, %v333_v10 }
  0x89   : > { %v342_v12 = vsub.f32 %v327_v1, %v341_v11 }
  0x8b   : > { %v343_v13 = vmul.f32 %v342_v12, %v342_v12 }
  0x8d   : > { %v344_v14 = vsel %vm330_vm0, %v343_v13, 0.0 }
  0x8e   : > { %345 = vadd.xlane.f32.xlu0 %v344_v14 }
 0x101   : > { %v346_v17 = vpop.xlane.xlu0 %345 }
 0x102   : > { %v347_v18 = vmul.f32 %v346_v17, %v340_v9 }
 0x104   : > { %v348_v19 = vadd.f32 1e-06, %v347_v18 }
 0x106   : > { %592 = vrsqrt.f32 %v348_v19  ;;  %vm355_vm3 = vweird.f32 %v348_v19 }
 0x10c   : > { %v593_v20 = vpop.eup %592 }
 0x10d   : > { %v350_v21 = vmul.f32 %v593_v20, %v348_v19  ;;  %vm356_vm2 = vweird.f32 %v593_v20 }
 0x10e   : > { %vm357_vm4 = vmor %vm355_vm3, %vm356_vm2 }
 0x10f   : > { %v351_v22 = vmul.f32 %v593_v20, %v350_v21 }
 0x111   : > { %v352_v24 = vmul.f32 0.5, %v351_v22 }
 0x113   : > { %v353_v26 = vsub.f32 1.5, %v352_v24 }
 0x115   : > { %v354_v27 = vmul.f32 %v593_v20, %v353_v26 }
 0x117   : > { %v358_v29 = vsel %vm357_vm4, %v593_v20, %v354_v27 }
 0x118   : > { %v359_v30 = vmul.f32 %v358_v29, %v342_v12 }
 0x11a   : > { %v364_v32 = vmul.f32 %v362_v28, %v359_v30 }
 0x11c   : > { %v368_v33 = vadd.f32 %v588_v31, %v364_v32 }
 0x11e   : > { %v369_v34 = vpack.c.bf16 %v368_v33, %v368_v33 }
 0x120   : > { %558 = vmatmul.msk.bf16.vlgmr.msra.gmra.mxu0 %vm330_vm0, %v369_v34 }
 0x19d   : > { %v402_v36 = vpop.f32.mrf.mxu0 }
 0x19e   : > { %v403_v37 = vadd.f32 %v589_v35, %v402_v36 }
 0x1a0   : > { %v406_v38 = vpack.c.bf16 %v403_v37, %v403_v37 }
 0x1a2   : > { %407 = vst [vmem:[%s324_s15] sm:$0xf] %v406_v38 }
 0x1a5   : > { %v404_v39 = vpop.f32.mrf.mxu0 }
 0x1a6 PF: > { %s15_s20 = sadd.s32 1, %s616_s20   ;;  %s715_s18 = smov %s612_s19 }
 0x1a7   : > { %p12_p5 = scmp.ge.s32.totalorder %s15_s20, 4   ;;  %s716_s19 = smov %s718_s21 }
 0x1a9   :  { %14 = sbr.rel (!%p12_p5) target bundleno = 2 (0x2), region = 82 }

// kernel: mm_double_stream_block_audio.18
= control target key start
LH: loop header
LB: loop body
LE: loop exit
PB: predicated region body
PF: predicated region fallthrough
CT: control target
= control target key end

     0   :  { %s1586_s21 = smov 0   ;;  %s1588_s22 = smov 0   ;;  %s1853_s0 = inlined_call_operand.vmem [shape: bf16[3,2,8,32], index: 0, kind: input, shape index: {}, may-alias: {0,3,4}]   ;;  %s1854_s1 = inlined_call_operand.vmem [shape: bf16[3,2,16,32], index: 1, kind: input, shape index: {}, may-alias: {1,2}]   ;;  %s1855_s2 = inlined_call_operand.vmem [shape: bf16[3,2,16,32], index: 2, kind: input, shape index: {}, may-alias: {1,2}]   ;;  %s1856_s3 = inlined_call_operand.vmem [shape: bf16[3,2,8,32], index: 3, kind: input, shape index: {}, may-alias: {0,3,4}]   ;;  %s1857_s4 = inlined_call_operand.vmem [shape: bf16[3,2,8,32], index: 4, kind: input, shape index: {}, may-alias: {0,3,4}]   ;;  %s1858_s5 = inlined_call_operand.vmem [shape: s32[2,1,8], index: 5, kind: input, shape index: {}]   ;;  %s1859_s6 = inlined_call_operand.vmem [shape: bf16[2,8,32], index: 6, kind: output, shape index: {}]  }
   0x1   :  { %s1590_s23 = smov 0  }
   0x2 LB: > { %s42_s24 = sadd.s32 1, %s1532_s22  ;;  %p1380_p0 = scmp.ge.s32.totalorder %s1536_s23, 1  ;;  %s1536_s23 = sphi %s1590_s23, %s16_s23   ;;  %s1532_s22 = sphi %s1588_s22, %s1861_s22   ;;  %s1528_s21 = sphi %s1586_s21, %s1860_s21  }
   0x3   : > { %p44_p1 = scmp.ge.s32.totalorder %s42_s24, 2  ;;  %p335_p2 = scmp.lt.s32.totalorder %s1536_s23, 3 }
   0x5   : > { %s1863_s24 = smov (%p44_p1, %s42_s24), 0  ;;  %p336_p3 = pnand %p1380_p0, %p335_p2 }
   0x6   : > { %p420_p4 = scmp.lt.s32.totalorder (!%p336_p3), %s1528_s21, 1  ;;  %s1539_s9 = smov (!%p336_p3), 112  }
   0x7   : > { %339 = sbr.rel (%p336_p3) target bundleno = 1529 (0x5f9), region = 44  ;;  %s1540_s10 = smov (!%p336_p3), 120  }
   0x8   : > { %s1543_s14 = smov (!%p336_p3), 104   ;;  %s1550_s30 = smov (!%p336_p3), 24  }
   0xc   : > { %s1865_s21 = smov (!%p420_p4, %s1528_s21), 1  ;;  %vm510_vm0 = vcmask 64512   ;;  %vm492_vm1 = vcmask 31744   ;;  %v1538_v6 = vmov -inf   ;;  %vm531_vm2 = vcmask 130048  }
   0xd   : > { %s1421_s25 = sshll.u32 %s1865_s21, 3  ;;  %s1608_s26 = sshll.u32 %s1865_s21, 2  ;;  %493 = vst.msk [vmem:[#allocation2] sm:$0xff] %vm492_vm1, %v1538_v6  ;;  %v1541_v10 = vmov 0   ;;  %v1542_v11 = vmov 0.0   ;;  %vm553_vm3 = vcmask 7168  }
   0xe   : > { %s1283_s29 = scalar_lea.vmem %s1854_s1, %s1421_s25  ;;  %s429_s8 = scalar_lea.vmem %s1853_s0, %s1608_s26  ;;  %1462 = vset.pattern.permute.xlu1 %v1541_v10  ;;  %1463 = vset.pattern.permute.xlu2 %v1541_v10  ;;  %494 = vst.msk [vmem:[#allocation3] sm:$0xff] %vm492_vm1, %v1542_v11  ;;  %v1544_v62 = vmov -1e+09   ;;  %vm495_vm5 = vcmask 261120   ;;  %vm636_vm6 = vcmask 15368   ;;  %vm718_vm7 = vcmask 23568  }
   0xf   : > { %v1423_v0 = vld [vmem:[%s1283_s29 + $0x10] sm:$0xff]  ;;  %v497_v1 = vld [vmem:[%s429_s8] sm:$0xf]  ;;  %s1293_s13 = scalar_lea.vmem %s1856_s3, %s1608_s26  ;;  %s1289_s17 = scalar_lea.vmem %s1855_s2, %s1421_s25  ;;  %496 = vst.msk [vmem:[#allocation4] sm:$0xff] %vm495_vm5, %v1542_v11  ;;  %vm800_vm8 = vcmask 31768   ;;  %vm891_vm9 = vcmask 1043456  }
  0x10   : > { %v498_v2 = vunpack.c.l.bf16 %v497_v1  ;;  %v515_v3 = vsel %vm510_vm0, %v1423_v0, 0  ;;  %675 = vrot.lane.b32.xlu2 %v1423_v0, %s1539_s9  ;;  %v1409_v14 = vld [vmem:[%s1293_s13 + $0x8] sm:$0xf]  ;;  %v1645_v17 = vld [vmem:[%s1289_s17 + $0x20] sm:$0xff]  ;;  %s476_s20 = scalar_lea.vmem %s1858_s5, %s1865_s21  ;;  %s1548_s21 = smov 8   ;;  %vm670_vm10 = vcmask 130112  }
  0x11   : > { %524 = vmatpush.bf16.xpose.msra.mxu0 %v515_v3  ;;  %v919_v15 = vunpack.c.l.b16 %v1409_v14  ;;  %572 = vmatpush.bf16.msra.mxu1 %v1645_v17  ;;  %v849_v34 = vsel %vm510_vm0, %v1409_v14, 0  ;;  %v840_v59 = vld [vmem:[%s476_s20] sm:$0x1]  ;;  %s1297_s28 = scalar_lea.vmem %s1857_s4, %s1608_s26  ;;  %s1549_s29 = smov 16   ;;  %vm752_vm11 = vcmask 195712   ;;  %vm834_vm12 = vcmask 261312  }
  0x12   : > { %v499_v4 = vmul.f32 0.35355338, %v498_v2  ;;  %vm841_vm4 = vcmp.gt.s32.totalorder %v840_v59, 0  ;;  %vm1188_vm13 = vcmask 257024  }
  0x13   : > { %v920_v16 = vpack.c.b16 %v919_v15, %v919_v15  ;;  %v842_v63 = vsel %vm841_vm4, 0.0, %v1544_v62 }
  0x14   : > { %v1620_v5 = vpack.c.bf16 %v499_v4, %v499_v4  ;;  %v530_v18 = vld [vmem:[#allocation2] sm:$0xff] }
  0x15   : > { %v547_v48 = vld [vmem:[#allocation3] sm:$0xff] }
  0x16   : > { %v589_v12 = vunpack.c.l.b16 %v1620_v5 }
  0x18   : > { %1397 = vmatmul.msk.bf16.vlgmr.msra.gmra.mxu0 %vm510_vm0, %v1620_v5  ;;  %v590_v13 = vpack.c.b16 %v589_v12, %v589_v12 }
  0x1a   : > { %673 = vrot.lane.b32.xlu2 %v590_v13, %s1539_s9 }
  0x22   : > { %755 = vrot.lane.b32.xlu2 %v590_v13, %s1543_s14 }
  0x2a   : > { %1001 = vrot.lane.b32.xlu2 %v920_v16, %s1539_s9 }
  0x6a   : > { %v676_v24 = vpop.permute.xlu2 %675 }
  0x6b   : > { %v681_v25 = vsel %vm510_vm0, %v676_v24, 0 }
  0x6c   : > { %690 = vmatpush.bf16.xpose.msrb.mxu1 %v681_v25 }
  0x74   : > { %v674_v29 = vpop.permute.xlu2 %673 }
  0x7c   : > { %v756_v37 = vpop.permute.xlu2 %755 }
  0x84   : > { %v1002_v42 = vpop.permute.xlu2 %1001 }
  0x85   : > { %v1004_v43 = vsel %vm510_vm0, %v1002_v42, 0 }
  0x95   : > { %v526_v7 = vpop.f32.mrf.mxu0 }
  0x96   : > { %v532_v8 = vsel %vm531_vm2, %v526_v7, -inf }
  0x97   : > { %533 = vmax.xlane.f32.xlu0 %v532_v8 }
  0x9d   : > { %v528_v9 = vpop.f32.mrf.mxu0 }
  0xab   : > { %593 = vrot.lane.b32.xlu0 %v1423_v0, %s1540_s10 }
  0xb3   : > { %1078 = vrot.lane.b32.xlu0 %v920_v16, %s1543_s14 }
 0x10a   : > { %v534_v19 = vpop.xlane.xlu0 %533 }
 0x10b   : > { %v535_v20 = vmax.f32 %v530_v18, %v534_v19 }
 0x10d   : > { %v536_v21 = vsub.f32 %v530_v18, %v535_v20  ;;  %587 = vst.msk [vmem:[#allocation2] sm:$0xff] %vm553_vm3, %v535_v20  ;;  %541 = vperm.xlu1 %1462, %v535_v20   ;;  %v1545_v20 = vmov 1  }
 0x10e   : > { %1465 = vset.pattern.permute.xlu0 %v1545_v20 }
 0x10f   : > { %v537_v46 = vmul.f32 1.442695, %v536_v21 }
 0x114   : > { %v614_v21 = vld [vmem:[#allocation2] sm:$0xff] }
 0x115   : > { %591 = vrot.lane.b32.xlu1 %v590_v13, %s1540_s10 }
 0x11d   : > { %757 = vrot.lane.b32.xlu1 %v1423_v0, %s1543_s14  ;;  %v594_v22 = vpop.permute.xlu0 %593  ;;  %v846_v0 = vperm.slane %v842_v63, 0 }
 0x11e   : > { %v599_v23 = vsel %vm510_vm0, %v594_v22, 0 }
 0x11f   : > { %608 = vmatpush.bf16.xpose.msra.mxu2 %v599_v23 }
 0x125   : > { %921 = vrot.lane.b32.xlu1 %v920_v16, %s1540_s10  ;;  %v1079_v38 = vpop.permute.xlu0 %1078 }
 0x126   : > { %v1081_v40 = vsel %vm510_vm0, %v1079_v38, 0  ;;  %v1546_v38 = vmov 2  }
 0x12d   : > { %639 = vrot.lane.b32.xlu1 %v1645_v17, %s1540_s10 }
 0x135   : > { %721 = vrot.lane.b32.xlu1 %v1645_v17, %s1539_s9 }
 0x17f   : > { %v542_v26 = vpop.permute.xlu1 %541 }
 0x180   : > { %v544_v27 = vsub.f32 %v526_v7, %v542_v26 }
 0x182   : > { %v545_v28 = vmul.f32 1.442695, %v544_v27 }
 0x184   : > { %1480 = vpow2.f32 %v545_v28  ;;  %v578_v28 = vld [vmem:[#allocation4] sm:$0xff] }
 0x185   : > { %1482 = vpow2.f32 %v537_v46 }
 0x187   : > { %v592_v30 = vpop.permute.xlu1 %591 }
 0x188   : > { %1403 = vmatmul.msk.bf16.vlgmr.msra.gmra.mxu2 %vm510_vm0, %v592_v30 }
 0x18a   : > { %v1481_v31 = vpop.eup %1480 }
 0x18b   : > { %v549_v32 = vsel %vm531_vm2, %v1481_v31, 0.0  ;;  %v555_v33 = vpack.c.bf16 %v1481_v31, %v1481_v31  ;;  %v1483_v47 = vpop.eup %1482 }
 0x18c   : > { %550 = vadd.xlane.f32.xlu1 %v549_v32  ;;  %v548_v49 = vmul.f32 %v1483_v47, %v547_v48 }
 0x18d   : > { %1402 = vmatmul.msk.bf16.vlgmr.msra.gmra.mxu1 %vm531_vm2, %v555_v33 }
 0x18e   : > { %858 = vmatpush.bf16.xpose.msra.mxu1 %v849_v34 }
 0x18f   : > { %v758_v35 = vpop.permute.xlu1 %757 }
 0x190   : > { %v763_v36 = vsel %vm510_vm0, %v758_v35, 0 }
 0x191   : > { %772 = vmatpush.bf16.xpose.msrb.mxu0 %v763_v36 }
 0x197   : > { %v922_v39 = vpop.permute.xlu1 %921 }
 0x198   : > { %1407 = vmatmul.msk.bf16.vlgmr.msrb.gmra.mxu0 %vm510_vm0, %v756_v37  ;;  %v924_v41 = vsel %vm510_vm0, %v922_v39, 0  ;;  %v1547_v39 = vmov 3  }
 0x199   : > { %933 = vmatpush.bf16.xpose.msra.mxu0 %v924_v41 }
 0x19d   : > { %1405 = vmatmul.msk.bf16.vlgmr.msrb.gmra.mxu1 %vm510_vm0, %v674_v29 }
 0x19e   : > { %1013 = vmatpush.bf16.xpose.msrb.mxu1 %v1004_v43 }
 0x19f   : > { %v640_v44 = vpop.permute.xlu1 %639 }
 0x1a0   : > { %652 = vmatpush.bf16.msra.mxu3 %v640_v44 }
 0x1a1   : > { %1090 = vmatpush.bf16.xpose.msrb.mxu0 %v1081_v40 }
 0x1a7   : > { %v722_v45 = vpop.permute.xlu1 %721 }
 0x1a8   : > { %1413 = vmatmul.msk.bf16.vlgmr.msra.gmra.mxu0 %vm510_vm0, %v592_v30  ;;  %734 = vmatpush.bf16.msrb.mxu3 %v722_v45 }
 0x1ad   : > { %1411 = vmatmul.msk.bf16.vlgmr.msra.gmra.mxu1 %vm510_vm0, %v1620_v5 }
 0x1b8   : > { %1417 = vmatmul.msk.bf16.vlgmr.msrb.gmra.mxu0 %vm510_vm0, %v756_v37 }
 0x1bd   : > { %1415 = vmatmul.msk.bf16.vlgmr.msrb.gmra.mxu1 %vm510_vm0, %v674_v29 }
 0x1ff   : > { %v551_v50 = vpop.xlane.xlu1 %550 }
 0x200   : > { %v552_v51 = vadd.f32 %v551_v50, %v548_v49 }
 0x202   : > { %554 = vst.msk [vmem:[#allocation3] sm:$0xff] %vm553_vm3, %v552_v51 }
 0x209   : > { %v630_v40 = vld [vmem:[#allocation3] sm:$0xff] }
 0x20a   : > { %v574_v52 = vpop.f32.mrf.mxu1 }
 0x20b   : > { %v610_v53 = vpop.f32.mrf.mxu2 }
 0x20c   : > { %v615_v54 = vsel %vm531_vm2, %v610_v53, -inf }
 0x20d   : > { %616 = vmax.xlane.f32.xlu0 %v615_v54 }
 0x212   : > { %v576_v55 = vpop.f32.mrf.mxu1 }
 0x213   : > { %v612_v56 = vpop.f32.mrf.mxu2 }
 0x215   : > { %v1676_v57 = vpop.f32.mrf.mxu0 }
 0x216   : > { %v779_v58 = vsel %vm531_vm2, %v1676_v57, -inf }
 0x217   : > { %780 = vmax.xlane.f32.xlu2 %v779_v58 }
 0x21a   : > { %v1684_v60 = vpop.f32.mrf.mxu1 }
 0x21b   : > { %v697_v37 = vsel %vm531_vm2, %v1684_v60, -inf }
 0x21d   : > { %v776_v61 = vpop.f32.mrf.mxu0 }
 0x21e   : > { %v1410_v61 = vld [vmem:[%s1297_s28 + $0x10] sm:$0xf] }
 0x21f   : > { %v964_v63 = vunpack.c.l.b16 %v1410_v61 }
 0x222   : > { %v694_v1 = vpop.f32.mrf.mxu1 }
 0x223   : > { %v965_v1 = vpack.c.b16 %v964_v63, %v964_v63 }
 0x225   : > { %v935_v2 = vpop.f32.mrf.mxu0 }
 0x226   : > { %v1686_v3 = vadd.f32 %v935_v2, %v846_v0 }
 0x228   : > { %v940_v4 = vsel %vm510_vm0, %v1686_v3, -inf }
 0x229   : > { %941 = vmax.xlane.f32.xlu0 %v940_v4 }
 0x22a   : > { %v860_v5 = vpop.f32.mrf.mxu1 }
 0x22b   : > { %v1690_v6 = vadd.f32 %v860_v5, %v846_v0 }
 0x22d   : > { %v937_v7 = vpop.f32.mrf.mxu0  ;;  %v865_v8 = vsel %vm510_vm0, %v1690_v6, -inf }
 0x22e   : > { %866 = vmax.xlane.f32.xlu1 %v865_v8 }
 0x22f   : > { %581 = vperm.xlu2 %1463, %v1483_v47  }
 0x232   : > { %v862_v9 = vpop.f32.mrf.mxu1 }
 0x235   : > { %v1092_v12 = vpop.f32.mrf.mxu0 }
 0x236   : > { %v1694_v13 = vadd.f32 %v1092_v12, %v846_v0 }
 0x237   : > { %1464 = vset.pattern.permute.xlu2 %v1545_v20 }
 0x238   : > { %v1097_v9 = vsel %vm510_vm0, %v1694_v13, -inf }
 0x23a   : > { %v1015_v14 = vpop.f32.mrf.mxu1 }
 0x23b   : > { %v1696_v15 = vadd.f32 %v1015_v14, %v846_v0 }
 0x23d   : > { %v1020_v16 = vsel %vm510_vm0, %v1696_v15, -inf  ;;  %v1094_v18 = vpop.f32.mrf.mxu0 }
 0x23e   : > { %1021 = vmax.xlane.f32.xlu1 %v1020_v16 }
 0x242   : > { %v1017_v19 = vpop.f32.mrf.mxu1 }
 0x280   : > { %v617_v22 = vpop.xlane.xlu0 %616 }
 0x281   : > { %v618_v23 = vmax.f32 %v614_v21, %v617_v22 }
 0x283   : > { %v619_v24 = vsub.f32 %v614_v21, %v618_v23  ;;  %672 = vst.msk [vmem:[#allocation2] sm:$0xff] %vm636_vm6, %v618_v23  ;;  %624 = vperm.xlu2 %1464, %v618_v23   ;;  %v893_v21 = vsel %vm891_vm9, %v1410_v61, 0 }
 0x285   : > { %v620_v25 = vmul.f32 1.442695, %v619_v24 }
 0x287   : > { %1484 = vpow2.f32 %v620_v25 }
 0x28a   : > { %v781_v26 = vpop.xlane.xlu2 %780  ;;  %v1712_v44 = vld [vmem:[#allocation2] sm:$0xff] }
 0x28b   : > { %1466 = vset.pattern.permute.xlu2 %v1546_v38 }
 0x28d   : > { %v1485_v27 = vpop.eup %1484 }
 0x28e   : > { %661 = vperm.xlu0 %1465, %v1485_v27   ;;  %v631_v41 = vmul.f32 %v1485_v27, %v630_v40 }
 0x292   : > { %v582_v29 = vpop.permute.xlu2 %581 }
 0x293   : > { %v584_v30 = vmul.f32 %v582_v29, %v578_v28 }
 0x295   : > { %v585_v31 = vadd.f32 %v584_v30, %v574_v52 }
 0x296   : > { %1467 = vset.pattern.permute.xlu0 %v1547_v39 }
 0x297   : > { %586 = vst.msk [vmem:[#allocation4] sm:$0xff] %vm510_vm0, %v585_v31 }
 0x29c   : > { %v942_v56 = vpop.xlane.xlu0 %941 }
 0x29e   : > { %v658_v23 = vld [vmem:[#allocation4] sm:$0xff] }
 0x2dd   : > { %v625_v11 = vpop.permute.xlu2 %624 }
 0x2de   : > { %v627_v32 = vsub.f32 %v610_v53, %v625_v11  ;;  %v867_v53 = vpop.xlane.xlu1 %866 }
 0x2e0   : > { %v628_v33 = vmul.f32 1.442695, %v627_v32 }
 0x2e2   : > { %1486 = vpow2.f32 %v628_v33 }
 0x2e6   : > { %v1022_v2 = vpop.xlane.xlu1 %1021 }
 0x2e8   : > { %v1487_v34 = vpop.eup %1486 }
 0x2e9   : > { %v632_v35 = vsel %vm531_vm2, %v1487_v34, 0.0  ;;  %v638_v36 = vpack.c.bf16 %v1487_v34, %v1487_v34 }
 0x2ea   : > { %633 = vadd.xlane.f32.xlu2 %v632_v35 }
 0x2eb   : > { %1404 = vmatmul.msk.bf16.vlgmr.msra.gmra.mxu3 %vm531_vm2, %v638_v36 }
 0x2ec   : > { %902 = vmatpush.bf16.msra.mxu3 %v893_v21 }
 0x2f2   : > { %698 = vmax.xlane.f32.xlu2 %v697_v37 }
 0x300   : > { %v662_v22 = vpop.permute.xlu0 %661 }
 0x35d   : > { %v634_v42 = vpop.xlane.xlu2 %633 }
 0x35e   : > { %v635_v43 = vadd.f32 %v634_v42, %v631_v41 }
 0x360   : > { %637 = vst.msk [vmem:[#allocation3] sm:$0xff] %vm636_vm6, %v635_v43 }
 0x365   : > { %v699_v45 = vpop.xlane.xlu2 %698 }
 0x366   : > { %v1715_v46 = vmax.f32 %v1712_v44, %v699_v45 }
 0x368   : > { %v701_v47 = vsub.f32 %v1712_v44, %v1715_v46  ;;  %754 = vst.msk [vmem:[#allocation2] sm:$0xff] %vm718_vm7, %v1715_v46  ;;  %706 = vperm.xlu2 %1466, %v1715_v46  }
 0x36e   : > { %v654_v48 = vpop.f32.mrf.mxu3 }
 0x36f   : > { %666 = vrot.lane.b32.xlu1 %v654_v48, %s1548_s21  ;;  %v1723_v49 = vld [vmem:[#allocation2] sm:$0xff] }
 0x370   : > { %v1726_v50 = vmax.f32 %v1723_v49, %v781_v26  ;;  %1474 = vset.pattern.permute.xlu2 %v1545_v20 }
 0x372   : > { %v783_v51 = vsub.f32 %v1723_v49, %v1726_v50  ;;  %836 = vst.msk [vmem:[#allocation2] sm:$0xff] %vm800_vm8, %v1726_v50  ;;  %788 = vperm.xlu0 %1467, %v1726_v50  }
 0x376   : > { %v656_v52 = vpop.f32.mrf.mxu3 }
 0x377   : > { %v784_v52 = vmul.f32 1.442695, %v783_v51 }
 0x379   : > { %v864_v54 = vld [vmem:[#allocation2] sm:$0xff] }
 0x37a   : > { %v868_v55 = vmax.f32 %v864_v54, %v867_v53  ;;  %1469 = vset.pattern.permute.xlu0 %v1546_v38 }
 0x37c   : > { %874 = vperm.xlu1 %1462, %v868_v55   ;;  %917 = vst.msk [vmem:[#allocation2] sm:$0xff] %vm553_vm3, %v868_v55  ;;  %v869_v0 = vsub.f32 %v864_v54, %v868_v55 }
 0x37e   : > { %v870_v5 = vmul.f32 1.442695, %v869_v0 }
 0x380   : > { %1488 = vpow2.f32 %v870_v5 }
 0x383   : > { %v939_v58 = vld [vmem:[#allocation2] sm:$0xff] }
 0x384   : > { %1468 = vset.pattern.permute.xlu1 %v1545_v20  ;;  %v943_v59 = vmax.f32 %v939_v58, %v942_v56 }
 0x386   : > { %949 = vperm.xlu1 %1468, %v943_v59   ;;  %v944_v62 = vsub.f32 %v939_v58, %v943_v59  ;;  %1000 = vst.msk [vmem:[#allocation2] sm:$0xff] %vm636_vm6, %v943_v59  ;;  %v1756_v12 = vpop.eup %1488 }
 0x388   : > { %v945_v35 = vmul.f32 1.442695, %v944_v62 }
 0x38d   : > { %v1742_v4 = vld [vmem:[#allocation2] sm:$0xff] }
 0x38e   : > { %v1745_v7 = vmax.f32 %v1742_v4, %v1022_v2  ;;  %966 = vrot.lane.b32.xlu1 %v965_v1, %s1540_s10  ;;  %v712_v2 = vld [vmem:[#allocation3] sm:$0xff] }
 0x38f   : > { %1470 = vset.pattern.permute.xlu1 %v1547_v39 }
 0x390   : > { %1029 = vperm.xlu0 %1469, %v1745_v7   ;;  %v1024_v8 = vsub.f32 %v1742_v4, %v1745_v7  ;;  %1077 = vst.msk [vmem:[#allocation2] sm:$0xff] %vm718_vm7, %v1745_v7 }
 0x391   : > { %1098 = vmax.xlane.f32.xlu2 %v1097_v9 }
 0x397   : > { %v1774_v40 = vld [vmem:[#allocation2] sm:$0xff] }
 0x398   : > { %1473 = vset.pattern.permute.xlu0 %v1541_v10 }
 0x399   : > { %911 = vperm.xlu0 %1473, %v1756_v12  }
 0x3a1   : > { %1475 = vset.pattern.permute.xlu0 %v1546_v38 }
 0x3a9   : > { %803 = vrot.lane.b32.xlu2 %v1645_v17, %s1543_s14  ;;  %v664_v17 = vmul.f32 %v662_v22, %v658_v23 }
 0x3b1   : > { %1043 = vrot.lane.b32.xlu2 %v965_v1, %s1539_s9  ;;  %s486_s9 = scalar_lea.vmem %s1859_s6, %s1608_s26 }
 0x3b9   : > { %1120 = vrot.lane.b32.xlu2 %v965_v1, %s1543_s14 }
 0x3c2   : > { %v707_v14 = vpop.permute.xlu2 %706 }
 0x3c3   : > { %v709_v16 = vsub.f32 %v1684_v60, %v707_v14 }
 0x3c5   : > { %v710_v18 = vmul.f32 1.442695, %v709_v16 }
 0x3c7   : > { %1490 = vpow2.f32 %v710_v18 }
 0x3cd   : > { %v1491_v19 = vpop.eup %1490 }
 0x3ce   : > { %v720_v20 = vpack.c.bf16 %v1491_v19, %v1491_v19  ;;  %v714_v25 = vsel %vm531_vm2, %v1491_v19, 0.0 }
 0x3d0   : > { %1406 = vmatmul.msk.bf16.vlgmr.msrb.gmra.mxu3 %vm531_vm2, %v720_v20 }
 0x3e1   : > { %v667_v24 = vpop.permute.xlu1 %666 }
 0x3e2   : > { %v669_v26 = vadd.f32 %v667_v24, %v664_v17  ;;  %715 = vadd.xlane.f32.xlu2 %v714_v25 }
 0x3e4   : > { %671 = vst.msk [vmem:[#allocation4] sm:$0xff] %vm670_vm10, %v669_v26  ;;  %v789_v60 = vpop.permute.xlu0 %788 }
 0x3e5   : > { %v791_v27 = vsub.f32 %v1676_v57, %v789_v60 }
 0x3e7   : > { %v792_v28 = vmul.f32 1.442695, %v791_v27 }
 0x3e9   : > { %1492 = vpow2.f32 %v792_v28 }
 0x3ee   : > { %v875_v29 = vpop.permute.xlu1 %874 }
 0x3ef   : > { %v1493_v30 = vpop.eup %1492  ;;  %v877_v31 = vsub.f32 %v1690_v6, %v875_v29  ;;  %v702_v6 = vmul.f32 1.442695, %v701_v47 }
 0x3f0   : > { %v796_v11 = vsel %vm531_vm2, %v1493_v30, 0.0  ;;  %v802_v53 = vpack.c.bf16 %v1493_v30, %v1493_v30 }
 0x3f1   : > { %v878_v32 = vmul.f32 1.442695, %v877_v31  ;;  %797 = vadd.xlane.f32.xlu2 %v796_v11 }
 0x3f3   : > { %1494 = vpow2.f32 %v878_v32 }
 0x3f4   : > { %1496 = vpow2.f32 %v945_v35 }
 0x3f5   : > { %1498 = vpow2.f32 %v702_v6  ;;  %v740_v6 = vld [vmem:[#allocation4] sm:$0xff] }
 0x3f8   : > { %v950_v36 = vpop.permute.xlu1 %949 }
 0x3f9   : > { %v1495_v33 = vpop.eup %1494 }
 0x3fa   : > { %v887_v34 = vpack.c.bf16 %v1495_v33, %v1495_v33  ;;  %v1788_v45 = vpop.eup %1496  ;;  %v882_v0 = vsel %vm510_vm0, %v1495_v33, 0.0 }
 0x3fb   : > { %v1499_v54 = vpop.eup %1498 }
 0x3fc   : > { %1412 = vmatmul.msk.bf16.vlgmr.msra.gmra.mxu3 %vm510_vm0, %v887_v34  ;;  %v713_v5 = vmul.f32 %v1499_v54, %v712_v2 }
 0x400   : > { %v967_v48 = vpop.permute.xlu1 %966 }
 0x401   : > { %v972_v46 = vsel %vm891_vm9, %v967_v48, 0 }
 0x402   : > { %v1030_v37 = vpop.permute.xlu0 %1029 }
 0x403   : > { %v1032_v42 = vsub.f32 %v1696_v15, %v1030_v37  ;;  %v952_v15 = vsub.f32 %v1686_v3, %v950_v36 }
 0x404   : > { %v1099_v57 = vpop.xlane.xlu2 %1098 }
 0x405   : > { %v1780_v41 = vmax.f32 %v1774_v40, %v1099_v57  ;;  %v1033_v44 = vmul.f32 1.442695, %v1032_v42  ;;  %v953_v55 = vmul.f32 1.442695, %v952_v15 }
 0x407   : > { %v1101_v43 = vsub.f32 %v1774_v40, %v1780_v41  ;;  %1154 = vst.msk [vmem:[#allocation2] sm:$0xff] %vm800_vm8, %v1780_v41  ;;  %1106 = vperm.xlu1 %1470, %v1780_v41   ;;  %1500 = vpow2.f32 %v1033_v44  ;;  %v1025_v44 = vmul.f32 1.442695, %v1024_v8 }
 0x408   : > { %1502 = vpow2.f32 %v784_v52 }
 0x409   : > { %990 = vperm.xlu2 %1474, %v1788_v45   ;;  %1504 = vpow2.f32 %v953_v55 }
 0x40b   : > { %v912_v57 = vpop.permute.xlu0 %911 }
 0x40c   : > { %v804_v47 = vpop.permute.xlu2 %803 }
 0x40d   : > { %816 = vmatpush.bf16.msrb.mxu2 %v804_v47  ;;  %v1501_v56 = vpop.eup %1500  ;;  %v1102_v47 = vmul.f32 1.442695, %v1101_v43 }
 0x40e   : > { %v1042_v59 = vpack.c.bf16 %v1501_v56, %v1501_v56  ;;  %v1503_v49 = vpop.eup %1502  ;;  %v1037_v63 = vsel %vm510_vm0, %v1501_v56, 0.0 }
 0x40f   : > { %1471 = vset.pattern.permute.xlu1 %v1546_v38  ;;  %v1505_v50 = vpop.eup %1504 }
 0x410   : > { %743 = vperm.xlu1 %1471, %v1499_v54   ;;  %1408 = vmatmul.msk.bf16.vlgmr.msrb.gmra.mxu2 %vm531_vm2, %v802_v53  ;;  %v962_v51 = vpack.c.bf16 %v1505_v50, %v1505_v50  ;;  %v957_v37 = vsel %vm510_vm0, %v1505_v50, 0.0 }
 0x411   : > { %981 = vmatpush.bf16.msra.mxu2 %v972_v46 }
 0x414   : > { %v1044_v58 = vpop.permute.xlu2 %1043 }
 0x415   : > { %v1049_v3 = vsel %vm891_vm9, %v1044_v58, 0 }
 0x416   : > { %1058 = vmatpush.bf16.msrb.mxu3 %v1049_v3 }
 0x418   : > { %1472 = vset.pattern.permute.xlu1 %v1547_v39 }
 0x419   : > { %825 = vperm.xlu1 %1472, %v1503_v49   ;;  %1416 = vmatmul.msk.bf16.vlgmr.msrb.gmra.mxu3 %vm510_vm0, %v1042_v59 }
 0x41c   : > { %v1121_v61 = vpop.permute.xlu2 %1120 }
 0x41d   : > { %v1126_v62 = vsel %vm891_vm9, %v1121_v61, 0 }
 0x41e   : > { %1135 = vmatpush.bf16.msrb.mxu2 %v1126_v62 }
 0x420   : > { %1414 = vmatmul.msk.bf16.vlgmr.msra.gmra.mxu2 %vm510_vm0, %v962_v51 }
 0x432   : > { %1038 = vadd.xlane.f32.xlu2 %v1037_v63 }
 0x443   : > { %883 = vadd.xlane.f32.xlu1 %v882_v0 }
 0x453   : > { %v736_v1 = vpop.f32.mrf.mxu3 }
 0x454   : > { %748 = vrot.lane.b32.xlu0 %v736_v1, %s1549_s29 }
 0x455   : > { %v716_v9 = vpop.xlane.xlu2 %715 }
 0x456   : > { %v717_v14 = vadd.f32 %v716_v9, %v713_v5 }
 0x458   : > { %719 = vst.msk [vmem:[#allocation3] sm:$0xff] %vm718_vm7, %v717_v14 }
 0x45b   : > { %v738_v16 = vpop.f32.mrf.mxu3 }
 0x45f   : > { %v794_v18 = vld [vmem:[#allocation3] sm:$0xff] }
 0x460   : > { %v795_v19 = vmul.f32 %v1503_v49, %v794_v18 }
 0x464   : > { %v798_v20 = vpop.xlane.xlu2 %797 }
 0x465   : > { %v799_v21 = vadd.f32 %v798_v20, %v795_v19 }
 0x467   : > { %801 = vst.msk [vmem:[#allocation3] sm:$0xff] %vm800_vm8, %v799_v21 }
 0x46c   : > { %v991_v56 = vpop.permute.xlu2 %990 }
 0x46e   : > { %v880_v33 = vld [vmem:[#allocation3] sm:$0xff] }
 0x46f   : > { %v881_v34 = vmul.f32 %v1756_v12, %v880_v33 }
 0x479   : > { %v1107_v22 = vpop.permute.xlu1 %1106 }
 0x47a   : > { %v1109_v23 = vsub.f32 %v1694_v13, %v1107_v22 }
 0x47c   : > { %v1110_v17 = vmul.f32 1.442695, %v1109_v23 }
 0x47e   : > { %1506 = vpow2.f32 %v1110_v17 }
 0x47f   : > { %v904_v24 = vpop.f32.mrf.mxu3  ;;  %1508 = vpow2.f32 %v1025_v44 }
 0x480   : > { %1510 = vpow2.f32 %v1102_v47 }
 0x482   : > { %v744_v31 = vpop.permute.xlu1 %743 }
 0x483   : > { %v746_v42 = vmul.f32 %v744_v31, %v740_v6 }
 0x484   : > { %v1507_v25 = vpop.eup %1506 }
 0x485   : > { %v1119_v26 = vpack.c.bf16 %v1507_v25, %v1507_v25  ;;  %v1114_v12 = vsel %vm510_vm0, %v1507_v25, 0.0  ;;  %v1509_v15 = vpop.eup %1508 }
 0x486   : > { %v1511_v52 = vpop.eup %1510 }
 0x487   : > { %v906_v60 = vpop.f32.mrf.mxu3  ;;  %1418 = vmatmul.msk.bf16.vlgmr.msrb.gmra.mxu2 %vm510_vm0, %v1119_v26 }
 0x48b   : > { %v826_v32 = vpop.permute.xlu1 %825 }
 0x493   : > { %v818_v27 = vpop.f32.mrf.mxu2 }
 0x494   : > { %830 = vrot.lane.b32.xlu0 %v818_v27, %s1550_s30 }
 0x49b   : > { %v820_v28 = vpop.f32.mrf.mxu2 }
 0x49c   : > { %v1060_v29 = vpop.f32.mrf.mxu3 }
 0x49d   : > { %1072 = vrot.lane.b32.xlu2 %v1060_v29, %s1549_s29 }
 0x4a3   : > { %v983_v30 = vpop.f32.mrf.mxu2 }
 0x4a4   : > { %995 = vrot.lane.b32.xlu1 %v983_v30, %s1548_s21  ;;  %v1062_v13 = vpop.f32.mrf.mxu3 }
 0x4a5   : > { %v1039_v0 = vpop.xlane.xlu2 %1038 }
 0x4ab   : > { %v985_v11 = vpop.f32.mrf.mxu2 }
 0x4b6   : > { %v884_v35 = vpop.xlane.xlu1 %883 }
 0x4b7   : > { %v885_v36 = vadd.f32 %v884_v35, %v881_v34 }
 0x4b9   : > { %886 = vst.msk [vmem:[#allocation3] sm:$0xff] %vm553_vm3, %v885_v36 }
 0x4be   : > { %958 = vadd.xlane.f32.xlu0 %v957_v37 }
 0x4c0   : > { %v955_v49 = vld [vmem:[#allocation3] sm:$0xff] }
 0x4c1   : > { %v956_v50 = vmul.f32 %v1788_v45, %v955_v49 }
 0x4c6   : > { %v749_v48 = vpop.permute.xlu0 %748 }
 0x4c7   : > { %v751_v46 = vadd.f32 %v749_v48, %v746_v42 }
 0x4c9   : > { %753 = vst.msk [vmem:[#allocation4] sm:$0xff] %vm752_vm11, %v751_v46 }
 0x4ce   : > { %1115 = vadd.xlane.f32.xlu1 %v1114_v12 }
 0x4d0   : > { %v822_v4 = vld [vmem:[#allocation4] sm:$0xff] }
 0x4d1   : > { %v828_v7 = vmul.f32 %v826_v32, %v822_v4 }
 0x4d2   : > { %1067 = vperm.xlu0 %1475, %v1509_v15  }
 0x4da   : > { %1476 = vset.pattern.permute.xlu0 %v1547_v39 }
 0x4db   : > { %1144 = vperm.xlu0 %1476, %v1511_v52  }
 0x4e3   : > { %1477 = vset.pattern.permute.xlu0 %v1541_v10 }
 0x4f7   : > { %v1073_v14 = vpop.permute.xlu2 %1072 }
 0x506   : > { %v831_v8 = vpop.permute.xlu0 %830 }
 0x507   : > { %v833_v53 = vadd.f32 %v831_v8, %v828_v7 }
 0x509   : > { %835 = vst.msk [vmem:[#allocation4] sm:$0xff] %vm834_vm12, %v833_v53 }
 0x50a   : > { %v1137_v54 = vpop.f32.mrf.mxu2 }
 0x50b   : > { %1149 = vrot.lane.b32.xlu1 %v1137_v54, %s1550_s30 }
 0x510   : > { %v908_v40 = vld [vmem:[#allocation4] sm:$0xff] }
 0x511   : > { %v914_v41 = vmul.f32 %v912_v57, %v908_v40 }
 0x512   : > { %v1139_v43 = vpop.f32.mrf.mxu2 }
 0x513   : > { %v915_v55 = vadd.f32 %v914_v41, %v904_v24 }
 0x515   : > { %916 = vst.msk [vmem:[#allocation4] sm:$0xff] %vm510_vm0, %v915_v55 }
 0x516   : > { %v996_v10 = vpop.permute.xlu1 %995 }
 0x51c   : > { %v987_v58 = vld [vmem:[#allocation4] sm:$0xff] }
 0x51d   : > { %v993_v3 = vmul.f32 %v991_v56, %v987_v58 }
 0x51f   : > { %v998_v59 = vadd.f32 %v996_v10, %v993_v3 }
 0x521   : > { %999 = vst.msk [vmem:[#allocation4] sm:$0xff] %vm670_vm10, %v998_v59 }
 0x528   : > { %v1064_v2 = vld [vmem:[#allocation4] sm:$0xff] }
 0x531   : > { %v959_v51 = vpop.xlane.xlu0 %958 }
 0x532   : > { %v960_v61 = vadd.f32 %v959_v51, %v956_v50 }
 0x534   : > { %961 = vst.msk [vmem:[#allocation3] sm:$0xff] %vm636_vm6, %v960_v61 }
 0x53b   : > { %v1035_v62 = vld [vmem:[#allocation3] sm:$0xff] }
 0x53c   : > { %v1036_v63 = vmul.f32 %v1509_v15, %v1035_v62 }
 0x53e   : > { %v1040_v1 = vadd.f32 %v1039_v0, %v1036_v63 }
 0x540   : > { %1041 = vst.msk [vmem:[#allocation3] sm:$0xff] %vm718_vm7, %v1040_v1 }
 0x541   : > { %v1116_v20 = vpop.xlane.xlu1 %1115 }
 0x544   : > { %v1068_v5 = vpop.permute.xlu0 %1067 }
 0x545   : > { %v1070_v9 = vmul.f32 %v1068_v5, %v1064_v2 }
 0x547   : > { %v1112_v16 = vld [vmem:[#allocation3] sm:$0xff]  ;;  %v1075_v18 = vadd.f32 %v1073_v14, %v1070_v9 }
 0x548   : > { %v1113_v19 = vmul.f32 %v1511_v52, %v1112_v16 }
 0x549   : > { %1076 = vst.msk [vmem:[#allocation4] sm:$0xff] %vm752_vm11, %v1075_v18 }
 0x54a   : > { %v1117_v45 = vadd.f32 %v1116_v20, %v1113_v19 }
 0x54c   : > { %1118 = vst.msk [vmem:[#allocation3] sm:$0xff] %vm800_vm8, %v1117_v45 }
 0x54d   : > { %v1145_v17 = vpop.permute.xlu0 %1144 }
 0x550   : > { %v1141_v23 = vld [vmem:[#allocation4] sm:$0xff] }
 0x551   : > { %v1147_v24 = vmul.f32 %v1145_v17, %v1141_v23 }
 0x553   : > { %v1155_v21 = vld [vmem:[#allocation3] sm:$0xff] }
 0x554   : > { %1512 = vrcp.f32 %v1155_v21 }
 0x55a   : > { %v1513_v22 = vpop.eup %1512 }
 0x55b   : > { %1167 = vperm.xlu2 %1474, %v1513_v22   ;;  %1160 = vperm.xlu0 %1477, %v1513_v22  }
 0x563   : > { %1478 = vset.pattern.permute.xlu2 %v1546_v38  ;;  %1479 = vset.pattern.permute.xlu0 %v1547_v39 }
 0x564   : > { %1174 = vperm.xlu2 %1478, %v1513_v22   ;;  %1181 = vperm.xlu0 %1479, %v1513_v22  }
 0x57d   : > { %v1150_v25 = vpop.permute.xlu1 %1149 }
 0x57e   : > { %v1152_v26 = vadd.f32 %v1150_v25, %v1147_v24 }
 0x580   : > { %1153 = vst.msk [vmem:[#allocation4] sm:$0xff] %vm834_vm12, %v1152_v26 }
 0x587   : > { %v1157_v60 = vld [vmem:[#allocation4] sm:$0xff] }
 0x5b5   : > { %v1168_v29 = vpop.permute.xlu2 %1167 }
 0x5be   : > { %v1175_v39 = vpop.permute.xlu2 %1174 }
 0x5cd   : > { %v1161_v27 = vpop.permute.xlu0 %1160 }
 0x5ce   : > { %v1163_v28 = vmul.f32 %v1161_v27, %v1157_v60 }
 0x5d0   : > { %1164 = vst.msk [vmem:[#allocation4] sm:$0xff] %vm510_vm0, %v1163_v28 }
 0x5d6   : > { %v1182_v32 = vpop.permute.xlu0 %1181 }
 0x5d7   : > { %v1165_v30 = vld [vmem:[#allocation4] sm:$0xff] }
 0x5d8   : > { %v1170_v38 = vmul.f32 %v1168_v29, %v1165_v30 }
 0x5da   : > { %1171 = vst.msk [vmem:[#allocation4] sm:$0xff] %vm670_vm10, %v1170_v38 }
 0x5e1   : > { %v1172_v31 = vld [vmem:[#allocation4] sm:$0xff] }
 0x5e2   : > { %v1177_v13 = vmul.f32 %v1175_v39, %v1172_v31 }
 0x5e4   : > { %1178 = vst.msk [vmem:[#allocation4] sm:$0xff] %vm752_vm11, %v1177_v13 }
 0x5eb   : > { %v1179_v11 = vld [vmem:[#allocation4] sm:$0xff] }
 0x5ec   : > { %v1184_v33 = vmul.f32 %v1182_v32, %v1179_v11 }
 0x5ee   : > { %1185 = vst.msk [vmem:[#allocation4] sm:$0xff] %vm834_vm12, %v1184_v33 }
 0x5f5   : > { %v1186_v34 = vld [vmem:[#allocation4] sm:$0xff] }
 0x5f6   : > { %v1187_v35 = vpack.c.bf16 %v1186_v34, %v1186_v34 }
 0x5f8   : > { %1189 = vst.msk [vmem:[%s486_s9] sm:$0xf] %vm1188_vm13, %v1187_v35 }
 0x5f9 PF: > { %s16_s23 = sadd.s32 1, %s1536_s23   ;;  %s1860_s21 = smov %s1532_s22 }
 0x5fa   : > { %p13_p5 = scmp.ge.s32.totalorder %s16_s23, 4   ;;  %s1861_s22 = smov %s1863_s24 }
 0x5fc   :  { %15 = sbr.rel (!%p13_p5) target bundleno = 2 (0x2), region = 97 }

// kernel: mm_double_stream_block_audio.17
= control target key start
LH: loop header
LB: loop body
LE: loop exit
PB: predicated region body
PF: predicated region fallthrough
CT: control target
= control target key end

     0   :  { %s2014_s21 = smov 0   ;;  %s2016_s22 = smov 0   ;;  %s2577_s0 = inlined_call_operand.vmem [shape: bf16[3,2,16,32], index: 0, kind: input, shape index: {}, may-alias: {0,1,2}]   ;;  %s2578_s1 = inlined_call_operand.vmem [shape: bf16[3,2,16,32], index: 1, kind: input, shape index: {}, may-alias: {0,1,2}]   ;;  %s2579_s2 = inlined_call_operand.vmem [shape: bf16[3,2,16,32], index: 2, kind: input, shape index: {}, may-alias: {0,1,2}]   ;;  %s2580_s3 = inlined_call_operand.vmem [shape: bf16[3,2,8,32], index: 3, kind: input, shape index: {}, may-alias: {3,4}]   ;;  %s2581_s4 = inlined_call_operand.vmem [shape: bf16[3,2,8,32], index: 4, kind: input, shape index: {}, may-alias: {3,4}]   ;;  %s2582_s5 = inlined_call_operand.vmem [shape: s32[2,1,8], index: 5, kind: input, shape index: {}]   ;;  %s2583_s6 = inlined_call_operand.vmem [shape: bf16[2,16,32], index: 6, kind: output, shape index: {}]  }
   0x1   :  { %s2018_s23 = smov 0  }
   0x2 LB: > { %s42_s24 = sadd.s32 1, %s1960_s22  ;;  %p1753_p0 = scmp.ge.s32.totalorder %s1964_s23, 1  ;;  %s1964_s23 = sphi %s2018_s23, %s16_s23   ;;  %s1960_s22 = sphi %s2016_s22, %s2585_s22   ;;  %s1956_s21 = sphi %s2014_s21, %s2584_s21  }
   0x3   : > { %p44_p1 = scmp.ge.s32.totalorder %s42_s24, 2  ;;  %p338_p2 = scmp.lt.s32.totalorder %s1964_s23, 3 }
   0x5   : > { %s2587_s24 = smov (%p44_p1, %s42_s24), 0  ;;  %p339_p3 = pnand %p1753_p0, %p338_p2 }
   0x6   : > { %p428_p4 = scmp.lt.s32.totalorder (!%p339_p3), %s1956_s21, 1  ;;  %s1966_s8 = smov (!%p339_p3), 120  }
   0x7   : > { %342 = sbr.rel (%p339_p3) target bundleno = 1497 (0x5d9), region = 44  ;;  %s1967_s9 = smov (!%p339_p3), 112  }
   0x8   : > { %s1969_s10 = smov (!%p339_p3), 104   ;;  %s1975_s26 = smov (!%p339_p3), 8  }
   0x9   : > { %s1978_s30 = smov (!%p339_p3), 24  }
   0xc   : > { %s2589_s21 = smov (!%p428_p4, %s1956_s21), 1  ;;  %vm535_vm0 = vcmask 64512   ;;  %vm505_vm1 = vcmask 31744   ;;  %v1968_v13 = vmov -inf   ;;  %vm558_vm2 = vcmask 130048  }
   0xd   : > { %s2035_s25 = sshll.u32 %s2589_s21, 3  ;;  %506 = vst.msk [vmem:[#allocation2] sm:$0xff] %vm505_vm1, %v1968_v13  ;;  %v1970_v20 = vmov 0   ;;  %v1971_v21 = vmov 0.0   ;;  %vm601_vm3 = vcmask 7168   ;;  %s1760_s11 = sshll.u32 %s2589_s21, 2 }
   0xe   : > { %s1652_s28 = scalar_lea.vmem %s2578_s1, %s2035_s25  ;;  %s438_s7 = scalar_lea.vmem %s2577_s0, %s2035_s25  ;;  %507 = vst.msk [vmem:[#allocation2 + $0x8] sm:$0xff] %vm505_vm1, %v1968_v13  ;;  %1843 = vset.pattern.permute.xlu1 %v1970_v20  ;;  %vm716_vm4 = vcmask 15368   ;;  %v1972_v56 = vmov 1   ;;  %vm510_vm6 = vcmask 261120   ;;  %vm837_vm7 = vcmask 23568  }
   0xf   : > { %v1800_v0 = vld [vmem:[%s1652_s28 + $0x10] sm:$0xff]  ;;  %v1803_v1 = vld [vmem:[%s438_s7] sm:$0xff]   ;;  %508 = vst.msk [vmem:[#allocation3] sm:$0xff] %vm505_vm1, %v1971_v21  ;;  %s1662_s14 = scalar_lea.vmem %s2580_s3, %s1760_s11  ;;  %s1658_s17 = scalar_lea.vmem %s2579_s2, %s2035_s25  ;;  %1845 = vset.pattern.permute.xlu2 %v1972_v56  ;;  %1844 = vset.pattern.permute.xlu0 %v1972_v56  ;;  %vm958_vm8 = vcmask 31768   ;;  %vm764_vm9 = vcmask 130112   ;;  %vm1089_vm10 = vcmask 1043456  }
  0x10   : > { %650 = vrot.lane.b32.xlu1 %v1800_v0, %s1966_s8  ;;  %v540_v2 = vsel %vm535_vm0, %v1800_v0, 0  ;;  %v1804_v3 = vunpack.c.l.bf16 %v1803_v1  ;;  %v1805_v4 = vunpack.c.h.bf16 %v1803_v1  ;;  %509 = vst.msk [vmem:[#allocation3 + $0x8] sm:$0xff] %vm505_vm1, %v1971_v21  ;;  %v2103_v33 = vld [vmem:[%s1662_s14 + $0x8] sm:$0xf]  ;;  %v2111_v36 = vld [vmem:[%s1658_s17 + $0x20] sm:$0xff]  ;;  %s486_s20 = scalar_lea.vmem %s2582_s5, %s2589_s21  ;;  %s1666_s29 = scalar_lea.vmem %s2581_s4, %s1760_s11  ;;  %vm885_vm11 = vcmask 195712  }
  0x11   : > { %549 = vmatpush.bf16.xpose.msra.mxu0 %v540_v2  ;;  %v1128_v34 = vunpack.c.l.b16 %v2103_v33  ;;  %621 = vmatpush.bf16.msra.mxu1 %v2111_v36  ;;  %512 = vst.msk [vmem:[#allocation4 + $0x8] sm:$0xff] %vm510_vm6, %v1971_v21  ;;  %s1977_s21 = smov 16   ;;  %vm1006_vm12 = vcmask 261312   ;;  %vm1547_vm13 = vcmask 257024  }
  0x12   : > { %v517_v5 = vmul.f32 0.35355338, %v1804_v3  ;;  %v518_v6 = vmul.f32 0.35355338, %v1805_v4  ;;  %511 = vst.msk [vmem:[#allocation4] sm:$0xff] %vm510_vm6, %v1971_v21 }
  0x13   : > { %v1129_v35 = vpack.c.b16 %v1128_v34, %v1128_v34 }
  0x14   : > { %v519_v7 = vpack.c.bf16 %v517_v5, %v517_v5  ;;  %v520_v8 = vpack.c.bf16 %v518_v6, %v518_v6  ;;  %v2071_v22 = vld [vmem:[#allocation2] sm:$0xff] }
  0x15   : > { %v2083_v27 = vld [vmem:[#allocation2 + $0x8] sm:$0xff] }
  0x16   : > { %v527_v9 = vunpack.c.l.b16 %v519_v7  ;;  %v528_v10 = vunpack.c.l.b16 %v520_v8  ;;  %v1023_v7 = vsel %vm535_vm0, %v2103_v33, 0  ;;  %v1973_v33 = vmov -1e+09  }
  0x18   : > { %v2047_v11 = vpack.c.b16 %v528_v10, %v527_v9 }
  0x1a   : > { %1772 = vmatmul.msk.bf16.vlgmr.msra.gmra.mxu0 %vm535_vm0, %v2047_v11  ;;  %648 = vrot.lane.b32.xlu2 %v2047_v11, %s1966_s8 }
  0x22   : > { %769 = vrot.lane.b32.xlu2 %v2047_v11, %s1967_s9 }
  0x74   : > { %v2058_v15 = vpop.permute.xlu2 %648 }
  0x7c   : > { %v2124_v39 = vpop.permute.xlu2 %769 }
  0x82   : > { %v651_v12 = vpop.permute.xlu1 %650 }
  0x83   : > { %v656_v14 = vsel %vm535_vm0, %v651_v12, 0 }
  0x84   : > { %665 = vmatpush.bf16.xpose.msra.mxu2 %v656_v14  ;;  %v589_v14 = vld [vmem:[#allocation3] sm:$0xff] }
  0x8b   : > { %1778 = vmatmul.msk.bf16.vlgmr.msra.gmra.mxu2 %vm535_vm0, %v2058_v15 }
  0x97   : > { %v551_v16 = vpop.f32.mrf.mxu0 }
  0x98   : > { %v559_v17 = vsel %vm558_vm2, %v551_v16, -inf }
  0x99   : > { %560 = vmax.xlane.f32.xlu0 %v559_v17 }
  0x9f   : > { %v553_v18 = vpop.f32.mrf.mxu0 }
  0xa0   : > { %v562_v19 = vsel %vm558_vm2, %v553_v18, -inf }
  0xa1   : > { %563 = vmax.xlane.f32.xlu0 %v562_v19 }
  0xb5   : > { %771 = vrot.lane.b32.xlu0 %v1800_v0, %s1967_s9 }
  0xbd   : > { %892 = vrot.lane.b32.xlu0 %v1800_v0, %s1969_s10 }
  0xc5   : > { %1130 = vrot.lane.b32.xlu0 %v1129_v35, %s1966_s8 }
  0xcd   : > { %720 = vrot.lane.b32.xlu0 %v2111_v36, %s1966_s8 }
  0xd5   : > { %1249 = vrot.lane.b32.xlu0 %v1129_v35, %s1967_s9 }
  0xdd   : > { %1365 = vrot.lane.b32.xlu0 %v1129_v35, %s1969_s10 }
  0xe5   : > { %841 = vrot.lane.b32.xlu0 %v2111_v36, %s1967_s9 }
 0x10c   : > { %v561_v23 = vpop.xlane.xlu0 %560 }
 0x10d   : > { %v2074_v24 = vmax.f32 %v2071_v22, %v561_v23 }
 0x10e   : > { %v2076_v25 = vpop.f32.mrf.mxu2 }
 0x10f   : > { %v567_v26 = vsub.f32 %v2071_v22, %v2074_v24  ;;  %646 = vst.msk [vmem:[#allocation2] sm:$0xff] %vm601_vm3, %v2074_v24  ;;  %575 = vperm.xlu1 %1843, %v2074_v24   ;;  %v674_v37 = vsel %vm558_vm2, %v2076_v25, -inf  ;;  %v1014_v24 = vld [vmem:[%s486_s20] sm:$0x1] }
 0x110   : > { %vm1015_vm5 = vcmp.gt.s32.totalorder %v1014_v24, 0 }
 0x111   : > { %v569_v9 = vmul.f32 1.442695, %v567_v26  ;;  %v1016_v34 = vsel %vm1015_vm5, 0.0, %v1973_v33 }
 0x114   : > { %v564_v28 = vpop.xlane.xlu0 %563 }
 0x115   : > { %v2086_v29 = vmax.f32 %v2083_v27, %v564_v28 }
 0x116   : > { %v2088_v30 = vpop.f32.mrf.mxu2  ;;  %v672_v59 = vld [vmem:[#allocation2] sm:$0xff] }
 0x117   : > { %v568_v31 = vsub.f32 %v2083_v27, %v2086_v29  ;;  %647 = vst.msk [vmem:[#allocation2 + $0x8] sm:$0xff] %vm601_vm3, %v2086_v29  ;;  %580 = vperm.xlu1 %1843, %v2086_v29   ;;  %v677_v32 = vsel %vm558_vm2, %v2088_v30, -inf  ;;  %v590_v27 = vld [vmem:[#allocation3 + $0x8] sm:$0xff] }
 0x118   : > { %678 = vmax.xlane.f32.xlu2 %v677_v32 }
 0x119   : > { %v571_v26 = vmul.f32 1.442695, %v568_v31 }
 0x11e   : > { %v673_v45 = vld [vmem:[#allocation2 + $0x8] sm:$0xff] }
 0x127   : > { %v772_v50 = vpop.permute.xlu0 %771 }
 0x128   : > { %v777_v53 = vsel %vm535_vm0, %v772_v50, 0 }
 0x129   : > { %786 = vmatpush.bf16.xpose.msrb.mxu1 %v777_v53 }
 0x12f   : > { %v893_v54 = vpop.permute.xlu0 %892 }
 0x130   : > { %v898_v55 = vsel %vm535_vm0, %v893_v54, 0 }
 0x131   : > { %907 = vmatpush.bf16.xpose.msrb.mxu0 %v898_v55 }
 0x137   : > { %v1131_v57 = vpop.permute.xlu0 %1130 }
 0x138   : > { %v1133_v58 = vsel %vm535_vm0, %v1131_v57, 0 }
 0x139   : > { %1142 = vmatpush.bf16.xpose.msra.mxu0 %v1133_v58 }
 0x13f   : > { %v721_v61 = vpop.permute.xlu0 %720 }
 0x140   : > { %733 = vmatpush.bf16.msra.mxu3 %v721_v61 }
 0x141   : > { %675 = vmax.xlane.f32.xlu1 %v674_v37 }
 0x147   : > { %v1250_v1 = vpop.permute.xlu0 %1249 }
 0x148   : > { %v1252_v6 = vsel %vm535_vm0, %v1250_v1, 0  ;;  %v629_v1 = vld [vmem:[#allocation4 + $0x8] sm:$0xff] }
 0x14f   : > { %v1366_v3 = vpop.permute.xlu0 %1365 }
 0x150   : > { %v1368_v4 = vsel %vm535_vm0, %v1366_v3, 0 }
 0x15a   : > { %890 = vrot.lane.b32.xlu1 %v2047_v11, %s1969_s10 }
 0x181   : > { %v576_v38 = vpop.permute.xlu1 %575 }
 0x182   : > { %v583_v40 = vsub.f32 %v551_v16, %v576_v38  ;;  %v2192_v38 = vperm.slane %v1016_v34, 0 }
 0x184   : > { %v585_v41 = vmul.f32 1.442695, %v583_v40 }
 0x186   : > { %1874 = vpow2.f32 %v585_v41 }
 0x189   : > { %v581_v42 = vpop.permute.xlu1 %580 }
 0x18a   : > { %v584_v43 = vsub.f32 %v553_v18, %v581_v42 }
 0x18b   : > { %v679_v44 = vpop.xlane.xlu2 %678 }
 0x18c   : > { %v1875_v46 = vpop.eup %1874  ;;  %v587_v47 = vmul.f32 1.442695, %v584_v43  ;;  %v2126_v48 = vmax.f32 %v673_v45, %v679_v44 }
 0x18d   : > { %v593_v49 = vsel %vm558_vm2, %v1875_v46, 0.0 }
 0x18e   : > { %1876 = vpow2.f32 %v587_v47  ;;  %768 = vst.msk [vmem:[#allocation2 + $0x8] sm:$0xff] %vm716_vm4, %v2126_v48  ;;  %594 = vadd.xlane.f32.xlu2 %v593_v49  ;;  %v683_v10 = vsub.f32 %v673_v45, %v2126_v48 }
 0x190   : > { %v686_v12 = vmul.f32 1.442695, %v683_v10 }
 0x194   : > { %v1877_v51 = vpop.eup %1876 }
 0x195   : > { %v604_v52 = vpack.c.bf16 %v1877_v51, %v1875_v46  ;;  %v596_v8 = vsel %vm558_vm2, %v1877_v51, 0.0 }
 0x197   : > { %1777 = vmatmul.msk.bf16.vlgmr.msra.gmra.mxu1 %vm558_vm2, %v604_v52  ;;  %v842_v52 = vpop.permute.xlu0 %841 }
 0x198   : > { %1032 = vmatpush.bf16.xpose.msra.mxu1 %v1023_v7  ;;  %854 = vmatpush.bf16.msrb.mxu3 %v842_v52 }
 0x1a7   : > { %1780 = vmatmul.msk.bf16.vlgmr.msrb.gmra.mxu1 %vm535_vm0, %v2124_v39 }
 0x1a8   : > { %1261 = vmatpush.bf16.xpose.msrb.mxu1 %v1252_v6 }
 0x1b4   : > { %v676_v60 = vpop.xlane.xlu1 %675 }
 0x1b5   : > { %v2139_v62 = vmax.f32 %v672_v59, %v676_v60 }
 0x1b7   : > { %v682_v63 = vsub.f32 %v672_v59, %v2139_v62  ;;  %767 = vst.msk [vmem:[#allocation2] sm:$0xff] %vm716_vm4, %v2139_v62  ;;  %1786 = vmatmul.msk.bf16.vlgmr.msra.gmra.mxu1 %vm535_vm0, %v2047_v11 }
 0x1b9   : > { %v684_v0 = vmul.f32 1.442695, %v682_v63 }
 0x1bb   : > { %1878 = vpow2.f32 %v684_v0 }
 0x1bc   : > { %1880 = vpow2.f32 %v569_v9 }
 0x1bd   : > { %1882 = vpow2.f32 %v686_v12 }
 0x1be   : > { %1884 = vpow2.f32 %v571_v26 }
 0x1c1   : > { %v2144_v2 = vpop.eup %1878 }
 0x1c2   : > { %744 = vperm.xlu2 %1845, %v2144_v2   ;;  %v2164_v13 = vpop.eup %1880 }
 0x1c3   : > { %v591_v11 = vmul.f32 %v2164_v13, %v589_v14  ;;  %v2167_v16 = vpop.eup %1882 }
 0x1c7   : > { %1790 = vmatmul.msk.bf16.vlgmr.msrb.gmra.mxu1 %vm535_vm0, %v2124_v39  ;;  %v1885_v39 = vpop.eup %1884 }
 0x1c8   : > { %v592_v31 = vmul.f32 %v1885_v39, %v590_v27 }
 0x1cc   : > { %v891_v5 = vpop.permute.xlu1 %890 }
 0x1cd   : > { %1782 = vmatmul.msk.bf16.vlgmr.msrb.gmra.mxu0 %vm535_vm0, %v891_v5 }
 0x1ce   : > { %1377 = vmatpush.bf16.xpose.msrb.mxu0 %v1368_v4 }
 0x1dd   : > { %1788 = vmatmul.msk.bf16.vlgmr.msra.gmra.mxu0 %vm535_vm0, %v2058_v15 }
 0x1eb   : > { %597 = vadd.xlane.f32.xlu2 %v596_v8 }
 0x1ed   : > { %1792 = vmatmul.msk.bf16.vlgmr.msrb.gmra.mxu0 %vm535_vm0, %v891_v5 }
 0x201   : > { %v595_v15 = vpop.xlane.xlu2 %594 }
 0x202   : > { %v599_v17 = vadd.f32 %v595_v15, %v591_v11 }
 0x203   : > { %749 = vperm.xlu2 %1845, %v2167_v16  }
 0x204   : > { %602 = vst.msk [vmem:[#allocation3] sm:$0xff] %vm601_vm3, %v599_v17 }
 0x214   : > { %v2171_v18 = vpop.f32.mrf.mxu1 }
 0x21c   : > { %v625_v23 = vpop.f32.mrf.mxu1  ;;  %v2190_v37 = vpop.permute.xlu2 %744 }
 0x224   : > { %v2188_v35 = vpop.f32.mrf.mxu1 }
 0x22c   : > { %v2197_v43 = vpop.f32.mrf.mxu1 }
 0x22d   : > { %v798_v60 = vsel %vm558_vm2, %v2197_v43, -inf }
 0x234   : > { %v1034_v47 = vpop.f32.mrf.mxu1 }
 0x235   : > { %v2211_v51 = vadd.f32 %v1034_v47, %v2192_v38 }
 0x237   : > { %v1041_v53 = vsel %vm535_vm0, %v2211_v51, -inf }
 0x23c   : > { %v1036_v49 = vpop.f32.mrf.mxu1 }
 0x23d   : > { %v2208_v50 = vadd.f32 %v1036_v49, %v2192_v38  ;;  %v704_v49 = vld [vmem:[#allocation3] sm:$0xff] }
 0x23e   : > { %v706_v52 = vmul.f32 %v2144_v2, %v704_v49 }
 0x23f   : > { %v1044_v8 = vsel %vm535_vm0, %v2208_v50, -inf }
 0x244   : > { %v1263_v54 = vpop.f32.mrf.mxu1 }
 0x245   : > { %v2217_v55 = vadd.f32 %v1263_v54, %v2192_v38 }
 0x24a   : > { %v2173_v19 = vpop.f32.mrf.mxu0 }
 0x24b   : > { %v916_v22 = vsel %vm558_vm2, %v2173_v19, -inf }
 0x24c   : > { %917 = vmax.xlane.f32.xlu1 %v916_v22  ;;  %v1265_v57 = vpop.f32.mrf.mxu1  ;;  %v795_v22 = vsel %vm558_vm2, %v2188_v35, -inf }
 0x24d   : > { %v2222_v58 = vadd.f32 %v1265_v57, %v2192_v38 }
 0x24f   : > { %v1273_v59 = vsel %vm535_vm0, %v2222_v58, -inf }
 0x252   : > { %v2184_v28 = vpop.f32.mrf.mxu0 }
 0x253   : > { %v919_v32 = vsel %vm558_vm2, %v2184_v28, -inf }
 0x254   : > { %920 = vmax.xlane.f32.xlu0 %v919_v32  ;;  %v2257_v32 = vld [vmem:[#allocation2 + $0x8] sm:$0xff] }
 0x25a   : > { %v1144_v40 = vpop.f32.mrf.mxu0 }
 0x25b   : > { %v2195_v29 = vadd.f32 %v1144_v40, %v2192_v38 }
 0x25e   : > { %v598_v41 = vpop.xlane.xlu2 %597 }
 0x25f   : > { %v600_v42 = vadd.f32 %v598_v41, %v592_v31 }
 0x261   : > { %603 = vst.msk [vmem:[#allocation3 + $0x8] sm:$0xff] %vm601_vm3, %v600_v42 }
 0x262   : > { %v1146_v44 = vpop.f32.mrf.mxu0 }
 0x263   : > { %v2201_v45 = vadd.f32 %v1146_v44, %v2192_v38 }
 0x265   : > { %637 = vperm.xlu1 %1843, %v1885_v39   ;;  %v1154_v46 = vsel %vm535_vm0, %v2201_v45, -inf }
 0x266   : > { %1155 = vmax.xlane.f32.xlu2 %v1154_v46  ;;  %v2271_v40 = vpop.permute.xlu2 %749 }
 0x268   : > { %690 = vperm.xlu0 %1844, %v2139_v62  }
 0x26a   : > { %v1379_v62 = vpop.f32.mrf.mxu0 }
 0x26b   : > { %v2235_v0 = vadd.f32 %v1379_v62, %v2192_v38  ;;  %v705_v62 = vld [vmem:[#allocation3 + $0x8] sm:$0xff] }
 0x26c   : > { %v707_v2 = vmul.f32 %v2167_v16, %v705_v62 }
 0x26d   : > { %v1386_v4 = vsel %vm535_vm0, %v2235_v0, -inf }
 0x26e   : > { %1042 = vmax.xlane.f32.xlu2 %v1041_v53 }
 0x270   : > { %695 = vperm.xlu0 %1844, %v2126_v48   ;;  %v1270_v48 = vsel %vm535_vm0, %v2217_v55, -inf }
 0x276   : > { %1271 = vmax.xlane.f32.xlu2 %v1270_v48  ;;  %v1974_v48 = vmov 2  }
 0x277   : > { %1849 = vset.pattern.permute.xlu1 %v1974_v48  ;;  %1847 = vset.pattern.permute.xlu2 %v1974_v48 }
 0x278   : > { %1846 = vset.pattern.permute.xlu0 %v1970_v20 }
 0x27e   : > { %1274 = vmax.xlane.f32.xlu2 %v1273_v59 }
 0x29a   : > { %799 = vmax.xlane.f32.xlu0 %v798_v60 }
 0x2ae   : > { %962 = vrot.lane.b32.xlu0 %v2111_v36, %s1969_s10 }
 0x2bf   : > { %v2232_v61 = vpop.xlane.xlu1 %917 }
 0x2c7   : > { %v921_v63 = vpop.xlane.xlu0 %920 }
 0x2d7   : > { %v638_v3 = vpop.permute.xlu1 %637 }
 0x2d8   : > { %v641_v5 = vmul.f32 %v638_v3, %v629_v1  ;;  %1387 = vmax.xlane.f32.xlu0 %v1386_v4  ;;  %v628_v3 = vld [vmem:[#allocation4] sm:$0xff] }
 0x2d9   : > { %v1156_v27 = vpop.xlane.xlu2 %1155 }
 0x2da   : > { %v643_v6 = vadd.f32 %v641_v5, %v625_v23  ;;  %v691_v7 = vpop.permute.xlu0 %690  ;;  %v1381_v23 = vpop.f32.mrf.mxu0 }
 0x2db   : > { %v698_v21 = vsub.f32 %v2076_v25, %v691_v7  ;;  %v2253_v24 = vadd.f32 %v1381_v23, %v2192_v38 }
 0x2dc   : > { %645 = vst.msk [vmem:[#allocation4 + $0x8] sm:$0xff] %vm535_vm0, %v643_v6 }
 0x2dd   : > { %v700_v36 = vmul.f32 1.442695, %v698_v21  ;;  %v1389_v26 = vsel %vm535_vm0, %v2253_v24, -inf }
 0x2df   : > { %1886 = vpow2.f32 %v700_v36 }
 0x2e0   : > { %1045 = vmax.xlane.f32.xlu0 %v1044_v8  ;;  %v793_v8 = vld [vmem:[#allocation2] sm:$0xff] }
 0x2e1   : > { %v1043_v41 = vpop.xlane.xlu2 %1042 }
 0x2e2   : > { %v696_v9 = vpop.permute.xlu0 %695 }
 0x2e3   : > { %v699_v10 = vsub.f32 %v2088_v30, %v696_v9  ;;  %v1151_v30 = vsel %vm535_vm0, %v2195_v29, -inf }
 0x2e5   : > { %v1887_v12 = vpop.eup %1886  ;;  %v702_v14 = vmul.f32 1.442695, %v699_v10 }
 0x2e6   : > { %v708_v11 = vsel %vm558_vm2, %v1887_v12, 0.0 }
 0x2e7   : > { %1888 = vpow2.f32 %v702_v14  ;;  %709 = vadd.xlane.f32.xlu1 %v708_v11 }
 0x2e9   : > { %v2287_v57 = vpop.xlane.xlu2 %1271 }
 0x2ed   : > { %v1889_v15 = vpop.eup %1888 }
 0x2ee   : > { %v711_v25 = vsel %vm558_vm2, %v1889_v15, 0.0  ;;  %v719_v17 = vpack.c.bf16 %v1889_v15, %v1887_v12 }
 0x2ef   : > { %712 = vadd.xlane.f32.xlu1 %v711_v25 }
 0x2f0   : > { %1779 = vmatmul.msk.bf16.vlgmr.msra.gmra.mxu3 %vm558_vm2, %v719_v17 }
 0x2f1   : > { %v1275_v5 = vpop.xlane.xlu2 %1274 }
 0x2f4   : > { %632 = vperm.xlu0 %1846, %v2164_v13  }
 0x2f7   : > { %796 = vmax.xlane.f32.xlu1 %v795_v22 }
 0x2ff   : > { %1152 = vmax.xlane.f32.xlu1 %v1151_v30 }
 0x307   : > { %1390 = vmax.xlane.f32.xlu1 %v1389_v26 }
 0x30d   : > { %v800_v13 = vpop.xlane.xlu0 %799 }
 0x30e   : > { %v2260_v33 = vmax.f32 %v2257_v32, %v800_v13 }
 0x310   : > { %889 = vst.msk [vmem:[#allocation2 + $0x8] sm:$0xff] %vm837_vm7, %v2260_v33 }
 0x317   : > { %v2264_v34 = vld [vmem:[#allocation2 + $0x8] sm:$0xff] }
 0x318   : > { %v2267_v38 = vmax.f32 %v2264_v34, %v921_v63 }
 0x31a   : > { %1010 = vst.msk [vmem:[#allocation2 + $0x8] sm:$0xff] %vm958_vm8, %v2267_v38 }
 0x320   : > { %v963_v39 = vpop.permute.xlu0 %962 }
 0x321   : > { %975 = vmatpush.bf16.msrb.mxu2 %v963_v39  ;;  %v2275_v42 = vld [vmem:[#allocation2 + $0x8] sm:$0xff] }
 0x34b   : > { %v2273_v31 = vpop.xlane.xlu0 %1387 }
 0x353   : > { %v1046_v44 = vpop.xlane.xlu0 %1045 }
 0x354   : > { %v2278_v46 = vmax.f32 %v2275_v42, %v1046_v44 }
 0x356   : > { %v1050_v47 = vsub.f32 %v2275_v42, %v2278_v46  ;;  %1126 = vst.msk [vmem:[#allocation2 + $0x8] sm:$0xff] %vm601_vm3, %v2278_v46 }
 0x35a   : > { %v710_v53 = vpop.xlane.xlu1 %709 }
 0x35b   : > { %v714_v54 = vadd.f32 %v710_v53, %v706_v52  ;;  %v1976_v53 = vmov 3  }
 0x35d   : > { %v2289_v59 = vld [vmem:[#allocation2 + $0x8] sm:$0xff]  ;;  %717 = vst.msk [vmem:[#allocation3] sm:$0xff] %vm716_vm4, %v714_v54 }
 0x35e   : > { %v2293_v60 = vmax.f32 %v2289_v59, %v1156_v27 }
 0x360   : > { %1248 = vst.msk [vmem:[#allocation2 + $0x8] sm:$0xff] %vm716_vm4, %v2293_v60 }
 0x362   : > { %v713_v63 = vpop.xlane.xlu1 %712 }
 0x363   : > { %v715_v1 = vadd.f32 %v713_v63, %v707_v2 }
 0x365   : > { %718 = vst.msk [vmem:[#allocation3 + $0x8] sm:$0xff] %vm716_vm4, %v715_v1 }
 0x366   : > { %v633_v4 = vpop.permute.xlu0 %632 }
 0x367   : > { %v640_v6 = vmul.f32 %v633_v4, %v628_v3  ;;  %v2299_v7 = vld [vmem:[#allocation2 + $0x8] sm:$0xff] }
 0x368   : > { %v2302_v21 = vmax.f32 %v2299_v7, %v1275_v5  ;;  %v804_v5 = vsub.f32 %v2257_v32, %v2260_v33 }
 0x369   : > { %v642_v36 = vadd.f32 %v640_v6, %v2171_v18 }
 0x36a   : > { %v797_v9 = vpop.xlane.xlu1 %796  ;;  %1364 = vst.msk [vmem:[#allocation2 + $0x8] sm:$0xff] %vm837_vm7, %v2302_v21  ;;  %v1279_v16 = vsub.f32 %v2299_v7, %v2302_v21  ;;  %v807_v6 = vmul.f32 1.442695, %v804_v5 }
 0x36b   : > { %644 = vst.msk [vmem:[#allocation4] sm:$0xff] %vm535_vm0, %v642_v36  ;;  %v801_v10 = vmax.f32 %v793_v8, %v797_v9 }
 0x36d   : > { %v803_v12 = vsub.f32 %v793_v8, %v801_v10  ;;  %888 = vst.msk [vmem:[#allocation2] sm:$0xff] %vm837_vm7, %v801_v10 }
 0x36f   : > { %v805_v14 = vmul.f32 1.442695, %v803_v12 }
 0x371   : > { %1890 = vpow2.f32 %v805_v14  ;;  %v2314_v30 = vld [vmem:[#allocation2 + $0x8] sm:$0xff] }
 0x372   : > { %v1153_v11 = vpop.xlane.xlu1 %1152 }
 0x373   : > { %v735_v15 = vpop.f32.mrf.mxu3 }
 0x374   : > { %v914_v25 = vld [vmem:[#allocation2] sm:$0xff]  ;;  %756 = vrot.lane.b32.xlu1 %v735_v15, %s1975_s26 }
 0x375   : > { %v922_v18 = vmax.f32 %v914_v25, %v2232_v61 }
 0x377   : > { %1009 = vst.msk [vmem:[#allocation2] sm:$0xff] %vm958_vm8, %v922_v18  ;;  %v924_v17 = vsub.f32 %v914_v25, %v922_v18  ;;  %v2316_v26 = vpop.eup %1890 }
 0x379   : > { %v926_v23 = vmul.f32 1.442695, %v924_v17 }
 0x37a   : > { %v1391_v22 = vpop.xlane.xlu1 %1390 }
 0x37b   : > { %v2319_v13 = vmax.f32 %v2314_v30, %v1391_v22  ;;  %v737_v39 = vpop.f32.mrf.mxu3  ;;  %1892 = vpow2.f32 %v926_v23  ;;  %v1053_v23 = vmul.f32 1.442695, %v1050_v47 }
 0x37c   : > { %758 = vrot.lane.b32.xlu2 %v737_v39, %s1975_s26  ;;  %865 = vperm.xlu1 %1849, %v2316_v26  }
 0x37d   : > { %v1395_v61 = vsub.f32 %v2314_v30, %v2319_v13  ;;  %1480 = vst.msk [vmem:[#allocation2 + $0x8] sm:$0xff] %vm958_vm8, %v2319_v13 }
 0x37e   : > { %v2327_v27 = vld [vmem:[#allocation2] sm:$0xff] }
 0x37f   : > { %v2330_v44 = vmax.f32 %v2327_v27, %v1043_v41  ;;  %v1398_v7 = vmul.f32 1.442695, %v1395_v61 }
 0x381   : > { %1125 = vst.msk [vmem:[#allocation2] sm:$0xff] %vm601_vm3, %v2330_v44  ;;  %1057 = vperm.xlu0 %1846, %v2330_v44   ;;  %v1049_v49 = vsub.f32 %v2327_v27, %v2330_v44  ;;  %v2337_v52 = vpop.eup %1892 }
 0x384   : > { %811 = vperm.xlu2 %1847, %v801_v10   ;;  %1851 = vset.pattern.permute.xlu1 %v1976_v53 }
 0x385   : > { %986 = vperm.xlu1 %1851, %v2337_v52  }
 0x388   : > { %v1149_v54 = vld [vmem:[#allocation2] sm:$0xff] }
 0x389   : > { %v1157_v62 = vmax.f32 %v1149_v54, %v1153_v11  ;;  %1858 = vset.pattern.permute.xlu0 %v1976_v53  ;;  %v741_v11 = vld [vmem:[#allocation4 + $0x8] sm:$0xff] }
 0x38a   : > { %1407 = vperm.xlu0 %1858, %v2319_v13   ;;  %v753_v15 = vmul.f32 %v2271_v40, %v741_v11  ;;  %v740_v40 = vld [vmem:[#allocation4] sm:$0xff] }
 0x38b   : > { %v1159_v41 = vsub.f32 %v1149_v54, %v1157_v62  ;;  %1247 = vst.msk [vmem:[#allocation2] sm:$0xff] %vm716_vm4, %v1157_v62  ;;  %v752_v39 = vmul.f32 %v2190_v37, %v740_v40 }
 0x38c   : > { %816 = vperm.xlu2 %1847, %v2260_v33   ;;  %v925_v33 = vsub.f32 %v2264_v34, %v2267_v38  ;;  %v1785_v34 = vld [vmem:[%s1666_s29 + $0x10] sm:$0xf] }
 0x38d   : > { %v1161_v2 = vmul.f32 1.442695, %v1159_v41  ;;  %1852 = vset.pattern.permute.xlu1 %v1970_v20  ;;  %v1091_v42 = vsel %vm1089_vm10, %v1785_v34, 0 }
 0x38e   : > { %1062 = vperm.xlu1 %1852, %v2278_v46   ;;  %1100 = vmatpush.bf16.msra.mxu3 %v1091_v42 }
 0x38f   : > { %1894 = vpow2.f32 %v1161_v2 }
 0x390   : > { %1896 = vpow2.f32 %v807_v6 }
 0x392   : > { %v2347_v63 = vld [vmem:[#allocation2] sm:$0xff]  ;;  %1860 = vset.pattern.permute.xlu0 %v1972_v56 }
 0x393   : > { %v2352_v1 = vmax.f32 %v2347_v63, %v2287_v57  ;;  %v1160_v57 = vsub.f32 %v2289_v59, %v2293_v60 }
 0x394   : > { %1848 = vset.pattern.permute.xlu2 %v1976_v53 }
 0x395   : > { %v2355_v3 = vpop.eup %1894  ;;  %1363 = vst.msk [vmem:[#allocation2] sm:$0xff] %vm837_vm7, %v2352_v1  ;;  %932 = vperm.xlu2 %1848, %v922_v18   ;;  %v1278_v4 = vsub.f32 %v2347_v63, %v2352_v1  ;;  %v1163_v9 = vmul.f32 1.442695, %v1160_v57 }
 0x396   : > { %1856 = vset.pattern.permute.xlu1 %v1974_v48  ;;  %1225 = vperm.xlu0 %1860, %v2355_v3   ;;  %v2384_v59 = vpop.eup %1896 }
 0x397   : > { %1291 = vperm.xlu1 %1856, %v2302_v21   ;;  %1898 = vpow2.f32 %v1163_v9 }
 0x39c   : > { %v2368_v36 = vld [vmem:[#allocation2] sm:$0xff] }
 0x39d   : > { %937 = vperm.xlu2 %1848, %v2267_v38   ;;  %v2373_v8 = vmax.f32 %v2368_v36, %v2273_v31  ;;  %v928_v31 = vmul.f32 1.442695, %v925_v33  ;;  %v2388_v10 = vpop.eup %1898  ;;  %v1197_v38 = vunpack.c.l.b16 %v1785_v34 }
 0x39e   : > { %1862 = vset.pattern.permute.xlu0 %v1974_v48 }
 0x39f   : > { %1857 = vset.pattern.permute.xlu1 %v1976_v53  ;;  %v1394_v32 = vsub.f32 %v2368_v36, %v2373_v8  ;;  %1479 = vst.msk [vmem:[#allocation2] sm:$0xff] %vm958_vm8, %v2373_v8  ;;  %1900 = vpow2.f32 %v928_v31  ;;  %v1198_v14 = vpack.c.b16 %v1197_v38, %v1197_v38 }
 0x3a0   : > { %1402 = vperm.xlu1 %1857, %v2373_v8  }
 0x3a5   : > { %1850 = vset.pattern.permute.xlu2 %v1974_v48  ;;  %v2392_v12 = vpop.eup %1900 }
 0x3a6   : > { %870 = vperm.xlu2 %1850, %v2384_v59  }
 0x3a8   : > { %1861 = vset.pattern.permute.xlu1 %v1972_v56 }
 0x3a9   : > { %1230 = vperm.xlu1 %1861, %v2388_v10  }
 0x3ae   : > { %1853 = vset.pattern.permute.xlu2 %v1976_v53 }
 0x3af   : > { %991 = vperm.xlu2 %1853, %v2392_v12  }
 0x3b1   : > { %1864 = vset.pattern.permute.xlu1 %v1976_v53 }
 0x3b7   : > { %1854 = vset.pattern.permute.xlu2 %v1972_v56 }
 0x3b8   : > { %1167 = vperm.xlu2 %1854, %v1157_v62  }
 0x3c0   : > { %1172 = vperm.xlu2 %1854, %v2293_v60   ;;  %v1051_v60 = vmul.f32 1.442695, %v1049_v49 }
 0x3c2   : > { %1902 = vpow2.f32 %v1051_v60 }
 0x3c3   : > { %1904 = vpow2.f32 %v1053_v23 }
 0x3c8   : > { %1199 = vrot.lane.b32.xlu2 %v1198_v14, %s1966_s8  ;;  %v2420_v2 = vpop.eup %1902 }
 0x3c9   : > { %1855 = vset.pattern.permute.xlu2 %v1974_v48  ;;  %v2428_v46 = vpop.eup %1904 }
 0x3d0   : > { %1286 = vperm.xlu2 %1855, %v2352_v1  }
 0x3d6   : > { %v759_v25 = vpop.permute.xlu2 %758 }
 0x3d7   : > { %v763_v18 = vadd.f32 %v759_v25, %v753_v15 }
 0x3d8   : > { %1315 = vrot.lane.b32.xlu2 %v1198_v14, %s1967_s9  ;;  %s498_s9 = scalar_lea.vmem %s2583_s6, %s2035_s25 }
 0x3d9   : > { %766 = vst.msk [vmem:[#allocation4 + $0x8] sm:$0xff] %vm764_vm9, %v763_v18  ;;  %1859 = vset.pattern.permute.xlu2 %v1970_v20 }
 0x3de   : > { %v812_v17 = vpop.permute.xlu2 %811 }
 0x3df   : > { %v819_v22 = vsub.f32 %v2188_v35, %v812_v17 }
 0x3e0   : > { %1431 = vrot.lane.b32.xlu2 %v1198_v14, %s1969_s10  ;;  %v862_v13 = vld [vmem:[#allocation4 + $0x8] sm:$0xff] }
 0x3e1   : > { %v821_v54 = vmul.f32 1.442695, %v819_v22 }
 0x3e3   : > { %1906 = vpow2.f32 %v821_v54 }
 0x3e6   : > { %v757_v62 = vpop.permute.xlu1 %756  ;;  %v817_v41 = vpop.permute.xlu2 %816 }
 0x3e7   : > { %v762_v27 = vadd.f32 %v757_v62, %v752_v39  ;;  %v820_v44 = vsub.f32 %v2197_v43, %v817_v41 }
 0x3e8   : > { %1111 = vperm.xlu2 %1859, %v2420_v2  }
 0x3e9   : > { %765 = vst.msk [vmem:[#allocation4] sm:$0xff] %vm764_vm9, %v762_v27  ;;  %v823_v35 = vmul.f32 1.442695, %v820_v44  ;;  %v1907_v49 = vpop.eup %1906 }
 0x3ea   : > { %v829_v44 = vsel %vm558_vm2, %v1907_v49, 0.0 }
 0x3eb   : > { %1908 = vpow2.f32 %v823_v35 }
 0x3ee   : > { %v2426_v37 = vpop.permute.xlu1 %865 }
 0x3ef   : > { %v933_v47 = vpop.permute.xlu2 %932 }
 0x3f0   : > { %1116 = vperm.xlu2 %1859, %v2428_v46   ;;  %v940_v6 = vsub.f32 %v2173_v19, %v933_v47  ;;  %v861_v36 = vld [vmem:[#allocation4] sm:$0xff] }
 0x3f1   : > { %v1909_v43 = vpop.eup %1908 }
 0x3f2   : > { %v832_v5 = vsel %vm558_vm2, %v1909_v43, 0.0  ;;  %v840_v57 = vpack.c.bf16 %v1909_v43, %v1907_v49  ;;  %v942_v33 = vmul.f32 1.442695, %v940_v6 }
 0x3f3   : > { %833 = vadd.xlane.f32.xlu1 %v832_v5  ;;  %v1058_v9 = vpop.permute.xlu0 %1057 }
 0x3f4   : > { %1781 = vmatmul.msk.bf16.vlgmr.msrb.gmra.mxu3 %vm558_vm2, %v840_v57  ;;  %v1065_v14 = vsub.f32 %v2211_v51, %v1058_v9  ;;  %1910 = vpow2.f32 %v942_v33 }
 0x3f6   : > { %v1067_v15 = vmul.f32 1.442695, %v1065_v14 }
 0x3f7   : > { %v2434_v31 = vpop.permute.xlu1 %986  ;;  %v938_v34 = vpop.permute.xlu2 %937 }
 0x3f8   : > { %v941_v38 = vsub.f32 %v2184_v28, %v938_v34  ;;  %1863 = vset.pattern.permute.xlu2 %v1974_v48 }
 0x3fa   : > { %v944_v11 = vmul.f32 1.442695, %v941_v38  ;;  %v1911_v18 = vpop.eup %1910 }
 0x3fb   : > { %v950_v57 = vsel %vm558_vm2, %v1911_v18, 0.0 }
 0x3fc   : > { %1912 = vpow2.f32 %v944_v11 }
 0x3fd   : > { %1914 = vpow2.f32 %v1067_v15 }
 0x400   : > { %v2439_v25 = vpop.permute.xlu2 %870  ;;  %v1063_v19 = vpop.permute.xlu1 %1062 }
 0x401   : > { %v1066_v60 = vsub.f32 %v2208_v50, %v1063_v19  ;;  %v1408_v19 = vpop.permute.xlu0 %1407  ;;  %v874_v61 = vmul.f32 %v2439_v25, %v862_v13 }
 0x402   : > { %v1913_v17 = vpop.eup %1912 }
 0x403   : > { %v1069_v22 = vmul.f32 1.442695, %v1066_v60  ;;  %v953_v40 = vsel %vm558_vm2, %v1913_v17, 0.0  ;;  %v961_v28 = vpack.c.bf16 %v1913_v17, %v1911_v18  ;;  %v1915_v51 = vpop.eup %1914 }
 0x404   : > { %954 = vadd.xlane.f32.xlu1 %v953_v40  ;;  %v1075_v54 = vsel %vm535_vm0, %v1915_v51, 0.0 }
 0x405   : > { %1916 = vpow2.f32 %v1069_v22  ;;  %1783 = vmatmul.msk.bf16.vlgmr.msrb.gmra.mxu2 %vm558_vm2, %v961_v28 }
 0x409   : > { %v2444_v23 = vpop.permute.xlu2 %991  ;;  %v1292_v5 = vpop.permute.xlu1 %1291 }
 0x40a   : > { %v1295_v49 = vsub.f32 %v2222_v58, %v1292_v5  ;;  %v1411_v58 = vsub.f32 %v2253_v24, %v1408_v19 }
 0x40b   : > { %v1917_v39 = vpop.eup %1916 }
 0x40c   : > { %v1085_v62 = vpack.c.bf16 %v1917_v39, %v1915_v51  ;;  %1076 = vadd.xlane.f32.xlu1 %v1075_v54  ;;  %v1078_v50 = vsel %vm535_vm0, %v1917_v39, 0.0  ;;  %v1298_v11 = vmul.f32 1.442695, %v1295_v49  ;;  %v1414_v40 = vmul.f32 1.442695, %v1411_v58  ;;  %v2481_v49 = vpop.permute.xlu0 %1225 }
 0x40d   : > { %1079 = vadd.xlane.f32.xlu0 %v1078_v50 }
 0x40e   : > { %1787 = vmatmul.msk.bf16.vlgmr.msra.gmra.mxu3 %vm535_vm0, %v1085_v62 }
 0x412   : > { %v1168_v41 = vpop.permute.xlu2 %1167  ;;  %v1403_v14 = vpop.permute.xlu1 %1402 }
 0x413   : > { %v1175_v27 = vsub.f32 %v2195_v29, %v1168_v41  ;;  %v1410_v60 = vsub.f32 %v2235_v0, %v1403_v14 }
 0x415   : > { %v1177_v35 = vmul.f32 1.442695, %v1175_v27  ;;  %v1412_v22 = vmul.f32 1.442695, %v1410_v60 }
 0x417   : > { %1918 = vpow2.f32 %v1177_v35  ;;  %v826_v35 = vld [vmem:[#allocation3 + $0x8] sm:$0xff] }
 0x419   : > { %830 = vadd.xlane.f32.xlu2 %v829_v44 }
 0x41a   : > { %v1173_v42 = vpop.permute.xlu2 %1172 }
 0x41b   : > { %v1176_v47 = vsub.f32 %v2201_v45, %v1173_v42  ;;  %v2472_v44 = vpop.permute.xlu1 %1230  ;;  %v828_v42 = vmul.f32 %v2384_v59, %v826_v35 }
 0x41d   : > { %v1179_v43 = vmul.f32 1.442695, %v1176_v47  ;;  %v1919_v33 = vpop.eup %1918 }
 0x41e   : > { %v1185_v45 = vsel %vm535_vm0, %v1919_v33, 0.0 }
 0x41f   : > { %1920 = vpow2.f32 %v1179_v43 }
 0x420   : > { %1922 = vpow2.f32 %v1298_v11 }
 0x421   : > { %951 = vadd.xlane.f32.xlu2 %v950_v57 }
 0x422   : > { %v1200_v6 = vpop.permute.xlu2 %1199 }
 0x423   : > { %v1205_v9 = vsel %vm1089_vm10, %v1200_v6, 0 }
 0x424   : > { %1214 = vmatpush.bf16.msra.mxu2 %v1205_v9 }
 0x425   : > { %v1921_v29 = vpop.eup %1920 }
 0x426   : > { %v1195_v34 = vpack.c.bf16 %v1921_v29, %v1919_v33  ;;  %v1188_v38 = vsel %vm535_vm0, %v1921_v29, 0.0  ;;  %v2462_v39 = vpop.eup %1922 }
 0x427   : > { %1189 = vadd.xlane.f32.xlu1 %v1188_v38 }
 0x428   : > { %1789 = vmatmul.msk.bf16.vlgmr.msra.gmra.mxu2 %vm535_vm0, %v1195_v34 }
 0x429   : > { %1186 = vadd.xlane.f32.xlu2 %v1185_v45 }
 0x42a   : > { %v1287_v15 = vpop.permute.xlu2 %1286 }
 0x42b   : > { %v1294_v18 = vsub.f32 %v2217_v55, %v1287_v15  ;;  %v825_v15 = vld [vmem:[#allocation3] sm:$0xff] }
 0x42c   : > { %v827_v19 = vmul.f32 %v2316_v26, %v825_v15 }
 0x42d   : > { %v1296_v17 = vmul.f32 1.442695, %v1294_v18 }
 0x42f   : > { %1924 = vpow2.f32 %v1296_v17 }
 0x430   : > { %1926 = vpow2.f32 %v1412_v22 }
 0x431   : > { %1928 = vpow2.f32 %v1414_v40 }
 0x432   : > { %v1316_v28 = vpop.permute.xlu2 %1315 }
 0x433   : > { %v1321_v51 = vsel %vm1089_vm10, %v1316_v28, 0 }
 0x434   : > { %1330 = vmatpush.bf16.msrb.mxu3 %v1321_v51 }
 0x435   : > { %v1925_v54 = vpop.eup %1924 }
 0x436   : > { %v1314_v55 = vpack.c.bf16 %v2462_v39, %v1925_v54  ;;  %v1304_v0 = vsel %vm535_vm0, %v1925_v54, 0.0  ;;  %v2467_v24 = vpop.eup %1926 }
 0x437   : > { %1305 = vadd.xlane.f32.xlu1 %v1304_v0  ;;  %v1929_v41 = vpop.eup %1928 }
 0x438   : > { %1791 = vmatmul.msk.bf16.vlgmr.msrb.gmra.mxu3 %vm535_vm0, %v1314_v55  ;;  %v1430_v27 = vpack.c.bf16 %v1929_v41, %v2467_v24 }
 0x43a   : > { %v1432_v62 = vpop.permute.xlu2 %1431 }
 0x43b   : > { %v1437_v50 = vsel %vm1089_vm10, %v1432_v62, 0 }
 0x43c   : > { %1446 = vmatpush.bf16.msrb.mxu2 %v1437_v50 }
 0x43f   : > { %1793 = vmatmul.msk.bf16.vlgmr.msrb.gmra.mxu2 %vm535_vm0, %v1430_v27  ;;  %v1307_v27 = vsel %vm535_vm0, %v2462_v39, 0.0  ;;  %v1420_v39 = vsel %vm535_vm0, %v2467_v24, 0.0  ;;  %v1282_v24 = vmul.f32 1.442695, %v1279_v16 }
 0x442   : > { %v2478_v29 = vpop.permute.xlu2 %1111 }
 0x466   : > { %v834_v47 = vpop.xlane.xlu1 %833 }
 0x467   : > { %v836_v43 = vadd.f32 %v834_v47, %v828_v42  ;;  %v1280_v42 = vmul.f32 1.442695, %v1278_v4 }
 0x469   : > { %839 = vst.msk [vmem:[#allocation3 + $0x8] sm:$0xff] %vm837_vm7, %v836_v43  ;;  %v1423_v43 = vsel %vm535_vm0, %v1929_v41, 0.0  ;;  %1930 = vpow2.f32 %v1280_v42  ;;  %v1396_v41 = vmul.f32 1.442695, %v1394_v32  ;;  %v873_v32 = vmul.f32 %v2426_v37, %v861_v36 }
 0x46a   : > { %1932 = vpow2.f32 %v1282_v24 }
 0x46b   : > { %1934 = vpow2.f32 %v1396_v41 }
 0x46c   : > { %1936 = vpow2.f32 %v1398_v7 }
 0x470   : > { %v947_v5 = vld [vmem:[#allocation3 + $0x8] sm:$0xff] }
 0x471   : > { %v949_v57 = vmul.f32 %v2392_v12, %v947_v5  ;;  %v2485_v12 = vpop.permute.xlu2 %1116  ;;  %v1931_v5 = vpop.eup %1930 }
 0x477   : > { %v856_v6 = vpop.f32.mrf.mxu3  ;;  %v955_v9 = vpop.xlane.xlu1 %954 }
 0x478   : > { %v957_v33 = vadd.f32 %v955_v9, %v949_v57  ;;  %877 = vrot.lane.b32.xlu0 %v856_v6, %s1977_s21 }
 0x47a   : > { %960 = vst.msk [vmem:[#allocation3 + $0x8] sm:$0xff] %vm958_vm8, %v957_v33 }
 0x47f   : > { %v858_v59 = vpop.f32.mrf.mxu3 }
 0x480   : > { %879 = vrot.lane.b32.xlu0 %v858_v59, %s1977_s21  ;;  %v1080_v45 = vpop.xlane.xlu0 %1079 }
 0x481   : > { %v1072_v34 = vld [vmem:[#allocation3 + $0x8] sm:$0xff] }
 0x482   : > { %v1074_v38 = vmul.f32 %v2428_v46, %v1072_v34  ;;  %v1077_v46 = vpop.xlane.xlu1 %1076  ;;  %v1933_v34 = vpop.eup %1932 }
 0x484   : > { %v1082_v14 = vadd.f32 %v1080_v45, %v1074_v38  ;;  %v1935_v38 = vpop.eup %1934 }
 0x485   : > { %v1937_v8 = vpop.eup %1936 }
 0x486   : > { %1084 = vst.msk [vmem:[#allocation3 + $0x8] sm:$0xff] %vm601_vm3, %v1082_v14 }
 0x488   : > { %v977_v11 = vpop.f32.mrf.mxu2 }
 0x489   : > { %998 = vrot.lane.b32.xlu1 %v977_v11, %s1978_s30 }
 0x48c   : > { %v831_v18 = vpop.xlane.xlu2 %830 }
 0x48d   : > { %v835_v60 = vadd.f32 %v831_v18, %v827_v19  ;;  %v1182_v22 = vld [vmem:[#allocation3 + $0x8] sm:$0xff] }
 0x48e   : > { %v1184_v54 = vmul.f32 %v2388_v10, %v1182_v22 }
 0x48f   : > { %838 = vst.msk [vmem:[#allocation3] sm:$0xff] %vm837_vm7, %v835_v60 }
 0x490   : > { %v979_v17 = vpop.f32.mrf.mxu2 }
 0x491   : > { %1000 = vrot.lane.b32.xlu2 %v979_v17, %s1978_s30  ;;  %v1102_v63 = vpop.f32.mrf.mxu3 }
 0x494   : > { %v952_v28 = vpop.xlane.xlu2 %951 }
 0x496   : > { %v946_v58 = vld [vmem:[#allocation3] sm:$0xff] }
 0x497   : > { %v948_v40 = vmul.f32 %v2337_v52, %v946_v58 }
 0x499   : > { %v956_v51 = vadd.f32 %v952_v28, %v948_v40  ;;  %v1104_v4 = vpop.f32.mrf.mxu3 }
 0x49a   : > { %v1190_v55 = vpop.xlane.xlu1 %1189 }
 0x49b   : > { %959 = vst.msk [vmem:[#allocation3] sm:$0xff] %vm958_vm8, %v956_v51  ;;  %v1192_v26 = vadd.f32 %v1190_v55, %v1184_v54 }
 0x49c   : > { %v1187_v10 = vpop.xlane.xlu2 %1186 }
 0x49d   : > { %1194 = vst.msk [vmem:[#allocation3 + $0x8] sm:$0xff] %vm716_vm4, %v1192_v26 }
 0x4a2   : > { %v1071_v0 = vld [vmem:[#allocation3] sm:$0xff] }
 0x4a3   : > { %v1073_v62 = vmul.f32 %v2420_v2, %v1071_v0 }
 0x4a4   : > { %v1301_v51 = vld [vmem:[#allocation3 + $0x8] sm:$0xff] }
 0x4a5   : > { %v1081_v50 = vadd.f32 %v1077_v46, %v1073_v62 }
 0x4a7   : > { %1083 = vst.msk [vmem:[#allocation3] sm:$0xff] %vm601_vm3, %v1081_v50 }
 0x4aa   : > { %1308 = vadd.xlane.f32.xlu0 %v1307_v27  ;;  %v1306_v6 = vpop.xlane.xlu1 %1305 }
 0x4ab   : > { %v1216_v2 = vpop.f32.mrf.mxu2 }
 0x4ae   : > { %v1181_v52 = vld [vmem:[#allocation3] sm:$0xff] }
 0x4af   : > { %v1183_v35 = vmul.f32 %v2355_v3, %v1181_v52 }
 0x4b1   : > { %v1191_v47 = vadd.f32 %v1187_v10, %v1183_v35 }
 0x4b3   : > { %1193 = vst.msk [vmem:[#allocation3] sm:$0xff] %vm716_vm4, %v1191_v47  ;;  %1424 = vadd.xlane.f32.xlu1 %v1423_v43  ;;  %v1218_v33 = vpop.f32.mrf.mxu2 }
 0x4ba   : > { %v1300_v57 = vld [vmem:[#allocation3] sm:$0xff]  ;;  %1421 = vadd.xlane.f32.xlu2 %v1420_v39 }
 0x4bb   : > { %v1302_v3 = vmul.f32 %v1931_v5, %v1300_v57  ;;  %v1332_v59 = vpop.f32.mrf.mxu3 }
 0x4bd   : > { %v1310_v9 = vadd.f32 %v1306_v6, %v1302_v3 }
 0x4be   : > { %1341 = vperm.xlu0 %1862, %v1931_v5  }
 0x4bf   : > { %1312 = vst.msk [vmem:[#allocation3] sm:$0xff] %vm837_vm7, %v1310_v9 }
 0x4c2   : > { %v1448_v1 = vpop.f32.mrf.mxu2 }
 0x4c3   : > { %v1334_v21 = vpop.f32.mrf.mxu3 }
 0x4c6   : > { %1469 = vrot.lane.b32.xlu0 %v1448_v1, %s1978_s30  ;;  %v1416_v50 = vld [vmem:[#allocation3] sm:$0xff] }
 0x4c7   : > { %1867 = vset.pattern.permute.xlu0 %v1970_v20  ;;  %v1418_v27 = vmul.f32 %v1935_v38, %v1416_v50 }
 0x4ca   : > { %v1450_v16 = vpop.f32.mrf.mxu2 }
 0x4cc   : > { %1239 = vrot.lane.b32.xlu1 %v1218_v33, %s1975_s26 }
 0x4d2   : > { %1237 = vrot.lane.b32.xlu2 %v1216_v2, %s1975_s26 }
 0x4d4   : > { %1353 = vrot.lane.b32.xlu1 %v1332_v59, %s1977_s21 }
 0x4da   : > { %1346 = vperm.xlu2 %1863, %v1933_v34  }
 0x4dc   : > { %1457 = vperm.xlu1 %1864, %v1935_v38  }
 0x4e2   : > { %1355 = vrot.lane.b32.xlu2 %v1334_v21, %s1977_s21 }
 0x4e3   : > { %1865 = vset.pattern.permute.xlu2 %v1976_v53 }
 0x4e4   : > { %1471 = vrot.lane.b32.xlu1 %v1450_v16, %s1978_s30 }
 0x4e5   : > { %1868 = vset.pattern.permute.xlu1 %v1972_v56 }
 0x4ea   : > { %1462 = vperm.xlu2 %1865, %v1937_v8   ;;  %v878_v45 = vpop.permute.xlu0 %877 }
 0x4eb   : > { %v883_v30 = vadd.f32 %v878_v45, %v873_v32  ;;  %v1001_v46 = vpop.permute.xlu2 %1000 }
 0x4ed   : > { %886 = vst.msk [vmem:[#allocation4] sm:$0xff] %vm885_vm11, %v883_v30 }
 0x4f2   : > { %v880_v14 = vpop.permute.xlu0 %879  ;;  %1866 = vset.pattern.permute.xlu2 %v1970_v20 }
 0x4f3   : > { %v884_v11 = vadd.f32 %v880_v14, %v874_v61 }
 0x4f4   : > { %v982_v15 = vld [vmem:[#allocation4] sm:$0xff] }
 0x4f5   : > { %887 = vst.msk [vmem:[#allocation4 + $0x8] sm:$0xff] %vm885_vm11, %v884_v11  ;;  %v994_v19 = vmul.f32 %v2434_v31, %v982_v15 }
 0x4fb   : > { %v999_v37 = vpop.permute.xlu1 %998 }
 0x4fc   : > { %v983_v18 = vld [vmem:[#allocation4 + $0x8] sm:$0xff]  ;;  %v1004_v60 = vadd.f32 %v999_v37, %v994_v19 }
 0x4fd   : > { %v995_v17 = vmul.f32 %v2444_v23, %v983_v18  ;;  %v1303_v23 = vmul.f32 %v1933_v34, %v1301_v51 }
 0x4fe   : > { %1007 = vst.msk [vmem:[#allocation4] sm:$0xff] %vm1006_vm12, %v1004_v60 }
 0x4ff   : > { %v1005_v58 = vadd.f32 %v1001_v46, %v995_v17 }
 0x501   : > { %1008 = vst.msk [vmem:[#allocation4 + $0x8] sm:$0xff] %vm1006_vm12, %v1005_v58 }
 0x505   : > { %v1107_v25 = vld [vmem:[#allocation4] sm:$0xff] }
 0x506   : > { %v1119_v20 = vmul.f32 %v2478_v29, %v1107_v25 }
 0x508   : > { %v1121_v22 = vadd.f32 %v1119_v20, %v1102_v63  ;;  %v1108_v40 = vld [vmem:[#allocation4 + $0x8] sm:$0xff] }
 0x509   : > { %v1120_v28 = vmul.f32 %v2485_v12, %v1108_v40 }
 0x50a   : > { %1123 = vst.msk [vmem:[#allocation4] sm:$0xff] %vm535_vm0, %v1121_v22 }
 0x50b   : > { %v1122_v31 = vadd.f32 %v1120_v28, %v1104_v4 }
 0x50d   : > { %1124 = vst.msk [vmem:[#allocation4 + $0x8] sm:$0xff] %vm535_vm0, %v1122_v31 }
 0x511   : > { %v1221_v35 = vld [vmem:[#allocation4] sm:$0xff] }
 0x512   : > { %v1233_v42 = vmul.f32 %v2481_v49, %v1221_v35 }
 0x514   : > { %v1222_v5 = vld [vmem:[#allocation4 + $0x8] sm:$0xff] }
 0x515   : > { %v1234_v57 = vmul.f32 %v2472_v44, %v1222_v5 }
 0x51d   : > { %v1309_v54 = vpop.xlane.xlu0 %1308 }
 0x51e   : > { %v1311_v55 = vadd.f32 %v1309_v54, %v1303_v23 }
 0x520   : > { %1313 = vst.msk [vmem:[#allocation3 + $0x8] sm:$0xff] %vm837_vm7, %v1311_v55 }
 0x526   : > { %v1425_v62 = vpop.xlane.xlu1 %1424 }
 0x527   : > { %v1417_v26 = vld [vmem:[#allocation3 + $0x8] sm:$0xff] }
 0x528   : > { %v1419_v0 = vmul.f32 %v1937_v8, %v1417_v26 }
 0x52a   : > { %v1427_v29 = vadd.f32 %v1425_v62, %v1419_v0 }
 0x52c   : > { %1429 = vst.msk [vmem:[#allocation3 + $0x8] sm:$0xff] %vm958_vm8, %v1427_v29 }
 0x52d   : > { %v1422_v12 = vpop.xlane.xlu2 %1421 }
 0x52e   : > { %v1426_v52 = vadd.f32 %v1422_v12, %v1418_v27 }
 0x530   : > { %1428 = vst.msk [vmem:[#allocation3] sm:$0xff] %vm958_vm8, %v1426_v52  ;;  %v1342_v63 = vpop.permute.xlu0 %1341 }
 0x533   : > { %v1482_v10 = vld [vmem:[#allocation3 + $0x8] sm:$0xff] }
 0x534   : > { %1938 = vrcp.f32 %v1482_v10 }
 0x535   : > { %v1238_v47 = vpop.permute.xlu2 %1237 }
 0x536   : > { %v1243_v43 = vadd.f32 %v1238_v47, %v1233_v42 }
 0x537   : > { %v1481_v2 = vld [vmem:[#allocation3] sm:$0xff] }
 0x538   : > { %1245 = vst.msk [vmem:[#allocation4] sm:$0xff] %vm764_vm9, %v1243_v43  ;;  %1940 = vrcp.f32 %v1481_v2 }
 0x53a   : > { %v1939_v39 = vpop.eup %1938 }
 0x53b   : > { %1494 = vperm.xlu0 %1867, %v1939_v39  }
 0x53d   : > { %v1347_v33 = vpop.permute.xlu2 %1346 }
 0x53e   : > { %v1941_v3 = vpop.eup %1940  ;;  %v1240_v6 = vpop.permute.xlu1 %1239 }
 0x53f   : > { %v1244_v9 = vadd.f32 %v1240_v6, %v1234_v57  ;;  %1489 = vperm.xlu2 %1866, %v1941_v3   ;;  %1504 = vperm.xlu1 %1868, %v1941_v3   ;;  %v1337_v49 = vld [vmem:[#allocation4] sm:$0xff] }
 0x540   : > { %v1349_v1 = vmul.f32 %v1342_v63, %v1337_v49 }
 0x541   : > { %1246 = vst.msk [vmem:[#allocation4 + $0x8] sm:$0xff] %vm764_vm9, %v1244_v9 }
 0x543   : > { %1872 = vset.pattern.permute.xlu0 %v1976_v53 }
 0x544   : > { %1532 = vperm.xlu0 %1872, %v1941_v3  }
 0x545   : > { %v1356_v59 = vpop.permute.xlu2 %1355 }
 0x546   : > { %v1354_v4 = vpop.permute.xlu1 %1353 }
 0x547   : > { %v1359_v24 = vadd.f32 %v1354_v4, %v1349_v1  ;;  %1869 = vset.pattern.permute.xlu2 %v1972_v56  ;;  %1870 = vset.pattern.permute.xlu1 %v1974_v48  ;;  %v1470_v56 = vpop.permute.xlu0 %1469 }
 0x548   : > { %v1338_v44 = vld [vmem:[#allocation4 + $0x8] sm:$0xff]  ;;  %1518 = vperm.xlu1 %1870, %v1941_v3   ;;  %1508 = vperm.xlu2 %1869, %v1939_v39  }
 0x549   : > { %v1350_v41 = vmul.f32 %v1347_v33, %v1338_v44  ;;  %1361 = vst.msk [vmem:[#allocation4] sm:$0xff] %vm885_vm11, %v1359_v24 }
 0x54b   : > { %v1360_v34 = vadd.f32 %v1356_v59, %v1350_v41 }
 0x54d   : > { %1362 = vst.msk [vmem:[#allocation4 + $0x8] sm:$0xff] %vm885_vm11, %v1360_v34  ;;  %v1463_v36 = vpop.permute.xlu2 %1462 }
 0x54e   : > { %v1458_v38 = vpop.permute.xlu1 %1457 }
 0x550   : > { %v1453_v7 = vld [vmem:[#allocation4] sm:$0xff]  ;;  %1873 = vset.pattern.permute.xlu1 %v1976_v53  ;;  %1871 = vset.pattern.permute.xlu2 %v1974_v48 }
 0x551   : > { %v1465_v21 = vmul.f32 %v1458_v38, %v1453_v7  ;;  %1536 = vperm.xlu1 %1873, %v1939_v39   ;;  %1522 = vperm.xlu2 %1871, %v1939_v39  }
 0x553   : > { %v1475_v16 = vadd.f32 %v1470_v56, %v1465_v21 }
 0x554   : > { %v1454_v8 = vld [vmem:[#allocation4 + $0x8] sm:$0xff] }
 0x555   : > { %v1466_v32 = vmul.f32 %v1463_v36, %v1454_v8  ;;  %1477 = vst.msk [vmem:[#allocation4] sm:$0xff] %vm1006_vm12, %v1475_v16 }
 0x556   : > { %v1472_v45 = vpop.permute.xlu1 %1471 }
 0x557   : > { %v1476_v30 = vadd.f32 %v1472_v45, %v1466_v32 }
 0x559   : > { %1478 = vst.msk [vmem:[#allocation4 + $0x8] sm:$0xff] %vm1006_vm12, %v1476_v30 }
 0x55c   : > { %v1485_v61 = vld [vmem:[#allocation4] sm:$0xff] }
 0x560   : > { %v1486_v48 = vld [vmem:[#allocation4 + $0x8] sm:$0xff] }
 0x599   : > { %v1490_v13 = vpop.permute.xlu2 %1489 }
 0x59a   : > { %v1497_v14 = vmul.f32 %v1490_v13, %v1485_v61 }
 0x59c   : > { %1499 = vst.msk [vmem:[#allocation4] sm:$0xff] %vm535_vm0, %v1497_v14 }
 0x5a2   : > { %v1509_v18 = vpop.permute.xlu2 %1508 }
 0x5a3   : > { %v1501_v19 = vld [vmem:[#allocation4] sm:$0xff] }
 0x5ab   : > { %v1523_v20 = vpop.permute.xlu2 %1522 }
 0x5ad   : > { %v1495_v53 = vpop.permute.xlu0 %1494 }
 0x5ae   : > { %v1498_v11 = vmul.f32 %v1495_v53, %v1486_v48 }
 0x5b0   : > { %1500 = vst.msk [vmem:[#allocation4 + $0x8] sm:$0xff] %vm535_vm0, %v1498_v11 }
 0x5b1   : > { %v1505_v15 = vpop.permute.xlu1 %1504 }
 0x5b2   : > { %v1511_v37 = vmul.f32 %v1505_v15, %v1501_v19 }
 0x5b4   : > { %1513 = vst.msk [vmem:[#allocation4] sm:$0xff] %vm764_vm9, %v1511_v37 }
 0x5b6   : > { %v1533_v28 = vpop.permute.xlu0 %1532 }
 0x5b7   : > { %v1502_v60 = vld [vmem:[#allocation4 + $0x8] sm:$0xff] }
 0x5b8   : > { %v1512_v17 = vmul.f32 %v1509_v18, %v1502_v60 }
 0x5ba   : > { %1514 = vst.msk [vmem:[#allocation4 + $0x8] sm:$0xff] %vm764_vm9, %v1512_v17  ;;  %v1519_v46 = vpop.permute.xlu1 %1518 }
 0x5bb   : > { %v1515_v58 = vld [vmem:[#allocation4] sm:$0xff] }
 0x5bc   : > { %v1525_v25 = vmul.f32 %v1519_v46, %v1515_v58 }
 0x5be   : > { %1527 = vst.msk [vmem:[#allocation4] sm:$0xff] %vm885_vm11, %v1525_v25 }
 0x5c1   : > { %v1516_v22 = vld [vmem:[#allocation4 + $0x8] sm:$0xff] }
 0x5c2   : > { %v1526_v40 = vmul.f32 %v1523_v20, %v1516_v22 }
 0x5c3   : > { %v1537_v23 = vpop.permute.xlu1 %1536 }
 0x5c4   : > { %1528 = vst.msk [vmem:[#allocation4 + $0x8] sm:$0xff] %vm885_vm11, %v1526_v40 }
 0x5c5   : > { %v1529_v31 = vld [vmem:[#allocation4] sm:$0xff] }
 0x5c6   : > { %v1539_v51 = vmul.f32 %v1533_v28, %v1529_v31 }
 0x5c8   : > { %1541 = vst.msk [vmem:[#allocation4] sm:$0xff] %vm1006_vm12, %v1539_v51 }
 0x5cb   : > { %v1530_v54 = vld [vmem:[#allocation4 + $0x8] sm:$0xff] }
 0x5cc   : > { %v1540_v55 = vmul.f32 %v1537_v23, %v1530_v54 }
 0x5ce   : > { %1542 = vst.msk [vmem:[#allocation4 + $0x8] sm:$0xff] %vm1006_vm12, %v1540_v55 }
 0x5cf   : > { %v1543_v26 = vld [vmem:[#allocation4] sm:$0xff] }
 0x5d0   : > { %v1545_v0 = vpack.c.bf16 %v1543_v26, %v1543_v26 }
 0x5d2   : > { %1548 = vst.msk [vmem:[%s498_s9] sm:$0xf] %vm1547_vm13, %v1545_v0 }
 0x5d5   : > { %v1544_v62 = vld [vmem:[#allocation4 + $0x8] sm:$0xff] }
 0x5d6   : > { %v1546_v50 = vpack.c.bf16 %v1544_v62, %v1544_v62 }
 0x5d8   : > { %1549 = vst.msk [vmem:[%s498_s9 + $0x4] sm:$0xf] %vm1547_vm13, %v1546_v50 }
 0x5d9 PF: > { %s16_s23 = sadd.s32 1, %s1964_s23   ;;  %s2584_s21 = smov %s1960_s22 }
 0x5da   : > { %p13_p5 = scmp.ge.s32.totalorder %s16_s23, 4   ;;  %s2585_s22 = smov %s2587_s24 }
 0x5dc   :  { %15 = sbr.rel (!%p13_p5) target bundleno = 2 (0x2), region = 97 }

// kernel: mm_double_stream_block_audio.20
= control target key start
LH: loop header
LB: loop body
LE: loop exit
PB: predicated region body
PF: predicated region fallthrough
CT: control target
= control target key end

     0   :  { %s1385_s20 = smov 0   ;;  %s1387_s21 = smov 0   ;;  %s1705_s0 = inlined_call_operand.vmem [shape: bf16[3,2,16,32], index: 0, kind: input, shape index: {}]   ;;  %s1706_s1 = inlined_call_operand.vmem [shape: bf16[3,2,8,32], index: 1, kind: input, shape index: {}, may-alias: {1,2}]   ;;  %s1707_s2 = inlined_call_operand.vmem [shape: bf16[3,2,8,32], index: 2, kind: input, shape index: {}, may-alias: {1,2}]   ;;  %s1708_s3 = inlined_call_operand.vmem [shape: f32[2,16,32], index: 3, kind: input, shape index: {}, may-alias: {3,5}]   ;;  %s1709_s4 = inlined_call_operand.<no memory space> [shape: f32[1], index: 4, kind: input, shape index: {}]   ;;  %s1710_s5 = inlined_call_operand.vmem [shape: f32[2,16,32], index: 5, kind: output, shape index: {}, may-alias: {3,5}]  }
   0x1   :  { %10 = sst [smem:[#allocation5]] %s1709_s4  ;;  %s1389_s22 = smov 0  }
   0x2 LB: > { %s42_s4 = sadd.s32 1, %s1334_s21  ;;  %p1193_p0 = scmp.ge.s32.totalorder %s1338_s22, 1  ;;  %s1338_s22 = sphi %s1389_s22, %s16_s22   ;;  %s1334_s21 = sphi %s1387_s21, %s1712_s21   ;;  %s1330_s20 = sphi %s1385_s20, %s1711_s20  }
   0x3   : > { %p44_p1 = scmp.ge.s32.totalorder %s42_s4, 2  ;;  %p292_p2 = scmp.lt.s32.totalorder %s1338_s22, 3 }
   0x5   : > { %s1714_s4 = smov (%p44_p1, %s42_s4), 0  ;;  %p293_p3 = pnand %p1193_p0, %p292_p2 }
   0x6   : > { %p369_p4 = scmp.lt.s32.totalorder (!%p293_p3), %s1330_s20, 1  ;;  %s1340_s6 = smov (!%p293_p3), 120  }
   0x7   : > { %296 = sbr.rel (%p293_p3) target bundleno = 1241 (0x4d9), region = 40  ;;  %s1342_s7 = smov (!%p293_p3), 112  }
   0x8   : > { %s1345_s8 = smov (!%p293_p3), 104   ;;  %s1349_s12 = smov (!%p293_p3), 8  }
   0x9   : > { %s1350_s13 = smov (!%p293_p3), 16   ;;  %s1351_s14 = smov (!%p293_p3), 24  }
   0xa   : > { %s1011_s15 = sld [smem:[#allocation5]] (!%p293_p3) }
   0xc   : > { %s1716_s20 = smov (!%p369_p4, %s1330_s20), 1  ;;  %vm457_vm0 = vcmask 64512   ;;  %vm434_vm1 = vcmask 31744   ;;  %v1341_v14 = vmov -inf   ;;  %v1343_v19 = vmov 0  }
   0xd   : > { %s1214_s23 = sshll.u32 %s1716_s20, 3  ;;  %s1196_s24 = sshll.u32 %s1716_s20, 2  ;;  %435 = vst.msk [vmem:[#allocation2] sm:$0xff] %vm434_vm1, %v1341_v14  ;;  %1257 = vset.pattern.permute.xlu1 %v1343_v19  ;;  %1258 = vset.pattern.permute.xlu2 %v1343_v19  ;;  %v1344_v20 = vmov 0.0   ;;  %vm522_vm2 = vcmask 7168   ;;  %vm529_vm3 = vcmask 1043456  }
   0xe   : > { %s379_s27 = scalar_lea.vmem %s1705_s0, %s1214_s23  ;;  %s1109_s30 = scalar_lea.vmem %s1706_s1, %s1196_s24  ;;  %436 = vst.msk [vmem:[#allocation2 + $0x8] sm:$0xff] %vm434_vm1, %v1341_v14  ;;  %vm638_vm4 = vcmask 15368   ;;  %vm764_vm5 = vcmask 23568   ;;  %vm887_vm6 = vcmask 31768   ;;  %vm439_vm7 = vcmask 261120  }
   0xf   : > { %v1218_v0 = vld [vmem:[%s379_s27] sm:$0xff]   ;;  %v1202_v1 = vld [vmem:[%s1109_s30 + $0x8] sm:$0xf]  ;;  %437 = vst.msk [vmem:[#allocation3] sm:$0xff] %vm434_vm1, %v1344_v20  ;;  %s1114_s11 = scalar_lea.vmem %s1707_s2, %s1196_s24  ;;  %vm691_vm8 = vcmask 130112   ;;  %vm814_vm9 = vcmask 195712  }
  0x10   : > { %v462_v2 = vsel %vm457_vm0, %v1202_v1, 0  ;;  %v1219_v3 = vunpack.c.l.bf16 %v1218_v0  ;;  %v1220_v4 = vunpack.c.h.bf16 %v1218_v0  ;;  %v570_v12 = vunpack.c.l.b16 %v1202_v1  ;;  %438 = vst.msk [vmem:[#allocation3 + $0x8] sm:$0xff] %vm434_vm1, %v1344_v20  ;;  %v1203_v31 = vld [vmem:[%s1114_s11 + $0x10] sm:$0xf]  ;;  %s1215_s16 = sshll.u32 %s1716_s20, 4 }
  0x11   : > { %471 = vmatpush.bf16.xpose.msra.mxu0 %v462_v2  ;;  %v531_v32 = vsel %vm529_vm3, %v1203_v31, 0  ;;  %v643_v63 = vunpack.c.l.b16 %v1203_v31  ;;  %v1346_v1 = vmov 1   ;;  %440 = vst.msk [vmem:[#allocation4] sm:$0xff] %vm439_vm7, %v1344_v20  ;;  %vm937_vm10 = vcmask 261312   ;;  %s414_s19 = scalar_lea.vmem %s1708_s3, %s1215_s16  ;;  %s427_s25 = scalar_lea.vmem %s1710_s5, %s1215_s16 }
  0x12   : > { %v446_v5 = vmul.f32 0.35355338, %v1219_v3  ;;  %v447_v6 = vmul.f32 0.35355338, %v1220_v4  ;;  %v571_v13 = vpack.c.b16 %v570_v12, %v570_v12  ;;  %540 = vmatpush.bf16.msra.mxu1 %v531_v32  ;;  %1259 = vset.pattern.permute.xlu0 %v1346_v1  ;;  %441 = vst.msk [vmem:[#allocation4 + $0x8] sm:$0xff] %vm439_vm7, %v1344_v20 }
  0x13   : > { %v644_v0 = vpack.c.b16 %v643_v63, %v643_v63 }
  0x14   : > { %v448_v7 = vpack.c.bf16 %v446_v5, %v446_v5  ;;  %v449_v8 = vpack.c.bf16 %v447_v6, %v447_v6  ;;  %572 = vrot.lane.b32.xlu1 %v571_v13, %s1340_s6  ;;  %v1429_v21 = vld [vmem:[#allocation2] sm:$0xff]  ;;  %v1347_v5 = vmov 2  }
  0x15   : > { %v1439_v25 = vld [vmem:[#allocation2 + $0x8] sm:$0xff] }
  0x16   : > { %v454_v9 = vunpack.c.l.b16 %v448_v7  ;;  %v455_v10 = vunpack.c.l.b16 %v449_v8 }
  0x18   : > { %v456_v11 = vpack.c.b16 %v455_v10, %v454_v9 }
  0x1a   : > { %1204 = vmatmul.msk.bf16.vlgmr.msra.gmra.mxu0 %vm457_vm0, %v456_v11 }
  0x86   : > { %v573_v29 = vpop.permute.xlu1 %572 }
  0x87   : > { %v578_v30 = vsel %vm457_vm0, %v573_v29, 0 }
  0x88   : > { %587 = vmatpush.bf16.xpose.msra.mxu2 %v578_v30 }
  0x97   : > { %v473_v15 = vpop.f32.mrf.mxu0 }
  0x98   : > { %v480_v16 = vsel %vm457_vm0, %v473_v15, -inf }
  0x99   : > { %481 = vmax.xlane.f32.xlu0 %v480_v16 }
  0x9f   : > { %v475_v17 = vpop.f32.mrf.mxu0 }
  0xa0   : > { %v483_v18 = vsel %vm457_vm0, %v475_v17, -inf }
  0xa1   : > { %484 = vmax.xlane.f32.xlu0 %v483_v18 }
  0xb5   : > { %698 = vrot.lane.b32.xlu0 %v571_v13, %s1342_s7 }
 0x10c   : > { %v482_v22 = vpop.xlane.xlu0 %481 }
 0x10d   : > { %v1432_v23 = vmax.f32 %v1429_v21, %v482_v22 }
 0x10f   : > { %v488_v24 = vsub.f32 %v1429_v21, %v1432_v23  ;;  %565 = vst.msk [vmem:[#allocation2] sm:$0xff] %vm522_vm2, %v1432_v23  ;;  %496 = vperm.xlu1 %1257, %v1432_v23  }
 0x114   : > { %v485_v26 = vpop.xlane.xlu0 %484 }
 0x115   : > { %v1442_v27 = vmax.f32 %v1439_v25, %v485_v26 }
 0x116   : > { %v1503_v2 = vld [vmem:[#allocation2] sm:$0xff] }
 0x117   : > { %v489_v28 = vsub.f32 %v1439_v25, %v1442_v27  ;;  %566 = vst.msk [vmem:[#allocation2 + $0x8] sm:$0xff] %vm522_vm2, %v1442_v27  ;;  %501 = vperm.xlu2 %1258, %v1442_v27   ;;  %696 = vrot.lane.b32.xlu1 %v456_v11, %s1342_s7 }
 0x118   : > { %1262 = vset.pattern.permute.xlu1 %v1347_v5 }
 0x119   : > { %v492_v21 = vmul.f32 1.442695, %v489_v28 }
 0x11e   : > { %v1514_v8 = vld [vmem:[#allocation2 + $0x8] sm:$0xff] }
 0x11f   : > { %567 = vrot.lane.b32.xlu2 %v456_v11, %s1340_s6  ;;  %819 = vrot.lane.b32.xlu1 %v456_v11, %s1345_s8  ;;  %v1348_v11 = vmov 3  }
 0x120   : > { %1260 = vset.pattern.permute.xlu2 %v1346_v1 }
 0x127   : > { %821 = vrot.lane.b32.xlu2 %v571_v13, %s1345_s8  ;;  %v699_v33 = vpop.permute.xlu0 %698 }
 0x128   : > { %v704_v34 = vsel %vm457_vm0, %v699_v33, 0 }
 0x129   : > { %713 = vmatpush.bf16.xpose.msrb.mxu1 %v704_v34  ;;  %v490_v34 = vmul.f32 1.442695, %v488_v24 }
 0x171   : > { %v502_v35 = vpop.permute.xlu2 %501 }
 0x172   : > { %v505_v37 = vsub.f32 %v475_v17, %v502_v35 }
 0x174   : > { %v508_v38 = vmul.f32 1.442695, %v505_v37 }
 0x176   : > { %1280 = vpow2.f32 %v508_v38 }
 0x179   : > { %v568_v36 = vpop.permute.xlu2 %567 }
 0x17a   : > { %1206 = vmatmul.msk.bf16.vlgmr.msra.gmra.mxu2 %vm457_vm0, %v568_v36 }
 0x17c   : > { %v1463_v45 = vpop.eup %1280 }
 0x17d   : > { %v517_v37 = vsel %vm457_vm0, %v1463_v45, 0.0 }
 0x181   : > { %v497_v39 = vpop.permute.xlu1 %496  ;;  %v822_v40 = vpop.permute.xlu2 %821 }
 0x182   : > { %v504_v41 = vsub.f32 %v473_v15, %v497_v39  ;;  %v827_v42 = vsel %vm457_vm0, %v822_v40, 0 }
 0x183   : > { %836 = vmatpush.bf16.xpose.msrb.mxu0 %v827_v42 }
 0x184   : > { %v506_v43 = vmul.f32 1.442695, %v504_v41 }
 0x186   : > { %1282 = vpow2.f32 %v506_v43 }
 0x187   : > { %1284 = vpow2.f32 %v490_v34  ;;  %v547_v34 = vld [vmem:[#allocation4] sm:$0xff] }
 0x188   : > { %1286 = vpow2.f32 %v492_v21 }
 0x189   : > { %v697_v44 = vpop.permute.xlu1 %696 }
 0x18c   : > { %v1465_v46 = vpop.eup %1282 }
 0x18d   : > { %v525_v47 = vpack.c.bf16 %v1463_v45, %v1465_v46  ;;  %v1577_v23 = vpop.eup %1284  ;;  %v514_v25 = vsel %vm457_vm0, %v1465_v46, 0.0 }
 0x18e   : > { %v1581_v24 = vpop.eup %1286 }
 0x18f   : > { %1205 = vmatmul.msk.bf16.vlgmr.msra.gmra.mxu1 %vm457_vm0, %v525_v47 }
 0x191   : > { %v820_v48 = vpop.permute.xlu1 %819 }
 0x192   : > { %1210 = vmatmul.msk.bf16.vlgmr.msrb.gmra.mxu0 %vm457_vm0, %v820_v48 }
 0x19f   : > { %1208 = vmatmul.msk.bf16.vlgmr.msrb.gmra.mxu1 %vm457_vm0, %v697_v44 }
 0x1fd   : > { %v1472_v49 = vpop.f32.mrf.mxu2 }
 0x1fe   : > { %v596_v50 = vsel %vm457_vm0, %v1472_v49, -inf }
 0x1ff   : > { %597 = vmax.xlane.f32.xlu2 %v596_v50 }
 0x205   : > { %v1476_v51 = vpop.f32.mrf.mxu2 }
 0x206   : > { %v599_v52 = vsel %vm457_vm0, %v1476_v51, -inf }
 0x207   : > { %600 = vmax.xlane.f32.xlu1 %v599_v52 }
 0x20c   : > { %v1480_v53 = vpop.f32.mrf.mxu1 }
 0x20f   : > { %v1482_v54 = vpop.f32.mrf.mxu0 }
 0x210   : > { %v845_v55 = vsel %vm457_vm0, %v1482_v54, -inf }
 0x211   : > { %846 = vmax.xlane.f32.xlu2 %v845_v55 }
 0x214   : > { %v1486_v56 = vpop.f32.mrf.mxu1 }
 0x217   : > { %v1488_v57 = vpop.f32.mrf.mxu0 }
 0x218   : > { %v848_v58 = vsel %vm457_vm0, %v1488_v57, -inf }
 0x219   : > { %849 = vmax.xlane.f32.xlu1 %v848_v58 }
 0x21c   : > { %v1492_v59 = vpop.f32.mrf.mxu1 }
 0x21d   : > { %v722_v60 = vsel %vm457_vm0, %v1492_v59, -inf }
 0x21e   : > { %723 = vmax.xlane.f32.xlu0 %v722_v60 }
 0x224   : > { %v1496_v61 = vpop.f32.mrf.mxu1 }
 0x225   : > { %v725_v62 = vsel %vm457_vm0, %v1496_v61, -inf }
 0x226   : > { %726 = vmax.xlane.f32.xlu2 %v725_v62 }
 0x232   : > { %645 = vrot.lane.b32.xlu1 %v644_v0, %s1340_s6 }
 0x272   : > { %v598_v3 = vpop.xlane.xlu2 %597 }
 0x273   : > { %v1506_v4 = vmax.f32 %v1503_v2, %v598_v3 }
 0x275   : > { %v604_v6 = vsub.f32 %v1503_v2, %v1506_v4  ;;  %694 = vst.msk [vmem:[#allocation2] sm:$0xff] %vm638_vm4, %v1506_v4  ;;  %612 = vperm.xlu0 %1259, %v1506_v4  }
 0x277   : > { %v606_v40 = vmul.f32 1.442695, %v604_v6 }
 0x27a   : > { %v601_v7 = vpop.xlane.xlu1 %600 }
 0x27b   : > { %v1517_v9 = vmax.f32 %v1514_v8, %v601_v7 }
 0x27c   : > { %v1526_v13 = vld [vmem:[#allocation2] sm:$0xff] }
 0x27d   : > { %v605_v10 = vsub.f32 %v1514_v8, %v1517_v9  ;;  %695 = vst.msk [vmem:[#allocation2 + $0x8] sm:$0xff] %vm638_vm4, %v1517_v9  ;;  %617 = vperm.xlu2 %1260, %v1517_v9   ;;  %1264 = vset.pattern.permute.xlu0 %v1348_v11 }
 0x27f   : > { %v608_v55 = vmul.f32 1.442695, %v605_v10 }
 0x284   : > { %v847_v12 = vpop.xlane.xlu2 %846  ;;  %v1536_v17 = vld [vmem:[#allocation2 + $0x8] sm:$0xff] }
 0x285   : > { %1261 = vset.pattern.permute.xlu2 %v1347_v5 }
 0x28c   : > { %v850_v32 = vpop.xlane.xlu1 %849 }
 0x291   : > { %v724_v14 = vpop.xlane.xlu0 %723 }
 0x292   : > { %v1529_v15 = vmax.f32 %v1526_v13, %v724_v14 }
 0x294   : > { %v730_v16 = vsub.f32 %v1526_v13, %v1529_v15  ;;  %817 = vst.msk [vmem:[#allocation2] sm:$0xff] %vm764_vm5, %v1529_v15  ;;  %738 = vperm.xlu2 %1261, %v1529_v15  }
 0x299   : > { %v727_v18 = vpop.xlane.xlu2 %726 }
 0x29a   : > { %v1539_v22 = vmax.f32 %v1536_v17, %v727_v18 }
 0x29b   : > { %v1541_v26 = vld [vmem:[#allocation2] sm:$0xff] }
 0x29c   : > { %v731_v29 = vsub.f32 %v1536_v17, %v1539_v22  ;;  %818 = vst.msk [vmem:[#allocation2 + $0x8] sm:$0xff] %vm764_vm5, %v1539_v22  ;;  %768 = vrot.lane.b32.xlu2 %v644_v0, %s1342_s7  ;;  %743 = vperm.xlu1 %1262, %v1539_v22   ;;  %v1550_v30 = vmax.f32 %v1541_v26, %v847_v12 }
 0x29d   : > { %1266 = vset.pattern.permute.xlu2 %v1346_v1 }
 0x29e   : > { %v853_v31 = vsub.f32 %v1541_v26, %v1550_v30  ;;  %940 = vst.msk [vmem:[#allocation2] sm:$0xff] %vm887_vm6, %v1550_v30 }
 0x2a0   : > { %v855_v13 = vmul.f32 1.442695, %v853_v31 }
 0x2a3   : > { %v1557_v33 = vld [vmem:[#allocation2 + $0x8] sm:$0xff] }
 0x2a4   : > { %v1563_v35 = vmax.f32 %v1557_v33, %v850_v32  ;;  %891 = vrot.lane.b32.xlu2 %v644_v0, %s1345_s8  ;;  %1263 = vset.pattern.permute.xlu1 %v1348_v11  ;;  %v646_v27 = vpop.permute.xlu1 %645 }
 0x2a5   : > { %861 = vperm.xlu1 %1263, %v1550_v30   ;;  %v651_v28 = vsel %vm529_vm3, %v646_v27, 0 }
 0x2a6   : > { %v854_v36 = vsub.f32 %v1557_v33, %v1563_v35  ;;  %941 = vst.msk [vmem:[#allocation2 + $0x8] sm:$0xff] %vm887_vm6, %v1563_v35  ;;  %866 = vperm.xlu0 %1264, %v1563_v35   ;;  %660 = vmatpush.bf16.msra.mxu3 %v651_v28  ;;  %v548_v28 = vld [vmem:[#allocation4 + $0x8] sm:$0xff] }
 0x2a8   : > { %v857_v26 = vmul.f32 1.442695, %v854_v36 }
 0x2ad   : > { %1267 = vset.pattern.permute.xlu1 %v1346_v1 }
 0x2ae   : > { %1265 = vset.pattern.permute.xlu0 %v1343_v19 }
 0x2af   : > { %551 = vperm.xlu0 %1265, %v1577_v23  }
 0x2b7   : > { %556 = vperm.xlu0 %1265, %v1581_v24  }
 0x2bf   : > { %1269 = vset.pattern.permute.xlu0 %v1347_v5 }
 0x2cd   : > { %518 = vadd.xlane.f32.xlu2 %v517_v37 }
 0x2cf   : > { %515 = vadd.xlane.f32.xlu1 %v514_v25 }
 0x2d7   : > { %v618_v38 = vpop.permute.xlu2 %617 }
 0x2d8   : > { %v621_v39 = vsub.f32 %v1476_v51, %v618_v38 }
 0x2da   : > { %v624_v41 = vmul.f32 1.442695, %v621_v39 }
 0x2dc   : > { %1288 = vpow2.f32 %v624_v41  ;;  %v734_v41 = vmul.f32 1.442695, %v731_v29 }
 0x2dd   : > { %1290 = vpow2.f32 %v606_v40 }
 0x2e2   : > { %v1289_v42 = vpop.eup %1288 }
 0x2e3   : > { %v633_v43 = vsel %vm457_vm0, %v1289_v42, 0.0  ;;  %v1592_v44 = vpop.eup %1290 }
 0x2e4   : > { %634 = vadd.xlane.f32.xlu1 %v633_v43  ;;  %v510_v43 = vld [vmem:[#allocation3] sm:$0xff] }
 0x2e5   : > { %671 = vperm.xlu2 %1266, %v1592_v44  }
 0x2e7   : > { %v613_v45 = vpop.permute.xlu0 %612 }
 0x2e8   : > { %v620_v46 = vsub.f32 %v1472_v49, %v613_v45 }
 0x2ea   : > { %v622_v47 = vmul.f32 1.442695, %v620_v46 }
 0x2ec   : > { %1292 = vpow2.f32 %v622_v47 }
 0x2ee   : > { %v739_v48 = vpop.permute.xlu2 %738 }
 0x2ef   : > { %v746_v50 = vsub.f32 %v1492_v59, %v739_v48 }
 0x2f1   : > { %v748_v51 = vmul.f32 1.442695, %v746_v50 }
 0x2f2   : > { %v1293_v52 = vpop.eup %1292 }
 0x2f3   : > { %1294 = vpow2.f32 %v748_v51  ;;  %v630_v58 = vsel %vm457_vm0, %v1293_v52, 0.0  ;;  %v641_v60 = vpack.c.bf16 %v1289_v42, %v1293_v52  ;;  %v511_v42 = vld [vmem:[#allocation3 + $0x8] sm:$0xff] }
 0x2f4   : > { %631 = vadd.xlane.f32.xlu0 %v630_v58  ;;  %1296 = vpow2.f32 %v608_v55  ;;  %v513_v45 = vmul.f32 %v1581_v24, %v511_v42  ;;  %v732_v55 = vmul.f32 1.442695, %v730_v16 }
 0x2f5   : > { %1207 = vmatmul.msk.bf16.vlgmr.msra.gmra.mxu3 %vm457_vm0, %v641_v60 }
 0x2f6   : > { %v769_v49 = vpop.permute.xlu2 %768 }
 0x2f7   : > { %v774_v62 = vsel %vm529_vm3, %v769_v49, 0 }
 0x2f8   : > { %783 = vmatpush.bf16.msrb.mxu3 %v774_v62 }
 0x2f9   : > { %v1295_v63 = vpop.eup %1294 }
 0x2fa   : > { %v756_v59 = vsel %vm457_vm0, %v1295_v63, 0.0  ;;  %v1297_v0 = vpop.eup %1296 }
 0x2fc   : > { %757 = vadd.xlane.f32.xlu0 %v756_v59 }
 0x2fd   : > { %676 = vperm.xlu1 %1267, %v1297_v0  }
 0x2fe   : > { %v892_v2 = vpop.permute.xlu2 %891 }
 0x2ff   : > { %v897_v3 = vsel %vm529_vm3, %v892_v2, 0 }
 0x300   : > { %906 = vmatpush.bf16.msrb.mxu2 %v897_v3 }
 0x305   : > { %1268 = vset.pattern.permute.xlu1 %v1347_v5 }
 0x30e   : > { %v744_v4 = vpop.permute.xlu1 %743 }
 0x30f   : > { %v747_v6 = vsub.f32 %v1496_v61, %v744_v4 }
 0x311   : > { %v750_v7 = vmul.f32 1.442695, %v747_v6 }
 0x313   : > { %1298 = vpow2.f32 %v750_v7 }
 0x317   : > { %v862_v8 = vpop.permute.xlu1 %861 }
 0x318   : > { %v869_v9 = vsub.f32 %v1482_v54, %v862_v8  ;;  %v867_v10 = vpop.permute.xlu0 %866 }
 0x319   : > { %v1612_v12 = vpop.eup %1298  ;;  %v870_v20 = vsub.f32 %v1488_v57, %v867_v10 }
 0x31a   : > { %v871_v14 = vmul.f32 1.442695, %v869_v9  ;;  %v767_v18 = vpack.c.bf16 %v1612_v12, %v1295_v63  ;;  %v759_v7 = vsel %vm457_vm0, %v1612_v12, 0.0 }
 0x31b   : > { %v873_v32 = vmul.f32 1.442695, %v870_v20 }
 0x31c   : > { %1300 = vpow2.f32 %v871_v14  ;;  %1209 = vmatmul.msk.bf16.vlgmr.msrb.gmra.mxu3 %vm457_vm0, %v767_v18 }
 0x31d   : > { %1302 = vpow2.f32 %v873_v32 }
 0x31e   : > { %1304 = vpow2.f32 %v734_v41 }
 0x31f   : > { %1306 = vpow2.f32 %v732_v55 }
 0x320   : > { %1308 = vpow2.f32 %v855_v13 }
 0x321   : > { %v552_v61 = vpop.permute.xlu0 %551  ;;  %1310 = vpow2.f32 %v857_v26 }
 0x322   : > { %v1301_v21 = vpop.eup %1300  ;;  %v559_v37 = vmul.f32 %v552_v61, %v547_v34 }
 0x323   : > { %v1617_v25 = vpop.eup %1302  ;;  %v879_v54 = vsel %vm457_vm0, %v1301_v21, 0.0 }
 0x324   : > { %v561_v27 = vadd.f32 %v559_v37, %v1480_v53  ;;  %880 = vadd.xlane.f32.xlu0 %v879_v54  ;;  %v890_v57 = vpack.c.bf16 %v1617_v25, %v1301_v21  ;;  %v1629_v53 = vpop.eup %1304  ;;  %v882_v9 = vsel %vm457_vm0, %v1617_v25, 0.0 }
 0x325   : > { %v1307_v60 = vpop.eup %1306 }
 0x326   : > { %563 = vst.msk [vmem:[#allocation4] sm:$0xff] %vm457_vm0, %v561_v27  ;;  %1211 = vmatmul.msk.bf16.vlgmr.msrb.gmra.mxu2 %vm457_vm0, %v890_v57  ;;  %v1309_v16 = vpop.eup %1308 }
 0x327   : > { %v1311_v31 = vpop.eup %1310 }
 0x329   : > { %v557_v38 = vpop.permute.xlu0 %556 }
 0x32a   : > { %v560_v39 = vmul.f32 %v557_v38, %v548_v28 }
 0x32c   : > { %v562_v40 = vadd.f32 %v560_v39, %v1486_v56  ;;  %v512_v56 = vmul.f32 %v1577_v23, %v510_v43 }
 0x32d   : > { %v667_v12 = vld [vmem:[#allocation4] sm:$0xff] }
 0x32e   : > { %564 = vst.msk [vmem:[#allocation4 + $0x8] sm:$0xff] %vm457_vm0, %v562_v40 }
 0x335   : > { %v668_v34 = vld [vmem:[#allocation4 + $0x8] sm:$0xff] }
 0x338   : > { %799 = vperm.xlu0 %1269, %v1629_v53  }
 0x340   : > { %v519_v46 = vpop.xlane.xlu2 %518  ;;  %1271 = vset.pattern.permute.xlu0 %v1348_v11 }
 0x341   : > { %v521_v47 = vadd.f32 %v519_v46, %v513_v45 }
 0x342   : > { %v516_v48 = vpop.xlane.xlu1 %515 }
 0x343   : > { %524 = vst.msk [vmem:[#allocation3 + $0x8] sm:$0xff] %vm522_vm2, %v521_v47  ;;  %v520_v17 = vadd.f32 %v516_v48, %v512_v56 }
 0x345   : > { %523 = vst.msk [vmem:[#allocation3] sm:$0xff] %vm522_vm2, %v520_v17 }
 0x348   : > { %v672_v36 = vpop.permute.xlu2 %671 }
 0x349   : > { %v679_v20 = vmul.f32 %v672_v36, %v667_v12 }
 0x34a   : > { %v627_v22 = vld [vmem:[#allocation3 + $0x8] sm:$0xff] }
 0x34b   : > { %v629_v29 = vmul.f32 %v1297_v0, %v627_v22 }
 0x34c   : > { %v626_v52 = vld [vmem:[#allocation3] sm:$0xff] }
 0x34d   : > { %v628_v24 = vmul.f32 %v1592_v44, %v626_v52 }
 0x357   : > { %v635_v50 = vpop.xlane.xlu1 %634 }
 0x358   : > { %v637_v51 = vadd.f32 %v635_v50, %v629_v29 }
 0x35a   : > { %640 = vst.msk [vmem:[#allocation3 + $0x8] sm:$0xff] %vm638_vm4, %v637_v51 }
 0x361   : > { %v753_v25 = vld [vmem:[#allocation3 + $0x8] sm:$0xff] }
 0x362   : > { %v755_v27 = vmul.f32 %v1629_v53, %v753_v25 }
 0x367   : > { %v632_v23 = vpop.xlane.xlu0 %631 }
 0x368   : > { %v636_v58 = vadd.f32 %v632_v23, %v628_v24 }
 0x36a   : > { %639 = vst.msk [vmem:[#allocation3] sm:$0xff] %vm638_vm4, %v636_v58 }
 0x36f   : > { %v758_v63 = vpop.xlane.xlu0 %757  ;;  %v677_v32 = vpop.permute.xlu1 %676 }
 0x370   : > { %v680_v61 = vmul.f32 %v677_v32, %v668_v34 }
 0x371   : > { %v752_v49 = vld [vmem:[#allocation3] sm:$0xff] }
 0x372   : > { %v754_v62 = vmul.f32 %v1307_v60, %v752_v49 }
 0x374   : > { %v762_v59 = vadd.f32 %v758_v63, %v754_v62 }
 0x376   : > { %765 = vst.msk [vmem:[#allocation3] sm:$0xff] %vm764_vm5, %v762_v59 }
 0x378   : > { %v662_v0 = vpop.f32.mrf.mxu3 }
 0x379   : > { %683 = vrot.lane.b32.xlu2 %v662_v0, %s1349_s12 }
 0x37d   : > { %v875_v15 = vld [vmem:[#allocation3] sm:$0xff] }
 0x37e   : > { %v877_v2 = vmul.f32 %v1309_v16, %v875_v15 }
 0x380   : > { %v664_v44 = vpop.f32.mrf.mxu3 }
 0x381   : > { %685 = vrot.lane.b32.xlu1 %v664_v44, %s1349_s12 }
 0x389   : > { %794 = vperm.xlu1 %1268, %v1307_v60  }
 0x391   : > { %1270 = vset.pattern.permute.xlu1 %v1348_v11 }
 0x397   : > { %v881_v3 = vpop.xlane.xlu0 %880 }
 0x398   : > { %v885_v4 = vadd.f32 %v881_v3, %v877_v2 }
 0x39a   : > { %888 = vst.msk [vmem:[#allocation3] sm:$0xff] %vm887_vm6, %v885_v4 }
 0x39f   : > { %v785_v6 = vpop.f32.mrf.mxu3 }
 0x3a1   : > { %v945_v8 = vld [vmem:[#allocation3] sm:$0xff] }
 0x3a2   : > { %760 = vadd.xlane.f32.xlu2 %v759_v7  ;;  %1312 = vrcp.f32 %v945_v8 }
 0x3a7   : > { %v787_v30 = vpop.f32.mrf.mxu3 }
 0x3a8   : > { %808 = vrot.lane.b32.xlu0 %v787_v30, %s1350_s13  ;;  %v1656_v10 = vpop.eup %1312 }
 0x3a9   : > { %v908_v33 = vpop.f32.mrf.mxu2 }
 0x3aa   : > { %v800_v54 = vpop.permute.xlu0 %799 }
 0x3b0   : > { %922 = vperm.xlu0 %1271, %v1311_v31  }
 0x3b1   : > { %v910_v35 = vpop.f32.mrf.mxu2 }
 0x3b3   : > { %883 = vadd.xlane.f32.xlu1 %v882_v9 }
 0x3b8   : > { %1272 = vset.pattern.permute.xlu0 %v1343_v19 }
 0x3b9   : > { %953 = vperm.xlu0 %1272, %v1656_v10  }
 0x3ba   : > { %806 = vrot.lane.b32.xlu2 %v785_v6, %s1350_s13 }
 0x3c1   : > { %1276 = vset.pattern.permute.xlu0 %v1347_v5 }
 0x3c2   : > { %929 = vrot.lane.b32.xlu2 %v908_v33, %s1351_s14  ;;  %v1009_v33 = vld [vmem:[%s414_s19] sm:$0xff] }
 0x3ca   : > { %931 = vrot.lane.b32.xlu2 %v910_v35, %s1351_s14 }
 0x3cc   : > { %917 = vperm.xlu1 %1270, %v1309_v16  }
 0x3d2   : > { %968 = vperm.xlu2 %1266, %v1656_v10  }
 0x3d3   : > { %v684_v14 = vpop.permute.xlu2 %683 }
 0x3d4   : > { %v689_v18 = vadd.f32 %v684_v14, %v679_v20  ;;  %1273 = vset.pattern.permute.xlu1 %v1343_v19  ;;  %v1010_v14 = vld [vmem:[%s414_s19 + $0x8] sm:$0xff] }
 0x3d6   : > { %692 = vst.msk [vmem:[#allocation4] sm:$0xff] %vm691_vm8, %v689_v18 }
 0x3da   : > { %1275 = vset.pattern.permute.xlu2 %v1347_v5 }
 0x3db   : > { %982 = vperm.xlu2 %1275, %v1656_v10  }
 0x3dd   : > { %v790_v40 = vld [vmem:[#allocation4] sm:$0xff] }
 0x3e3   : > { %1278 = vset.pattern.permute.xlu2 %v1348_v11 }
 0x3f3   : > { %v686_v21 = vpop.permute.xlu1 %685 }
 0x3f4   : > { %v690_v37 = vadd.f32 %v686_v21, %v680_v61 }
 0x3f6   : > { %693 = vst.msk [vmem:[#allocation4 + $0x8] sm:$0xff] %vm691_vm8, %v690_v37 }
 0x3fb   : > { %v795_v5 = vpop.permute.xlu1 %794 }
 0x3fc   : > { %v802_v42 = vmul.f32 %v795_v5, %v790_v40 }
 0x3fd   : > { %v791_v28 = vld [vmem:[#allocation4 + $0x8] sm:$0xff] }
 0x3fe   : > { %v803_v38 = vmul.f32 %v800_v54, %v791_v28 }
 0x415   : > { %v761_v19 = vpop.xlane.xlu2 %760 }
 0x416   : > { %v763_v57 = vadd.f32 %v761_v19, %v755_v27 }
 0x418   : > { %766 = vst.msk [vmem:[#allocation3 + $0x8] sm:$0xff] %vm764_vm5, %v763_v57 }
 0x41a   : > { %v809_v39 = vpop.permute.xlu0 %808 }
 0x41b   : > { %v813_v41 = vadd.f32 %v809_v39, %v803_v38 }
 0x41d   : > { %816 = vst.msk [vmem:[#allocation4 + $0x8] sm:$0xff] %vm814_vm9, %v813_v41  ;;  %v807_v43 = vpop.permute.xlu2 %806 }
 0x41e   : > { %v812_v45 = vadd.f32 %v807_v43, %v802_v42 }
 0x41f   : > { %v876_v46 = vld [vmem:[#allocation3 + $0x8] sm:$0xff] }
 0x420   : > { %815 = vst.msk [vmem:[#allocation4] sm:$0xff] %vm814_vm9, %v812_v45  ;;  %v878_v47 = vmul.f32 %v1311_v31, %v876_v46 }
 0x422   : > { %v923_v22 = vpop.permute.xlu0 %922 }
 0x424   : > { %v914_v17 = vld [vmem:[#allocation4 + $0x8] sm:$0xff] }
 0x425   : > { %v930_v53 = vpop.permute.xlu2 %929  ;;  %v926_v29 = vmul.f32 %v923_v22, %v914_v17 }
 0x426   : > { %v884_v56 = vpop.xlane.xlu1 %883 }
 0x427   : > { %v886_v48 = vadd.f32 %v884_v56, %v878_v47  ;;  %v913_v23 = vld [vmem:[#allocation4] sm:$0xff] }
 0x429   : > { %889 = vst.msk [vmem:[#allocation3 + $0x8] sm:$0xff] %vm887_vm6, %v886_v48 }
 0x42b   : > { %v954_v49 = vpop.permute.xlu0 %953 }
 0x42d   : > { %v932_v50 = vpop.permute.xlu2 %931 }
 0x42e   : > { %v936_v51 = vadd.f32 %v932_v50, %v926_v29 }
 0x430   : > { %939 = vst.msk [vmem:[#allocation4 + $0x8] sm:$0xff] %vm937_vm10, %v936_v51  ;;  %v946_v52 = vld [vmem:[#allocation3 + $0x8] sm:$0xff] }
 0x431   : > { %1314 = vrcp.f32 %v946_v52 }
 0x435   : > { %v969_v59 = vpop.permute.xlu2 %968 }
 0x437   : > { %v1315_v24 = vpop.eup %1314  ;;  %v950_v2 = vld [vmem:[#allocation4 + $0x8] sm:$0xff] }
 0x438   : > { %1000 = vperm.xlu2 %1278, %v1315_v24   ;;  %986 = vperm.xlu0 %1276, %v1315_v24  }
 0x439   : > { %958 = vperm.xlu1 %1273, %v1315_v24  }
 0x43d   : > { %v983_v13 = vpop.permute.xlu2 %982 }
 0x43e   : > { %v918_v55 = vpop.permute.xlu1 %917 }
 0x43f   : > { %v925_v58 = vmul.f32 %v918_v55, %v913_v23 }
 0x440   : > { %1279 = vset.pattern.permute.xlu0 %v1348_v11 }
 0x441   : > { %v935_v60 = vadd.f32 %v930_v53, %v925_v58  ;;  %1274 = vset.pattern.permute.xlu1 %v1346_v1 }
 0x442   : > { %972 = vperm.xlu1 %1274, %v1315_v24  }
 0x443   : > { %938 = vst.msk [vmem:[#allocation4] sm:$0xff] %vm937_vm10, %v935_v60 }
 0x44a   : > { %v949_v62 = vld [vmem:[#allocation4] sm:$0xff]  ;;  %1277 = vset.pattern.permute.xlu1 %v1348_v11 }
 0x44b   : > { %v961_v63 = vmul.f32 %v954_v49, %v949_v62  ;;  %996 = vperm.xlu1 %1277, %v1656_v10   ;;  %v1012_v10 = vstv %s1011_s15 }
 0x44d   : > { %963 = vst.msk [vmem:[#allocation4] sm:$0xff] %vm457_vm0, %v961_v63 }
 0x454   : > { %v965_v0 = vld [vmem:[#allocation4] sm:$0xff] }
 0x455   : > { %v975_v44 = vmul.f32 %v969_v59, %v965_v0 }
 0x457   : > { %977 = vst.msk [vmem:[#allocation4] sm:$0xff] %vm691_vm8, %v975_v44 }
 0x45e   : > { %v979_v15 = vld [vmem:[#allocation4] sm:$0xff] }
 0x45f   : > { %v989_v1 = vmul.f32 %v983_v13, %v979_v15 }
 0x461   : > { %991 = vst.msk [vmem:[#allocation4] sm:$0xff] %vm814_vm9, %v989_v1 }
 0x468   : > { %v993_v26 = vld [vmem:[#allocation4] sm:$0xff] }
 0x492   : > { %v1001_v12 = vpop.permute.xlu2 %1000 }
 0x4aa   : > { %v987_v31 = vpop.permute.xlu0 %986 }
 0x4ab   : > { %v959_v16 = vpop.permute.xlu1 %958 }
 0x4ac   : > { %v962_v3 = vmul.f32 %v959_v16, %v950_v2 }
 0x4ae   : > { %964 = vst.msk [vmem:[#allocation4 + $0x8] sm:$0xff] %vm457_vm0, %v962_v3 }
 0x4b4   : > { %v973_v11 = vpop.permute.xlu1 %972 }
 0x4b5   : > { %v966_v4 = vld [vmem:[#allocation4 + $0x8] sm:$0xff] }
 0x4b6   : > { %v976_v6 = vmul.f32 %v973_v11, %v966_v4 }
 0x4b8   : > { %978 = vst.msk [vmem:[#allocation4 + $0x8] sm:$0xff] %vm691_vm8, %v976_v6 }
 0x4bd   : > { %v997_v7 = vpop.permute.xlu1 %996 }
 0x4be   : > { %v1003_v30 = vmul.f32 %v997_v7, %v993_v26 }
 0x4bf   : > { %v980_v8 = vld [vmem:[#allocation4 + $0x8] sm:$0xff] }
 0x4c0   : > { %v990_v9 = vmul.f32 %v987_v31, %v980_v8  ;;  %1005 = vst.msk [vmem:[#allocation4] sm:$0xff] %vm937_vm10, %v1003_v30 }
 0x4c2   : > { %992 = vst.msk [vmem:[#allocation4 + $0x8] sm:$0xff] %vm814_vm9, %v990_v9 }
 0x4c7   : > { %v1007_v35 = vld [vmem:[#allocation4] sm:$0xff] }
 0x4c8   : > { %v1013_v36 = vmul.f32 %v1012_v10, %v1007_v35 }
 0x4c9   : > { %v994_v20 = vld [vmem:[#allocation4 + $0x8] sm:$0xff] }
 0x4ca   : > { %v1004_v18 = vmul.f32 %v1001_v12, %v994_v20  ;;  %v1015_v32 = vadd.f32 %v1013_v36, %v1009_v33 }
 0x4cc   : > { %1006 = vst.msk [vmem:[#allocation4 + $0x8] sm:$0xff] %vm937_vm10, %v1004_v18 }
 0x4cd   : > { %1018 = vst.msk [vmem:[%s427_s25] sm:$0xff] %vm439_vm7, %v1015_v32 }
 0x4d3   : > { %v1008_v34 = vld [vmem:[#allocation4 + $0x8] sm:$0xff] }
 0x4d4   : > { %v1014_v61 = vmul.f32 %v1012_v10, %v1008_v34 }
 0x4d6   : > { %v1016_v21 = vadd.f32 %v1014_v61, %v1010_v14 }
 0x4d8   : > { %1019 = vst.msk [vmem:[%s427_s25 + $0x8] sm:$0xff] %vm439_vm7, %v1016_v21 }
 0x4d9 PF: > { %s16_s22 = sadd.s32 1, %s1338_s22   ;;  %s1711_s20 = smov %s1334_s21 }
 0x4da   : > { %p13_p5 = scmp.ge.s32.totalorder %s16_s22, 4   ;;  %s1712_s21 = smov %s1714_s4 }
 0x4dc   :  { %15 = sbr.rel (!%p13_p5) target bundleno = 2 (0x2), region = 87 }

// kernel: mm_double_stream_block_audio.21
= control target key start
LH: loop header
LB: loop body
LE: loop exit
PB: predicated region body
PF: predicated region fallthrough
CT: control target
= control target key end

     0   :  { %s718_s18 = smov 0   ;;  %s720_s19 = smov 0   ;;  %s785_s0 = inlined_call_operand.vmem [shape: bf16[2,16,32], index: 0, kind: input, shape index: {}]   ;;  %s786_s1 = inlined_call_operand.vmem [shape: f32[2,1,32], index: 1, kind: input, shape index: {}]   ;;  %s787_s2 = inlined_call_operand.vmem [shape: f32[2,1,32], index: 2, kind: input, shape index: {}]   ;;  %s788_s3 = inlined_call_operand.vmem [shape: bf16[32,128], index: 3, kind: input, shape index: {}]   ;;  %s789_s4 = inlined_call_operand.vmem [shape: f32[1,128], index: 4, kind: input, shape index: {}]   ;;  %s790_s5 = inlined_call_operand.vmem [shape: bf16[2,16,128], index: 5, kind: output, shape index: {}]  }
   0x1   :  { %s722_s20 = smov 0  }
   0x2 LB: > { %s34_s21 = sadd.s32 1, %s681_s19  ;;  %p601_p0 = scmp.ge.s32.totalorder %s685_s20, 1  ;;  %s685_s20 = sphi %s722_s20, %s15_s20   ;;  %s681_s19 = sphi %s720_s19, %s792_s19   ;;  %s677_s18 = sphi %s718_s18, %s791_s18  }
   0x3   : > { %p36_p1 = scmp.ge.s32.totalorder %s34_s21, 2  ;;  %p250_p2 = scmp.lt.s32.totalorder %s685_s20, 3 }
   0x5   : > { %s794_s21 = smov (%p36_p1, %s34_s21), 0  ;;  %p251_p3 = pnand %p601_p0, %p250_p2 }
   0x6   : > { %p303_p4 = scmp.lt.s32.totalorder (!%p251_p3), %s677_s18, 1 }
   0x7   : > { %254 = sbr.rel (%p251_p3) target bundleno = 435 (0x1b3), region = 40 }
   0xc   : > { %s796_s18 = smov (!%p303_p4, %s677_s18), 1  ;;  %vm345_vm0 = vcmask 261120   ;;  %v687_v5 = vmov 32.0   ;;  %v620_v22 = vld [vmem:[%s788_s3 + $0x8] sm:$0xff]  ;;  %v619_v24 = vld [vmem:[%s788_s3] sm:$0xff] }
   0xd   : > { %s617_s22 = sshll.u32 %s796_s18, 3  ;;  %657 = vrcp.f32 %v687_v5  ;;  %s314_s28 = scalar_lea.vmem %s786_s1, %s796_s18  ;;  %438 = vmatpush.bf16.msra.mxu0 %v620_v22  ;;  %v656_v56 = vld [vmem:[%s789_s4] ss:$0 sm:$0xff] }
   0xe   : > { %s310_s25 = scalar_lea.vmem %s785_s0, %s617_s22  ;;  %s317_s10 = scalar_lea.vmem %s787_s2, %s796_s18  ;;  %v655_v50 = vld [vmem:[%s314_s28] ss:$0 sm:$0xff] }
   0xf   : > { %v622_v0 = vld [vmem:[%s310_s25] sm:$0xff]   ;;  %s336_s17 = scalar_lea.vmem %s790_s5, %s617_s22 }
  0x10   : > { %v623_v1 = vunpack.c.l.bf16 %v622_v0  ;;  %v624_v3 = vunpack.c.h.bf16 %v622_v0  ;;  %v344_v38 = vld [vmem:[%s317_s10] sm:$0x1] }
  0x11   : > { %439 = vmatpush.bf16.msra.mxu0 %v619_v24  ;;  %v397_v40 = vadd.f32 1.0, %v344_v38 }
  0x12   : > { %v346_v2 = vsel %vm345_vm0, %v623_v1, 0.0  ;;  %v349_v4 = vsel %vm345_vm0, %v624_v3, 0.0 }
  0x13   : > { %347 = vadd.xlane.f32.xlu0 %v346_v2  ;;  %v658_v6 = vpop.eup %657  ;;  %v399_v45 = vperm.slane %v397_v40, 0 }
  0x14   : > { %v353_v7 = vmul.f32 32.0, %v658_v6  ;;  %vm357_vm1 = vweird.f32 %v658_v6 }
  0x16   : > { %v354_v8 = vsub.f32 1.0, %v353_v7 }
  0x18   : > { %v355_v9 = vmul.f32 %v658_v6, %v354_v8 }
  0x1a   : > { %v356_v10 = vadd.f32 %v658_v6, %v355_v9 }
  0x1b   : > { %350 = vadd.xlane.f32.xlu0 %v349_v4 }
  0x1c   : > { %v358_v11 = vsel %vm357_vm1, %v658_v6, %v356_v10 }
  0x86   : > { %v348_v12 = vpop.xlane.xlu0 %347 }
  0x87   : > { %v359_v13 = vmul.f32 %v358_v11, %v348_v12 }
  0x89   : > { %v361_v14 = vsub.f32 %v623_v1, %v359_v13 }
  0x8b   : > { %v363_v15 = vmul.f32 %v361_v14, %v361_v14 }
  0x8d   : > { %v365_v16 = vsel %vm345_vm0, %v363_v15, 0.0 }
  0x8e   : > { %366 = vadd.xlane.f32.xlu1 %v365_v16  ;;  %v351_v17 = vpop.xlane.xlu0 %350 }
  0x8f   : > { %v360_v18 = vmul.f32 %v358_v11, %v351_v17 }
  0x91   : > { %v362_v19 = vsub.f32 %v624_v3, %v360_v18 }
  0x93   : > { %v364_v20 = vmul.f32 %v362_v19, %v362_v19 }
  0x95   : > { %v368_v21 = vsel %vm345_vm0, %v364_v20, 0.0 }
  0x96   : > { %369 = vadd.xlane.f32.xlu1 %v368_v21 }
 0x101   : > { %v367_v23 = vpop.xlane.xlu1 %366 }
 0x102   : > { %v371_v25 = vmul.f32 %v367_v23, %v358_v11 }
 0x104   : > { %v373_v26 = vadd.f32 1e-06, %v371_v25 }
 0x106   : > { %659 = vrsqrt.f32 %v373_v26  ;;  %vm381_vm3 = vweird.f32 %v373_v26 }
 0x109   : > { %v370_v27 = vpop.xlane.xlu1 %369 }
 0x10a   : > { %v372_v28 = vmul.f32 %v370_v27, %v358_v11 }
 0x10c   : > { %v660_v29 = vpop.eup %659  ;;  %v374_v30 = vadd.f32 1e-06, %v372_v28 }
 0x10d   : > { %v376_v31 = vmul.f32 %v660_v29, %v373_v26  ;;  %vm382_vm2 = vweird.f32 %v660_v29 }
 0x10e   : > { %661 = vrsqrt.f32 %v374_v30  ;;  %vm383_vm4 = vmor %vm381_vm3, %vm382_vm2  ;;  %vm391_vm6 = vweird.f32 %v374_v30 }
 0x10f   : > { %v377_v32 = vmul.f32 %v660_v29, %v376_v31 }
 0x111   : > { %v378_v33 = vmul.f32 0.5, %v377_v32 }
 0x113   : > { %v379_v34 = vsub.f32 1.5, %v378_v33 }
 0x114   : > { %v662_v35 = vpop.eup %661 }
 0x115   : > { %v380_v36 = vmul.f32 %v660_v29, %v379_v34  ;;  %v386_v37 = vmul.f32 %v662_v35, %v374_v30  ;;  %vm392_vm5 = vweird.f32 %v662_v35 }
 0x116   : > { %vm393_vm7 = vmor %vm391_vm6, %vm392_vm5 }
 0x117   : > { %v387_v39 = vmul.f32 %v662_v35, %v386_v37  ;;  %v384_v41 = vsel %vm383_vm4, %v660_v29, %v380_v36 }
 0x118   : > { %v395_v44 = vmul.f32 %v384_v41, %v361_v14 }
 0x119   : > { %v388_v42 = vmul.f32 0.5, %v387_v39 }
 0x11a   : > { %v401_v49 = vmul.f32 %v399_v45, %v395_v44 }
 0x11b   : > { %v389_v43 = vsub.f32 1.5, %v388_v42 }
 0x11c   : > { %v406_v52 = vadd.f32 %v655_v50, %v401_v49 }
 0x11d   : > { %v390_v46 = vmul.f32 %v662_v35, %v389_v43 }
 0x11f   : > { %v394_v47 = vsel %vm393_vm7, %v662_v35, %v390_v46 }
 0x120   : > { %v396_v48 = vmul.f32 %v394_v47, %v362_v19 }
 0x122   : > { %v402_v51 = vmul.f32 %v399_v45, %v396_v48 }
 0x124   : > { %v407_v53 = vadd.f32 %v655_v50, %v402_v51 }
 0x126   : > { %v408_v54 = vpack.c.bf16 %v407_v53, %v406_v52 }
 0x128   : > { %614 = vmatmul.msk.bf16.vlgmr.msra.gmra.mxu0 %vm345_vm0, %v408_v54 }
 0x1a5   : > { %v441_v55 = vpop.f32.mrf.mxu0 }
 0x1a6   : > { %v442_v58 = vadd.f32 %v656_v56, %v441_v55 }
 0x1ad   : > { %v443_v57 = vpop.f32.mrf.mxu0 }
 0x1ae   : > { %v444_v59 = vadd.f32 %v656_v56, %v443_v57 }
 0x1b0   : > { %v628_v60 = vpack.c.bf16 %v444_v59, %v442_v58 }
 0x1b2   : > { %629 = vst [vmem:[%s336_s17] sm:$0xff] %v628_v60  }
 0x1b3 PF: > { %s15_s20 = sadd.s32 1, %s685_s20   ;;  %s791_s18 = smov %s681_s19 }
 0x1b4   : > { %p12_p5 = scmp.ge.s32.totalorder %s15_s20, 4   ;;  %s792_s19 = smov %s794_s21 }
 0x1b6   :  { %14 = sbr.rel (!%p12_p5) target bundleno = 2 (0x2), region = 82 }

// kernel: mm_double_stream_block_audio.22
= control target key start
LH: loop header
LB: loop body
LE: loop exit
PB: predicated region body
PF: predicated region fallthrough
CT: control target
= control target key end

     0   :  { %s806_s18 = smov 0   ;;  %s808_s19 = smov 0   ;;  %s882_s0 = inlined_call_operand.vmem [shape: bf16[2,16,128], index: 0, kind: input, shape index: {}]   ;;  %s883_s1 = inlined_call_operand.vmem [shape: bf16[128,32], index: 1, kind: input, shape index: {}]   ;;  %s884_s2 = inlined_call_operand.vmem [shape: f32[1,32], index: 2, kind: input, shape index: {}]   ;;  %s885_s3 = inlined_call_operand.vmem [shape: f32[2,1,32], index: 3, kind: input, shape index: {}]   ;;  %s886_s4 = inlined_call_operand.vmem [shape: f32[2,16,32], index: 4, kind: input, shape index: {}, may-alias: {4,5}]   ;;  %s887_s5 = inlined_call_operand.vmem [shape: f32[2,16,32], index: 5, kind: output, shape index: {}, may-alias: {4,5}]  }
   0x1   :  { %s810_s20 = smov 0  }
   0x2 LB: > { %s34_s21 = sadd.s32 1, %s770_s19  ;;  %p666_p0 = scmp.ge.s32.totalorder %s774_s20, 1  ;;  %s774_s20 = sphi %s810_s20, %s15_s20   ;;  %s770_s19 = sphi %s808_s19, %s889_s19   ;;  %s766_s18 = sphi %s806_s18, %s888_s18  }
   0x3   : > { %p36_p1 = scmp.ge.s32.totalorder %s34_s21, 2  ;;  %p269_p2 = scmp.lt.s32.totalorder %s774_s20, 3 }
   0x5   : > { %s891_s21 = smov (%p36_p1, %s34_s21), 0  ;;  %p270_p3 = pnand %p666_p0, %p269_p2 }
   0x6   : > { %p334_p4 = scmp.lt.s32.totalorder (!%p270_p3), %s766_s18, 1 }
   0x7   : > { %273 = sbr.rel (%p270_p3) target bundleno = 185 (0xb9), region = 40 }
   0xc   : > { %v717_v0 = vld [vmem:[%s883_s1 + $0x38] sm:$0xff]  ;;  %v716_v1 = vld [vmem:[%s883_s1 + $0x30] sm:$0xff]  ;;  %s893_s18 = smov (!%p334_p4, %s766_s18), 1  ;;  %v715_v2 = vld [vmem:[%s883_s1 + $0x28] sm:$0xff]  ;;  %vm497_vm0 = vcmask 261120  }
   0xd   : > { %473 = vmatpush.bf16.msra.mxu0 %v717_v0  ;;  %s707_s26 = sshll.u32 %s893_s18, 3  ;;  %s355_s29 = scalar_lea.vmem %s885_s3, %s893_s18  ;;  %v714_v8 = vld [vmem:[%s883_s1 + $0x20] sm:$0xff]  ;;  %v713_v13 = vld [vmem:[%s883_s1 + $0x18] sm:$0xff]  ;;  %v712_v18 = vld [vmem:[%s883_s1 + $0x10] sm:$0xff] }
   0xe   : > { %s341_s7 = scalar_lea.vmem %s882_s0, %s707_s26  ;;  %v711_v19 = vld [vmem:[%s883_s1 + $0x8] sm:$0xff]  ;;  %v710_v24 = vld [vmem:[%s883_s1] sm:$0xff]  ;;  %s708_s24 = sshll.u32 %s893_s18, 4 }
   0xf   : > { %v719_v3 = vld [vmem:[%s341_s7] sm:$0xff]   ;;  %s367_s30 = scalar_lea.vmem %s886_s4, %s708_s24  ;;  %s380_s10 = scalar_lea.vmem %s887_s5, %s708_s24 }
  0x10   : > { %v720_v4 = vunpack.c.l.bf16 %v719_v3  ;;  %v721_v5 = vunpack.c.h.bf16 %v719_v3  ;;  %v746_v30 = vld [vmem:[%s884_s2] ss:$0 sm:$0xff]  ;;  %v488_v36 = vld [vmem:[%s367_s30 + $0x8] sm:$0xff] }
  0x11   : > { %474 = vmatpush.bf16.msra.mxu0 %v716_v1  ;;  %v747_v31 = vld [vmem:[%s355_s29] ss:$0 sm:$0xff] }
  0x12   : > { %v388_v6 = vmul.f32 0.044715, %v720_v4  ;;  %v389_v7 = vmul.f32 0.044715, %v721_v5  ;;  %v386_v20 = vmul.f32 0.5, %v720_v4  ;;  %v387_v22 = vmul.f32 0.5, %v721_v5 }
  0x13   : > { %v487_v34 = vld [vmem:[%s367_s30] sm:$0xff] }
  0x14   : > { %v390_v9 = vmul.f32 %v720_v4, %v388_v6  ;;  %v391_v10 = vmul.f32 %v721_v5, %v389_v7 }
  0x15   : > { %475 = vmatpush.bf16.msra.mxu0 %v715_v2 }
  0x16   : > { %v392_v11 = vmul.f32 %v720_v4, %v390_v9  ;;  %v393_v12 = vmul.f32 %v721_v5, %v391_v10 }
  0x18   : > { %v394_v14 = vadd.f32 %v720_v4, %v392_v11  ;;  %v395_v15 = vadd.f32 %v721_v5, %v393_v12 }
  0x19   : > { %476 = vmatpush.bf16.msra.mxu0 %v714_v8 }
  0x1a   : > { %v396_v16 = vmul.f32 0.7978846, %v394_v14  ;;  %v397_v17 = vmul.f32 0.7978846, %v395_v15 }
  0x1c   : > { %748 = vtanh.f32 %v396_v16 }
  0x1d   : > { %477 = vmatpush.bf16.msra.mxu0 %v713_v13  ;;  %750 = vtanh.f32 %v397_v17 }
  0x21   : > { %478 = vmatpush.bf16.msra.mxu0 %v712_v18 }
  0x22   : > { %v749_v21 = vpop.eup %748 }
  0x23   : > { %v751_v23 = vpop.eup %750  ;;  %v400_v25 = vadd.f32 1.0, %v749_v21 }
  0x24   : > { %v401_v26 = vadd.f32 1.0, %v751_v23 }
  0x25   : > { %479 = vmatpush.bf16.msra.mxu0 %v711_v19  ;;  %v402_v27 = vmul.f32 %v400_v25, %v386_v20 }
  0x26   : > { %v403_v28 = vmul.f32 %v401_v26, %v387_v22 }
  0x28   : > { %v404_v29 = vpack.c.bf16 %v403_v28, %v402_v27 }
  0x29   : > { %480 = vmatpush.bf16.msra.mxu0 %v710_v24 }
  0x2c   : > { %481 = vmatmul.bf16.vlgmr.msra.gmra.mxu0 %v404_v29 }
  0xa9   : > { %v482_v32 = vpop.f32.mrf.mxu0 }
  0xaa   : > { %v483_v33 = vadd.f32 %v746_v30, %v482_v32 }
  0xac   : > { %v493_v35 = vmul.f32 %v747_v31, %v483_v33 }
  0xae   : > { %v495_v37 = vadd.f32 %v493_v35, %v487_v34 }
  0xb0   : > { %498 = vst.msk [vmem:[%s380_s10] sm:$0xff] %vm497_vm0, %v495_v37 }
  0xb1   : > { %v484_v38 = vpop.f32.mrf.mxu0 }
  0xb2   : > { %v485_v39 = vadd.f32 %v746_v30, %v484_v38 }
  0xb4   : > { %v494_v40 = vmul.f32 %v747_v31, %v485_v39 }
  0xb6   : > { %v496_v41 = vadd.f32 %v494_v40, %v488_v36 }
  0xb8   : > { %499 = vst.msk [vmem:[%s380_s10 + $0x8] sm:$0xff] %vm497_vm0, %v496_v41 }
  0xb9 PF: > { %s15_s20 = sadd.s32 1, %s774_s20   ;;  %s888_s18 = smov %s770_s19 }
  0xba   : > { %p12_p5 = scmp.ge.s32.totalorder %s15_s20, 4   ;;  %s889_s19 = smov %s891_s21 }
  0xbc   :  { %14 = sbr.rel (!%p12_p5) target bundleno = 2 (0x2), region = 82 }

// kernel: mm_double_stream_block_audio.25
= control target key start
LH: loop header
LB: loop body
LE: loop exit
PB: predicated region body
PF: predicated region fallthrough
CT: control target
= control target key end

     0   :  { %s742_s18 = smov 0   ;;  %s744_s19 = smov 0   ;;  %s818_s0 = inlined_call_operand.vmem [shape: bf16[2,8,128], index: 0, kind: input, shape index: {}]   ;;  %s819_s1 = inlined_call_operand.vmem [shape: bf16[128,32], index: 1, kind: input, shape index: {}]   ;;  %s820_s2 = inlined_call_operand.vmem [shape: f32[1,32], index: 2, kind: input, shape index: {}]   ;;  %s821_s3 = inlined_call_operand.vmem [shape: f32[2,1,32], index: 3, kind: input, shape index: {}]   ;;  %s822_s4 = inlined_call_operand.vmem [shape: f32[2,8,32], index: 4, kind: input, shape index: {}, may-alias: {4,5}]   ;;  %s823_s5 = inlined_call_operand.vmem [shape: f32[2,8,32], index: 5, kind: output, shape index: {}, may-alias: {4,5}]  }
   0x1   :  { %s746_s20 = smov 0  }
   0x2 LB: > { %s34_s21 = sadd.s32 1, %s706_s19  ;;  %p614_p0 = scmp.ge.s32.totalorder %s710_s20, 1  ;;  %s710_s20 = sphi %s746_s20, %s15_s20   ;;  %s706_s19 = sphi %s744_s19, %s825_s19   ;;  %s702_s18 = sphi %s742_s18, %s824_s18  }
   0x3   : > { %p36_p1 = scmp.ge.s32.totalorder %s34_s21, 2  ;;  %p263_p2 = scmp.lt.s32.totalorder %s710_s20, 3 }
   0x5   : > { %s827_s21 = smov (%p36_p1, %s34_s21), 0  ;;  %p264_p3 = pnand %p614_p0, %p263_p2 }
   0x6   : > { %p321_p4 = scmp.lt.s32.totalorder (!%p264_p3), %s702_s18, 1 }
   0x7   : > { %267 = sbr.rel (%p264_p3) target bundleno = 178 (0xb2), region = 40 }
   0xc   : > { %v659_v0 = vld [vmem:[%s819_s1 + $0x38] sm:$0xff]  ;;  %v658_v1 = vld [vmem:[%s819_s1 + $0x30] sm:$0xff]  ;;  %s829_s18 = smov (!%p321_p4, %s702_s18), 1  ;;  %v657_v2 = vld [vmem:[%s819_s1 + $0x28] sm:$0xff]  ;;  %vm461_vm0 = vcmask 261120  }
   0xd   : > { %441 = vmatpush.bf16.msra.mxu0 %v659_v0  ;;  %s615_s26 = sshll.u32 %s829_s18, 2  ;;  %s340_s29 = scalar_lea.vmem %s821_s3, %s829_s18  ;;  %v656_v6 = vld [vmem:[%s819_s1 + $0x20] sm:$0xff]  ;;  %v655_v9 = vld [vmem:[%s819_s1 + $0x18] sm:$0xff]  ;;  %v654_v12 = vld [vmem:[%s819_s1 + $0x10] sm:$0xff] }
   0xe   : > { %s327_s7 = scalar_lea.vmem %s818_s0, %s615_s26  ;;  %v653_v13 = vld [vmem:[%s819_s1 + $0x8] sm:$0xff]  ;;  %v652_v16 = vld [vmem:[%s819_s1] sm:$0xff]  ;;  %s616_s24 = sshll.u32 %s829_s18, 3 }
   0xf   : > { %v361_v3 = vld [vmem:[%s327_s7] sm:$0xf]  ;;  %s350_s30 = scalar_lea.vmem %s822_s4, %s616_s24  ;;  %s360_s10 = scalar_lea.vmem %s823_s5, %s616_s24 }
  0x10   : > { %v362_v4 = vunpack.c.l.bf16 %v361_v3  ;;  %v684_v20 = vld [vmem:[%s820_s2] ss:$0 sm:$0xff] }
  0x11   : > { %442 = vmatpush.bf16.msra.mxu0 %v658_v1  ;;  %v685_v21 = vld [vmem:[%s340_s29] ss:$0 sm:$0xff] }
  0x12   : > { %v364_v5 = vmul.f32 0.044715, %v362_v4  ;;  %v363_v14 = vmul.f32 0.5, %v362_v4  ;;  %v454_v24 = vld [vmem:[%s350_s30] sm:$0xff] }
  0x14   : > { %v365_v7 = vmul.f32 %v364_v5, %v362_v4 }
  0x15   : > { %443 = vmatpush.bf16.msra.mxu0 %v657_v2 }
  0x16   : > { %v366_v8 = vmul.f32 %v365_v7, %v362_v4 }
  0x18   : > { %v367_v10 = vadd.f32 %v366_v8, %v362_v4 }
  0x19   : > { %444 = vmatpush.bf16.msra.mxu0 %v656_v6 }
  0x1a   : > { %v368_v11 = vmul.f32 0.7978846, %v367_v10 }
  0x1c   : > { %686 = vtanh.f32 %v368_v11 }
  0x1d   : > { %445 = vmatpush.bf16.msra.mxu0 %v655_v9 }
  0x21   : > { %446 = vmatpush.bf16.msra.mxu0 %v654_v12 }
  0x22   : > { %v687_v15 = vpop.eup %686 }
  0x23   : > { %v370_v17 = vadd.f32 1.0, %v687_v15 }
  0x25   : > { %447 = vmatpush.bf16.msra.mxu0 %v653_v13  ;;  %v371_v18 = vmul.f32 %v370_v17, %v363_v14 }
  0x27   : > { %v372_v19 = vpack.c.bf16 %v371_v18, %v371_v18 }
  0x29   : > { %448 = vmatpush.bf16.msra.mxu0 %v652_v16 }
  0x2c   : > { %449 = vmatmul.bf16.vlgmr.msra.gmra.mxu0 %v372_v19 }
  0xa9   : > { %v450_v22 = vpop.f32.mrf.mxu0 }
  0xaa   : > { %v451_v23 = vadd.f32 %v684_v20, %v450_v22 }
  0xac   : > { %v459_v25 = vmul.f32 %v685_v21, %v451_v23 }
  0xae   : > { %v460_v26 = vadd.f32 %v459_v25, %v454_v24 }
  0xb0   : > { %462 = vst.msk [vmem:[%s360_s10] sm:$0xff] %vm461_vm0, %v460_v26 }
  0xb1   : > { %v452_v27 = vpop.f32.mrf.mxu0 }
  0xb2 PF: > { %s15_s20 = sadd.s32 1, %s710_s20   ;;  %s824_s18 = smov %s706_s19 }
  0xb3   : > { %p12_p5 = scmp.ge.s32.totalorder %s15_s20, 4   ;;  %s825_s19 = smov %s827_s21 }
  0xb5   :  { %14 = sbr.rel (!%p12_p5) target bundleno = 2 (0x2), region = 82 }

</bundles_post_ra>
